<compile_context>
chip_gen: v7x
topology: tpu7x:2x2x1
jax: 0.10.0
libtpu: 0.0.40
codegen_flags: <defaults>
</compile_context>

<pallas_src>
import functools

import jax
import jax.numpy as jnp
from jax.experimental import pallas as pl
from jax.experimental.pallas import tpu as pltpu

EPS = 1e-5      # PyTorch BatchNorm default eps
SLOPE = 0.2     # leaky_relu negative slope
LANE = 128      # TPU lane width; conv output channels are zero-padded to this

# ConvTranspose2d(k=4, stride=2, padding=1): output row oh = 2*a + rh gets
# contributions from kernel rows kh with 2*ih + kh = oh + 1.  Per output phase
# rh the (kernel-row, input-offset) pairs are below (input row = a + offset,
# contribution is zero when a + offset falls outside [0, H)).
_TAPS = {0: ((1, 0), (3, -1)),
         1: ((0, 1), (2, 0))}
_PHASES = ((0, 0), (0, 1), (1, 0), (1, 1))   # phase index p = rh*2 + rw


# ----------------------------- Pallas kernels ------------------------------

def _fc12_kernel(x_ref, w1_ref, b1_ref, g1_ref, be1_ref,
                 w2_ref, b2_ref, g2_ref, be2_ref, o_ref):
    """Fused fc1 -> bn1 -> lrelu -> fc2(N-tile) -> bn2 -> lrelu.

    fc1 is tiny (B x z_dim x 1024) and recomputed per N-tile so the grid axis
    is fully parallel.  BN stats are per-column over the batch rows, all of
    which are inside every block, so per-tile stats are exact.
    """
    h = jnp.dot(x_ref[...], w1_ref[...], preferred_element_type=jnp.float32)
    h = h + b1_ref[...]
    m = jnp.mean(h, axis=0, keepdims=True)
    v = jnp.mean((h - m) ** 2, axis=0, keepdims=True)          # biased (train mode)
    h = g1_ref[...] * (h - m) * jax.lax.rsqrt(v + EPS) + be1_ref[...]
    h = jnp.where(h > 0, h, SLOPE * h)

    h2 = jnp.dot(h.astype(jnp.bfloat16), w2_ref[...],
                 preferred_element_type=jnp.float32)
    h2 = h2 + b2_ref[...]
    m2 = jnp.mean(h2, axis=0, keepdims=True)
    v2 = jnp.mean((h2 - m2) ** 2, axis=0, keepdims=True)
    y = g2_ref[...] * (h2 - m2) * jax.lax.rsqrt(v2 + EPS) + be2_ref[...]
    o_ref[...] = jnp.where(y > 0, y, SLOPE * y)


def _convt_bn_lrelu_kernel(cols_ref, w_ref, b_ref, g_ref, be_ref, o_ref):
    """One ConvTranspose output phase per grid step (matmul + bias).  The full
    (4, R, Cpad) output stays resident in VMEM across the (arbitrary) phase
    grid; at the last phase compute exact BatchNorm2d batch statistics over
    all phases/pixels, then normalize + leaky_relu in place."""
    p = pl.program_id(0)
    y = jnp.dot(cols_ref[0], w_ref[0], preferred_element_type=jnp.float32)
    o_ref[p] = y + b_ref[...]

    @pl.when(p == pl.num_programs(0) - 1)
    def _():
        d = o_ref[...]
        cnt = d.shape[0] * d.shape[1]
        s = jnp.sum(jnp.sum(d, axis=1, keepdims=True), axis=0, keepdims=True)
        m = s / cnt
        sq = jnp.sum(jnp.sum((d - m) ** 2, axis=1, keepdims=True),
                     axis=0, keepdims=True)
        v = sq / cnt
        yn = g_ref[...] * (d - m) * jax.lax.rsqrt(v + EPS) + be_ref[...]
        o_ref[...] = jnp.where(yn > 0, yn, SLOPE * yn)


def _convt_tanh_kernel(cols_ref, w_ref, b_ref, o_ref):
    """One ConvTranspose output phase per grid step: matmul + bias + tanh."""
    y = jnp.dot(cols_ref[0], w_ref[0], preferred_element_type=jnp.float32)
    o_ref[0] = jnp.tanh(y + b_ref[...])


# ------------------------------ pallas wrappers -----------------------------

def _choose_tile_n(n2, max_tile=2048):
    """Largest N-tile <= max_tile that divides n2 (multiple of 128).  2048
    columns of bf16 w2 = 4 MiB, so double-buffering fits even v7x's VMEM."""
    for t in range(min(n2, max_tile), 0, -LANE):
        if n2 % t == 0:
            return t
    return LANE


def fc12(x, p, *, n2, tile_n):
    b, z = x.shape
    return pl.pallas_call(
        _fc12_kernel,
        out_shape=jax.ShapeDtypeStruct((b, n2), jnp.float32),
        grid_spec=pltpu.PrefetchScalarGridSpec(
            num_scalar_prefetch=0,
            grid=(n2 // tile_n,),
            in_specs=[
                pl.BlockSpec((b, z), lambda j: (0, 0)),
                pl.BlockSpec((z, 1024), lambda j: (0, 0)),
                pl.BlockSpec((1, 1024), lambda j: (0, 0)),
                pl.BlockSpec((1, 1024), lambda j: (0, 0)),
                pl.BlockSpec((1, 1024), lambda j: (0, 0)),
                pl.BlockSpec((1024, tile_n), lambda j: (0, j)),
                pl.BlockSpec((1, tile_n), lambda j: (0, j)),
                pl.BlockSpec((1, tile_n), lambda j: (0, j)),
                pl.BlockSpec((1, tile_n), lambda j: (0, j)),
            ],
            out_specs=pl.BlockSpec((b, tile_n), lambda j: (0, j)),
        ),
        compiler_params=pltpu.CompilerParams(
            dimension_semantics=("parallel",)),
    )(x.astype(jnp.bfloat16), p["w1"], p["b1"], p["g1"], p["be1"],
      p["w2"], p["b2"], p["g2"], p["be2"])


def convt_bn_lrelu(cols, wph, bias, gamma, beta):
    nph, r, k4 = cols.shape
    cpad = wph.shape[-1]
    return pl.pallas_call(
        _convt_bn_lrelu_kernel,
        out_shape=jax.ShapeDtypeStruct((nph, r, cpad), jnp.float32),
        grid_spec=pltpu.PrefetchScalarGridSpec(
            num_scalar_prefetch=0,
            grid=(nph,),
            in_specs=[
                pl.BlockSpec((1, r, k4), lambda ph: (ph, 0, 0)),
                pl.BlockSpec((1, k4, cpad), lambda ph: (ph, 0, 0)),
                pl.BlockSpec((1, cpad), lambda ph: (0, 0)),
                pl.BlockSpec((1, cpad), lambda ph: (0, 0)),
                pl.BlockSpec((1, cpad), lambda ph: (0, 0)),
            ],
            # Resident accumulator: same output block for every phase.
            out_specs=pl.BlockSpec((nph, r, cpad), lambda ph: (0, 0, 0)),
        ),
        compiler_params=pltpu.CompilerParams(
            dimension_semantics=("arbitrary",)),
    )(cols, wph, bias, gamma, beta)


def convt_tanh(cols, wph, bias):
    nph, r, k4 = cols.shape
    cpad = wph.shape[-1]
    return pl.pallas_call(
        _convt_tanh_kernel,
        out_shape=jax.ShapeDtypeStruct((nph, r, cpad), jnp.float32),
        grid_spec=pltpu.PrefetchScalarGridSpec(
            num_scalar_prefetch=0,
            grid=(nph,),
            in_specs=[
                pl.BlockSpec((1, r, k4), lambda ph: (ph, 0, 0)),
                pl.BlockSpec((1, k4, cpad), lambda ph: (ph, 0, 0)),
                pl.BlockSpec((1, cpad), lambda ph: (0, 0)),
            ],
            out_specs=pl.BlockSpec((1, r, cpad), lambda ph: (ph, 0, 0)),
        ),
        compiler_params=pltpu.CompilerParams(
            dimension_semantics=("parallel",)),
    )(cols, wph, bias)


# --------------------- 4-phase ConvTranspose lowering glue -------------------
# TODO(synk): the phase-patch gather / phase interleave below are thin XLA glue
# around the Pallas matmul kernels (no clean in-kernel gather needed at these
# sizes).

def _phase_cols(x_nhwc):
    """(B,H,W,C) NHWC -> (4, B*H*W, 4*C) bf16 patch matrices, one per output
    phase of ConvTranspose2d(k=4, s=2, p=1). Zero-free: only 2x2 taps/phase."""
    b, h, w, c = x_nhwc.shape
    xp = jnp.pad(x_nhwc, ((0, 0), (1, 1), (1, 1), (0, 0)))
    phases = []
    for rh, rw in _PHASES:
        taps = []
        for _kh, dh in _TAPS[rh]:
            for _kw, dw in _TAPS[rw]:
                taps.append(xp[:, 1 + dh:1 + dh + h, 1 + dw:1 + dw + w, :])
        patch = jnp.stack(taps, axis=3)                    # (B,H,W,4,C)
        phases.append(patch.reshape(b * h * w, 4 * c))
    return jnp.stack(phases, axis=0).astype(jnp.bfloat16)  # (4, B*H*W, 4*C)


def _interleave_phases(y, b, h, w):
    """(4, B*H*W, C) phase outputs -> (B, 2H, 2W, C) NHWC."""
    c = y.shape[-1]
    y = y.reshape(2, 2, b, h, w, c)            # (rh, rw, B, H, W, C)
    y = y.transpose(2, 3, 0, 4, 1, 5)          # (B, H, rh, W, rw, C)
    return y.reshape(b, 2 * h, 2 * w, c)


# --------------------------------- forward ----------------------------------

def generator_infogan_forward(x, params, *, dim, color_channels):
    assert dim % 4 == 0
    b = x.shape[0]
    d4, d2 = dim // 4, dim // 2
    n2 = 128 * d4 * d4
    tile_n = _choose_tile_n(n2)

    # fc1 -> bn1 -> lrelu -> fc2 -> bn2 -> lrelu  (fused, tiled over N)
    h = fc12(x, params, n2=n2, tile_n=tile_n)           # (B, n2), NHWC col order
    h = h.reshape(b, d4, d4, 128)                       # NHWC

    # c1: ConvTranspose2d(128->64, k4 s2 p1) -> bn3 -> lrelu  (4-phase matmuls)
    cols1 = _phase_cols(h)                              # (4, B*d4*d4, 512)
    y1 = convt_bn_lrelu(cols1, params["wp1"], params["bc1"],
                        params["g3"], params["be3"])    # (4, R1, 128) lane-padded
    h1 = _interleave_phases(y1, b, d4, d4)              # (B, d2, d2, 128)

    # c2: ConvTranspose2d(64->color, k4 s2 p1) -> tanh
    cols2 = _phase_cols(h1)                             # (4, B*d2*d2, 512)
    y2 = convt_tanh(cols2, params["wp2"], params["bc2"])  # (4, R2, 128)
    out = _interleave_phases(y2, b, d2, d2)             # (B, dim, dim, 128)

    out = out[:, :, :, :color_channels]                 # drop lane padding
    return out.transpose(0, 3, 1, 2)                    # NCHW, matches PyTorch


# ------------------------------ param handling -------------------------------

def init_raw_params(key, z_dim, dim, color_channels):
    """Parameters in the native PyTorch layouts of Generator_INFOGAN."""
    d4 = dim // 4
    n2 = 128 * d4 * d4
    ks = jax.random.split(key, 14)

    def nrm(k, shape, scale=0.05):
        return scale * jax.random.normal(k, shape, dtype=jnp.float32)

    return dict(
        w1=nrm(ks[0], (1024, z_dim)), b1=nrm(ks[1], (1024,)),
        g1=1.0 + nrm(ks[2], (1024,)), be1=nrm(ks[3], (1024,)),
        w2=nrm(ks[4], (n2, 1024)), b2=nrm(ks[5], (n2,)),
        g2=1.0 + nrm(ks[6], (n2,)), be2=nrm(ks[7], (n2,)),
        wc1=nrm(ks[8], (128, 64, 4, 4)), bc1=nrm(ks[9], (64,)),
        g3=1.0 + nrm(ks[10], (64,)), be3=nrm(ks[11], (64,)),
        wc2=nrm(ks[12], (64, color_channels, 4, 4)),
        bc2=nrm(ks[13], (color_channels,)),
    )


def _pad_lane_row(v, n=LANE):
    return jnp.zeros((1, n), jnp.float32).at[0, :v.shape[0]].set(v)


def _phase_weights(w_t, cin_pad, cout_pad):
    """PyTorch ConvTranspose2d weight (Cin, Cout, 4, 4) -> bf16 (4, 4*cin_pad,
    cout_pad) phase matmul matrices, zero-padded to lane-dense Cin/Cout."""
    cin, cout = w_t.shape[0], w_t.shape[1]
    wp = jnp.zeros((cin_pad, cout_pad, 4, 4), jnp.float32).at[:cin, :cout].set(w_t)
    mats = []
    for rh, rw in _PHASES:
        taps = []
        for kh, _dh in _TAPS[rh]:
            for kw, _dw in _TAPS[rw]:
                taps.append(wp[:, :, kh, kw])            # (cin_pad, cout_pad)
        mats.append(jnp.stack(taps, axis=0).reshape(4 * cin_pad, cout_pad))
    return jnp.stack(mats, axis=0).astype(jnp.bfloat16)


def prepare_params(raw, *, dim):
    """One-time (outside jit) weight pre-transforms: transposes, fc2 column
    permutation to NHWC order, bf16 casts, conv phase matrices, lane padding."""
    d4 = dim // 4
    n2 = 128 * d4 * d4

    w2 = raw["w2"].T.reshape(1024, 128, d4, d4)          # cols in (C,H,W) order
    w2 = w2.transpose(0, 2, 3, 1).reshape(1024, n2)      # -> (H,W,C) order

    def perm_cols(v):
        return v.reshape(128, d4, d4).transpose(1, 2, 0).reshape(1, n2)

    return dict(
        w1=raw["w1"].T.astype(jnp.bfloat16),
        b1=raw["b1"].reshape(1, 1024),
        g1=raw["g1"].reshape(1, 1024),
        be1=raw["be1"].reshape(1, 1024),
        w2=w2.astype(jnp.bfloat16),
        b2=perm_cols(raw["b2"]),
        g2=perm_cols(raw["g2"]),
        be2=perm_cols(raw["be2"]),
        wp1=_phase_weights(raw["wc1"], cin_pad=128, cout_pad=LANE),
        bc1=_pad_lane_row(raw["bc1"]),
        g3=_pad_lane_row(raw["g3"]),
        be3=_pad_lane_row(raw["be3"]),
        wp2=_phase_weights(raw["wc2"], cin_pad=128, cout_pad=LANE),
        bc2=_pad_lane_row(raw["bc2"]),
    )


# ----------------------------------- main ------------------------------------

if __name__ == "__main__":
    B = 2
    Z_DIM = 8            # small (module would only print a warning for != 64)
    DIM = 16
    COLOR_CHANNELS = 3

    key = jax.random.PRNGKey(0)
    pkey, xkey = jax.random.split(key)
    raw = init_raw_params(pkey, Z_DIM, DIM, COLOR_CHANNELS)
    params = prepare_params(raw, dim=DIM)                # one-time, outside jit
    x = jax.random.normal(xkey, (B, Z_DIM), dtype=jnp.float32)

    fwd = jax.jit(functools.partial(generator_infogan_forward,
                                    dim=DIM, color_channels=COLOR_CHANNELS))
    out = jax.block_until_ready(fwd(x, params))

    assert out.shape == (B, COLOR_CHANNELS, DIM, DIM), out.shape
    assert out.dtype == jnp.float32
    assert bool(jnp.all(jnp.isfinite(out)))
    assert bool(jnp.all(jnp.abs(out) <= 1.0))            # tanh range
    print("KERNEL_OK")
</pallas_src>

<mosaic_0001>
module attributes {stable_mosaic.version = 11 : i64} {
  func.func @_fc12_kernel(%arg0: i32, %arg1: memref<2x8xbf16, #tpu.memory_space<vmem>>, %arg2: memref<8x1024xbf16, #tpu.memory_space<vmem>>, %arg3: memref<1x1024xf32, #tpu.memory_space<vmem>>, %arg4: memref<1x1024xf32, #tpu.memory_space<vmem>>, %arg5: memref<1x1024xf32, #tpu.memory_space<vmem>>, %arg6: memref<1024x2048xbf16, #tpu.memory_space<vmem>>, %arg7: memref<1x2048xf32, #tpu.memory_space<vmem>>, %arg8: memref<1x2048xf32, #tpu.memory_space<vmem>>, %arg9: memref<1x2048xf32, #tpu.memory_space<vmem>>, %arg10: memref<2x2048xf32, #tpu.memory_space<vmem>>) attributes {dimension_semantics = [#tpu.dimension_semantics<parallel>], iteration_bounds = array<i64: 1>, scalar_prefetch = 0 : i64, scratch_operands = 0 : i64, tpu.core_type = #tpu.core_type<tc>, window_params = [{pipeline_mode = #tpu.pipeline_mode<synchronous>, transform_indices = @transform_0, window_bounds = array<i64: 2, 8>}, {pipeline_mode = #tpu.pipeline_mode<synchronous>, transform_indices = @transform_1, window_bounds = array<i64: 8, 1024>}, {pipeline_mode = #tpu.pipeline_mode<synchronous>, transform_indices = @transform_2, window_bounds = array<i64: 1, 1024>}, {pipeline_mode = #tpu.pipeline_mode<synchronous>, transform_indices = @transform_3, window_bounds = array<i64: 1, 1024>}, {pipeline_mode = #tpu.pipeline_mode<synchronous>, transform_indices = @transform_4, window_bounds = array<i64: 1, 1024>}, {transform_indices = @transform_5, window_bounds = array<i64: 1024, 2048>}, {transform_indices = @transform_6, window_bounds = array<i64: 1, 2048>}, {transform_indices = @transform_7, window_bounds = array<i64: 1, 2048>}, {transform_indices = @transform_8, window_bounds = array<i64: 1, 2048>}, {transform_indices = @transform_9, window_bounds = array<i64: 2, 2048>}]} {
    %c0 = arith.constant 0 : index
    %c0_0 = arith.constant 0 : index
    %0 = vector.load %arg1[%c0, %c0_0] : memref<2x8xbf16, #tpu.memory_space<vmem>>, vector<2x8xbf16>
    %c0_1 = arith.constant 0 : index
    %c0_2 = arith.constant 0 : index
    %1 = vector.load %arg2[%c0_1, %c0_2] : memref<8x1024xbf16, #tpu.memory_space<vmem>>, vector<8x1024xbf16>
    %cst = arith.constant dense<0.000000e+00> : vector<2x1024xf32>
    %2 = tpu.matmul %0, %1, %cst {dimension_numbers = #tpu.dot_dimension_numbers<[1], [0], [0], [1], [0, 0, 1, 1], [], []>} : vector<2x8xbf16>, vector<8x1024xbf16>, vector<2x1024xf32> -> vector<2x1024xf32>
    %c0_3 = arith.constant 0 : index
    %c0_4 = arith.constant 0 : index
    %3 = vector.load %arg3[%c0_3, %c0_4] : memref<1x1024xf32, #tpu.memory_space<vmem>>, vector<1x1024xf32>
    %4 = vector.broadcast %3 : vector<1x1024xf32> to vector<2x1024xf32>
    %5 = arith.addf %2, %4 : vector<2x1024xf32>
    %cst_5 = arith.constant dense<0.000000e+00> : vector<1024xf32>
    %6 = vector.multi_reduction <add>, %5, %cst_5 [0] : vector<2x1024xf32> to vector<1024xf32>
    %7 = vector.shape_cast %6 : vector<1024xf32> to vector<1x1024xf32>
    %cst_6 = arith.constant 2.000000e+00 : f32
    %8 = vector.broadcast %cst_6 : f32 to vector<1x1024xf32>
    %9 = arith.divf %7, %8 : vector<1x1024xf32>
    %10 = vector.broadcast %9 : vector<1x1024xf32> to vector<2x1024xf32>
    %11 = arith.subf %5, %10 : vector<2x1024xf32>
    %12 = arith.mulf %11, %11 : vector<2x1024xf32>
    %cst_7 = arith.constant dense<0.000000e+00> : vector<1024xf32>
    %13 = vector.multi_reduction <add>, %12, %cst_7 [0] : vector<2x1024xf32> to vector<1024xf32>
    %14 = vector.shape_cast %13 : vector<1024xf32> to vector<1x1024xf32>
    %cst_8 = arith.constant 2.000000e+00 : f32
    %15 = vector.broadcast %cst_8 : f32 to vector<1x1024xf32>
    %16 = arith.divf %14, %15 : vector<1x1024xf32>
    %c0_9 = arith.constant 0 : index
    %c0_10 = arith.constant 0 : index
    %17 = vector.load %arg4[%c0_9, %c0_10] : memref<1x1024xf32, #tpu.memory_space<vmem>>, vector<1x1024xf32>
    %18 = vector.broadcast %9 : vector<1x1024xf32> to vector<2x1024xf32>
    %19 = arith.subf %5, %18 : vector<2x1024xf32>
    %20 = vector.broadcast %17 : vector<1x1024xf32> to vector<2x1024xf32>
    %21 = arith.mulf %20, %19 : vector<2x1024xf32>
    %cst_11 = arith.constant 9.99999974E-6 : f32
    %22 = vector.broadcast %cst_11 : f32 to vector<1x1024xf32>
    %23 = arith.addf %16, %22 : vector<1x1024xf32>
    %24 = math.rsqrt %23 : vector<1x1024xf32>
    %25 = vector.broadcast %24 : vector<1x1024xf32> to vector<2x1024xf32>
    %26 = arith.mulf %21, %25 : vector<2x1024xf32>
    %c0_12 = arith.constant 0 : index
    %c0_13 = arith.constant 0 : index
    %27 = vector.load %arg5[%c0_12, %c0_13] : memref<1x1024xf32, #tpu.memory_space<vmem>>, vector<1x1024xf32>
    %28 = vector.broadcast %27 : vector<1x1024xf32> to vector<2x1024xf32>
    %29 = arith.addf %26, %28 : vector<2x1024xf32>
    %cst_14 = arith.constant 0.000000e+00 : f32
    %30 = vector.broadcast %cst_14 : f32 to vector<2x1024xf32>
    %31 = arith.cmpf ogt, %29, %30 : vector<2x1024xf32>
    %cst_15 = arith.constant 2.000000e-01 : f32
    %32 = vector.broadcast %cst_15 : f32 to vector<2x1024xf32>
    %33 = arith.mulf %32, %29 : vector<2x1024xf32>
    %34 = arith.select %31, %29, %33 : vector<2x1024xi1>, vector<2x1024xf32>
    %35 = arith.truncf %34 : vector<2x1024xf32> to vector<2x1024xbf16>
    %c0_16 = arith.constant 0 : index
    %c0_17 = arith.constant 0 : index
    %36 = vector.load %arg6[%c0_16, %c0_17] : memref<1024x2048xbf16, #tpu.memory_space<vmem>>, vector<1024x2048xbf16>
    %cst_18 = arith.constant dense<0.000000e+00> : vector<2x2048xf32>
    %37 = tpu.matmul %35, %36, %cst_18 {dimension_numbers = #tpu.dot_dimension_numbers<[1], [0], [0], [1], [0, 0, 1, 1], [], []>} : vector<2x1024xbf16>, vector<1024x2048xbf16>, vector<2x2048xf32> -> vector<2x2048xf32>
    %c0_19 = arith.constant 0 : index
    %c0_20 = arith.constant 0 : index
    %38 = vector.load %arg7[%c0_19, %c0_20] : memref<1x2048xf32, #tpu.memory_space<vmem>>, vector<1x2048xf32>
    %39 = vector.broadcast %38 : vector<1x2048xf32> to vector<2x2048xf32>
    %40 = arith.addf %37, %39 : vector<2x2048xf32>
    %cst_21 = arith.constant dense<0.000000e+00> : vector<2048xf32>
    %41 = vector.multi_reduction <add>, %40, %cst_21 [0] : vector<2x2048xf32> to vector<2048xf32>
    %42 = vector.shape_cast %41 : vector<2048xf32> to vector<1x2048xf32>
    %cst_22 = arith.constant 2.000000e+00 : f32
    %43 = vector.broadcast %cst_22 : f32 to vector<1x2048xf32>
    %44 = arith.divf %42, %43 : vector<1x2048xf32>
    %45 = vector.broadcast %44 : vector<1x2048xf32> to vector<2x2048xf32>
    %46 = arith.subf %40, %45 : vector<2x2048xf32>
    %47 = arith.mulf %46, %46 : vector<2x2048xf32>
    %cst_23 = arith.constant dense<0.000000e+00> : vector<2048xf32>
    %48 = vector.multi_reduction <add>, %47, %cst_23 [0] : vector<2x2048xf32> to vector<2048xf32>
    %49 = vector.shape_cast %48 : vector<2048xf32> to vector<1x2048xf32>
    %cst_24 = arith.constant 2.000000e+00 : f32
    %50 = vector.broadcast %cst_24 : f32 to vector<1x2048xf32>
    %51 = arith.divf %49, %50 : vector<1x2048xf32>
    %c0_25 = arith.constant 0 : index
    %c0_26 = arith.constant 0 : index
    %52 = vector.load %arg8[%c0_25, %c0_26] : memref<1x2048xf32, #tpu.memory_space<vmem>>, vector<1x2048xf32>
    %53 = vector.broadcast %44 : vector<1x2048xf32> to vector<2x2048xf32>
    %54 = arith.subf %40, %53 : vector<2x2048xf32>
    %55 = vector.broadcast %52 : vector<1x2048xf32> to vector<2x2048xf32>
    %56 = arith.mulf %55, %54 : vector<2x2048xf32>
    %cst_27 = arith.constant 9.99999974E-6 : f32
    %57 = vector.broadcast %cst_27 : f32 to vector<1x2048xf32>
    %58 = arith.addf %51, %57 : vector<1x2048xf32>
    %59 = math.rsqrt %58 : vector<1x2048xf32>
    %60 = vector.broadcast %59 : vector<1x2048xf32> to vector<2x2048xf32>
    %61 = arith.mulf %56, %60 : vector<2x2048xf32>
    %c0_28 = arith.constant 0 : index
    %c0_29 = arith.constant 0 : index
    %62 = vector.load %arg9[%c0_28, %c0_29] : memref<1x2048xf32, #tpu.memory_space<vmem>>, vector<1x2048xf32>
    %63 = vector.broadcast %62 : vector<1x2048xf32> to vector<2x2048xf32>
    %64 = arith.addf %61, %63 : vector<2x2048xf32>
    %cst_30 = arith.constant 0.000000e+00 : f32
    %65 = vector.broadcast %cst_30 : f32 to vector<2x2048xf32>
    %66 = arith.cmpf ogt, %64, %65 : vector<2x2048xf32>
    %cst_31 = arith.constant 2.000000e-01 : f32
    %67 = vector.broadcast %cst_31 : f32 to vector<2x2048xf32>
    %68 = arith.mulf %67, %64 : vector<2x2048xf32>
    %69 = arith.select %66, %64, %68 : vector<2x2048xi1>, vector<2x2048xf32>
    %c0_32 = arith.constant 0 : index
    %c0_33 = arith.constant 0 : index
    %70 = vector.load %arg10[%c0_32, %c0_33] : memref<2x2048xf32, #tpu.memory_space<vmem>>, vector<2x2048xf32>
    tpu.vector_store %arg10[%c0_32, %c0_33], %69 {strides = array<i32>} : memref<2x2048xf32, #tpu.memory_space<vmem>>, vector<2x2048xf32>,
    return
  }
  func.func @transform_0(%arg0: i32) -> (i32, i32) {
    %c0_i32 = arith.constant 0 : i32
    %c0_i32_0 = arith.constant 0 : i32
    %c0_i32_1 = arith.constant 0 : i32
    return %c0_i32, %c0_i32_0 : i32, i32
  }
  func.func @transform_1(%arg0: i32) -> (i32, i32) {
    %c0_i32 = arith.constant 0 : i32
    %c0_i32_0 = arith.constant 0 : i32
    %c0_i32_1 = arith.constant 0 : i32
    return %c0_i32, %c0_i32_0 : i32, i32
  }
  func.func @transform_2(%arg0: i32) -> (i32, i32) {
    %c0_i32 = arith.constant 0 : i32
    %c0_i32_0 = arith.constant 0 : i32
    %c0_i32_1 = arith.constant 0 : i32
    return %c0_i32, %c0_i32_0 : i32, i32
  }
  func.func @transform_3(%arg0: i32) -> (i32, i32) {
    %c0_i32 = arith.constant 0 : i32
    %c0_i32_0 = arith.constant 0 : i32
    %c0_i32_1 = arith.constant 0 : i32
    return %c0_i32, %c0_i32_0 : i32, i32
  }
  func.func @transform_4(%arg0: i32) -> (i32, i32) {
    %c0_i32 = arith.constant 0 : i32
    %c0_i32_0 = arith.constant 0 : i32
    %c0_i32_1 = arith.constant 0 : i32
    return %c0_i32, %c0_i32_0 : i32, i32
  }
  func.func @transform_5(%arg0: i32) -> (i32, i32) {
    %c0_i32 = arith.constant 0 : i32
    %c0_i32_0 = arith.constant 0 : i32
    return %c0_i32, %arg0 : i32, i32
  }
  func.func @transform_6(%arg0: i32) -> (i32, i32) {
    %c0_i32 = arith.constant 0 : i32
    %c0_i32_0 = arith.constant 0 : i32
    return %c0_i32, %arg0 : i32, i32
  }
  func.func @transform_7(%arg0: i32) -> (i32, i32) {
    %c0_i32 = arith.constant 0 : i32
    %c0_i32_0 = arith.constant 0 : i32
    return %c0_i32, %arg0 : i32, i32
  }
  func.func @transform_8(%arg0: i32) -> (i32, i32) {
    %c0_i32 = arith.constant 0 : i32
    %c0_i32_0 = arith.constant 0 : i32
    return %c0_i32, %arg0 : i32, i32
  }
  func.func @transform_9(%arg0: i32) -> (i32, i32) {
    %c0_i32 = arith.constant 0 : i32
    %c0_i32_0 = arith.constant 0 : i32
    return %c0_i32, %arg0 : i32, i32
  }
}

module attributes {stable_mosaic.version = 11 : i64} {
  func.func @_convt_bn_lrelu_kernel(%arg0: i32, %arg1: memref<1x32x512xbf16, #tpu.memory_space<vmem>>, %arg2: memref<1x512x128xbf16, #tpu.memory_space<vmem>>, %arg3: memref<1x128xf32, #tpu.memory_space<vmem>>, %arg4: memref<1x128xf32, #tpu.memory_space<vmem>>, %arg5: memref<1x128xf32, #tpu.memory_space<vmem>>, %arg6: memref<4x32x128xf32, #tpu.memory_space<vmem>>) attributes {dimension_semantics = [#tpu.dimension_semantics<arbitrary>], iteration_bounds = array<i64: 4>, scalar_prefetch = 0 : i64, scratch_operands = 0 : i64, tpu.core_type = #tpu.core_type<tc>, window_params = [{transform_indices = @transform_0, window_bounds = array<i64: 1, 32, 512>}, {transform_indices = @transform_1, window_bounds = array<i64: 1, 512, 128>}, {pipeline_mode = #tpu.pipeline_mode<synchronous>, transform_indices = @transform_2, window_bounds = array<i64: 1, 128>}, {pipeline_mode = #tpu.pipeline_mode<synchronous>, transform_indices = @transform_3, window_bounds = array<i64: 1, 128>}, {pipeline_mode = #tpu.pipeline_mode<synchronous>, transform_indices = @transform_4, window_bounds = array<i64: 1, 128>}, {pipeline_mode = #tpu.pipeline_mode<synchronous>, transform_indices = @transform_5, window_bounds = array<i64: 4, 32, 128>}]} {
    %c0 = arith.constant 0 : index
    %c0_0 = arith.constant 0 : index
    %c0_1 = arith.constant 0 : index
    %0 = vector.load %arg1[%c0, %c0_0, %c0_1] : memref<1x32x512xbf16, #tpu.memory_space<vmem>>, vector<1x32x512xbf16>
    %1 = vector.shape_cast %0 : vector<1x32x512xbf16> to vector<32x512xbf16>
    %c0_2 = arith.constant 0 : index
    %c0_3 = arith.constant 0 : index
    %c0_4 = arith.constant 0 : index
    %2 = vector.load %arg2[%c0_2, %c0_3, %c0_4] : memref<1x512x128xbf16, #tpu.memory_space<vmem>>, vector<1x512x128xbf16>
    %3 = vector.shape_cast %2 : vector<1x512x128xbf16> to vector<512x128xbf16>
    %cst = arith.constant dense<0.000000e+00> : vector<32x128xf32>
    %4 = tpu.matmul %1, %3, %cst {dimension_numbers = #tpu.dot_dimension_numbers<[1], [0], [0], [1], [0, 0, 1, 1], [], []>} : vector<32x512xbf16>, vector<512x128xbf16>, vector<32x128xf32> -> vector<32x128xf32>
    %c0_5 = arith.constant 0 : index
    %c0_6 = arith.constant 0 : index
    %5 = vector.load %arg3[%c0_5, %c0_6] : memref<1x128xf32, #tpu.memory_space<vmem>>, vector<1x128xf32>
    %6 = vector.broadcast %5 : vector<1x128xf32> to vector<32x128xf32>
    %7 = arith.addf %4, %6 : vector<32x128xf32>
    %8 = arith.index_cast %arg0 : i32 to index
    %c0_7 = arith.constant 0 : index
    %c0_8 = arith.constant 0 : index
    %9 = vector.load %arg6[%8, %c0_7, %c0_8] : memref<4x32x128xf32, #tpu.memory_space<vmem>>, vector<1x32x128xf32>
    %10 = vector.shape_cast %9 : vector<1x32x128xf32> to vector<32x128xf32>
    %11 = vector.shape_cast %7 : vector<32x128xf32> to vector<1x32x128xf32>
    tpu.vector_store %arg6[%8, %c0_7, %c0_8], %11 {strides = array<i32>} : memref<4x32x128xf32, #tpu.memory_space<vmem>>, vector<1x32x128xf32>,
    %c3_i32 = arith.constant 3 : i32
    %12 = arith.cmpi eq, %arg0, %c3_i32 : i32
    %13 = arith.extui %12 : i1 to i32
    %c0_i32 = arith.constant 0 : i32
    %14 = arith.cmpi ne, %13, %c0_i32 : i32
    scf.if %14 {
      %c0_9 = arith.constant 0 : index
      %c0_10 = arith.constant 0 : index
      %c0_11 = arith.constant 0 : index
      %15 = vector.load %arg6[%c0_9, %c0_10, %c0_11] : memref<4x32x128xf32, #tpu.memory_space<vmem>>, vector<4x32x128xf32>
      %cst_12 = arith.constant dense<0.000000e+00> : vector<4x128xf32>
      %16 = vector.multi_reduction <add>, %15, %cst_12 [1] : vector<4x32x128xf32> to vector<4x128xf32>
      %17 = vector.shape_cast %16 : vector<4x128xf32> to vector<4x1x128xf32>
      %cst_13 = arith.constant dense<0.000000e+00> : vector<1x128xf32>
      %18 = vector.multi_reduction <add>, %17, %cst_13 [0] : vector<4x1x128xf32> to vector<1x128xf32>
      %19 = vector.shape_cast %18 : vector<1x128xf32> to vector<1x1x128xf32>
      %cst_14 = arith.constant 1.280000e+02 : f32
      %20 = vector.broadcast %cst_14 : f32 to vector<1x1x128xf32>
      %21 = arith.divf %19, %20 : vector<1x1x128xf32>
      %22 = vector.broadcast %21 : vector<1x1x128xf32> to vector<4x32x128xf32>
      %23 = arith.subf %15, %22 : vector<4x32x128xf32>
      %24 = arith.mulf %23, %23 : vector<4x32x128xf32>
      %cst_15 = arith.constant dense<0.000000e+00> : vector<4x128xf32>
      %25 = vector.multi_reduction <add>, %24, %cst_15 [1] : vector<4x32x128xf32> to vector<4x128xf32>
      %26 = vector.shape_cast %25 : vector<4x128xf32> to vector<4x1x128xf32>
      %cst_16 = arith.constant dense<0.000000e+00> : vector<1x128xf32>
      %27 = vector.multi_reduction <add>, %26, %cst_16 [0] : vector<4x1x128xf32> to vector<1x128xf32>
      %28 = vector.shape_cast %27 : vector<1x128xf32> to vector<1x1x128xf32>
      %cst_17 = arith.constant 1.280000e+02 : f32
      %29 = vector.broadcast %cst_17 : f32 to vector<1x1x128xf32>
      %30 = arith.divf %28, %29 : vector<1x1x128xf32>
      %c0_18 = arith.constant 0 : index
      %c0_19 = arith.constant 0 : index
      %31 = vector.load %arg4[%c0_18, %c0_19] : memref<1x128xf32, #tpu.memory_space<vmem>>, vector<1x128xf32>
      %32 = vector.broadcast %21 : vector<1x1x128xf32> to vector<4x32x128xf32>
      %33 = arith.subf %15, %32 : vector<4x32x128xf32>
      %34 = vector.shape_cast %31 : vector<1x128xf32> to vector<1x1x128xf32>
      %35 = vector.broadcast %34 : vector<1x1x128xf32> to vector<4x32x128xf32>
      %36 = arith.mulf %35, %33 : vector<4x32x128xf32>
      %cst_20 = arith.constant 9.99999974E-6 : f32
      %37 = vector.broadcast %cst_20 : f32 to vector<1x1x128xf32>
      %38 = arith.addf %30, %37 : vector<1x1x128xf32>
      %39 = math.rsqrt %38 : vector<1x1x128xf32>
      %40 = vector.broadcast %39 : vector<1x1x128xf32> to vector<4x32x128xf32>
      %41 = arith.mulf %36, %40 : vector<4x32x128xf32>
      %c0_21 = arith.constant 0 : index
      %c0_22 = arith.constant 0 : index
      %42 = vector.load %arg5[%c0_21, %c0_22] : memref<1x128xf32, #tpu.memory_space<vmem>>, vector<1x128xf32>
      %43 = vector.shape_cast %42 : vector<1x128xf32> to vector<1x1x128xf32>
      %44 = vector.broadcast %43 : vector<1x1x128xf32> to vector<4x32x128xf32>
      %45 = arith.addf %41, %44 : vector<4x32x128xf32>
      %cst_23 = arith.constant 0.000000e+00 : f32
      %46 = vector.broadcast %cst_23 : f32 to vector<4x32x128xf32>
      %47 = arith.cmpf ogt, %45, %46 : vector<4x32x128xf32>
      %cst_24 = arith.constant 2.000000e-01 : f32
      %48 = vector.broadcast %cst_24 : f32 to vector<4x32x128xf32>
      %49 = arith.mulf %48, %45 : vector<4x32x128xf32>
      %50 = arith.select %47, %45, %49 : vector<4x32x128xi1>, vector<4x32x128xf32>
      %c0_25 = arith.constant 0 : index
      %c0_26 = arith.constant 0 : index
      %c0_27 = arith.constant 0 : index
      %51 = vector.load %arg6[%c0_25, %c0_26, %c0_27] : memref<4x32x128xf32, #tpu.memory_space<vmem>>, vector<4x32x128xf32>
      tpu.vector_store %arg6[%c0_25, %c0_26, %c0_27], %50 {strides = array<i32>} : memref<4x32x128xf32, #tpu.memory_space<vmem>>, vector<4x32x128xf32>,
    } else {
    }
    return
  }
  func.func @transform_0(%arg0: i32) -> (i32, i32, i32) {
    %c0_i32 = arith.constant 0 : i32
    %c0_i32_0 = arith.constant 0 : i32
    %c0_i32_1 = arith.constant 0 : i32
    return %arg0, %c0_i32, %c0_i32_0 : i32, i32, i32
  }
  func.func @transform_1(%arg0: i32) -> (i32, i32, i32) {
    %c0_i32 = arith.constant 0 : i32
    %c0_i32_0 = arith.constant 0 : i32
    %c0_i32_1 = arith.constant 0 : i32
    return %arg0, %c0_i32, %c0_i32_0 : i32, i32, i32
  }
  func.func @transform_2(%arg0: i32) -> (i32, i32) {
    %c0_i32 = arith.constant 0 : i32
    %c0_i32_0 = arith.constant 0 : i32
    %c0_i32_1 = arith.constant 0 : i32
    return %c0_i32, %c0_i32_0 : i32, i32
  }
  func.func @transform_3(%arg0: i32) -> (i32, i32) {
    %c0_i32 = arith.constant 0 : i32
    %c0_i32_0 = arith.constant 0 : i32
    %c0_i32_1 = arith.constant 0 : i32
    return %c0_i32, %c0_i32_0 : i32, i32
  }
  func.func @transform_4(%arg0: i32) -> (i32, i32) {
    %c0_i32 = arith.constant 0 : i32
    %c0_i32_0 = arith.constant 0 : i32
    %c0_i32_1 = arith.constant 0 : i32
    return %c0_i32, %c0_i32_0 : i32, i32
  }
  func.func @transform_5(%arg0: i32) -> (i32, i32, i32) {
    %c0_i32 = arith.constant 0 : i32
    %c0_i32_0 = arith.constant 0 : i32
    %c0_i32_1 = arith.constant 0 : i32
    %c0_i32_2 = arith.constant 0 : i32
    return %c0_i32, %c0_i32_0, %c0_i32_1 : i32, i32, i32
  }
}

module attributes {stable_mosaic.version = 11 : i64} {
  func.func @_convt_tanh_kernel(%arg0: i32, %arg1: memref<1x128x512xbf16, #tpu.memory_space<vmem>>, %arg2: memref<1x512x128xbf16, #tpu.memory_space<vmem>>, %arg3: memref<1x128xf32, #tpu.memory_space<vmem>>, %arg4: memref<1x128x128xf32, #tpu.memory_space<vmem>>) attributes {dimension_semantics = [#tpu.dimension_semantics<parallel>], iteration_bounds = array<i64: 4>, scalar_prefetch = 0 : i64, scratch_operands = 0 : i64, tpu.core_type = #tpu.core_type<tc>, window_params = [{transform_indices = @transform_0, window_bounds = array<i64: 1, 128, 512>}, {transform_indices = @transform_1, window_bounds = array<i64: 1, 512, 128>}, {pipeline_mode = #tpu.pipeline_mode<synchronous>, transform_indices = @transform_2, window_bounds = array<i64: 1, 128>}, {transform_indices = @transform_3, window_bounds = array<i64: 1, 128, 128>}]} {
    %c0 = arith.constant 0 : index
    %c0_0 = arith.constant 0 : index
    %c0_1 = arith.constant 0 : index
    %0 = vector.load %arg1[%c0, %c0_0, %c0_1] : memref<1x128x512xbf16, #tpu.memory_space<vmem>>, vector<1x128x512xbf16>
    %1 = vector.shape_cast %0 : vector<1x128x512xbf16> to vector<128x512xbf16>
    %c0_2 = arith.constant 0 : index
    %c0_3 = arith.constant 0 : index
    %c0_4 = arith.constant 0 : index
    %2 = vector.load %arg2[%c0_2, %c0_3, %c0_4] : memref<1x512x128xbf16, #tpu.memory_space<vmem>>, vector<1x512x128xbf16>
    %3 = vector.shape_cast %2 : vector<1x512x128xbf16> to vector<512x128xbf16>
    %cst = arith.constant dense<0.000000e+00> : vector<128x128xf32>
    %4 = tpu.matmul %1, %3, %cst {dimension_numbers = #tpu.dot_dimension_numbers<[1], [0], [0], [1], [0, 0, 1, 1], [], []>} : vector<128x512xbf16>, vector<512x128xbf16>, vector<128x128xf32> -> vector<128x128xf32>
    %c0_5 = arith.constant 0 : index
    %c0_6 = arith.constant 0 : index
    %5 = vector.load %arg3[%c0_5, %c0_6] : memref<1x128xf32, #tpu.memory_space<vmem>>, vector<1x128xf32>
    %6 = vector.broadcast %5 : vector<1x128xf32> to vector<128x128xf32>
    %7 = arith.addf %4, %6 : vector<128x128xf32>
    %8 = math.tanh %7 : vector<128x128xf32>
    %c0_7 = arith.constant 0 : index
    %c0_8 = arith.constant 0 : index
    %c0_9 = arith.constant 0 : index
    %9 = vector.load %arg4[%c0_7, %c0_8, %c0_9] : memref<1x128x128xf32, #tpu.memory_space<vmem>>, vector<1x128x128xf32>
    %10 = vector.shape_cast %9 : vector<1x128x128xf32> to vector<128x128xf32>
    %11 = vector.shape_cast %8 : vector<128x128xf32> to vector<1x128x128xf32>
    tpu.vector_store %arg4[%c0_7, %c0_8, %c0_9], %11 {strides = array<i32>} : memref<1x128x128xf32, #tpu.memory_space<vmem>>, vector<1x128x128xf32>,
    return
  }
  func.func @transform_0(%arg0: i32) -> (i32, i32, i32) {
    %c0_i32 = arith.constant 0 : i32
    %c0_i32_0 = arith.constant 0 : i32
    %c0_i32_1 = arith.constant 0 : i32
    return %arg0, %c0_i32, %c0_i32_0 : i32, i32, i32
  }
  func.func @transform_1(%arg0: i32) -> (i32, i32, i32) {
    %c0_i32 = arith.constant 0 : i32
    %c0_i32_0 = arith.constant 0 : i32
    %c0_i32_1 = arith.constant 0 : i32
    return %arg0, %c0_i32, %c0_i32_0 : i32, i32, i32
  }
  func.func @transform_2(%arg0: i32) -> (i32, i32) {
    %c0_i32 = arith.constant 0 : i32
    %c0_i32_0 = arith.constant 0 : i32
    %c0_i32_1 = arith.constant 0 : i32
    return %c0_i32, %c0_i32_0 : i32, i32
  }
  func.func @transform_3(%arg0: i32) -> (i32, i32, i32) {
    %c0_i32 = arith.constant 0 : i32
    %c0_i32_0 = arith.constant 0 : i32
    %c0_i32_1 = arith.constant 0 : i32
    return %arg0, %c0_i32, %c0_i32_0 : i32, i32, i32
  }
}

</mosaic_0001>

<bundles_post_ra>
// kernel: generator_infogan_forward.4
= control target key start
LH: loop header
LB: loop body
LE: loop exit
PB: predicated region body
PF: predicated region fallthrough
CT: control target
= control target key end

     0   :  { %s1154_s18 = smov 0   ;;  %s1442_s0 = inlined_call_operand.vmem [shape: bf16[4,32,512], index: 0, kind: input, shape index: {}]   ;;  %s1443_s1 = inlined_call_operand.vmem [shape: bf16[4,512,128], index: 1, kind: input, shape index: {}]   ;;  %s1444_s2 = inlined_call_operand.vmem [shape: f32[1,128], index: 2, kind: input, shape index: {}]   ;;  %s1445_s3 = inlined_call_operand.vmem [shape: f32[1,128], index: 3, kind: input, shape index: {}]   ;;  %s1446_s4 = inlined_call_operand.vmem [shape: f32[1,128], index: 4, kind: input, shape index: {}]   ;;  %s1447_s5 = inlined_call_operand.vmem [shape: f32[4,32,128], index: 5, kind: output, shape index: {}]  }
   0x1 LB: > { %s1160_s19 = sadd.s32 4294967295, %s1122_s18   ;;  %p952_p0 = scmp.ge.s32.totalorder %s1122_s18, 1  ;;  %s1122_s18 = sphi %s1154_s18, %s15_s18  }
   0x2   : > { %p192_p1 = scmp.lt.s32.totalorder %s1122_s18, 5 }
   0x4   : > { %p193_p2 = pnand %p952_p0, %p192_p1 }
   0x5   : > { %p220_p3 = scmp.lt.s32.totalorder (!%p193_p2), %s1160_s19, 3  ;;  %v957_v42 = vld [vmem:[%s1444_s2] ss:$0 sm:$0xff] (!%p193_p2)  ;;  %s998_s6 = sshll.u32 (!%p193_p2), %s1160_s19, 5 }
   0x6   : > { %196 = sbr.rel (%p193_p2) target bundleno = 387 (0x183), region = 40  ;;  %s641_s9 = scalar_lea.vmem (!%p193_p2), %s1447_s5, %s998_s6 }
   0x7   : > { %p999_p4 = scmp.ne.s32.totalorder (!%p193_p2), %s1160_s19, 3 }
   0xd   : > { %s1166_s20 = scalar_select %p220_p3, %s1160_s19, 3 }
   0xf   : > { %s1005_s21 = sshll.u32 %s1166_s20, 8  ;;  %s1004_s25 = sshll.u32 %s1166_s20, 6 }
  0x10   : > { %s1172_s24 = scalar_lea.vmem %s1443_s1, %s1005_s21  ;;  %s224_s28 = scalar_lea.vmem %s1442_s0, %s1004_s25 }
  0x11   : > { %v1070_v0 = vld [vmem:[%s1172_s24 + $0x40] sm:$0xff]   ;;  %v1074_v4 = vld [vmem:[%s1172_s24 + $0x48] sm:$0xff]   ;;  %v1078_v8 = vld [vmem:[%s1172_s24 + $0x50] sm:$0xff]  }
  0x12   : > { %v1071_v1 = vld [vmem:[%s1172_s24 + $0xc0] sm:$0xff]   ;;  %1006 = vmatprep.subr.bf16.mxu0 %v1070_v0  ;;  %v1075_v5 = vld [vmem:[%s1172_s24 + $0xc8] sm:$0xff]   ;;  %v1079_v9 = vld [vmem:[%s1172_s24 + $0xd0] sm:$0xff]  }
  0x13   : > { %v1072_v2 = vld [vmem:[%s1172_s24] sm:$0xff]   ;;  %1034 = vmatprep.subr.bf16.mxu1 %v1071_v1  ;;  %v1076_v6 = vld [vmem:[%s1172_s24 + $0x8] sm:$0xff]   ;;  %v1080_v10 = vld [vmem:[%s1172_s24 + $0x10] sm:$0xff]  }
  0x14   : > { %v1073_v3 = vld [vmem:[%s1172_s24 + $0x80] sm:$0xff]   ;;  %1007 = vmatpush3.bf16.msra.mxu0 %v1072_v2  ;;  %v1077_v7 = vld [vmem:[%s1172_s24 + $0x88] sm:$0xff]   ;;  %v1081_v11 = vld [vmem:[%s1172_s24 + $0x90] sm:$0xff]  }
  0x15   : > { %1035 = vmatpush3.bf16.msra.mxu1 %v1073_v3  ;;  %1008 = vmatprep.subr.bf16.mxu0 %v1074_v4  ;;  %v1082_v12 = vld [vmem:[%s1172_s24 + $0x58] sm:$0xff]   ;;  %v1086_v16 = vld [vmem:[%s1172_s24 + $0x60] sm:$0xff]   ;;  %v1090_v20 = vld [vmem:[%s1172_s24 + $0x68] sm:$0xff]  }
  0x16   : > { %1036 = vmatprep.subr.bf16.mxu1 %v1075_v5  ;;  %v1083_v13 = vld [vmem:[%s1172_s24 + $0xd8] sm:$0xff]   ;;  %v1087_v17 = vld [vmem:[%s1172_s24 + $0xe0] sm:$0xff]   ;;  %v1091_v21 = vld [vmem:[%s1172_s24 + $0xe8] sm:$0xff]  }
  0x17   : > { %v1084_v14 = vld [vmem:[%s1172_s24 + $0x18] sm:$0xff]   ;;  %v1088_v18 = vld [vmem:[%s1172_s24 + $0x20] sm:$0xff]   ;;  %v1092_v22 = vld [vmem:[%s1172_s24 + $0x28] sm:$0xff]  }
  0x18   : > { %1009 = vmatpush3.bf16.msra.mxu0 %v1076_v6  ;;  %v1085_v15 = vld [vmem:[%s1172_s24 + $0x98] sm:$0xff]   ;;  %v1089_v19 = vld [vmem:[%s1172_s24 + $0xa0] sm:$0xff]   ;;  %v1093_v23 = vld [vmem:[%s1172_s24 + $0xa8] sm:$0xff]  }
  0x19   : > { %1037 = vmatpush3.bf16.msra.mxu1 %v1077_v7  ;;  %1010 = vmatprep.subr.bf16.mxu0 %v1078_v8  ;;  %v1094_v24 = vld [vmem:[%s1172_s24 + $0x70] sm:$0xff]   ;;  %v1098_v28 = vld [vmem:[%s1172_s24 + $0x78] sm:$0xff]  }
  0x1a   : > { %1038 = vmatprep.subr.bf16.mxu1 %v1079_v9  ;;  %v1095_v25 = vld [vmem:[%s1172_s24 + $0xf0] sm:$0xff]   ;;  %v1099_v29 = vld [vmem:[%s1172_s24 + $0xf8] sm:$0xff]  }
  0x1b   : > { %v1096_v26 = vld [vmem:[%s1172_s24 + $0x30] sm:$0xff]   ;;  %v1100_v30 = vld [vmem:[%s1172_s24 + $0x38] sm:$0xff]  }
  0x1c   : > { %1011 = vmatpush3.bf16.msra.mxu0 %v1080_v10  ;;  %v1097_v27 = vld [vmem:[%s1172_s24 + $0xb0] sm:$0xff]   ;;  %v1101_v31 = vld [vmem:[%s1172_s24 + $0xb8] sm:$0xff]  }
  0x1d   : > { %1039 = vmatpush3.bf16.msra.mxu1 %v1081_v11  ;;  %1012 = vmatprep.subr.bf16.mxu0 %v1082_v12  ;;  %v1102_v32 = vld [vmem:[%s224_s28] ss:$16 sps:$4 sm:$0xff]   ;;  %v1104_v33 = vld [vmem:[%s224_s28 + $0x4] ss:$16 sps:$4 sm:$0xff]   ;;  %v1105_v34 = vld [vmem:[%s224_s28 + $0x8] ss:$16 sps:$4 sm:$0xff]  }
  0x1e   : > { %1040 = vmatprep.subr.bf16.mxu1 %v1083_v13  ;;  %v1107_v35 = vld [vmem:[%s224_s28 + $0xc] ss:$16 sps:$4 sm:$0xff]   ;;  %574 = vmatprep.mubr.bf16.mxu0 %v1104_v33  ;;  %v1108_v36 = vld [vmem:[%s224_s28 + $0x24] ss:$16 sps:$4 sm:$0xff]   ;;  %v1112_v38 = vld [vmem:[%s224_s28 + $0x20] ss:$16 sps:$4 sm:$0xff]  }
  0x1f   : > { %623 = vmatprep.mubr.bf16.mxu1 %v1107_v35  ;;  %v1110_v37 = vld [vmem:[%s224_s28 + $0x2c] ss:$16 sps:$4 sm:$0xff]   ;;  %v1113_v39 = vld [vmem:[%s224_s28 + $0x28] ss:$16 sps:$4 sm:$0xff]  }
  0x20   : > { %1013 = vmatpush3.bf16.msra.mxu0 %v1084_v14 }
  0x21   : > { %1041 = vmatpush3.bf16.msra.mxu1 %v1085_v15  ;;  %1014 = vmatprep.subr.bf16.mxu0 %v1086_v16 }
  0x22   : > { %1042 = vmatprep.subr.bf16.mxu1 %v1087_v17 }
  0x24   : > { %1015 = vmatpush3.bf16.msra.mxu0 %v1088_v18 }
  0x25   : > { %1043 = vmatpush3.bf16.msra.mxu1 %v1089_v19  ;;  %1016 = vmatprep.subr.bf16.mxu0 %v1090_v20 }
  0x26   : > { %1044 = vmatprep.subr.bf16.mxu1 %v1091_v21 }
  0x28   : > { %1017 = vmatpush3.bf16.msra.mxu0 %v1092_v22 }
  0x29   : > { %1045 = vmatpush3.bf16.msra.mxu1 %v1093_v23  ;;  %1018 = vmatprep.subr.bf16.mxu0 %v1094_v24 }
  0x2a   : > { %1046 = vmatprep.subr.bf16.mxu1 %v1095_v25 }
  0x2c   : > { %1019 = vmatpush3.bf16.msra.mxu0 %v1096_v26 }
  0x2d   : > { %1047 = vmatpush3.bf16.msra.mxu1 %v1097_v27  ;;  %1020 = vmatprep.subr.bf16.mxu0 %v1098_v28 }
  0x2e   : > { %1048 = vmatprep.subr.bf16.mxu1 %v1099_v29 }
  0x30   : > { %1021 = vmatpush3.bf16.msra.mxu0 %v1100_v30 }
  0x31   : > { %1049 = vmatpush3.bf16.msra.mxu1 %v1101_v31 }
  0x33   : > { %575 = vmatmul.mubr.bf16.vlgmr.msra.gmra.mrb[0].mxu0 %v1102_v32 }
  0x34   : > { %624 = vmatmul.mubr.bf16.vlgmr.msra.gmra.mrb[0].mxu1 %v1105_v34  ;;  %582 = vmatprep.mubr.bf16.mxu0 %v1108_v36 }
  0x35   : > { %631 = vmatprep.mubr.bf16.mxu1 %v1110_v37 }
  0x3b   : > { %583 = vmatmul.mubr.bf16.gmra.mrb[4].mxu0 %v1112_v38 }
  0x3c   : > { %632 = vmatmul.mubr.bf16.gmra.mrb[4].mxu1 %v1113_v39 }
 0x106   : > { %v1022_v40 = vpop.f32.mrb[0].mxu0 }
 0x107   : > { %v1050_v41 = vpop.f32.mrb[0].mxu1  ;;  %v1023_v43 = vpop.f32.mrb[1].mxu0 }
 0x108   : > { %v1024_v44 = vadd.f32 %v1023_v43, %v1022_v40  ;;  %v1051_v45 = vpop.f32.mrb[1].mxu1  ;;  %v1025_v46 = vpop.f32.mrb[2].mxu0 }
 0x109   : > { %v1052_v47 = vadd.f32 %v1051_v45, %v1050_v41  ;;  %v1053_v48 = vpop.f32.mrb[2].mxu1  ;;  %v1026_v49 = vpop.f32.mrb[3].mxu0 }
 0x10a   : > { %v577_v50 = vadd.f32 %v1024_v44, %v957_v42  ;;  %v1027_v51 = vadd.f32 %v1026_v49, %v1025_v46  ;;  %v1054_v52 = vpop.f32.mrb[3].mxu1 }
 0x10b   : > { %v1055_v53 = vadd.f32 %v1054_v52, %v1053_v48 }
 0x10c   : > { %v626_v54 = vadd.f32 %v1052_v47, %v577_v50  ;;  %v580_v55 = vadd.f32 %v1027_v51, %v957_v42 }
 0x10e   : > { %642 = vst [vmem:[%s641_s9] sm:$0xff] %v626_v54  ;;  %v629_v56 = vadd.f32 %v1055_v53, %v580_v55  ;;  %v1028_v57 = vpop.f32.mrb[4].mxu0 }
 0x10f   : > { %v1056_v58 = vpop.f32.mrb[4].mxu1  ;;  %v1029_v59 = vpop.f32.mrb[5].mxu0 }
 0x110   : > { %643 = vst [vmem:[%s641_s9 + $0x8] sm:$0xff] %v629_v56  ;;  %v1030_v60 = vadd.f32 %v1029_v59, %v1028_v57  ;;  %v1057_v61 = vpop.f32.mrb[5].mxu1  ;;  %v1031_v62 = vpop.f32.mrb[6].mxu0 }
 0x111   : > { %v1058_v63 = vadd.f32 %v1057_v61, %v1056_v58  ;;  %v1059_v0 = vpop.f32.mrb[6].mxu1  ;;  %v1032_v1 = vpop.f32.mrb[7].mxu0 }
 0x112   : > { %v585_v2 = vadd.f32 %v1030_v60, %v957_v42  ;;  %v1033_v3 = vadd.f32 %v1032_v1, %v1031_v62  ;;  %v1060_v4 = vpop.f32.mrb[7].mxu1  ;;  %649 = sbr.rel (%p999_p4) target bundleno = 387 (0x183), region = 44 }
 0x113   : > { %v1061_v5 = vadd.f32 %v1060_v4, %v1059_v0 }
 0x114   : > { %v634_v6 = vadd.f32 %v1058_v63, %v585_v2  ;;  %v588_v7 = vadd.f32 %v1033_v3, %v957_v42 }
 0x116   : > { %644 = vst [vmem:[%s641_s9 + $0x10] sm:$0xff] %v634_v6  ;;  %v637_v8 = vadd.f32 %v1061_v5, %v588_v7 }
 0x118   : > { %645 = vst [vmem:[%s641_s9 + $0x18] sm:$0xff] %v637_v8 }
 0x11f   : > { %v650_v9 = vld [vmem:[%s1447_s5] sm:$0xff]  ;;  %v651_v10 = vld [vmem:[%s1447_s5 + $0x8] sm:$0xff]  ;;  %v652_v11 = vld [vmem:[%s1447_s5 + $0x10] sm:$0xff] }
 0x120   : > { %v654_v12 = vld [vmem:[%s1447_s5 + $0x20] sm:$0xff]  ;;  %v655_v13 = vld [vmem:[%s1447_s5 + $0x28] sm:$0xff]  ;;  %v666_v14 = vadd.f32 %v651_v10, %v650_v9  ;;  %v653_v15 = vld [vmem:[%s1447_s5 + $0x18] sm:$0xff] }
 0x121   : > { %v656_v16 = vld [vmem:[%s1447_s5 + $0x30] sm:$0xff]  ;;  %v658_v17 = vld [vmem:[%s1447_s5 + $0x40] sm:$0xff]  ;;  %v675_v18 = vadd.f32 %v655_v13, %v654_v12  ;;  %v657_v19 = vld [vmem:[%s1447_s5 + $0x38] sm:$0xff] }
 0x122   : > { %v659_v20 = vld [vmem:[%s1447_s5 + $0x48] sm:$0xff]  ;;  %v660_v21 = vld [vmem:[%s1447_s5 + $0x50] sm:$0xff]  ;;  %v667_v22 = vadd.f32 %v666_v14, %v652_v11  ;;  %v662_v23 = vld [vmem:[%s1447_s5 + $0x60] sm:$0xff] }
 0x123   : > { %v663_v24 = vld [vmem:[%s1447_s5 + $0x68] sm:$0xff]  ;;  %v664_v25 = vld [vmem:[%s1447_s5 + $0x70] sm:$0xff]  ;;  %v676_v26 = vadd.f32 %v675_v18, %v656_v16  ;;  %v684_v27 = vadd.f32 %v659_v20, %v658_v17  ;;  %v661_v28 = vld [vmem:[%s1447_s5 + $0x58] sm:$0xff] }
 0x124   : > { %v668_v29 = vadd.f32 %v667_v22, %v653_v15  ;;  %v693_v30 = vadd.f32 %v663_v24, %v662_v23  ;;  %v665_v31 = vld [vmem:[%s1447_s5 + $0x78] sm:$0xff] }
 0x125   : > { %v677_v32 = vadd.f32 %v676_v26, %v657_v19  ;;  %v685_v33 = vadd.f32 %v684_v27, %v660_v21 }
 0x126   : > { %v669_v34 = vrot.slane %v668_v29, 4  ;;  %v694_v35 = vadd.f32 %v693_v30, %v664_v25 }
 0x127   : > { %v678_v36 = vrot.slane %v677_v32, 4  ;;  %v686_v37 = vadd.f32 %v685_v33, %v661_v28 }
 0x128   : > { %v670_v38 = vadd.f32 %v669_v34, %v668_v29  ;;  %v695_v39 = vadd.f32 %v694_v35, %v665_v31 }
 0x129   : > { %v679_v40 = vadd.f32 %v678_v36, %v677_v32  ;;  %v687_v41 = vrot.slane %v686_v37, 4 }
 0x12a   : > { %v671_v42 = vrot.slane %v670_v38, 2  ;;  %v696_v43 = vrot.slane %v695_v39, 4 }
 0x12b   : > { %v680_v44 = vrot.slane %v679_v40, 2  ;;  %v688_v45 = vadd.f32 %v687_v41, %v686_v37 }
 0x12c   : > { %v672_v46 = vadd.f32 %v671_v42, %v670_v38  ;;  %v697_v47 = vadd.f32 %v696_v43, %v695_v39 }
 0x12d   : > { %v681_v48 = vadd.f32 %v680_v44, %v679_v40  ;;  %v689_v49 = vrot.slane %v688_v45, 2 }
 0x12e   : > { %v673_v50 = vrot.slane %v672_v46, 1  ;;  %v698_v51 = vrot.slane %v697_v47, 2 }
 0x12f   : > { %v682_v52 = vrot.slane %v681_v48, 1  ;;  %v690_v53 = vadd.f32 %v689_v49, %v688_v45 }
 0x130   : > { %v674_v54 = vadd.f32 %v673_v50, %v672_v46  ;;  %v699_v55 = vadd.f32 %v698_v51, %v697_v47 }
 0x131   : > { %v683_v56 = vadd.f32 %v682_v52, %v681_v48  ;;  %v691_v57 = vrot.slane %v690_v53, 1 }
 0x132   : > { %v700_v58 = vrot.slane %v699_v55, 1 }
 0x133   : > { %v692_v59 = vadd.f32 %v691_v57, %v690_v53  ;;  %v702_v60 = vadd.f32 %v683_v56, %v674_v54 }
 0x134   : > { %v701_v61 = vadd.f32 %v700_v58, %v699_v55 }
 0x135   : > { %v703_v62 = vadd.f32 %v702_v60, %v692_v59 }
 0x137   : > { %v704_v63 = vadd.f32 %v703_v62, %v701_v61 }
 0x139   : > { %v706_v0 = vmul.f32 0.0078125, %v704_v63 }
 0x13b   : > { %v1266_v1 = vsub.f32 %v650_v9, %v706_v0  ;;  %v1268_v2 = vsub.f32 %v651_v10, %v706_v0  ;;  %v1270_v3 = vsub.f32 %v652_v11, %v706_v0  ;;  %v1272_v4 = vsub.f32 %v653_v15, %v706_v0 }
 0x13c   : > { %v1274_v5 = vsub.f32 %v654_v12, %v706_v0  ;;  %v1276_v6 = vsub.f32 %v655_v13, %v706_v0  ;;  %v1278_v7 = vsub.f32 %v656_v16, %v706_v0  ;;  %v1280_v8 = vsub.f32 %v658_v17, %v706_v0 }
 0x13d   : > { %v1282_v14 = vsub.f32 %v659_v20, %v706_v0  ;;  %v1284_v18 = vsub.f32 %v660_v21, %v706_v0  ;;  %v1286_v9 = vsub.f32 %v657_v19, %v706_v0  ;;  %v1288_v10 = vsub.f32 %v662_v23, %v706_v0 }
 0x13e   : > { %v1290_v11 = vsub.f32 %v663_v24, %v706_v0  ;;  %v1292_v15 = vsub.f32 %v664_v25, %v706_v0  ;;  %v1294_v12 = vsub.f32 %v661_v28, %v706_v0  ;;  %v1296_v13 = vsub.f32 %v665_v31, %v706_v0 }
 0x13f   : > { %v723_v16 = vmul.f32 %v1266_v1, %v1266_v1  ;;  %v724_v17 = vmul.f32 %v1268_v2, %v1268_v2  ;;  %v725_v19 = vmul.f32 %v1270_v3, %v1270_v3  ;;  %v726_v20 = vmul.f32 %v1272_v4, %v1272_v4 }
 0x140   : > { %v727_v21 = vmul.f32 %v1274_v5, %v1274_v5  ;;  %v728_v22 = vmul.f32 %v1276_v6, %v1276_v6  ;;  %v729_v23 = vmul.f32 %v1278_v7, %v1278_v7  ;;  %v731_v24 = vmul.f32 %v1280_v8, %v1280_v8 }
 0x141   : > { %v732_v25 = vmul.f32 %v1282_v14, %v1282_v14  ;;  %v733_v26 = vmul.f32 %v1284_v18, %v1284_v18  ;;  %v730_v27 = vmul.f32 %v1286_v9, %v1286_v9  ;;  %v735_v28 = vmul.f32 %v1288_v10, %v1288_v10 }
 0x142   : > { %v736_v29 = vmul.f32 %v1290_v11, %v1290_v11  ;;  %v737_v30 = vmul.f32 %v1292_v15, %v1292_v15  ;;  %v734_v31 = vmul.f32 %v1294_v12, %v1294_v12  ;;  %v739_v32 = vadd.f32 %v724_v17, %v723_v16 }
 0x143   : > { %v748_v33 = vadd.f32 %v728_v22, %v727_v21  ;;  %v757_v34 = vadd.f32 %v732_v25, %v731_v24  ;;  %v738_v35 = vmul.f32 %v1296_v13, %v1296_v13 }
 0x144   : > { %v766_v36 = vadd.f32 %v736_v29, %v735_v28  ;;  %v740_v37 = vadd.f32 %v739_v32, %v725_v19 }
 0x145   : > { %v749_v38 = vadd.f32 %v748_v33, %v729_v23  ;;  %v758_v39 = vadd.f32 %v757_v34, %v733_v26  ;;  %v1000_v26 = vld [vmem:[%s1445_s3] ss:$0 sm:$0xff] }
 0x146   : > { %v767_v40 = vadd.f32 %v766_v36, %v737_v30  ;;  %v741_v41 = vadd.f32 %v740_v37, %v726_v20  ;;  %v787_v28 = vmul.f32 %v1000_v26, %v1268_v2  ;;  %v788_v29 = vmul.f32 %v1000_v26, %v1270_v3  ;;  %v1350_v3 = vld [vmem:[%s1446_s4] ss:$0 sm:$0xff] }
 0x147   : > { %v750_v42 = vadd.f32 %v749_v38, %v730_v27  ;;  %v759_v43 = vadd.f32 %v758_v39, %v734_v31  ;;  %v786_v27 = vmul.f32 %v1000_v26, %v1266_v1  ;;  %v789_v30 = vmul.f32 %v1000_v26, %v1272_v4 }
 0x148   : > { %v768_v44 = vadd.f32 %v767_v40, %v738_v35  ;;  %v742_v45 = vrot.slane %v741_v41, 4  ;;  %v790_v31 = vmul.f32 %v1000_v26, %v1274_v5  ;;  %v791_v32 = vmul.f32 %v1000_v26, %v1276_v6 }
 0x149   : > { %v751_v46 = vrot.slane %v750_v42, 4  ;;  %v760_v47 = vrot.slane %v759_v43, 4  ;;  %v792_v33 = vmul.f32 %v1000_v26, %v1278_v7  ;;  %v793_v34 = vmul.f32 %v1000_v26, %v1286_v9 }
 0x14a   : > { %v769_v48 = vrot.slane %v768_v44, 4  ;;  %v743_v49 = vadd.f32 %v742_v45, %v741_v41  ;;  %v794_v35 = vmul.f32 %v1000_v26, %v1280_v8  ;;  %v795_v36 = vmul.f32 %v1000_v26, %v1282_v14 }
 0x14b   : > { %v752_v50 = vadd.f32 %v751_v46, %v750_v42  ;;  %v761_v51 = vadd.f32 %v760_v47, %v759_v43  ;;  %v796_v1 = vmul.f32 %v1000_v26, %v1284_v18  ;;  %v797_v2 = vmul.f32 %v1000_v26, %v1294_v12 }
 0x14c   : > { %v770_v52 = vadd.f32 %v769_v48, %v768_v44  ;;  %v744_v53 = vrot.slane %v743_v49, 2  ;;  %v798_v4 = vmul.f32 %v1000_v26, %v1288_v10  ;;  %v799_v5 = vmul.f32 %v1000_v26, %v1290_v11 }
 0x14d   : > { %v753_v54 = vrot.slane %v752_v50, 2  ;;  %v762_v55 = vrot.slane %v761_v51, 2  ;;  %v800_v6 = vmul.f32 %v1000_v26, %v1292_v15  ;;  %v1356_v7 = vmul.f32 %v1000_v26, %v1296_v13 }
 0x14e   : > { %v771_v56 = vrot.slane %v770_v52, 2  ;;  %v745_v57 = vadd.f32 %v744_v53, %v743_v49 }
 0x14f   : > { %v754_v58 = vadd.f32 %v753_v54, %v752_v50  ;;  %v763_v59 = vadd.f32 %v762_v55, %v761_v51 }
 0x150   : > { %v772_v60 = vadd.f32 %v771_v56, %v770_v52  ;;  %v746_v61 = vrot.slane %v745_v57, 1 }
 0x151   : > { %v755_v62 = vrot.slane %v754_v58, 1  ;;  %v764_v63 = vrot.slane %v763_v59, 1 }
 0x152   : > { %v773_v0 = vrot.slane %v772_v60, 1  ;;  %v747_v16 = vadd.f32 %v746_v61, %v745_v57 }
 0x153   : > { %v756_v17 = vadd.f32 %v755_v62, %v754_v58  ;;  %v765_v19 = vadd.f32 %v764_v63, %v763_v59 }
 0x154   : > { %v774_v20 = vadd.f32 %v773_v0, %v772_v60 }
 0x155   : > { %v775_v21 = vadd.f32 %v756_v17, %v747_v16 }
 0x157   : > { %v776_v22 = vadd.f32 %v775_v21, %v765_v19 }
 0x159   : > { %v777_v23 = vadd.f32 %v776_v22, %v774_v20 }
 0x15b   : > { %v778_v24 = vmul.f32 0.0078125, %v777_v23 }
 0x15d   : > { %v802_v25 = vadd.f32 1e-05, %v778_v24 }
 0x15f   : > { %1114 = vrsqrt.f32 %v802_v25 }
 0x169   : > { %v1345_v37 = vpop.eup %1114 }
 0x16a   : > { %v804_v8 = vmul.f32 %v1345_v37, %v786_v27  ;;  %v805_v14 = vmul.f32 %v1345_v37, %v787_v28  ;;  %v806_v18 = vmul.f32 %v1345_v37, %v788_v29  ;;  %v807_v9 = vmul.f32 %v1345_v37, %v789_v30 }
 0x16b   : > { %v808_v12 = vmul.f32 %v1345_v37, %v790_v31  ;;  %v809_v38 = vmul.f32 %v1345_v37, %v791_v32  ;;  %v810_v10 = vmul.f32 %v1345_v37, %v792_v33  ;;  %v811_v11 = vmul.f32 %v1345_v37, %v793_v34 }
 0x16c   : > { %v827_v15 = vadd.f32 %v1350_v3, %v804_v8  ;;  %v828_v13 = vadd.f32 %v1350_v3, %v805_v14  ;;  %v829_v39 = vadd.f32 %v1350_v3, %v806_v18  ;;  %v830_v40 = vadd.f32 %v1350_v3, %v807_v9 }
 0x16d   : > { %v831_v41 = vadd.f32 %v1350_v3, %v808_v12  ;;  %v832_v42 = vadd.f32 %v1350_v3, %v809_v38  ;;  %v833_v43 = vadd.f32 %v1350_v3, %v810_v10  ;;  %v834_v44 = vadd.f32 %v1350_v3, %v811_v11 }
 0x16e   : > { %vm843_vm0 = vcmp.gt.f32.partialorder %v827_v15, 0.0  ;;  %v859_v45 = vmul.f32 0.2, %v827_v15  ;;  %vm844_vm1 = vcmp.gt.f32.partialorder %v828_v13, 0.0  ;;  %v860_v46 = vmul.f32 0.2, %v828_v13 }
 0x16f   : > { %vm845_vm2 = vcmp.gt.f32.partialorder %v829_v39, 0.0  ;;  %v861_v47 = vmul.f32 0.2, %v829_v39  ;;  %vm846_vm3 = vcmp.gt.f32.partialorder %v830_v40, 0.0  ;;  %v862_v48 = vmul.f32 0.2, %v830_v40 }
 0x170   : > { %v875_v49 = vsel %vm843_vm0, %v827_v15, %v859_v45  ;;  %v876_v50 = vsel %vm844_vm1, %v828_v13, %v860_v46  ;;  %vm847_vm4 = vcmp.gt.f32.partialorder %v831_v41, 0.0  ;;  %v863_v51 = vmul.f32 0.2, %v831_v41 }
 0x171   : > { %891 = vst [vmem:[%s1447_s5] sm:$0xff] %v875_v49  ;;  %892 = vst [vmem:[%s1447_s5 + $0x8] sm:$0xff] %v876_v50  ;;  %v877_v52 = vsel %vm845_vm2, %v829_v39, %v861_v47  ;;  %v878_v53 = vsel %vm846_vm3, %v830_v40, %v862_v48  ;;  %vm848_vm5 = vcmp.gt.f32.partialorder %v832_v42, 0.0  ;;  %v864_v54 = vmul.f32 0.2, %v832_v42 }
 0x172   : > { %893 = vst [vmem:[%s1447_s5 + $0x10] sm:$0xff] %v877_v52  ;;  %894 = vst [vmem:[%s1447_s5 + $0x18] sm:$0xff] %v878_v53  ;;  %v879_v55 = vsel %vm847_vm4, %v831_v41, %v863_v51  ;;  %vm849_vm6 = vcmp.gt.f32.partialorder %v833_v43, 0.0  ;;  %v865_v56 = vmul.f32 0.2, %v833_v43  ;;  %vm850_vm7 = vcmp.gt.f32.partialorder %v834_v44, 0.0 }
 0x173   : > { %895 = vst [vmem:[%s1447_s5 + $0x20] sm:$0xff] %v879_v55  ;;  %v880_v57 = vsel %vm848_vm5, %v832_v42, %v864_v54  ;;  %v866_v58 = vmul.f32 0.2, %v834_v44  ;;  %v812_v59 = vmul.f32 %v1345_v37, %v794_v35  ;;  %v813_v60 = vmul.f32 %v1345_v37, %v795_v36 }
 0x174   : > { %896 = vst [vmem:[%s1447_s5 + $0x28] sm:$0xff] %v880_v57  ;;  %v881_v61 = vsel %vm849_vm6, %v833_v43, %v865_v56  ;;  %v814_v62 = vmul.f32 %v1345_v37, %v796_v1  ;;  %v815_v63 = vmul.f32 %v1345_v37, %v797_v2  ;;  %v816_v0 = vmul.f32 %v1345_v37, %v798_v4 }
 0x175   : > { %897 = vst [vmem:[%s1447_s5 + $0x30] sm:$0xff] %v881_v61  ;;  %v882_v16 = vsel %vm850_vm7, %v834_v44, %v866_v58  ;;  %v835_v17 = vadd.f32 %v1350_v3, %v812_v59  ;;  %v836_v19 = vadd.f32 %v1350_v3, %v813_v60  ;;  %v817_v20 = vmul.f32 %v1345_v37, %v799_v5 }
 0x176   : > { %898 = vst [vmem:[%s1447_s5 + $0x38] sm:$0xff] %v882_v16  ;;  %v837_v21 = vadd.f32 %v1350_v3, %v814_v62  ;;  %v838_v22 = vadd.f32 %v1350_v3, %v815_v63  ;;  %v839_v23 = vadd.f32 %v1350_v3, %v816_v0  ;;  %v818_v24 = vmul.f32 %v1345_v37, %v800_v6 }
 0x177   : > { %vm851_vm8 = vcmp.gt.f32.partialorder %v835_v17, 0.0  ;;  %v867_v25 = vmul.f32 0.2, %v835_v17  ;;  %vm852_vm9 = vcmp.gt.f32.partialorder %v836_v19, 0.0  ;;  %v868_v26 = vmul.f32 0.2, %v836_v19 }
 0x178   : > { %vm853_vm10 = vcmp.gt.f32.partialorder %v837_v21, 0.0  ;;  %v869_v27 = vmul.f32 0.2, %v837_v21  ;;  %vm854_vm11 = vcmp.gt.f32.partialorder %v838_v22, 0.0  ;;  %v870_v28 = vmul.f32 0.2, %v838_v22 }
 0x179   : > { %v883_v29 = vsel %vm851_vm8, %v835_v17, %v867_v25  ;;  %v884_v30 = vsel %vm852_vm9, %v836_v19, %v868_v26  ;;  %vm855_vm12 = vcmp.gt.f32.partialorder %v839_v23, 0.0  ;;  %v871_v31 = vmul.f32 0.2, %v839_v23 }
 0x17a   : > { %899 = vst [vmem:[%s1447_s5 + $0x40] sm:$0xff] %v883_v29  ;;  %900 = vst [vmem:[%s1447_s5 + $0x48] sm:$0xff] %v884_v30  ;;  %v885_v32 = vsel %vm853_vm10, %v837_v21, %v869_v27  ;;  %v886_v33 = vsel %vm854_vm11, %v838_v22, %v870_v28  ;;  %v840_v34 = vadd.f32 %v1350_v3, %v817_v20 }
 0x17b   : > { %v841_v35 = vadd.f32 %v1350_v3, %v818_v24  ;;  %901 = vst [vmem:[%s1447_s5 + $0x50] sm:$0xff] %v885_v32  ;;  %902 = vst [vmem:[%s1447_s5 + $0x58] sm:$0xff] %v886_v33  ;;  %v887_v36 = vsel %vm855_vm12, %v839_v23, %v871_v31  ;;  %v819_v1 = vmul.f32 %v1345_v37, %v1356_v7 }
 0x17c   : > { %903 = vst [vmem:[%s1447_s5 + $0x60] sm:$0xff] %v887_v36  ;;  %vm856_vm13 = vcmp.gt.f32.partialorder %v840_v34, 0.0  ;;  %v872_v2 = vmul.f32 0.2, %v840_v34 }
 0x17d   : > { %vm857_vm14 = vcmp.gt.f32.partialorder %v841_v35, 0.0  ;;  %v873_v4 = vmul.f32 0.2, %v841_v35  ;;  %v842_v5 = vadd.f32 %v1350_v3, %v819_v1 }
 0x17e   : > { %v888_v6 = vsel %vm856_vm13, %v840_v34, %v872_v2 }
 0x17f   : > { %v889_v8 = vsel %vm857_vm14, %v841_v35, %v873_v4  ;;  %904 = vst [vmem:[%s1447_s5 + $0x68] sm:$0xff] %v888_v6  ;;  %vm858_vm15 = vcmp.gt.f32.partialorder %v842_v5, 0.0  ;;  %v874_v37 = vmul.f32 0.2, %v842_v5 }
 0x180   : > { %905 = vst [vmem:[%s1447_s5 + $0x70] sm:$0xff] %v889_v8 }
 0x181   : > { %v890_v7 = vsel %vm858_vm15, %v842_v5, %v874_v37 }
 0x182   : > { %906 = vst [vmem:[%s1447_s5 + $0x78] sm:$0xff] %v890_v7 }
 0x183 PF: > { %s15_s18 = sadd.s32 1, %s1122_s18  }
 0x184   : > { %p12_p5 = scmp.ge.s32.totalorder %s15_s18, 6  }
 0x186   :  { %14 = sbr.rel (!%p12_p5) target bundleno = 1 (0x1), region = 74 }

// kernel: generator_infogan_forward.5
= control target key start
LH: loop header
LB: loop body
LE: loop exit
PB: predicated region body
PF: predicated region fallthrough
CT: control target
= control target key end

     0   :  { %s1297_s12 = smov 0   ;;  %s1432_s0 = inlined_call_operand.vmem [shape: bf16[4,128,512], index: 0, kind: input, shape index: {}]   ;;  %s1433_s1 = inlined_call_operand.vmem [shape: bf16[4,512,128], index: 1, kind: input, shape index: {}]   ;;  %s1434_s2 = inlined_call_operand.vmem [shape: f32[1,128], index: 2, kind: input, shape index: {}]   ;;  %s1435_s3 = inlined_call_operand.vmem [shape: f32[4,128,128], index: 3, kind: output, shape index: {}]  }
   0x1 LB: > { %s940_s13 = sadd.s32 4294967295, %s1275_s12   ;;  %p944_p0 = scmp.ge.s32.totalorder %s1275_s12, 1  ;;  %s1275_s12 = sphi %s1297_s12, %s13_s12  }
   0x2   : > { %p147_p1 = scmp.lt.s32.totalorder %s1275_s12, 5 }
   0x4   : > { %p148_p2 = pnand %p944_p0, %p147_p1 }
   0x5   : > { %p176_p3 = scmp.lt.s32.totalorder (!%p148_p2), %s940_s13, 3 }
   0x6   : > { %151 = sbr.rel (%p148_p2) target bundleno = 340 (0x154), region = 32 }
   0xd   : > { %s1437_s13 = smov (!%p176_p3, %s940_s13), 3 }
   0xe   : > { %s1018_s14 = sshll.u32 %s1437_s13, 8  ;;  %s1020_s23 = sshll.u32 %s1437_s13, 7 }
   0xf   : > { %s1313_s17 = scalar_lea.vmem %s1433_s1, %s1018_s14  ;;  %s1350_s20 = scalar_lea.vmem %s1432_s0, %s1018_s14 }
  0x10   : > { %v1157_v0 = vld [vmem:[%s1313_s17 + $0x40] sm:$0xff]   ;;  %v1161_v4 = vld [vmem:[%s1313_s17 + $0x48] sm:$0xff]   ;;  %v1165_v8 = vld [vmem:[%s1313_s17 + $0x50] sm:$0xff]   ;;  %s1399_s26 = scalar_lea.vmem %s1435_s3, %s1020_s23 }
  0x11   : > { %v1158_v1 = vld [vmem:[%s1313_s17 + $0xc0] sm:$0xff]   ;;  %1021 = vmatprep.subr.bf16.mxu0 %v1157_v0  ;;  %v1162_v5 = vld [vmem:[%s1313_s17 + $0xc8] sm:$0xff]   ;;  %v1166_v9 = vld [vmem:[%s1313_s17 + $0xd0] sm:$0xff]  }
  0x12   : > { %v1159_v2 = vld [vmem:[%s1313_s17] sm:$0xff]   ;;  %1085 = vmatprep.subr.bf16.mxu1 %v1158_v1  ;;  %v1163_v6 = vld [vmem:[%s1313_s17 + $0x8] sm:$0xff]   ;;  %v1167_v10 = vld [vmem:[%s1313_s17 + $0x10] sm:$0xff]  }
  0x13   : > { %v1160_v3 = vld [vmem:[%s1313_s17 + $0x80] sm:$0xff]   ;;  %1022 = vmatpush3.bf16.msra.mxu0 %v1159_v2  ;;  %v1164_v7 = vld [vmem:[%s1313_s17 + $0x88] sm:$0xff]   ;;  %v1168_v11 = vld [vmem:[%s1313_s17 + $0x90] sm:$0xff]  }
  0x14   : > { %1086 = vmatpush3.bf16.msra.mxu1 %v1160_v3  ;;  %1023 = vmatprep.subr.bf16.mxu0 %v1161_v4  ;;  %v1169_v12 = vld [vmem:[%s1313_s17 + $0x58] sm:$0xff]   ;;  %v1173_v16 = vld [vmem:[%s1313_s17 + $0x60] sm:$0xff]   ;;  %v1177_v20 = vld [vmem:[%s1313_s17 + $0x68] sm:$0xff]  }
  0x15   : > { %1087 = vmatprep.subr.bf16.mxu1 %v1162_v5  ;;  %v1170_v13 = vld [vmem:[%s1313_s17 + $0xd8] sm:$0xff]   ;;  %v1174_v17 = vld [vmem:[%s1313_s17 + $0xe0] sm:$0xff]   ;;  %v1178_v21 = vld [vmem:[%s1313_s17 + $0xe8] sm:$0xff]  }
  0x16   : > { %v1171_v14 = vld [vmem:[%s1313_s17 + $0x18] sm:$0xff]   ;;  %v1175_v18 = vld [vmem:[%s1313_s17 + $0x20] sm:$0xff]   ;;  %v1179_v22 = vld [vmem:[%s1313_s17 + $0x28] sm:$0xff]  }
  0x17   : > { %1024 = vmatpush3.bf16.msra.mxu0 %v1163_v6  ;;  %v1172_v15 = vld [vmem:[%s1313_s17 + $0x98] sm:$0xff]   ;;  %v1176_v19 = vld [vmem:[%s1313_s17 + $0xa0] sm:$0xff]   ;;  %v1180_v23 = vld [vmem:[%s1313_s17 + $0xa8] sm:$0xff]  }
  0x18   : > { %1088 = vmatpush3.bf16.msra.mxu1 %v1164_v7  ;;  %1025 = vmatprep.subr.bf16.mxu0 %v1165_v8  ;;  %v1181_v24 = vld [vmem:[%s1313_s17 + $0x70] sm:$0xff]   ;;  %v1185_v28 = vld [vmem:[%s1313_s17 + $0x78] sm:$0xff]   ;;  %v1389_v2 = vld [vmem:[%s1434_s2] ss:$0 sm:$0xff] }
  0x19   : > { %1089 = vmatprep.subr.bf16.mxu1 %v1166_v9  ;;  %v1182_v25 = vld [vmem:[%s1313_s17 + $0xf0] sm:$0xff]   ;;  %v1186_v29 = vld [vmem:[%s1313_s17 + $0xf8] sm:$0xff]  }
  0x1a   : > { %v1183_v26 = vld [vmem:[%s1313_s17 + $0x30] sm:$0xff]   ;;  %v1187_v30 = vld [vmem:[%s1313_s17 + $0x38] sm:$0xff]  }
  0x1b   : > { %1026 = vmatpush3.bf16.msra.mxu0 %v1167_v10  ;;  %v1184_v27 = vld [vmem:[%s1313_s17 + $0xb0] sm:$0xff]   ;;  %v1188_v31 = vld [vmem:[%s1313_s17 + $0xb8] sm:$0xff]  }
  0x1c   : > { %1090 = vmatpush3.bf16.msra.mxu1 %v1168_v11  ;;  %1027 = vmatprep.subr.bf16.mxu0 %v1169_v12  ;;  %v1189_v32 = vld [vmem:[%s1350_s20] ss:$16 sps:$4 sm:$0xff]   ;;  %v1191_v33 = vld [vmem:[%s1350_s20 + $0x4] ss:$16 sps:$4 sm:$0xff]   ;;  %v1192_v34 = vld [vmem:[%s1350_s20 + $0x8] ss:$16 sps:$4 sm:$0xff]  }
  0x1d   : > { %1091 = vmatprep.subr.bf16.mxu1 %v1170_v13  ;;  %v1194_v35 = vld [vmem:[%s1350_s20 + $0xc] ss:$16 sps:$4 sm:$0xff]   ;;  %679 = vmatprep.mubr.bf16.mxu0 %v1191_v33  ;;  %v1195_v36 = vld [vmem:[%s1350_s20 + $0x24] ss:$16 sps:$4 sm:$0xff]   ;;  %v1199_v38 = vld [vmem:[%s1350_s20 + $0x20] ss:$16 sps:$4 sm:$0xff]  }
  0x1e   : > { %776 = vmatprep.mubr.bf16.mxu1 %v1194_v35  ;;  %v1197_v37 = vld [vmem:[%s1350_s20 + $0x2c] ss:$16 sps:$4 sm:$0xff]   ;;  %v1200_v39 = vld [vmem:[%s1350_s20 + $0x28] ss:$16 sps:$4 sm:$0xff]   ;;  %v1201_v40 = vld [vmem:[%s1350_s20 + $0x44] ss:$16 sps:$4 sm:$0xff]  }
  0x1f   : > { %1028 = vmatpush3.bf16.msra.mxu0 %v1171_v14  ;;  %v1203_v41 = vld [vmem:[%s1350_s20 + $0x4c] ss:$16 sps:$4 sm:$0xff]   ;;  %v1205_v42 = vld [vmem:[%s1350_s20 + $0x40] ss:$16 sps:$4 sm:$0xff]   ;;  %v1206_v43 = vld [vmem:[%s1350_s20 + $0x48] ss:$16 sps:$4 sm:$0xff]  }
  0x20   : > { %1092 = vmatpush3.bf16.msra.mxu1 %v1172_v15  ;;  %1029 = vmatprep.subr.bf16.mxu0 %v1173_v16  ;;  %v1207_v44 = vld [vmem:[%s1350_s20 + $0x64] ss:$16 sps:$4 sm:$0xff]   ;;  %v1209_v45 = vld [vmem:[%s1350_s20 + $0x6c] ss:$16 sps:$4 sm:$0xff]   ;;  %v1211_v46 = vld [vmem:[%s1350_s20 + $0x60] ss:$16 sps:$4 sm:$0xff]  }
  0x21   : > { %1093 = vmatprep.subr.bf16.mxu1 %v1174_v17  ;;  %v1212_v47 = vld [vmem:[%s1350_s20 + $0x68] ss:$16 sps:$4 sm:$0xff]   ;;  %v1213_v48 = vld [vmem:[%s1350_s20 + $0x84] ss:$16 sps:$4 sm:$0xff]   ;;  %v1215_v49 = vld [vmem:[%s1350_s20 + $0x8c] ss:$16 sps:$4 sm:$0xff]  }
  0x22   : > { %v1217_v50 = vld [vmem:[%s1350_s20 + $0x80] ss:$16 sps:$4 sm:$0xff]   ;;  %v1218_v51 = vld [vmem:[%s1350_s20 + $0x88] ss:$16 sps:$4 sm:$0xff]   ;;  %v1219_v52 = vld [vmem:[%s1350_s20 + $0xa4] ss:$16 sps:$4 sm:$0xff]  }
  0x23   : > { %1030 = vmatpush3.bf16.msra.mxu0 %v1175_v18  ;;  %v1221_v53 = vld [vmem:[%s1350_s20 + $0xac] ss:$16 sps:$4 sm:$0xff]   ;;  %v1223_v54 = vld [vmem:[%s1350_s20 + $0xa0] ss:$16 sps:$4 sm:$0xff]   ;;  %v1224_v55 = vld [vmem:[%s1350_s20 + $0xa8] ss:$16 sps:$4 sm:$0xff]  }
  0x24   : > { %1094 = vmatpush3.bf16.msra.mxu1 %v1176_v19  ;;  %1031 = vmatprep.subr.bf16.mxu0 %v1177_v20  ;;  %v1225_v56 = vld [vmem:[%s1350_s20 + $0xc4] ss:$16 sps:$4 sm:$0xff]   ;;  %v1227_v57 = vld [vmem:[%s1350_s20 + $0xcc] ss:$16 sps:$4 sm:$0xff]   ;;  %v1229_v58 = vld [vmem:[%s1350_s20 + $0xc0] ss:$16 sps:$4 sm:$0xff]  }
  0x25   : > { %1095 = vmatprep.subr.bf16.mxu1 %v1178_v21  ;;  %v1230_v59 = vld [vmem:[%s1350_s20 + $0xc8] ss:$16 sps:$4 sm:$0xff]   ;;  %v1231_v60 = vld [vmem:[%s1350_s20 + $0xe4] ss:$16 sps:$4 sm:$0xff]   ;;  %v1233_v61 = vld [vmem:[%s1350_s20 + $0xec] ss:$16 sps:$4 sm:$0xff]  }
  0x26   : > { %v1235_v62 = vld [vmem:[%s1350_s20 + $0xe0] ss:$16 sps:$4 sm:$0xff]   ;;  %v1236_v63 = vld [vmem:[%s1350_s20 + $0xe8] ss:$16 sps:$4 sm:$0xff]  }
  0x27   : > { %1032 = vmatpush3.bf16.msra.mxu0 %v1179_v22 }
  0x28   : > { %1096 = vmatpush3.bf16.msra.mxu1 %v1180_v23  ;;  %1033 = vmatprep.subr.bf16.mxu0 %v1181_v24 }
  0x29   : > { %1097 = vmatprep.subr.bf16.mxu1 %v1182_v25 }
  0x2b   : > { %1034 = vmatpush3.bf16.msra.mxu0 %v1183_v26 }
  0x2c   : > { %1098 = vmatpush3.bf16.msra.mxu1 %v1184_v27  ;;  %1035 = vmatprep.subr.bf16.mxu0 %v1185_v28 }
  0x2d   : > { %1099 = vmatprep.subr.bf16.mxu1 %v1186_v29 }
  0x2f   : > { %1036 = vmatpush3.bf16.msra.mxu0 %v1187_v30 }
  0x30   : > { %1100 = vmatpush3.bf16.msra.mxu1 %v1188_v31 }
  0x32   : > { %680 = vmatmul.mubr.bf16.vlgmr.msra.gmra.mrb[0].mxu0 %v1189_v32 }
  0x33   : > { %777 = vmatmul.mubr.bf16.vlgmr.msra.gmra.mrb[0].mxu1 %v1192_v34  ;;  %687 = vmatprep.mubr.bf16.mxu0 %v1195_v36 }
  0x34   : > { %784 = vmatprep.mubr.bf16.mxu1 %v1197_v37 }
  0x3a   : > { %688 = vmatmul.mubr.bf16.gmra.mrb[4].mxu0 %v1199_v38 }
  0x3b   : > { %785 = vmatmul.mubr.bf16.gmra.mrb[4].mxu1 %v1200_v39  ;;  %695 = vmatprep.mubr.bf16.mxu0 %v1201_v40 }
  0x3c   : > { %792 = vmatprep.mubr.bf16.mxu1 %v1203_v41 }
  0x42   : > { %696 = vmatmul.mubr.bf16.gmra.mrb[8].mxu0 %v1205_v42 }
  0x43   : > { %793 = vmatmul.mubr.bf16.gmra.mrb[8].mxu1 %v1206_v43  ;;  %703 = vmatprep.mubr.bf16.mxu0 %v1207_v44 }
  0x44   : > { %800 = vmatprep.mubr.bf16.mxu1 %v1209_v45 }
  0x4a   : > { %704 = vmatmul.mubr.bf16.gmra.mrb[12].mxu0 %v1211_v46 }
  0x4b   : > { %801 = vmatmul.mubr.bf16.gmra.mrb[12].mxu1 %v1212_v47  ;;  %711 = vmatprep.mubr.bf16.mxu0 %v1213_v48 }
  0x4c   : > { %808 = vmatprep.mubr.bf16.mxu1 %v1215_v49 }
  0x52   : > { %712 = vmatmul.mubr.bf16.gmra.mrb[16].mxu0 %v1217_v50 }
  0x53   : > { %809 = vmatmul.mubr.bf16.gmra.mrb[16].mxu1 %v1218_v51  ;;  %719 = vmatprep.mubr.bf16.mxu0 %v1219_v52 }
  0x54   : > { %816 = vmatprep.mubr.bf16.mxu1 %v1221_v53 }
  0x5a   : > { %720 = vmatmul.mubr.bf16.gmra.mrb[20].mxu0 %v1223_v54 }
  0x5b   : > { %817 = vmatmul.mubr.bf16.gmra.mrb[20].mxu1 %v1224_v55  ;;  %727 = vmatprep.mubr.bf16.mxu0 %v1225_v56 }
  0x5c   : > { %824 = vmatprep.mubr.bf16.mxu1 %v1227_v57 }
  0x62   : > { %728 = vmatmul.mubr.bf16.gmra.mrb[24].mxu0 %v1229_v58 }
  0x63   : > { %825 = vmatmul.mubr.bf16.gmra.mrb[24].mxu1 %v1230_v59  ;;  %735 = vmatprep.mubr.bf16.mxu0 %v1231_v60 }
  0x64   : > { %832 = vmatprep.mubr.bf16.mxu1 %v1233_v61 }
  0x6a   : > { %736 = vmatmul.mubr.bf16.gmra.mrb[28].mxu0 %v1235_v62 }
  0x6b   : > { %833 = vmatmul.mubr.bf16.gmra.mrb[28].mxu1 %v1236_v63 }
 0x105   : > { %v1037_v0 = vpop.f32.mrb[0].mxu0 }
 0x106   : > { %v1101_v1 = vpop.f32.mrb[0].mxu1  ;;  %v1038_v3 = vpop.f32.mrb[1].mxu0 }
 0x107   : > { %v1039_v4 = vadd.f32 %v1038_v3, %v1037_v0  ;;  %v1102_v5 = vpop.f32.mrb[1].mxu1  ;;  %v1040_v6 = vpop.f32.mrb[2].mxu0 }
 0x108   : > { %v1103_v7 = vadd.f32 %v1102_v5, %v1101_v1  ;;  %v1104_v8 = vpop.f32.mrb[2].mxu1  ;;  %v1041_v9 = vpop.f32.mrb[3].mxu0 }
 0x109   : > { %v682_v10 = vadd.f32 %v1039_v4, %v1389_v2  ;;  %v1042_v11 = vadd.f32 %v1041_v9, %v1040_v6  ;;  %v1105_v12 = vpop.f32.mrb[3].mxu1 }
 0x10a   : > { %v1106_v13 = vadd.f32 %v1105_v12, %v1104_v8 }
 0x10b   : > { %v779_v14 = vadd.f32 %v1103_v7, %v682_v10  ;;  %v685_v15 = vadd.f32 %v1042_v11, %v1389_v2 }
 0x10d   : > { %1237 = vtanh.f32 %v779_v14  ;;  %v782_v16 = vadd.f32 %v1106_v13, %v685_v15  ;;  %v1043_v17 = vpop.f32.mrb[4].mxu0 }
 0x10e   : > { %v1107_v18 = vpop.f32.mrb[4].mxu1  ;;  %v1044_v19 = vpop.f32.mrb[5].mxu0 }
 0x10f   : > { %1239 = vtanh.f32 %v782_v16  ;;  %v1045_v20 = vadd.f32 %v1044_v19, %v1043_v17  ;;  %v1108_v21 = vpop.f32.mrb[5].mxu1  ;;  %v1046_v22 = vpop.f32.mrb[6].mxu0 }
 0x110   : > { %v1109_v23 = vadd.f32 %v1108_v21, %v1107_v18  ;;  %v1110_v24 = vpop.f32.mrb[6].mxu1  ;;  %v1047_v25 = vpop.f32.mrb[7].mxu0 }
 0x111   : > { %v690_v26 = vadd.f32 %v1045_v20, %v1389_v2  ;;  %v1048_v27 = vadd.f32 %v1047_v25, %v1046_v22  ;;  %v1111_v28 = vpop.f32.mrb[7].mxu1 }
 0x112   : > { %v1112_v29 = vadd.f32 %v1111_v28, %v1110_v24 }
 0x113   : > { %v787_v30 = vadd.f32 %v1109_v23, %v690_v26  ;;  %v693_v31 = vadd.f32 %v1048_v27, %v1389_v2 }
 0x115   : > { %1241 = vtanh.f32 %v787_v30  ;;  %v790_v32 = vadd.f32 %v1112_v29, %v693_v31  ;;  %v1049_v33 = vpop.f32.mrb[8].mxu0 }
 0x116   : > { %v1113_v34 = vpop.f32.mrb[8].mxu1  ;;  %v1050_v35 = vpop.f32.mrb[9].mxu0 }
 0x117   : > { %v1238_v36 = vpop.eup %1237  ;;  %1243 = vtanh.f32 %v790_v32  ;;  %v1051_v37 = vadd.f32 %v1050_v35, %v1049_v33  ;;  %v1114_v38 = vpop.f32.mrb[9].mxu1 }
 0x118   : > { %v1052_v39 = vpop.f32.mrb[10].mxu0  ;;  %857 = vst [vmem:[%s1399_s26] sm:$0xff] %v1238_v36  ;;  %v1115_v40 = vadd.f32 %v1114_v38, %v1113_v34  ;;  %v1116_v41 = vpop.f32.mrb[10].mxu1 }
 0x119   : > { %v1053_v42 = vpop.f32.mrb[11].mxu0  ;;  %v1240_v43 = vpop.eup %1239  ;;  %v698_v44 = vadd.f32 %v1051_v37, %v1389_v2 }
 0x11a   : > { %v1054_v45 = vadd.f32 %v1053_v42, %v1052_v39  ;;  %v1117_v46 = vpop.f32.mrb[11].mxu1  ;;  %858 = vst [vmem:[%s1399_s26 + $0x8] sm:$0xff] %v1240_v43 }
 0x11b   : > { %v1118_v47 = vadd.f32 %v1117_v46, %v1116_v41  ;;  %v795_v48 = vadd.f32 %v1115_v40, %v698_v44 }
 0x11c   : > { %v701_v49 = vadd.f32 %v1054_v45, %v1389_v2 }
 0x11d   : > { %1245 = vtanh.f32 %v795_v48  ;;  %v1055_v51 = vpop.f32.mrb[12].mxu0 }
 0x11e   : > { %v798_v50 = vadd.f32 %v1118_v47, %v701_v49  ;;  %v1119_v52 = vpop.f32.mrb[12].mxu1  ;;  %v1056_v53 = vpop.f32.mrb[13].mxu0 }
 0x11f   : > { %v1242_v54 = vpop.eup %1241  ;;  %v1057_v55 = vadd.f32 %v1056_v53, %v1055_v51  ;;  %v1120_v56 = vpop.f32.mrb[13].mxu1 }
 0x120   : > { %1247 = vtanh.f32 %v798_v50  ;;  %v1058_v57 = vpop.f32.mrb[14].mxu0  ;;  %859 = vst [vmem:[%s1399_s26 + $0x10] sm:$0xff] %v1242_v54  ;;  %v1121_v58 = vadd.f32 %v1120_v56, %v1119_v52  ;;  %v1122_v59 = vpop.f32.mrb[14].mxu1 }
 0x121   : > { %v1059_v60 = vpop.f32.mrb[15].mxu0  ;;  %v1244_v61 = vpop.eup %1243  ;;  %v706_v62 = vadd.f32 %v1057_v55, %v1389_v2 }
 0x122   : > { %v1060_v63 = vadd.f32 %v1059_v60, %v1058_v57  ;;  %v1123_v0 = vpop.f32.mrb[15].mxu1  ;;  %860 = vst [vmem:[%s1399_s26 + $0x18] sm:$0xff] %v1244_v61 }
 0x123   : > { %v1124_v1 = vadd.f32 %v1123_v0, %v1122_v59  ;;  %v803_v3 = vadd.f32 %v1121_v58, %v706_v62 }
 0x124   : > { %v709_v4 = vadd.f32 %v1060_v63, %v1389_v2 }
 0x125   : > { %1249 = vtanh.f32 %v803_v3  ;;  %v1061_v6 = vpop.f32.mrb[16].mxu0 }
 0x126   : > { %v806_v5 = vadd.f32 %v1124_v1, %v709_v4  ;;  %v1125_v7 = vpop.f32.mrb[16].mxu1  ;;  %v1062_v8 = vpop.f32.mrb[17].mxu0 }
 0x127   : > { %v1246_v9 = vpop.eup %1245  ;;  %v1063_v10 = vadd.f32 %v1062_v8, %v1061_v6  ;;  %v1126_v11 = vpop.f32.mrb[17].mxu1 }
 0x128   : > { %1251 = vtanh.f32 %v806_v5  ;;  %v1064_v12 = vpop.f32.mrb[18].mxu0  ;;  %861 = vst [vmem:[%s1399_s26 + $0x20] sm:$0xff] %v1246_v9  ;;  %v1127_v13 = vadd.f32 %v1126_v11, %v1125_v7  ;;  %v1128_v14 = vpop.f32.mrb[18].mxu1 }
 0x129   : > { %v1065_v15 = vpop.f32.mrb[19].mxu0  ;;  %v714_v17 = vadd.f32 %v1063_v10, %v1389_v2  ;;  %v1129_v19 = vpop.f32.mrb[19].mxu1 }
 0x12a   : > { %v1248_v16 = vpop.eup %1247  ;;  %v1066_v18 = vadd.f32 %v1065_v15, %v1064_v12  ;;  %v1130_v20 = vadd.f32 %v1129_v19, %v1128_v14 }
 0x12b   : > { %862 = vst [vmem:[%s1399_s26 + $0x28] sm:$0xff] %v1248_v16  ;;  %v811_v21 = vadd.f32 %v1127_v13, %v714_v17 }
 0x12c   : > { %v717_v22 = vadd.f32 %v1066_v18, %v1389_v2 }
 0x12d   : > { %1253 = vtanh.f32 %v811_v21  ;;  %v1067_v24 = vpop.f32.mrb[20].mxu0 }
 0x12e   : > { %v814_v23 = vadd.f32 %v1130_v20, %v717_v22  ;;  %v1131_v25 = vpop.f32.mrb[20].mxu1  ;;  %v1068_v26 = vpop.f32.mrb[21].mxu0 }
 0x12f   : > { %v1250_v27 = vpop.eup %1249  ;;  %v1069_v28 = vadd.f32 %v1068_v26, %v1067_v24  ;;  %v1132_v29 = vpop.f32.mrb[21].mxu1 }
 0x130   : > { %1255 = vtanh.f32 %v814_v23  ;;  %v1070_v30 = vpop.f32.mrb[22].mxu0  ;;  %863 = vst [vmem:[%s1399_s26 + $0x30] sm:$0xff] %v1250_v27  ;;  %v1133_v31 = vadd.f32 %v1132_v29, %v1131_v25  ;;  %v1134_v32 = vpop.f32.mrb[22].mxu1 }
 0x131   : > { %v1071_v33 = vpop.f32.mrb[23].mxu0  ;;  %v722_v35 = vadd.f32 %v1069_v28, %v1389_v2  ;;  %v1135_v37 = vpop.f32.mrb[23].mxu1 }
 0x132   : > { %v1252_v34 = vpop.eup %1251  ;;  %v1072_v36 = vadd.f32 %v1071_v33, %v1070_v30  ;;  %v1136_v38 = vadd.f32 %v1135_v37, %v1134_v32 }
 0x133   : > { %864 = vst [vmem:[%s1399_s26 + $0x38] sm:$0xff] %v1252_v34  ;;  %v819_v39 = vadd.f32 %v1133_v31, %v722_v35 }
 0x134   : > { %v725_v40 = vadd.f32 %v1072_v36, %v1389_v2 }
 0x135   : > { %1257 = vtanh.f32 %v819_v39  ;;  %v1073_v42 = vpop.f32.mrb[24].mxu0 }
 0x136   : > { %v822_v41 = vadd.f32 %v1136_v38, %v725_v40  ;;  %v1137_v43 = vpop.f32.mrb[24].mxu1  ;;  %v1074_v44 = vpop.f32.mrb[25].mxu0 }
 0x137   : > { %v1254_v45 = vpop.eup %1253  ;;  %v1075_v46 = vadd.f32 %v1074_v44, %v1073_v42  ;;  %v1138_v47 = vpop.f32.mrb[25].mxu1 }
 0x138   : > { %1259 = vtanh.f32 %v822_v41  ;;  %v1076_v48 = vpop.f32.mrb[26].mxu0  ;;  %865 = vst [vmem:[%s1399_s26 + $0x40] sm:$0xff] %v1254_v45  ;;  %v1139_v49 = vadd.f32 %v1138_v47, %v1137_v43  ;;  %v1140_v50 = vpop.f32.mrb[26].mxu1 }
 0x139   : > { %v1077_v51 = vpop.f32.mrb[27].mxu0  ;;  %v730_v53 = vadd.f32 %v1075_v46, %v1389_v2  ;;  %v1141_v55 = vpop.f32.mrb[27].mxu1 }
 0x13a   : > { %v1256_v52 = vpop.eup %1255  ;;  %v1078_v54 = vadd.f32 %v1077_v51, %v1076_v48  ;;  %v1142_v56 = vadd.f32 %v1141_v55, %v1140_v50 }
 0x13b   : > { %866 = vst [vmem:[%s1399_s26 + $0x48] sm:$0xff] %v1256_v52  ;;  %v827_v57 = vadd.f32 %v1139_v49, %v730_v53 }
 0x13c   : > { %v733_v58 = vadd.f32 %v1078_v54, %v1389_v2 }
 0x13d   : > { %1261 = vtanh.f32 %v827_v57  ;;  %v1079_v60 = vpop.f32.mrb[28].mxu0 }
 0x13e   : > { %v830_v59 = vadd.f32 %v1142_v56, %v733_v58  ;;  %v1143_v61 = vpop.f32.mrb[28].mxu1  ;;  %v1080_v62 = vpop.f32.mrb[29].mxu0 }
 0x13f   : > { %v1258_v63 = vpop.eup %1257  ;;  %v1081_v0 = vadd.f32 %v1080_v62, %v1079_v60  ;;  %v1144_v1 = vpop.f32.mrb[29].mxu1 }
 0x140   : > { %1263 = vtanh.f32 %v830_v59  ;;  %v1082_v3 = vpop.f32.mrb[30].mxu0  ;;  %867 = vst [vmem:[%s1399_s26 + $0x50] sm:$0xff] %v1258_v63  ;;  %v1145_v4 = vadd.f32 %v1144_v1, %v1143_v61  ;;  %v1146_v5 = vpop.f32.mrb[30].mxu1 }
 0x141   : > { %v1083_v6 = vpop.f32.mrb[31].mxu0  ;;  %v738_v8 = vadd.f32 %v1081_v0, %v1389_v2  ;;  %v1147_v10 = vpop.f32.mrb[31].mxu1 }
 0x142   : > { %v1260_v7 = vpop.eup %1259  ;;  %v1084_v9 = vadd.f32 %v1083_v6, %v1082_v3  ;;  %v1148_v11 = vadd.f32 %v1147_v10, %v1146_v5 }
 0x143   : > { %868 = vst [vmem:[%s1399_s26 + $0x58] sm:$0xff] %v1260_v7  ;;  %v835_v12 = vadd.f32 %v1145_v4, %v738_v8 }
 0x144   : > { %v741_v13 = vadd.f32 %v1084_v9, %v1389_v2 }
 0x145   : > { %1265 = vtanh.f32 %v835_v12 }
 0x146   : > { %v838_v14 = vadd.f32 %v1148_v11, %v741_v13 }
 0x147   : > { %v1262_v15 = vpop.eup %1261 }
 0x148   : > { %1267 = vtanh.f32 %v838_v14  ;;  %869 = vst [vmem:[%s1399_s26 + $0x60] sm:$0xff] %v1262_v15 }
 0x14a   : > { %v1264_v16 = vpop.eup %1263 }
 0x14b   : > { %870 = vst [vmem:[%s1399_s26 + $0x68] sm:$0xff] %v1264_v16 }
 0x14f   : > { %v1266_v17 = vpop.eup %1265 }
 0x150   : > { %871 = vst [vmem:[%s1399_s26 + $0x70] sm:$0xff] %v1266_v17 }
 0x152   : > { %v1268_v18 = vpop.eup %1267 }
 0x153   : > { %872 = vst [vmem:[%s1399_s26 + $0x78] sm:$0xff] %v1268_v18 }
 0x154 PF: > { %s13_s12 = sadd.s32 1, %s1275_s12  }
 0x155   : > { %p10_p4 = scmp.ge.s32.totalorder %s13_s12, 6  }
 0x157   :  { %12 = sbr.rel (!%p10_p4) target bundleno = 1 (0x1), region = 65 }

// kernel: generator_infogan_forward.3
= control target key start
LH: loop header
LB: loop body
LE: loop exit
PB: predicated region body
PF: predicated region fallthrough
CT: control target
= control target key end

     0   :  { %14 = vsyncpa [#allocation3], 0  ;;  %s11003_s0 = inlined_call_operand.vmem [shape: bf16[2,8], index: 0, kind: input, shape index: {}]   ;;  %s11004_s1 = inlined_call_operand.hbm [shape: bf16[8,1024], index: 1, kind: input, shape index: {}]   ;;  %s11005_s2 = inlined_call_operand.hbm [shape: f32[1,1024], index: 2, kind: input, shape index: {}]   ;;  %s11006_s3 = inlined_call_operand.hbm [shape: f32[1,1024], index: 3, kind: input, shape index: {}]   ;;  %s11007_s4 = inlined_call_operand.hbm [shape: f32[1,1024], index: 4, kind: input, shape index: {}]   ;;  %s11008_s5 = inlined_call_operand.hbm [shape: bf16[1024,2048], index: 5, kind: input, shape index: {}]   ;;  %s11009_s6 = inlined_call_operand.hbm [shape: f32[1,2048], index: 6, kind: input, shape index: {}]   ;;  %s11010_s7 = inlined_call_operand.hbm [shape: f32[1,2048], index: 7, kind: input, shape index: {}]   ;;  %s11011_s8 = inlined_call_operand.hbm [shape: f32[1,2048], index: 8, kind: input, shape index: {}]   ;;  %s11012_s9 = inlined_call_operand.vmem [shape: f32[2,2048], index: 9, kind: output, shape index: {}]  }
   0x1   :  { %15 = vsyncpa [#allocation5], 0 }
   0x2   :  { %16 = vsyncpa [#allocation8], 0 }
   0x3   :  { %17 = vsyncpa [#allocation11], 0 }
   0x4   :  { %18 = vsyncpa [#allocation14], 0  ;;  %s10326_s30 = smov [#allocation4]   ;;  %s10327_s11 = smov [#allocation7]  }
   0x5   :  { %s37_s10 = sshll.u32 %s10326_s30, 4  ;;  %s57_s12 = sshll.u32 %s10327_s11, 4  ;;  %s38_s10 = int_to_ptr.vmem [resolvable:$true] %s37_s10  ;;  %s58_s12 = int_to_ptr.vmem [resolvable:$true] %s57_s12 }
   0x6   :  { %s10140_s15 = scalar_lea.hbm %s11005_s2, 128 }
   0x7   :  { %p10141_p0 = scmp.ne.s32.totalorder %s11005_s2, %s10140_s15  ;;  %p10144_p1 = scmp.lt.u32.totalorder %s10140_s15, %s11005_s2 }
   0x9   :  { %p10146_p2 = pnand %p10144_p1, %p10141_p0 }
   0xb   :  { %10149 = shalt.err (!%p10146_p2)
}
   0xc   :  { %s10150_s20 = scalar_lea.vmem %s38_s10, 128  ;;  %p10155_p4 = scmp.lt.s32.totalorder %s38_s10, %s38_s10 }
   0xd   :  { %p10151_p3 = scmp.ne.s32.totalorder %s38_s10, %s10150_s20  ;;  %p10156_p5 = scmp.lt.s32.totalorder %s10150_s20, %s10150_s20 }
   0xf   :  { %p10157_p6 = por %p10156_p5, %p10155_p4 }
  0x11   :  { %p10158_p7 = pnand %p10157_p6, %p10151_p3 }
  0x13   :  { %10161 = shalt.err (!%p10158_p7)
}
  0x14   :  { %40 = dma.hbm_to_vmem [thread:$0]  %s11005_s2, 128, %s38_s10, [#allocation5]  }
  0x15   :  { %s10162_s25 = scalar_lea.hbm %s11007_s4, 128 }
  0x16   :  { %p10163_p8 = scmp.ne.s32.totalorder %s11007_s4, %s10162_s25  ;;  %p10166_p9 = scmp.lt.u32.totalorder %s10162_s25, %s11007_s4 }
  0x18   :  { %p10168_p10 = pnand %p10166_p9, %p10163_p8 }
  0x1a   :  { %10171 = shalt.err (!%p10168_p10)
}
  0x1b   :  { %s10172_s30 = scalar_lea.vmem %s58_s12, 128  ;;  %p10177_p12 = scmp.lt.s32.totalorder %s58_s12, %s58_s12 }
  0x1c   :  { %p10173_p11 = scmp.ne.s32.totalorder %s58_s12, %s10172_s30  ;;  %p10178_p13 = scmp.lt.s32.totalorder %s10172_s30, %s10172_s30 }
  0x1e   :  { %p10179_p0 = por %p10178_p13, %p10177_p12 }
  0x20   :  { %p10180_p1 = pnand %p10179_p0, %p10173_p11 }
  0x22   :  { %10183 = shalt.err (!%p10180_p1)
}
  0x23   :  { %60 = dma.hbm_to_vmem [thread:$0]  %s11007_s4, 128, %s58_s12, [#allocation8]  }
  0x24   :  { %s10328_s11 = smov [#allocation10]   ;;  %s10329_s14 = smov [#allocation2]  }
  0x25   :  { %s79_s13 = sshll.u32 %s10328_s11, 4  ;;  %s27_s15 = sshll.u32 %s10329_s14, 4  ;;  %s80_s13 = int_to_ptr.vmem [resolvable:$true] %s79_s13  ;;  %s28_s15 = int_to_ptr.vmem [resolvable:$true] %s27_s15 }
  0x26   :  { %s10184_s18 = scalar_lea.hbm %s11009_s6, 256 }
  0x27   :  { %p10185_p2 = scmp.ne.s32.totalorder %s11009_s6, %s10184_s18  ;;  %p10188_p3 = scmp.lt.u32.totalorder %s10184_s18, %s11009_s6 }
  0x29   :  { %p10190_p4 = pnand %p10188_p3, %p10185_p2 }
  0x2b   :  { %10193 = shalt.err (!%p10190_p4)
}
  0x2c   :  { %s10194_s4 = scalar_lea.vmem %s80_s13, 256  ;;  %p10199_p6 = scmp.lt.s32.totalorder %s80_s13, %s80_s13 }
  0x2d   :  { %p10195_p5 = scmp.ne.s32.totalorder %s80_s13, %s10194_s4  ;;  %p10200_p7 = scmp.lt.s32.totalorder %s10194_s4, %s10194_s4 }
  0x2f   :  { %p10201_p8 = por %p10200_p7, %p10199_p6 }
  0x31   :  { %p10202_p9 = pnand %p10201_p8, %p10195_p5 }
  0x33   :  { %10205 = shalt.err (!%p10202_p9)
}
  0x34   :  { %82 = dma.hbm_to_vmem [thread:$0]  %s11009_s6, 256, %s80_s13, [#allocation11]  }
  0x35   :  { %s10206_s26 = scalar_lea.hbm %s11004_s1, 512 }
  0x36   :  { %p10207_p10 = scmp.ne.s32.totalorder %s11004_s1, %s10206_s26  ;;  %p10210_p11 = scmp.lt.u32.totalorder %s10206_s26, %s11004_s1 }
  0x38   :  { %p10212_p12 = pnand %p10210_p11, %p10207_p10 }
  0x3a   :  { %10215 = shalt.err (!%p10212_p12)
}
  0x3b   :  { %s10216_s2 = scalar_lea.vmem %s28_s15, 512  ;;  %p10221_p0 = scmp.lt.s32.totalorder %s28_s15, %s28_s15 }
  0x3c   :  { %p10217_p13 = scmp.ne.s32.totalorder %s28_s15, %s10216_s2  ;;  %p10222_p1 = scmp.lt.s32.totalorder %s10216_s2, %s10216_s2 }
  0x3e   :  { %p10223_p2 = por %p10222_p1, %p10221_p0 }
  0x40   :  { %p10224_p3 = pnand %p10223_p2, %p10217_p13 }
  0x42   :  { %10227 = shalt.err (!%p10224_p3)
}
  0x43   :  { %30 = dma.hbm_to_vmem [thread:$0]  %s11004_s1, 512, %s28_s15, [#allocation3]  }
  0x44   :  { %s10330_s11 = smov [#allocation6]   ;;  %s10331_s14 = smov [#allocation9]  }
  0x45   :  { %s47_s13 = sshll.u32 %s10330_s11, 4  ;;  %s66_s16 = sshll.u32 %s10331_s14, 4  ;;  %s48_s13 = int_to_ptr.vmem [resolvable:$true] %s47_s13  ;;  %s10436_s16 = int_to_ptr.vmem [resolvable:$true] %s66_s16 }
  0x46   :  { %s10228_s19 = scalar_lea.hbm %s11006_s3, 128 }
  0x47   :  { %p10229_p4 = scmp.ne.s32.totalorder %s11006_s3, %s10228_s19  ;;  %p10232_p5 = scmp.lt.u32.totalorder %s10228_s19, %s11006_s3 }
  0x49   :  { %p10234_p6 = pnand %p10232_p5, %p10229_p4 }
  0x4b   :  { %10237 = shalt.err (!%p10234_p6)
}
  0x4c   :  { %s10238_s1 = scalar_lea.vmem %s48_s13, 128  ;;  %p10243_p8 = scmp.lt.s32.totalorder %s48_s13, %s48_s13 }
  0x4d   :  { %p10239_p7 = scmp.ne.s32.totalorder %s48_s13, %s10238_s1  ;;  %p10244_p9 = scmp.lt.s32.totalorder %s10238_s1, %s10238_s1 }
  0x4f   :  { %p10245_p10 = por %p10244_p9, %p10243_p8 }
  0x51   :  { %p10246_p11 = pnand %p10245_p10, %p10239_p7 }
  0x53   :  { %10249 = shalt.err (!%p10246_p11)
}
  0x54   :  { %50 = dma.hbm_to_vmem [thread:$0]  %s11006_s3, 128, %s48_s13, [#allocation5]  }
  0x55   :  { %s10250_s25 = scalar_lea.hbm %s11008_s5, 131072 }
  0x56   :  { %p10251_p12 = scmp.ne.s32.totalorder %s11008_s5, %s10250_s25  ;;  %p10254_p13 = scmp.lt.u32.totalorder %s10250_s25, %s11008_s5 }
  0x58   :  { %p10256_p0 = pnand %p10254_p13, %p10251_p12 }
  0x5a   :  { %10259 = shalt.err (!%p10256_p0)
}
  0x5b   :  { %s10260_s30 = scalar_lea.vmem %s10436_s16, 131072  ;;  %p10265_p2 = scmp.lt.s32.totalorder %s10436_s16, %s10436_s16 }
  0x5c   :  { %p10261_p1 = scmp.ne.s32.totalorder %s10436_s16, %s10260_s30  ;;  %p10266_p3 = scmp.lt.s32.totalorder %s10260_s30, %s10260_s30 }
  0x5e   :  { %p10267_p4 = por %p10266_p3, %p10265_p2 }
  0x60   :  { %p10268_p5 = pnand %p10267_p4, %p10261_p1 }
  0x62   :  { %10271 = shalt.err (!%p10268_p5)
}
  0x63   :  { %s10332_s3 = smov 1024   ;;  %s10333_s2 = smov 64  }
  0x64   :  { %72 = dma.hbm_to_vmem [thread:$0]  %s11008_s5, 131072, %s10436_s16, [#allocation8], %s10332_s3, %s10332_s3, %s10333_s2  }
  0x65   :  { %s10334_s11 = smov [#allocation12]   ;;  %s10335_s14 = smov [#allocation13]  }
  0x66   :  { %s89_s13 = sshll.u32 %s10334_s11, 4  ;;  %s99_s17 = sshll.u32 %s10335_s14, 4  ;;  %s90_s13 = int_to_ptr.vmem [resolvable:$true] %s89_s13  ;;  %s100_s17 = int_to_ptr.vmem [resolvable:$true] %s99_s17 }
  0x67   :  { %s10272_s20 = scalar_lea.hbm %s11010_s7, 256 }
  0x68   :  { %p10273_p6 = scmp.ne.s32.totalorder %s11010_s7, %s10272_s20  ;;  %p10276_p7 = scmp.lt.u32.totalorder %s10272_s20, %s11010_s7 }
  0x6a   :  { %p10278_p8 = pnand %p10276_p7, %p10273_p6 }
  0x6c   :  { %10281 = shalt.err (!%p10278_p8)
}
  0x6d   :  { %s10282_s5 = scalar_lea.vmem %s90_s13, 256  ;;  %p10287_p10 = scmp.lt.s32.totalorder %s90_s13, %s90_s13 }
  0x6e   :  { %p10283_p9 = scmp.ne.s32.totalorder %s90_s13, %s10282_s5  ;;  %p10288_p11 = scmp.lt.s32.totalorder %s10282_s5, %s10282_s5 }
  0x70   :  { %p10289_p12 = por %p10288_p11, %p10287_p10 }
  0x72   :  { %p10290_p13 = pnand %p10289_p12, %p10283_p9 }
  0x74   :  { %10293 = shalt.err (!%p10290_p13)
}
  0x75   :  { %92 = dma.hbm_to_vmem [thread:$0]  %s11010_s7, 256, %s90_s13, [#allocation11]  }
  0x76   :  { %s10294_s24 = scalar_lea.hbm %s11011_s8, 256 }
  0x77   :  { %p10295_p0 = scmp.ne.s32.totalorder %s11011_s8, %s10294_s24  ;;  %p10298_p1 = scmp.lt.u32.totalorder %s10294_s24, %s11011_s8 }
  0x79   :  { %p10300_p2 = pnand %p10298_p1, %p10295_p0 }
  0x7b   :  { %10303 = shalt.err (!%p10300_p2)
}
  0x7c   :  { %s10304_s29 = scalar_lea.vmem %s100_s17, 256  ;;  %p10309_p4 = scmp.lt.s32.totalorder %s100_s17, %s100_s17 }
  0x7d   :  { %p10305_p3 = scmp.ne.s32.totalorder %s100_s17, %s10304_s29  ;;  %p10310_p5 = scmp.lt.s32.totalorder %s10304_s29, %s10304_s29 }
  0x7f   :  { %p10311_p6 = por %p10310_p5, %p10309_p4 }
  0x81   :  { %p10312_p7 = pnand %p10311_p6, %p10305_p3 }
  0x83   :  { %10315 = shalt.err (!%p10312_p7)
}
  0x84   :  { %102 = dma.hbm_to_vmem [thread:$0]  %s11011_s8, 256, %s100_s17, [#allocation14]  }
  0x85   :  { %10316 = dma.done.wait [#allocation3], 512  }
  0x86   :  { %10317 = vsyncadd [#allocation3], 4294966784 }
  0x87   :  { %10318 = dma.done.wait [#allocation5], 256  }
  0x88   :  { %10319 = vsyncadd [#allocation5], 4294967040 }
  0x89   :  { %10320 = dma.done.wait [#allocation8], 131200  }
  0x8a   :  { %10321 = vsyncadd [#allocation8], 4294836096 }
  0x8b   :  { %10322 = dma.done.wait [#allocation11], 512  }
  0x8c   :  { %10323 = vsyncadd [#allocation11], 4294966784 }
  0x8d   :  { %10324 = dma.done.wait [#allocation14], 256  }
  0x8e   :  { %10325 = vsyncadd [#allocation14], 4294967040  ;;  %v10336_v0 = vmov 0   ;;  %v129_v1 = vld [vmem:[#allocation2] sm:$0xff]  ;;  %vm199_vm0 = vcmask 1043456   ;;  %v130_v2 = vld [vmem:[#allocation2 + $0x8] sm:$0xff] }
  0x8f   :  { %256 = vmatprep.mubr.bf16.mxu0 %v10336_v0  ;;  %297 = vmatprep.mubr.bf16.mxu1 %v10336_v0  ;;  %v8916_v3 = vcombine.high %v129_v1, %v129_v1  ;;  %v8915_v4 = vcombine.low %v129_v1, %v129_v1  ;;  %v8918_v5 = vcombine.high %v130_v2, %v130_v2  ;;  %v131_v7 = vld [vmem:[#allocation2 + $0x10] sm:$0xff]  ;;  %v132_v8 = vld [vmem:[#allocation2 + $0x18] sm:$0xff]  ;;  %v691_v17 = vld [vmem:[#allocation9 + $0x8] sm:$0xff]  ;;  %vm195_vm1 = vcmask 64512  }
  0x90   :  { %v8917_v6 = vcombine.low %v130_v2, %v130_v2  ;;  %v8920_v9 = vcombine.high %v131_v7, %v131_v7  ;;  %v8919_v10 = vcombine.low %v131_v7, %v131_v7  ;;  %v8922_v11 = vcombine.high %v132_v8, %v132_v8  ;;  %v690_v13 = vld [vmem:[#allocation9] sm:$0xff]  ;;  %v699_v18 = vld [vmem:[#allocation9 + $0x48] sm:$0xff] }
  0x91   :  { %v8921_v12 = vcombine.low %v132_v8, %v132_v8  ;;  %8923 = vmatprep.subr.msk.bf16.mxu0 %vm199_vm0, %v8916_v3  ;;  %v201_v14 = vsel %vm199_vm0, %v8915_v4, 0  ;;  %8925 = vmatprep.subr.msk.bf16.mxu1 %vm199_vm0, %v8918_v5  ;;  %v698_v16 = vld [vmem:[#allocation9 + $0x40] sm:$0xff]  ;;  %v8934_v23 = vcombine.high %v691_v17, %v699_v18  ;;  %v8933_v25 = vcombine.low %v691_v17, %v699_v18  ;;  %v707_v28 = vld [vmem:[#allocation9 + $0x88] sm:$0xff] }
  0x92   :  { %v207_v15 = vsel %vm199_vm0, %v8917_v6, 0  ;;  %225 = vmatpush1.bf16.msra.mxu0 %v201_v14  ;;  %v128_v19 = vld [vmem:[%s11003_s0] sm:$0x1]  ;;  %v213_v20 = vsel %vm199_vm0, %v8919_v10, 0  ;;  %v8932_v22 = vcombine.high %v690_v13, %v698_v16  ;;  %v8931_v24 = vcombine.low %v690_v13, %v698_v16  ;;  %v715_v30 = vld [vmem:[#allocation9 + $0xc8] sm:$0xff] }
  0x93   :  { %266 = vmatpush1.bf16.msra.mxu1 %v207_v15  ;;  %8927 = vmatprep.subr.msk.bf16.mxu0 %vm199_vm0, %v8920_v9  ;;  %v219_v21 = vsel %vm199_vm0, %v8921_v12, 0  ;;  %v706_v26 = vld [vmem:[#allocation9 + $0x80] sm:$0xff]  ;;  %v8949_v32 = vcombine.low %v707_v28, %v715_v30  ;;  %v8950_v33 = vcombine.high %v707_v28, %v715_v30  ;;  %v723_v36 = vld [vmem:[#allocation9 + $0x108] sm:$0xff]  ;;  %vm388_vm2 = vcmask 1041408  }
  0x94   :  { %8929 = vmatprep.subr.msk.bf16.mxu1 %vm199_vm0, %v8922_v11  ;;  %v714_v27 = vld [vmem:[#allocation9 + $0xc0] sm:$0xff]  ;;  %v731_v38 = vld [vmem:[#allocation9 + $0x148] sm:$0xff] }
  0x95   :  { %8924 = vmatmul.mubr.msk.bf16.vlgmr.msra.gmra.mrb[0].mxu0 %vm195_vm1, %v128_v19  ;;  %v8948_v29 = vcombine.high %v706_v26, %v714_v27  ;;  %v8947_v31 = vcombine.low %v706_v26, %v714_v27  ;;  %v722_v34 = vld [vmem:[#allocation9 + $0x100] sm:$0xff]  ;;  %v8965_v40 = vcombine.low %v723_v36, %v731_v38  ;;  %v8966_v41 = vcombine.high %v723_v36, %v731_v38  ;;  %v739_v44 = vld [vmem:[#allocation9 + $0x188] sm:$0xff] }
  0x96   :  { %8926 = vmatmul.mubr.msk.bf16.vlgmr.msra.gmra.mrb[0].mxu1 %vm195_vm1, %v128_v19  ;;  %307 = vmatpush1.bf16.msra.mxu0 %v213_v20  ;;  %v730_v35 = vld [vmem:[#allocation9 + $0x140] sm:$0xff]  ;;  %v747_v46 = vld [vmem:[#allocation9 + $0x1c8] sm:$0xff] }
  0x97   :  { %338 = vmatprep.mubr.bf16.mxu0 %v10336_v0  ;;  %348 = vmatpush1.bf16.msra.mxu1 %v219_v21  ;;  %v8964_v37 = vcombine.high %v722_v34, %v730_v35  ;;  %v8963_v39 = vcombine.low %v722_v34, %v730_v35  ;;  %v738_v42 = vld [vmem:[#allocation9 + $0x180] sm:$0xff]  ;;  %v8981_v48 = vcombine.low %v739_v44, %v747_v46  ;;  %v755_v52 = vld [vmem:[#allocation9 + $0x208] sm:$0xff] }
  0x98   :  { %379 = vmatprep.mubr.bf16.mxu1 %v10336_v0  ;;  %6918 = vmatprep.subr.bf16.mxu0 %v8932_v22  ;;  %v746_v43 = vld [vmem:[#allocation9 + $0x1c0] sm:$0xff]  ;;  %v8982_v49 = vcombine.high %v739_v44, %v747_v46  ;;  %v763_v54 = vld [vmem:[#allocation9 + $0x248] sm:$0xff] }
  0x99   :  { %7082 = vmatprep.subr.bf16.mxu1 %v8934_v23  ;;  %v8980_v45 = vcombine.high %v738_v42, %v746_v43  ;;  %v8979_v47 = vcombine.low %v738_v42, %v746_v43  ;;  %v754_v50 = vld [vmem:[#allocation9 + $0x200] sm:$0xff]  ;;  %v8997_v56 = vcombine.low %v755_v52, %v763_v54  ;;  %v8998_v57 = vcombine.high %v755_v52, %v763_v54  ;;  %v771_v60 = vld [vmem:[#allocation9 + $0x288] sm:$0xff] }
  0x9a   :  { %v762_v51 = vld [vmem:[#allocation9 + $0x240] sm:$0xff]  ;;  %v779_v62 = vld [vmem:[#allocation9 + $0x2c8] sm:$0xff] }
  0x9b   :  { %v8996_v53 = vcombine.high %v754_v50, %v762_v51  ;;  %v8995_v55 = vcombine.low %v754_v50, %v762_v51  ;;  %v770_v58 = vld [vmem:[#allocation9 + $0x280] sm:$0xff]  ;;  %v9013_v0 = vcombine.low %v771_v60, %v779_v62  ;;  %v9014_v1 = vcombine.high %v771_v60, %v779_v62  ;;  %v787_v5 = vld [vmem:[#allocation9 + $0x308] sm:$0xff] }
  0x9c   :  { %v778_v59 = vld [vmem:[#allocation9 + $0x2c0] sm:$0xff]  ;;  %v795_v6 = vld [vmem:[#allocation9 + $0x348] sm:$0xff] }
  0x9d   :  { %8928 = vmatmul.mubr.msk.bf16.vlgmr.msra.gmra.mrb[4].mxu0 %vm195_vm1, %v128_v19  ;;  %v9012_v61 = vcombine.high %v770_v58, %v778_v59  ;;  %v9011_v63 = vcombine.low %v770_v58, %v778_v59  ;;  %v786_v2 = vld [vmem:[#allocation9 + $0x300] sm:$0xff]  ;;  %v9029_v8 = vcombine.low %v787_v5, %v795_v6  ;;  %v9030_v9 = vcombine.high %v787_v5, %v795_v6  ;;  %v803_v12 = vld [vmem:[#allocation9 + $0x388] sm:$0xff] }
  0x9e   :  { %8930 = vmatmul.mubr.msk.bf16.vlgmr.msra.gmra.mrb[4].mxu1 %vm195_vm1, %v128_v19  ;;  %6919 = vmatpush1.bf16.msra.mxu0 %v8931_v24  ;;  %v794_v3 = vld [vmem:[#allocation9 + $0x340] sm:$0xff]  ;;  %v811_v14 = vld [vmem:[#allocation9 + $0x3c8] sm:$0xff] }
  0x9f   :  { %7083 = vmatpush1.bf16.msra.mxu1 %v8933_v25  ;;  %6920 = vmatprep.subr.bf16.mxu0 %v8948_v29  ;;  %v9028_v4 = vcombine.high %v786_v2, %v794_v3  ;;  %v9027_v7 = vcombine.low %v786_v2, %v794_v3  ;;  %v802_v10 = vld [vmem:[#allocation9 + $0x380] sm:$0xff]  ;;  %v9045_v16 = vcombine.low %v803_v12, %v811_v14  ;;  %v819_v20 = vld [vmem:[#allocation9 + $0x408] sm:$0xff] }
  0xa0   :  { %7084 = vmatprep.subr.bf16.mxu1 %v8950_v33  ;;  %v810_v11 = vld [vmem:[#allocation9 + $0x3c0] sm:$0xff]  ;;  %v9046_v17 = vcombine.high %v803_v12, %v811_v14  ;;  %v827_v22 = vld [vmem:[#allocation9 + $0x448] sm:$0xff] }
  0xa1   :  { %v9044_v13 = vcombine.high %v802_v10, %v810_v11  ;;  %v9043_v15 = vcombine.low %v802_v10, %v810_v11  ;;  %v818_v18 = vld [vmem:[#allocation9 + $0x400] sm:$0xff]  ;;  %v9061_v24 = vcombine.low %v819_v20, %v827_v22  ;;  %v9062_v25 = vcombine.high %v819_v20, %v827_v22  ;;  %v835_v28 = vld [vmem:[#allocation9 + $0x488] sm:$0xff] }
  0xa2   :  { %6921 = vmatpush1.bf16.msra.mxu0 %v8947_v31  ;;  %v826_v19 = vld [vmem:[#allocation9 + $0x440] sm:$0xff]  ;;  %v843_v30 = vld [vmem:[#allocation9 + $0x4c8] sm:$0xff] }
  0xa3   :  { %7085 = vmatpush1.bf16.msra.mxu1 %v8949_v32  ;;  %6922 = vmatprep.subr.bf16.mxu0 %v8964_v37  ;;  %v9060_v21 = vcombine.high %v818_v18, %v826_v19  ;;  %v9059_v23 = vcombine.low %v818_v18, %v826_v19  ;;  %v834_v26 = vld [vmem:[#allocation9 + $0x480] sm:$0xff]  ;;  %v9077_v32 = vcombine.low %v835_v28, %v843_v30  ;;  %v851_v36 = vld [vmem:[#allocation9 + $0x508] sm:$0xff] }
  0xa4   :  { %7086 = vmatprep.subr.bf16.mxu1 %v8966_v41  ;;  %v842_v27 = vld [vmem:[#allocation9 + $0x4c0] sm:$0xff]  ;;  %v9078_v33 = vcombine.high %v835_v28, %v843_v30  ;;  %v859_v38 = vld [vmem:[#allocation9 + $0x548] sm:$0xff] }
  0xa5   :  { %v9076_v29 = vcombine.high %v834_v26, %v842_v27  ;;  %v9075_v31 = vcombine.low %v834_v26, %v842_v27  ;;  %v850_v34 = vld [vmem:[#allocation9 + $0x500] sm:$0xff]  ;;  %v9094_v41 = vcombine.high %v851_v36, %v859_v38  ;;  %v867_v44 = vld [vmem:[#allocation9 + $0x588] sm:$0xff]  ;;  %v135_v26 = vlaneseq }
  0xa6   :  { %6923 = vmatpush1.bf16.msra.mxu0 %v8963_v39  ;;  %v858_v35 = vld [vmem:[#allocation9 + $0x540] sm:$0xff]  ;;  %v875_v46 = vld [vmem:[#allocation9 + $0x5c8] sm:$0xff] }
  0xa7   :  { %7087 = vmatpush1.bf16.msra.mxu1 %v8965_v40  ;;  %6924 = vmatprep.subr.bf16.mxu0 %v8980_v45  ;;  %v9092_v37 = vcombine.high %v850_v34, %v858_v35  ;;  %v9091_v39 = vcombine.low %v850_v34, %v858_v35  ;;  %v9093_v40 = vcombine.low %v851_v36, %v859_v38  ;;  %v866_v42 = vld [vmem:[#allocation9 + $0x580] sm:$0xff]  ;;  %v883_v52 = vld [vmem:[#allocation9 + $0x608] sm:$0xff]  ;;  %v10522_v27 = vshrl.u32 %v135_v26, 7 }
  0xa8   :  { %7088 = vmatprep.subr.bf16.mxu1 %v8982_v49  ;;  %v874_v43 = vld [vmem:[#allocation9 + $0x5c0] sm:$0xff]  ;;  %v9110_v49 = vcombine.high %v867_v44, %v875_v46  ;;  %v891_v54 = vld [vmem:[#allocation9 + $0x648] sm:$0xff] }
  0xa9   :  { %v9108_v45 = vcombine.high %v866_v42, %v874_v43  ;;  %v882_v50 = vld [vmem:[#allocation9 + $0x600] sm:$0xff]  ;;  %v899_v60 = vld [vmem:[#allocation9 + $0x688] sm:$0xff]  ;;  %v10525_v28 = vsub.s32 0, %v10522_v27  ;;  %v10530_v30 = vsub.s32 1, %v10522_v27 }
  0xaa   :  { %6925 = vmatpush1.bf16.msra.mxu0 %v8979_v47  ;;  %v9107_v47 = vcombine.low %v866_v42, %v874_v43  ;;  %v890_v51 = vld [vmem:[#allocation9 + $0x640] sm:$0xff]  ;;  %v907_v62 = vld [vmem:[#allocation9 + $0x6c8] sm:$0xff] }
  0xab   :  { %7089 = vmatpush1.bf16.msra.mxu1 %v8981_v48  ;;  %6926 = vmatprep.subr.bf16.mxu0 %v8996_v53  ;;  %v9109_v48 = vcombine.low %v867_v44, %v875_v46  ;;  %v9124_v53 = vcombine.high %v882_v50, %v890_v51  ;;  %v898_v58 = vld [vmem:[#allocation9 + $0x680] sm:$0xff]  ;;  %v915_v5 = vld [vmem:[#allocation9 + $0x708] sm:$0xff] }
  0xac   :  { %7090 = vmatprep.subr.bf16.mxu1 %v8998_v57  ;;  %v9126_v57 = vcombine.high %v883_v52, %v891_v54  ;;  %v906_v59 = vld [vmem:[#allocation9 + $0x6c0] sm:$0xff]  ;;  %v923_v6 = vld [vmem:[#allocation9 + $0x748] sm:$0xff] }
  0xad   :  { %v914_v2 = vld [vmem:[#allocation9 + $0x700] sm:$0xff]  ;;  %v931_v12 = vld [vmem:[#allocation9 + $0x788] sm:$0xff] }
  0xae   :  { %6927 = vmatpush1.bf16.msra.mxu0 %v8995_v55  ;;  %v9123_v55 = vcombine.low %v882_v50, %v890_v51  ;;  %v922_v3 = vld [vmem:[#allocation9 + $0x740] sm:$0xff]  ;;  %v939_v14 = vld [vmem:[#allocation9 + $0x7c8] sm:$0xff] }
  0xaf   :  { %7091 = vmatpush1.bf16.msra.mxu1 %v8997_v56  ;;  %6928 = vmatprep.subr.bf16.mxu0 %v9012_v61  ;;  %v9125_v56 = vcombine.low %v883_v52, %v891_v54  ;;  %v9140_v61 = vcombine.high %v898_v58, %v906_v59  ;;  %v930_v10 = vld [vmem:[#allocation9 + $0x780] sm:$0xff]  ;;  %v10510_v20 = vld [vmem:[#allocation9 + $0x808] sm:$0xff] }
  0xb0   :  { %7092 = vmatprep.subr.bf16.mxu1 %v9014_v1  ;;  %v9142_v1 = vcombine.high %v899_v60, %v907_v62  ;;  %v938_v11 = vld [vmem:[#allocation9 + $0x7c0] sm:$0xff]  ;;  %v10514_v22 = vld [vmem:[#allocation9 + $0x848] sm:$0xff] }
  0xb1   :  { %v10506_v18 = vld [vmem:[#allocation9 + $0x800] sm:$0xff] }
  0xb2   :  { %6929 = vmatpush1.bf16.msra.mxu0 %v9011_v63  ;;  %v9139_v63 = vcombine.low %v898_v58, %v906_v59  ;;  %v10508_v19 = vld [vmem:[#allocation9 + $0x840] sm:$0xff]  ;;  %v10547_v58 = vsub.s32 2, %v10522_v27 }
  0xb3   :  { %7093 = vmatpush1.bf16.msra.mxu1 %v9013_v0  ;;  %6930 = vmatprep.subr.bf16.mxu0 %v9028_v4  ;;  %v9141_v0 = vcombine.low %v899_v60, %v907_v62  ;;  %v9156_v4 = vcombine.high %v914_v2, %v922_v3  ;;  %v10550_v62 = vsub.s32 5, %v10522_v27 }
  0xb4   :  { %7094 = vmatprep.subr.bf16.mxu1 %v9030_v9  ;;  %v9158_v9 = vcombine.high %v915_v5, %v923_v6 }
  0xb6   :  { %6931 = vmatpush1.bf16.msra.mxu0 %v9027_v7  ;;  %v9155_v7 = vcombine.low %v914_v2, %v922_v3 }
  0xb7   :  { %7095 = vmatpush1.bf16.msra.mxu1 %v9029_v8  ;;  %6932 = vmatprep.subr.bf16.mxu0 %v9044_v13  ;;  %v9157_v8 = vcombine.low %v915_v5, %v923_v6  ;;  %v9172_v13 = vcombine.high %v930_v10, %v938_v11 }
  0xb8   :  { %7096 = vmatprep.subr.bf16.mxu1 %v9046_v17  ;;  %v9174_v17 = vcombine.high %v931_v12, %v939_v14 }
  0xba   :  { %6933 = vmatpush1.bf16.msra.mxu0 %v9043_v15  ;;  %v9171_v15 = vcombine.low %v930_v10, %v938_v11 }
  0xbb   :  { %7097 = vmatpush1.bf16.msra.mxu1 %v9045_v16  ;;  %6934 = vmatprep.subr.bf16.mxu0 %v9060_v21  ;;  %v9173_v16 = vcombine.low %v931_v12, %v939_v14  ;;  %v9188_v21 = vcombine.high %v10506_v18, %v10508_v19 }
  0xbc   :  { %7098 = vmatprep.subr.bf16.mxu1 %v9062_v25  ;;  %v9190_v25 = vcombine.high %v10510_v20, %v10514_v22 }
  0xbe   :  { %6935 = vmatpush1.bf16.msra.mxu0 %v9059_v23  ;;  %v9187_v23 = vcombine.low %v10506_v18, %v10508_v19 }
  0xbf   :  { %7099 = vmatpush1.bf16.msra.mxu1 %v9061_v24  ;;  %6936 = vmatprep.subr.bf16.mxu0 %v9076_v29  ;;  %v9189_v24 = vcombine.low %v10510_v20, %v10514_v22  ;;  %v10527_v29 = vld [vmem:[#allocation4] sm:$0xff] }
  0xc0   :  { %7100 = vmatprep.subr.bf16.mxu1 %v9078_v33  ;;  %v142_v33 = vrot.slane %v10527_v29, %v10530_v30  ;;  %v146_v5 = vrot.slane %v10527_v29, %v10547_v58 }
  0xc2   :  { %6937 = vmatpush1.bf16.msra.mxu0 %v9075_v31  ;;  %v10533_v31 = vsub.s32 3, %v10522_v27 }
  0xc3   :  { %7101 = vmatpush1.bf16.msra.mxu1 %v9077_v32  ;;  %6938 = vmatprep.subr.bf16.mxu0 %v9092_v37  ;;  %v138_v32 = vrot.slane %v10527_v29, %v10525_v28 }
  0xc4   :  { %7102 = vmatprep.subr.bf16.mxu1 %v9094_v41  ;;  %v150_v34 = vrot.slane %v10527_v29, %v10533_v31 }
  0xc6   :  { %6939 = vmatpush1.bf16.msra.mxu0 %v9091_v39 }
  0xc7   :  { %7103 = vmatpush1.bf16.msra.mxu1 %v9093_v40  ;;  %6940 = vmatprep.subr.bf16.mxu0 %v9108_v45 }
  0xc8   :  { %7104 = vmatprep.subr.bf16.mxu1 %v9110_v49 }
  0xca   :  { %6941 = vmatpush1.bf16.msra.mxu0 %v9107_v47 }
  0xcb   :  { %7105 = vmatpush1.bf16.msra.mxu1 %v9109_v48  ;;  %6942 = vmatprep.subr.bf16.mxu0 %v9124_v53 }
  0xcc   :  { %7106 = vmatprep.subr.bf16.mxu1 %v9126_v57 }
  0xce   :  { %6943 = vmatpush1.bf16.msra.mxu0 %v9123_v55 }
  0xcf   :  { %7107 = vmatpush1.bf16.msra.mxu1 %v9125_v56  ;;  %6944 = vmatprep.subr.bf16.mxu0 %v9140_v61 }
  0xd0   :  { %7108 = vmatprep.subr.bf16.mxu1 %v9142_v1 }
  0xd2   :  { %6945 = vmatpush1.bf16.msra.mxu0 %v9139_v63 }
  0xd3   :  { %7109 = vmatpush1.bf16.msra.mxu1 %v9141_v0  ;;  %6946 = vmatprep.subr.bf16.mxu0 %v9156_v4 }
  0xd4   :  { %7110 = vmatprep.subr.bf16.mxu1 %v9158_v9 }
  0xd6   :  { %6947 = vmatpush1.bf16.msra.mxu0 %v9155_v7 }
  0xd7   :  { %7111 = vmatpush1.bf16.msra.mxu1 %v9157_v8  ;;  %6948 = vmatprep.subr.bf16.mxu0 %v9172_v13  ;;  %v158_v8 = vrot.slane %v10527_v29, %v10550_v62 }
  0xd8   :  { %7112 = vmatprep.subr.bf16.mxu1 %v9174_v17 }
  0xda   :  { %6949 = vmatpush1.bf16.msra.mxu0 %v9171_v15 }
  0xdb   :  { %7113 = vmatpush1.bf16.msra.mxu1 %v9173_v16  ;;  %6959 = vmatprep.subr.bf16.mxu0 %v9188_v21 }
  0xdc   :  { %7123 = vmatprep.subr.bf16.mxu1 %v9190_v25 }
 0x168   :  { %v258_v35 = vpop.f32.mrb[0].mxu0 }
 0x169   :  { %v299_v36 = vpop.f32.mrb[0].mxu1  ;;  %v259_v37 = vadd.f32 %v258_v35, %v138_v32  ;;  %v260_v38 = vpop.f32.mrb[1].mxu0 }
 0x16a   :  { %v301_v39 = vpop.f32.mrb[1].mxu1  ;;  %v261_v40 = vadd.f32 %v260_v38, %v142_v33  ;;  %v262_v41 = vpop.f32.mrb[2].mxu0  ;;  %v10556_v13 = vadd.f32 %v299_v36, %v146_v5 }
 0x16b   :  { %v302_v42 = vadd.f32 %v301_v39, %v150_v34  ;;  %v303_v43 = vpop.f32.mrb[2].mxu1  ;;  %v389_v44 = vsel %vm388_vm2, %v259_v37, 0.0  ;;  %v263_v45 = vpop.f32.mrb[3].mxu0 }
 0x16c   :  { %v304_v46 = vpop.f32.mrb[3].mxu1  ;;  %v390_v47 = vrot.slane %v389_v44, 4  ;;  %v396_v48 = vsel %vm388_vm2, %v261_v40, 0.0  ;;  %v403_v35 = vsel %vm388_vm2, %v10556_v13, 0.0 }
 0x16d   :  { %v410_v49 = vsel %vm388_vm2, %v302_v42, 0.0  ;;  %v397_v50 = vrot.slane %v396_v48, 4 }
 0x16e   :  { %v411_v51 = vrot.slane %v410_v49, 4  ;;  %v391_v52 = vadd.f32 %v390_v47, %v389_v44  ;;  %v404_v44 = vrot.slane %v403_v35, 4 }
 0x16f   :  { %v398_v53 = vadd.f32 %v397_v50, %v396_v48 }
 0x170   :  { %v412_v54 = vadd.f32 %v411_v51, %v410_v49  ;;  %v392_v55 = vrot.slane %v391_v52, 2  ;;  %v10544_v56 = vpop.f32.mrb[4].mxu0 }
 0x171   :  { %v399_v57 = vrot.slane %v398_v53, 2  ;;  %v342_v60 = vpop.f32.mrb[5].mxu0  ;;  %v10560_v17 = vpop.f32.mrb[4].mxu1 }
 0x172   :  { %v413_v59 = vrot.slane %v412_v54, 2  ;;  %v393_v61 = vadd.f32 %v392_v55, %v391_v52  ;;  %v344_v63 = vpop.f32.mrb[6].mxu0  ;;  %v10558_v16 = vadd.f32 %v342_v60, %v158_v8  ;;  %v10562_v26 = vpop.f32.mrb[5].mxu1  ;;  %v405_v52 = vadd.f32 %v404_v44, %v403_v35 }
 0x173   :  { %v400_v0 = vadd.f32 %v399_v57, %v398_v53  ;;  %v345_v2 = vpop.f32.mrb[7].mxu0  ;;  %v385_v33 = vpop.f32.mrb[6].mxu1 }
 0x174   :  { %v414_v1 = vadd.f32 %v413_v59, %v412_v54  ;;  %v394_v3 = vrot.slane %v393_v61, 1  ;;  %v386_v39 = vpop.f32.mrb[7].mxu1  ;;  %v406_v63 = vrot.slane %v405_v52, 2 }
 0x175   :  { %v401_v4 = vrot.slane %v400_v0, 1 }
 0x176   :  { %v415_v6 = vrot.slane %v414_v1, 1  ;;  %v395_v7 = vadd.f32 %v394_v3, %v393_v61 }
 0x177   :  { %v402_v9 = vadd.f32 %v401_v4, %v400_v0 }
 0x178   :  { %v416_v10 = vadd.f32 %v415_v6, %v414_v1  ;;  %v446_v11 = vmul.f32 0.5, %v395_v7  ;;  %v407_v7 = vadd.f32 %v406_v63, %v405_v52 }
 0x179   :  { %v447_v12 = vmul.f32 0.5, %v402_v9 }
 0x17a   :  { %v449_v14 = vmul.f32 0.5, %v416_v10  ;;  %v454_v15 = vsub.f32 %v259_v37, %v446_v11  ;;  %v424_v37 = vsel %vm388_vm2, %v10558_v16, 0.0 }
 0x17b   :  { %v455_v21 = vsub.f32 %v261_v40, %v447_v12  ;;  %v425_v47 = vrot.slane %v424_v37, 4 }
 0x17c   :  { %v457_v25 = vsub.f32 %v302_v42, %v449_v14  ;;  %v462_v32 = vmul.f32 %v454_v15, %v454_v15  ;;  %v408_v14 = vrot.slane %v407_v7, 1 }
 0x17d   :  { %v463_v34 = vmul.f32 %v455_v21, %v455_v21  ;;  %v426_v55 = vadd.f32 %v425_v47, %v424_v37 }
 0x17e   :  { %v465_v38 = vmul.f32 %v457_v25, %v457_v25  ;;  %v470_v36 = vsel %vm388_vm2, %v462_v32, 0.0  ;;  %v10571_v32 = vld [vmem:[#allocation6] sm:$0xff]  ;;  %v409_v35 = vadd.f32 %v408_v14, %v407_v7  ;;  %v979_v14 = vld [vmem:[#allocation9 + $0x908] sm:$0xff] }
 0x17f   :  { %v471_v41 = vrot.slane %v470_v36, 4  ;;  %v477_v43 = vsel %vm388_vm2, %v463_v34, 0.0  ;;  %v427_v2 = vrot.slane %v426_v55, 2  ;;  %v539_v34 = vrot.slane %v10571_v32, %v10525_v28 }
 0x180   :  { %v491_v40 = vsel %vm388_vm2, %v465_v38, 0.0  ;;  %v478_v42 = vrot.slane %v477_v43, 4  ;;  %v10575_v38 = vld [vmem:[#allocation7] sm:$0xff]  ;;  %v543_v39 = vrot.slane %v10571_v32, %v10530_v30 }
 0x181   :  { %v492_v45 = vrot.slane %v491_v40, 4  ;;  %v472_v46 = vadd.f32 %v471_v41, %v470_v36  ;;  %v428_v10 = vadd.f32 %v427_v2, %v426_v55  ;;  %v551_v36 = vrot.slane %v10571_v32, %v10533_v31  ;;  %v971_v2 = vld [vmem:[#allocation9 + $0x8c8] sm:$0xff] }
 0x182   :  { %v479_v48 = vadd.f32 %v478_v42, %v477_v43  ;;  %v576_v41 = vmul.f32 %v539_v34, %v454_v15  ;;  %v613_v43 = vrot.slane %v10575_v38, %v10525_v28  ;;  %v577_v44 = vmul.f32 %v543_v39, %v455_v21 }
 0x183   :  { %v493_v49 = vadd.f32 %v492_v45, %v491_v40  ;;  %v473_v50 = vrot.slane %v472_v46, 2  ;;  %v429_v33 = vrot.slane %v428_v10, 1  ;;  %v448_v40 = vmul.f32 0.5, %v409_v35 }
 0x184   :  { %v480_v51 = vrot.slane %v479_v48, 2  ;;  %v617_v45 = vrot.slane %v10575_v38, %v10530_v30 }
 0x185   :  { %v494_v53 = vrot.slane %v493_v49, 2  ;;  %v474_v54 = vadd.f32 %v473_v50, %v472_v46  ;;  %v430_v37 = vadd.f32 %v429_v33, %v428_v10  ;;  %v579_v46 = vmul.f32 %v551_v36, %v457_v25  ;;  %v987_v33 = vld [vmem:[#allocation9 + $0x948] sm:$0xff] }
 0x186   :  { %v481_v57 = vadd.f32 %v480_v51, %v479_v48  ;;  %v625_v51 = vrot.slane %v10575_v38, %v10533_v31  ;;  %v10588_v15 = vsub.f32 %v10556_v13, %v448_v40  ;;  %v1002_v40 = vld [vmem:[#allocation9 + $0x9c0] sm:$0xff]  ;;  %v9221_v20 = vcombine.low %v979_v14, %v987_v33 }
 0x187   :  { %v495_v59 = vadd.f32 %v494_v53, %v493_v49  ;;  %v475_v60 = vrot.slane %v474_v54, 1  ;;  %v451_v47 = vmul.f32 0.5, %v430_v37 }
 0x188   :  { %v482_v61 = vrot.slane %v481_v57, 1  ;;  %v464_v63 = vmul.f32 %v10588_v15, %v10588_v15 }
 0x189   :  { %v496_v0 = vrot.slane %v495_v59, 1  ;;  %v476_v1 = vadd.f32 %v475_v60, %v474_v54  ;;  %v10591_v21 = vsub.f32 %v10558_v16, %v451_v47  ;;  %v962_v60 = vld [vmem:[#allocation9 + $0x880] sm:$0xff]  ;;  %v1011_v47 = vld [vmem:[#allocation9 + $0xa08] sm:$0xff] }
 0x18a   :  { %v483_v3 = vadd.f32 %v482_v61, %v481_v57  ;;  %v484_v10 = vsel %vm388_vm2, %v464_v63, 0.0 }
 0x18b   :  { %v497_v4 = vadd.f32 %v496_v0, %v495_v59  ;;  %v526_v5 = vmul.f32 0.5, %v476_v1  ;;  %v970_v0 = vld [vmem:[#allocation9 + $0x8c0] sm:$0xff]  ;;  %v963_v1 = vld [vmem:[#allocation9 + $0x888] sm:$0xff]  ;;  %v467_v16 = vmul.f32 %v10591_v21, %v10591_v21  ;;  %v485_v36 = vrot.slane %v484_v10, 4 }
 0x18c   :  { %v527_v6 = vmul.f32 0.5, %v483_v3  ;;  %v9204_v7 = vcombine.high %v962_v60, %v970_v0  ;;  %v9203_v35 = vcombine.low %v962_v60, %v970_v0  ;;  %v9205_v39 = vcombine.low %v963_v1, %v971_v2 }
 0x18d   :  { %v529_v8 = vmul.f32 0.5, %v497_v4  ;;  %v584_v9 = vadd.f32 1e-05, %v526_v5  ;;  %v505_v34 = vsel %vm388_vm2, %v467_v16, 0.0  ;;  %v486_v22 = vadd.f32 %v485_v36, %v484_v10  ;;  %v1042_v16 = vld [vmem:[#allocation9 + $0xb00] sm:$0xff] }
 0x18e   :  { %v585_v11 = vadd.f32 1e-05, %v527_v6  ;;  %v506_v18 = vrot.slane %v505_v34, 4  ;;  %v1058_v36 = vld [vmem:[#allocation9 + $0xb80] sm:$0xff] }
 0x18f   :  { %v587_v12 = vadd.f32 1e-05, %v529_v8  ;;  %10087 = vrsqrt.f32 %v584_v9  ;;  %v9206_v8 = vcombine.high %v963_v1, %v971_v2  ;;  %v978_v9 = vld [vmem:[#allocation9 + $0x900] sm:$0xff]  ;;  %v10621_v1 = vsub.s32 7, %v10522_v27 }
 0x190   :  { %10089 = vrsqrt.f32 %v585_v11 }
 0x191   :  { %10091 = vrsqrt.f32 %v587_v12  ;;  %v986_v12 = vld [vmem:[#allocation9 + $0x940] sm:$0xff] }
 0x192   :  { %v9220_v37 = vcombine.high %v978_v9, %v986_v12  ;;  %v9219_v19 = vcombine.low %v978_v9, %v986_v12  ;;  %v1051_v9 = vld [vmem:[#allocation9 + $0xb48] sm:$0xff] }
 0x199   :  { %v10088_v42 = vpop.eup %10087 }
 0x19a   :  { %v10090_v48 = vpop.eup %10089  ;;  %v600_v49 = vmul.f32 %v10088_v42, %v576_v41  ;;  %v9222_v41 = vcombine.high %v979_v14, %v987_v33  ;;  %v995_v42 = vld [vmem:[#allocation9 + $0x988] sm:$0xff]  ;;  %v166_v33 = vrot.slane %v10527_v29, %v10621_v1 }
 0x19b   :  { %v601_v50 = vmul.f32 %v10090_v48, %v577_v44  ;;  %v10092_v52 = vpop.eup %10091  ;;  %v1003_v44 = vld [vmem:[#allocation9 + $0x9c8] sm:$0xff] }
 0x19c   :  { %v650_v53 = vadd.f32 %v613_v43, %v600_v49  ;;  %v603_v55 = vmul.f32 %v10092_v52, %v579_v46  ;;  %v994_v43 = vld [vmem:[#allocation9 + $0x980] sm:$0xff]  ;;  %v1019_v48 = vld [vmem:[#allocation9 + $0xa48] sm:$0xff]  ;;  %v507_v49 = vadd.f32 %v506_v18, %v505_v34  ;;  %v487_v52 = vrot.slane %v486_v22, 2 }
 0x19d   :  { %v651_v54 = vadd.f32 %v617_v45, %v601_v50  ;;  %v1010_v45 = vld [vmem:[#allocation9 + $0xa00] sm:$0xff]  ;;  %v9235_v50 = vcombine.low %v994_v43, %v1002_v40  ;;  %v9253_v0 = vcombine.low %v1011_v47, %v1019_v48 }
 0x19e   :  { %vm658_vm3 = vcmp.gt.f32.partialorder %v650_v53, 0.0  ;;  %v666_v57 = vmul.f32 0.2, %v650_v53  ;;  %v653_v59 = vadd.f32 %v625_v51, %v603_v55  ;;  %v1018_v46 = vld [vmem:[#allocation9 + $0xa40] sm:$0xff]  ;;  %v9237_v51 = vcombine.low %v995_v42, %v1003_v44 }
 0x19f   :  { %vm659_vm4 = vcmp.gt.f32.partialorder %v651_v54, 0.0  ;;  %v667_v25 = vmul.f32 0.2, %v651_v54  ;;  %v1026_v55 = vld [vmem:[#allocation9 + $0xa80] sm:$0xff]  ;;  %v508_v60 = vrot.slane %v507_v49, 2  ;;  %v9251_v63 = vcombine.low %v1010_v45, %v1018_v46 }
 0x1a0   :  { %v674_v61 = vsel %vm658_vm3, %v650_v53, %v666_v57  ;;  %vm661_vm5 = vcmp.gt.f32.partialorder %v653_v59, 0.0  ;;  %v669_v3 = vmul.f32 0.2, %v653_v59  ;;  %v9252_v53 = vcombine.high %v1010_v45, %v1018_v46  ;;  %v1034_v57 = vld [vmem:[#allocation9 + $0xac0] sm:$0xff] }
 0x1a1   :  { %v675_v13 = vsel %vm659_vm4, %v651_v54, %v667_v25  ;;  %v10599_v5 = vpack.c.bf16 %v674_v61, %v674_v61  ;;  %v9254_v54 = vcombine.high %v1011_v47, %v1019_v48  ;;  %v1027_v25 = vld [vmem:[#allocation9 + $0xa88] sm:$0xff]  ;;  %v10618_v61 = vsub.s32 4, %v10522_v27  ;;  %v1082_v46 = vld [vmem:[#allocation9 + $0xc40] sm:$0xff] }
 0x1a2   :  { %v10597_v4 = vpack.c.bf16 %v675_v13, %v675_v13  ;;  %v677_v6 = vsel %vm661_vm5, %v653_v59, %v669_v3  ;;  %v1035_v59 = vld [vmem:[#allocation9 + $0xac8] sm:$0xff]  ;;  %v488_v2 = vadd.f32 %v487_v52, %v486_v22  ;;  %v9268_v13 = vcombine.high %v1026_v55, %v1034_v57 }
 0x1a3   :  { %v10602_v11 = vpack.c.bf16 %v677_v6, %v677_v6  ;;  %v9270_v3 = vcombine.high %v1027_v25, %v1035_v59  ;;  %v509_v6 = vadd.f32 %v508_v60, %v507_v49  ;;  %v154_v10 = vrot.slane %v10527_v29, %v10618_v61  ;;  %v1075_v47 = vld [vmem:[#allocation9 + $0xc08] sm:$0xff] }
 0x1a4   :  { %6950 = vmatprep.mubr.bf16.mxu0 %v10597_v4  ;;  %7114 = vmatprep.mubr.bf16.mxu1 %v10597_v4  ;;  %v9267_v12 = vcombine.low %v1026_v55, %v1034_v57  ;;  %v9269_v14 = vcombine.low %v1027_v25, %v1035_v59  ;;  %v489_v34 = vrot.slane %v488_v2, 1  ;;  %v1083_v48 = vld [vmem:[#allocation9 + $0xc48] sm:$0xff]  ;;  %v1098_v25 = vld [vmem:[#allocation9 + $0xcc0] sm:$0xff] }
 0x1a5   :  { %6951 = vmatmul.mubr.bf16.vlgmr.msra.gmra.mrb[8].mxu0 %v10599_v5  ;;  %7115 = vmatmul.mubr.bf16.vlgmr.msra.gmra.mrb[8].mxu1 %v10599_v5  ;;  %v1091_v59 = vld [vmem:[#allocation9 + $0xc88] sm:$0xff] }
 0x1a6   :  { %6960 = vmatpush1.bf16.msra.mxu0 %v9187_v23  ;;  %7124 = vmatpush1.bf16.msra.mxu1 %v9189_v24  ;;  %v9236_v23 = vcombine.high %v994_v43, %v1002_v40  ;;  %v9238_v24 = vcombine.high %v995_v42, %v1003_v44  ;;  %v1059_v43 = vld [vmem:[#allocation9 + $0xb88] sm:$0xff]  ;;  %v10628_v42 = vadd.f32 %v10544_v56, %v154_v10 }
 0x1a7   :  { %6961 = vmatprep.subr.bf16.mxu0 %v9204_v7  ;;  %7125 = vmatprep.subr.bf16.mxu1 %v9206_v8  ;;  %v1050_v7 = vld [vmem:[#allocation9 + $0xb40] sm:$0xff]  ;;  %v1043_v8 = vld [vmem:[#allocation9 + $0xb08] sm:$0xff] }
 0x1a8   :  { %6991 = vmatprep.mubr.bf16.mxu0 %v10602_v11  ;;  %7155 = vmatprep.mubr.bf16.mxu1 %v10602_v11  ;;  %v1067_v40 = vld [vmem:[#allocation9 + $0xbc8] sm:$0xff]  ;;  %v9283_v44 = vcombine.low %v1042_v16, %v1050_v7  ;;  %v9285_v18 = vcombine.low %v1043_v8, %v1051_v9  ;;  %v417_v56 = vsel %vm388_vm2, %v10628_v42, 0.0 }
 0x1a9   :  { %v418_v55 = vrot.slane %v417_v56, 4  ;;  %v1099_v60 = vld [vmem:[#allocation9 + $0xcc8] sm:$0xff] }
 0x1aa   :  { %6962 = vmatpush1.bf16.msra.mxu0 %v9203_v35  ;;  %7126 = vmatpush1.bf16.msra.mxu1 %v9205_v39  ;;  %v9284_v35 = vcombine.high %v1042_v16, %v1050_v7  ;;  %v9286_v39 = vcombine.high %v1043_v8, %v1051_v9  ;;  %v9334_v16 = vcombine.high %v1091_v59, %v1099_v60  ;;  %v1114_v9 = vld [vmem:[#allocation9 + $0xd40] sm:$0xff]  ;;  %v1107_v10 = vld [vmem:[#allocation9 + $0xd08] sm:$0xff] }
 0x1ab   :  { %6963 = vmatprep.subr.bf16.mxu0 %v9220_v37  ;;  %7127 = vmatprep.subr.bf16.mxu1 %v9222_v41  ;;  %v510_v37 = vrot.slane %v509_v6, 1  ;;  %v1066_v41 = vld [vmem:[#allocation9 + $0xbc0] sm:$0xff]  ;;  %v419_v7 = vadd.f32 %v418_v55, %v417_v56  ;;  %v1147_v56 = vld [vmem:[#allocation9 + $0xe48] sm:$0xff] }
 0x1ac   :  { %v9300_v22 = vcombine.high %v1058_v36, %v1066_v41  ;;  %v9299_v49 = vcombine.low %v1058_v36, %v1066_v41  ;;  %v1122_v36 = vld [vmem:[#allocation9 + $0xd80] sm:$0xff] }
 0x1ad   :  { %v511_v45 = vadd.f32 %v510_v37, %v509_v6  ;;  %v1106_v6 = vld [vmem:[#allocation9 + $0xd00] sm:$0xff]  ;;  %v420_v37 = vrot.slane %v419_v7, 2 }
 0x1ae   :  { %6964 = vmatpush1.bf16.msra.mxu0 %v9219_v19  ;;  %7128 = vmatpush1.bf16.msra.mxu1 %v9221_v20  ;;  %v10631_v19 = vadd.f32 %v10562_v26, %v166_v33  ;;  %v490_v20 = vadd.f32 %v489_v34, %v488_v2  ;;  %v9317_v2 = vcombine.low %v1075_v47, %v1083_v48  ;;  %v1130_v41 = vld [vmem:[#allocation9 + $0xdc0] sm:$0xff] }
 0x1af   :  { %6965 = vmatprep.subr.bf16.mxu0 %v9236_v23  ;;  %7129 = vmatprep.subr.bf16.mxu1 %v9238_v24  ;;  %v9302_v23 = vcombine.high %v1059_v43, %v1067_v40  ;;  %v1074_v24 = vld [vmem:[#allocation9 + $0xc00] sm:$0xff]  ;;  %v531_v57 = vmul.f32 0.5, %v511_v45  ;;  %v9333_v34 = vcombine.low %v1091_v59, %v1099_v60  ;;  %v547_v45 = vrot.slane %v10571_v32, %v10547_v58  ;;  %v1155_v59 = vld [vmem:[#allocation9 + $0xe88] sm:$0xff] }
 0x1b0   :  { %v438_v26 = vsel %vm388_vm2, %v10631_v19, 0.0  ;;  %v9316_v52 = vcombine.high %v1074_v24, %v1082_v46  ;;  %v1163_v60 = vld [vmem:[#allocation9 + $0xec8] sm:$0xff] }
 0x1b1   :  { %v589_v8 = vadd.f32 1e-05, %v531_v57  ;;  %v578_v55 = vmul.f32 %v547_v45, %v10588_v15  ;;  %v621_v15 = vrot.slane %v10575_v38, %v10547_v58 }
 0x1b2   :  { %6966 = vmatpush1.bf16.msra.mxu0 %v9235_v50  ;;  %7130 = vmatpush1.bf16.msra.mxu1 %v9237_v51  ;;  %v9301_v50 = vcombine.low %v1059_v43, %v1067_v40  ;;  %v528_v51 = vmul.f32 0.5, %v490_v20  ;;  %v1123_v43 = vld [vmem:[#allocation9 + $0xd88] sm:$0xff] }
 0x1b3   :  { %6967 = vmatprep.subr.bf16.mxu0 %v9252_v53  ;;  %7131 = vmatprep.subr.bf16.mxu1 %v9254_v54  ;;  %v9318_v53 = vcombine.high %v1075_v47, %v1083_v48  ;;  %v1090_v54 = vld [vmem:[#allocation9 + $0xc80] sm:$0xff]  ;;  %v1131_v40 = vld [vmem:[#allocation9 + $0xdc8] sm:$0xff] }
 0x1b4   :  { %v9331_v33 = vcombine.low %v1090_v54, %v1098_v25  ;;  %v1146_v47 = vld [vmem:[#allocation9 + $0xe40] sm:$0xff]  ;;  %v1139_v48 = vld [vmem:[#allocation9 + $0xe08] sm:$0xff] }
 0x1b6   :  { %6968 = vmatpush1.bf16.msra.mxu0 %v9251_v63  ;;  %7132 = vmatpush1.bf16.msra.mxu1 %v9253_v0  ;;  %v439_v63 = vrot.slane %v438_v26, 4  ;;  %v9315_v0 = vcombine.low %v1074_v24, %v1082_v46  ;;  %v1138_v24 = vld [vmem:[#allocation9 + $0xe00] sm:$0xff]  ;;  %v421_v46 = vadd.f32 %v420_v37, %v419_v7  ;;  %v9398_v7 = vcombine.high %v1155_v59, %v1163_v60 }
 0x1b7   :  { %6969 = vmatprep.subr.bf16.mxu0 %v9268_v13  ;;  %7133 = vmatprep.subr.bf16.mxu1 %v9270_v3  ;;  %v586_v13 = vadd.f32 1e-05, %v528_v51  ;;  %v9332_v3 = vcombine.high %v1090_v54, %v1098_v25  ;;  %v9365_v51 = vcombine.low %v1123_v43, %v1131_v40  ;;  %v1154_v54 = vld [vmem:[#allocation9 + $0xe80] sm:$0xff] }
 0x1b8   :  { %v422_v57 = vrot.slane %v421_v46, 1  ;;  %v1162_v25 = vld [vmem:[#allocation9 + $0xec0] sm:$0xff] }
 0x1b9   :  { %10093 = vrsqrt.f32 %v586_v13 }
 0x1ba   :  { %6970 = vmatpush1.bf16.msra.mxu0 %v9267_v12  ;;  %7134 = vmatpush1.bf16.msra.mxu1 %v9269_v14  ;;  %v1115_v12 = vld [vmem:[#allocation9 + $0xd48] sm:$0xff]  ;;  %v440_v14 = vadd.f32 %v439_v63, %v438_v26  ;;  %10095 = vrsqrt.f32 %v589_v8  ;;  %v9363_v26 = vcombine.low %v1122_v36, %v1130_v41  ;;  %v1170_v8 = vld [vmem:[#allocation9 + $0xf00] sm:$0xff] }
 0x1bb   :  { %6971 = vmatprep.subr.bf16.mxu0 %v9284_v35  ;;  %7135 = vmatprep.subr.bf16.mxu1 %v9286_v39  ;;  %v9348_v35 = vcombine.high %v1106_v6, %v1114_v9  ;;  %v9350_v39 = vcombine.high %v1107_v10, %v1115_v12  ;;  %v9349_v20 = vcombine.low %v1107_v10, %v1115_v12  ;;  %v1178_v12 = vld [vmem:[#allocation9 + $0xf40] sm:$0xff] }
 0x1bc   :  { %v423_v10 = vadd.f32 %v422_v57, %v421_v46  ;;  %v9412_v37 = vcombine.high %v1170_v8, %v1178_v12  ;;  %v9411_v45 = vcombine.low %v1170_v8, %v1178_v12 }
 0x1be   :  { %6972 = vmatpush1.bf16.msra.mxu0 %v9283_v44  ;;  %7136 = vmatpush1.bf16.msra.mxu1 %v9285_v18  ;;  %v441_v44 = vrot.slane %v440_v14, 2  ;;  %v9347_v18 = vcombine.low %v1106_v6, %v1114_v9  ;;  %v9396_v6 = vcombine.high %v1154_v54, %v1162_v25 }
 0x1bf   :  { %6973 = vmatprep.subr.bf16.mxu0 %v9300_v22  ;;  %7137 = vmatprep.subr.bf16.mxu1 %v9302_v23  ;;  %v9364_v22 = vcombine.high %v1122_v36, %v1130_v41  ;;  %v9366_v23 = vcombine.high %v1123_v43, %v1131_v40  ;;  %v9397_v36 = vcombine.low %v1155_v59, %v1163_v60  ;;  %v1186_v43 = vld [vmem:[#allocation9 + $0xf80] sm:$0xff] }
 0x1c0   :  { %v1218_v60 = vld [vmem:[#allocation9 + $0x1080] sm:$0xff] }
 0x1c2   :  { %6974 = vmatpush1.bf16.msra.mxu0 %v9299_v49  ;;  %7138 = vmatpush1.bf16.msra.mxu1 %v9301_v50  ;;  %v559_v49 = vrot.slane %v10571_v32, %v10550_v62  ;;  %v442_v50 = vadd.f32 %v441_v44, %v440_v14  ;;  %v1171_v14 = vld [vmem:[#allocation9 + $0xf08] sm:$0xff]  ;;  %v450_v44 = vmul.f32 0.5, %v423_v10 }
 0x1c3   :  { %6975 = vmatprep.subr.bf16.mxu0 %v9316_v52  ;;  %7139 = vmatprep.subr.bf16.mxu1 %v9318_v53  ;;  %v9380_v52 = vcombine.high %v1138_v24, %v1146_v47  ;;  %v9382_v53 = vcombine.high %v1139_v48, %v1147_v56  ;;  %v10094_v63 = vpop.eup %10093 }
 0x1c4   :  { %v10096_v13 = vpop.eup %10095  ;;  %v602_v9 = vmul.f32 %v10094_v63, %v578_v55 }
 0x1c6   :  { %6976 = vmatpush1.bf16.msra.mxu0 %v9315_v0  ;;  %7140 = vmatpush1.bf16.msra.mxu1 %v9317_v2  ;;  %v581_v0 = vmul.f32 %v559_v49, %v10591_v21  ;;  %v443_v2 = vrot.slane %v442_v50, 1  ;;  %v652_v40 = vadd.f32 %v621_v15, %v602_v9  ;;  %v1234_v15 = vld [vmem:[#allocation9 + $0x1100] sm:$0xff] }
 0x1c7   :  { %6977 = vmatprep.subr.bf16.mxu0 %v9332_v3  ;;  %7141 = vmatprep.subr.bf16.mxu1 %v9334_v16  ;;  %v9379_v3 = vcombine.low %v1138_v24, %v1146_v47  ;;  %v9381_v16 = vcombine.low %v1139_v48, %v1147_v56  ;;  %v1202_v56 = vld [vmem:[#allocation9 + $0x1000] sm:$0xff] }
 0x1c8   :  { %v605_v21 = vmul.f32 %v10096_v13, %v581_v0  ;;  %v668_v49 = vmul.f32 0.2, %v652_v40  ;;  %vm660_vm6 = vcmp.gt.f32.partialorder %v652_v40, 0.0  ;;  %v1226_v0 = vld [vmem:[#allocation9 + $0x10c0] sm:$0xff]  ;;  %v1227_v13 = vld [vmem:[#allocation9 + $0x10c8] sm:$0xff] }
 0x1c9   :  { %v9460_v8 = vcombine.high %v1218_v60, %v1226_v0 }
 0x1ca   :  { %6978 = vmatpush1.bf16.msra.mxu0 %v9331_v33  ;;  %7142 = vmatpush1.bf16.msra.mxu1 %v9333_v34  ;;  %v1179_v33 = vld [vmem:[#allocation9 + $0xf48] sm:$0xff]  ;;  %v633_v34 = vrot.slane %v10575_v38, %v10550_v62 }
 0x1cb   :  { %6979 = vmatprep.subr.bf16.mxu0 %v9348_v35  ;;  %7143 = vmatprep.subr.bf16.mxu1 %v9350_v39  ;;  %v444_v35 = vadd.f32 %v443_v2, %v442_v50  ;;  %v9395_v39 = vcombine.low %v1154_v54, %v1162_v25  ;;  %v9414_v41 = vcombine.high %v1171_v14, %v1179_v33  ;;  %v1219_v2 = vld [vmem:[#allocation9 + $0x1088] sm:$0xff] }
 0x1cc   :  { %v9413_v46 = vcombine.low %v1171_v14, %v1179_v33  ;;  %v10648_v50 = vsub.f32 %v10628_v42, %v450_v44  ;;  %v676_v42 = vsel %vm660_vm6, %v652_v40, %v668_v49  ;;  %v9462_v9 = vcombine.high %v1219_v2, %v1227_v13  ;;  %v1242_v14 = vld [vmem:[#allocation9 + $0x1140] sm:$0xff]  ;;  %v1235_v33 = vld [vmem:[#allocation9 + $0x1108] sm:$0xff] }
 0x1cd   :  { %v453_v24 = vmul.f32 0.5, %v444_v35  ;;  %v9459_v35 = vcombine.low %v1218_v60, %v1226_v0  ;;  %v1258_v40 = vld [vmem:[#allocation9 + $0x11c0] sm:$0xff]  ;;  %v1251_v44 = vld [vmem:[#allocation9 + $0x1188] sm:$0xff]  ;;  %v10668_v0 = vsub.s32 6, %v10522_v27 }
 0x1ce   :  { %6980 = vmatpush1.bf16.msra.mxu0 %v9347_v18  ;;  %7144 = vmatpush1.bf16.msra.mxu1 %v9349_v20  ;;  %v1194_v18 = vld [vmem:[#allocation9 + $0xfc0] sm:$0xff]  ;;  %v1187_v20 = vld [vmem:[#allocation9 + $0xf88] sm:$0xff]  ;;  %v466_v63 = vmul.f32 %v10648_v50, %v10648_v50 }
 0x1cf   :  { %6981 = vmatprep.subr.bf16.mxu0 %v9364_v22  ;;  %7145 = vmatprep.subr.bf16.mxu1 %v9366_v23  ;;  %v1195_v22 = vld [vmem:[#allocation9 + $0xfc8] sm:$0xff]  ;;  %v655_v23 = vadd.f32 %v633_v34, %v605_v21  ;;  %v9428_v47 = vcombine.high %v1186_v43, %v1194_v18  ;;  %v10651_v54 = vsub.f32 %v10631_v19, %v453_v24 }
 0x1d0   :  { %v9430_v48 = vcombine.high %v1187_v20, %v1195_v22  ;;  %v9427_v55 = vcombine.low %v1186_v43, %v1194_v18  ;;  %v9429_v57 = vcombine.low %v1187_v20, %v1195_v22  ;;  %v498_v10 = vsel %vm388_vm2, %v466_v63, 0.0  ;;  %v1243_v21 = vld [vmem:[#allocation9 + $0x1148] sm:$0xff]  ;;  %v1250_v43 = vld [vmem:[#allocation9 + $0x1180] sm:$0xff] }
 0x1d1   :  { %vm663_vm7 = vcmp.gt.f32.partialorder %v655_v23, 0.0  ;;  %v469_v19 = vmul.f32 %v10651_v54, %v10651_v54  ;;  %v1259_v18 = vld [vmem:[#allocation9 + $0x11c8] sm:$0xff]  ;;  %v9475_v22 = vcombine.low %v1234_v15, %v1242_v14 }
 0x1d2   :  { %6982 = vmatpush1.bf16.msra.mxu0 %v9363_v26  ;;  %7146 = vmatpush1.bf16.msra.mxu1 %v9365_v51  ;;  %v1210_v26 = vld [vmem:[#allocation9 + $0x1040] sm:$0xff]  ;;  %v1203_v51 = vld [vmem:[#allocation9 + $0x1008] sm:$0xff] }
 0x1d3   :  { %6983 = vmatprep.subr.bf16.mxu0 %v9380_v52  ;;  %7147 = vmatprep.subr.bf16.mxu1 %v9382_v53  ;;  %v1211_v52 = vld [vmem:[#allocation9 + $0x1048] sm:$0xff]  ;;  %v671_v53 = vmul.f32 0.2, %v655_v23  ;;  %v9444_v25 = vcombine.high %v1202_v56, %v1210_v26  ;;  %v519_v34 = vsel %vm388_vm2, %v469_v19, 0.0 }
 0x1d4   :  { %v9446_v59 = vcombine.high %v1203_v51, %v1211_v52  ;;  %v520_v20 = vrot.slane %v519_v34, 4  ;;  %v1275_v49 = vld [vmem:[#allocation9 + $0x1248] sm:$0xff] }
 0x1d5   :  { %v1283_v60 = vld [vmem:[#allocation9 + $0x1288] sm:$0xff] }
 0x1d6   :  { %6984 = vmatpush1.bf16.msra.mxu0 %v9379_v3  ;;  %7148 = vmatpush1.bf16.msra.mxu1 %v9381_v16  ;;  %v679_v3 = vsel %vm663_vm7, %v655_v23, %v671_v53  ;;  %v9443_v16 = vcombine.low %v1202_v56, %v1210_v26  ;;  %v9477_v23 = vcombine.low %v1235_v33, %v1243_v21  ;;  %v1267_v56 = vld [vmem:[#allocation9 + $0x1208] sm:$0xff] }
 0x1d7   :  { %6985 = vmatprep.subr.bf16.mxu0 %v9396_v6  ;;  %7149 = vmatprep.subr.bf16.mxu1 %v9398_v7  ;;  %v9445_v6 = vcombine.low %v1203_v51, %v1211_v52  ;;  %v10657_v7 = vpack.c.bf16 %v676_v42, %v676_v42  ;;  %v10660_v12 = vpack.c.bf16 %v679_v3, %v679_v3  ;;  %v1291_v42 = vld [vmem:[#allocation9 + $0x12c8] sm:$0xff] }
 0x1d8   :  { %v521_v26 = vadd.f32 %v520_v20, %v519_v34  ;;  %v9491_v51 = vcombine.low %v1250_v43, %v1258_v40  ;;  %v9493_v52 = vcombine.low %v1251_v44, %v1259_v18 }
 0x1da   :  { %6986 = vmatpush1.bf16.msra.mxu0 %v9395_v39  ;;  %7150 = vmatpush1.bf16.msra.mxu1 %v9397_v36  ;;  %v9461_v39 = vcombine.low %v1219_v2, %v1227_v13  ;;  %v499_v36 = vrot.slane %v498_v10, 4  ;;  %v522_v63 = vrot.slane %v521_v26, 2  ;;  %v9509_v13 = vcombine.low %v1267_v56, %v1275_v49 }
 0x1db   :  { %6987 = vmatprep.subr.bf16.mxu0 %v9412_v37  ;;  %7151 = vmatprep.subr.bf16.mxu1 %v9414_v41  ;;  %v9476_v37 = vcombine.high %v1234_v15, %v1242_v14  ;;  %v9478_v41 = vcombine.high %v1235_v33, %v1243_v21  ;;  %v1299_v15 = vld [vmem:[#allocation9 + $0x1308] sm:$0xff]  ;;  %v162_v14 = vrot.slane %v10527_v29, %v10668_v0 }
 0x1dc   :  { %v500_v24 = vadd.f32 %v499_v36, %v498_v10  ;;  %v1307_v10 = vld [vmem:[#allocation9 + $0x1348] sm:$0xff]  ;;  %v9525_v21 = vcombine.low %v1283_v60, %v1291_v42  ;;  %v1314_v36 = vld [vmem:[#allocation9 + $0x1380] sm:$0xff] }
 0x1de   :  { %6988 = vmatpush1.bf16.msra.mxu0 %v9411_v45  ;;  %7152 = vmatpush1.bf16.msra.mxu1 %v9413_v46  ;;  %v9492_v45 = vcombine.high %v1250_v43, %v1258_v40  ;;  %v9494_v46 = vcombine.high %v1251_v44, %v1259_v18  ;;  %v501_v53 = vrot.slane %v500_v24, 2  ;;  %v1315_v43 = vld [vmem:[#allocation9 + $0x1388] sm:$0xff]  ;;  %v10673_v44 = vadd.f32 %v10560_v17, %v162_v14 }
 0x1df   :  { %6989 = vmatprep.subr.bf16.mxu0 %v9428_v47  ;;  %7153 = vmatprep.subr.bf16.mxu1 %v9430_v48  ;;  %v1266_v47 = vld [vmem:[#allocation9 + $0x1200] sm:$0xff]  ;;  %v1323_v40 = vld [vmem:[#allocation9 + $0x13c8] sm:$0xff]  ;;  %v9541_v18 = vcombine.low %v1299_v15, %v1307_v10 }
 0x1e0   :  { %v1274_v48 = vld [vmem:[#allocation9 + $0x1240] sm:$0xff]  ;;  %v502_v3 = vadd.f32 %v501_v53, %v500_v24 }
 0x1e1   :  { %v9507_v2 = vcombine.low %v1266_v47, %v1274_v48  ;;  %v1330_v24 = vld [vmem:[#allocation9 + $0x1400] sm:$0xff] }
 0x1e2   :  { %6990 = vmatpush1.bf16.msra.mxu0 %v9427_v55  ;;  %7154 = vmatpush1.bf16.msra.mxu1 %v9429_v57  ;;  %v9508_v55 = vcombine.high %v1266_v47, %v1274_v48  ;;  %v9510_v57 = vcombine.high %v1267_v56, %v1275_v49  ;;  %v503_v34 = vrot.slane %v502_v3, 1  ;;  %v1331_v47 = vld [vmem:[#allocation9 + $0x1408] sm:$0xff]  ;;  %v431_v56 = vsel %vm388_vm2, %v10673_v44, 0.0  ;;  %v1346_v53 = vld [vmem:[#allocation9 + $0x1480] sm:$0xff] }
 0x1e3   :  { %7000 = vmatprep.subr.bf16.mxu0 %v9444_v25  ;;  %7164 = vmatprep.subr.bf16.mxu1 %v9446_v59  ;;  %v1282_v25 = vld [vmem:[#allocation9 + $0x1280] sm:$0xff]  ;;  %v1339_v48 = vld [vmem:[#allocation9 + $0x1448] sm:$0xff]  ;;  %v9557_v49 = vcombine.low %v1315_v43, %v1323_v40 }
 0x1e4   :  { %v1290_v59 = vld [vmem:[#allocation9 + $0x12c0] sm:$0xff]  ;;  %v504_v20 = vadd.f32 %v503_v34, %v502_v3 }
 0x1e5   :  { %6992 = vmatmul.mubr.bf16.vlgmr.msra.gmra.mrb[8].mxu0 %v10657_v7  ;;  %7156 = vmatmul.mubr.bf16.vlgmr.msra.gmra.mrb[8].mxu1 %v10657_v7  ;;  %v9524_v19 = vcombine.high %v1282_v25, %v1290_v59  ;;  %v9523_v33 = vcombine.low %v1282_v25, %v1290_v59  ;;  %v1354_v25 = vld [vmem:[#allocation9 + $0x14c0] sm:$0xff]  ;;  %v1347_v59 = vld [vmem:[#allocation9 + $0x1488] sm:$0xff] }
 0x1e6   :  { %7001 = vmatpush1.bf16.msra.mxu0 %v9443_v16  ;;  %7165 = vmatpush1.bf16.msra.mxu1 %v9445_v6  ;;  %v9526_v16 = vcombine.high %v1283_v60, %v1291_v42  ;;  %v1298_v6 = vld [vmem:[#allocation9 + $0x1300] sm:$0xff]  ;;  %v1355_v60 = vld [vmem:[#allocation9 + $0x14c8] sm:$0xff] }
 0x1e7   :  { %7002 = vmatprep.subr.bf16.mxu0 %v9460_v8  ;;  %7166 = vmatprep.subr.bf16.mxu1 %v9462_v9  ;;  %v523_v8 = vadd.f32 %v522_v63, %v521_v26  ;;  %v1306_v9 = vld [vmem:[#allocation9 + $0x1340] sm:$0xff]  ;;  %v530_v26 = vmul.f32 0.5, %v504_v20  ;;  %v9573_v63 = vcombine.low %v1331_v47, %v1339_v48  ;;  %v9590_v3 = vcombine.high %v1347_v59, %v1355_v60 }
 0x1e8   :  { %7032 = vmatprep.mubr.bf16.mxu0 %v10660_v12  ;;  %7196 = vmatprep.mubr.bf16.mxu1 %v10660_v12  ;;  %v9539_v29 = vcombine.low %v1298_v6, %v1306_v9  ;;  %v9589_v14 = vcombine.low %v1347_v59, %v1355_v60  ;;  %v1378_v34 = vld [vmem:[#allocation9 + $0x1580] sm:$0xff]  ;;  %v555_v20 = vrot.slane %v10571_v32, %v10618_v61 }
 0x1ea   :  { %7003 = vmatpush1.bf16.msra.mxu0 %v9459_v35  ;;  %7167 = vmatpush1.bf16.msra.mxu1 %v9461_v39  ;;  %v9540_v35 = vcombine.high %v1298_v6, %v1306_v9  ;;  %v9542_v39 = vcombine.high %v1299_v15, %v1307_v10  ;;  %v1363_v9 = vld [vmem:[#allocation9 + $0x1508] sm:$0xff]  ;;  %v9587_v10 = vcombine.low %v1346_v53, %v1354_v25 }
 0x1eb   :  { %7004 = vmatprep.subr.bf16.mxu0 %v9476_v37  ;;  %7168 = vmatprep.subr.bf16.mxu1 %v9478_v41  ;;  %v524_v37 = vrot.slane %v523_v8, 1  ;;  %v1322_v41 = vld [vmem:[#allocation9 + $0x13c0] sm:$0xff]  ;;  %v1371_v15 = vld [vmem:[#allocation9 + $0x1548] sm:$0xff] }
 0x1ec   :  { %v9555_v17 = vcombine.low %v1314_v36, %v1322_v41 }
 0x1ee   :  { %7005 = vmatpush1.bf16.msra.mxu0 %v9475_v22  ;;  %7169 = vmatpush1.bf16.msra.mxu1 %v9477_v23  ;;  %v9556_v22 = vcombine.high %v1314_v36, %v1322_v41  ;;  %v9558_v23 = vcombine.high %v1315_v43, %v1323_v40  ;;  %v1379_v36 = vld [vmem:[#allocation9 + $0x1588] sm:$0xff]  ;;  %v9605_v43 = vcombine.low %v1363_v9, %v1371_v15 }
 0x1ef   :  { %7006 = vmatprep.subr.bf16.mxu0 %v9492_v45  ;;  %7170 = vmatprep.subr.bf16.mxu1 %v9494_v46  ;;  %v525_v45 = vadd.f32 %v524_v37, %v523_v8  ;;  %v1338_v46 = vld [vmem:[#allocation9 + $0x1440] sm:$0xff]  ;;  %v1387_v37 = vld [vmem:[#allocation9 + $0x15c8] sm:$0xff] }
 0x1f0   :  { %v9571_v42 = vcombine.low %v1330_v24, %v1338_v46  ;;  %v1370_v8 = vld [vmem:[#allocation9 + $0x1540] sm:$0xff] }
 0x1f2   :  { %7007 = vmatpush1.bf16.msra.mxu0 %v9491_v51  ;;  %7171 = vmatpush1.bf16.msra.mxu1 %v9493_v52  ;;  %v9572_v51 = vcombine.high %v1330_v24, %v1338_v46  ;;  %v9574_v52 = vcombine.high %v1331_v47, %v1339_v48  ;;  %v1395_v24 = vld [vmem:[#allocation9 + $0x1608] sm:$0xff]  ;;  %v567_v46 = vrot.slane %v10571_v32, %v10621_v1 }
 0x1f3   :  { %7008 = vmatprep.subr.bf16.mxu0 %v9508_v55  ;;  %7172 = vmatprep.subr.bf16.mxu1 %v9510_v57  ;;  %v432_v55 = vrot.slane %v431_v56, 4  ;;  %v533_v57 = vmul.f32 0.5, %v525_v45  ;;  %v1403_v45 = vld [vmem:[#allocation9 + $0x1648] sm:$0xff]  ;;  %v9621_v48 = vcombine.low %v1379_v36, %v1387_v37 }
 0x1f4   :  { %v9637_v60 = vcombine.low %v1395_v24, %v1403_v45 }
 0x1f5   :  { %v591_v6 = vadd.f32 1e-05, %v533_v57 }
 0x1f6   :  { %7009 = vmatpush1.bf16.msra.mxu0 %v9507_v2  ;;  %7173 = vmatpush1.bf16.msra.mxu1 %v9509_v13  ;;  %v588_v2 = vadd.f32 1e-05, %v530_v26  ;;  %v9588_v13 = vcombine.high %v1346_v53, %v1354_v25  ;;  %v580_v26 = vmul.f32 %v555_v20, %v10648_v50  ;;  %v1411_v53 = vld [vmem:[#allocation9 + $0x1688] sm:$0xff]  ;;  %v583_v25 = vmul.f32 %v567_v46, %v10651_v54 }
 0x1f7   :  { %7010 = vmatprep.subr.bf16.mxu0 %v9524_v19  ;;  %7174 = vmatprep.subr.bf16.mxu1 %v9526_v16  ;;  %v1362_v19 = vld [vmem:[#allocation9 + $0x1500] sm:$0xff]  ;;  %v433_v16 = vadd.f32 %v432_v55, %v431_v56  ;;  %v1419_v55 = vld [vmem:[#allocation9 + $0x16c8] sm:$0xff]  ;;  %v629_v50 = vrot.slane %v10575_v38, %v10618_v61  ;;  %v641_v54 = vrot.slane %v10575_v38, %v10621_v1 }
 0x1f8   :  { %10097 = vrsqrt.f32 %v588_v2  ;;  %v9603_v41 = vcombine.low %v1362_v19, %v1370_v8  ;;  %v1426_v2 = vld [vmem:[#allocation9 + $0x1700] sm:$0xff] }
 0x1f9   :  { %10099 = vrsqrt.f32 %v591_v6  ;;  %v1435_v6 = vld [vmem:[#allocation9 + $0x1748] sm:$0xff] }
 0x1fa   :  { %7011 = vmatpush1.bf16.msra.mxu0 %v9523_v33  ;;  %7175 = vmatpush1.bf16.msra.mxu1 %v9525_v21  ;;  %v9604_v33 = vcombine.high %v1362_v19, %v1370_v8  ;;  %v9606_v21 = vcombine.high %v1363_v9, %v1371_v15  ;;  %v1434_v19 = vld [vmem:[#allocation9 + $0x1740] sm:$0xff]  ;;  %v9653_v15 = vcombine.low %v1411_v53, %v1419_v55 }
 0x1fb   :  { %7012 = vmatprep.subr.bf16.mxu0 %v9540_v35  ;;  %7176 = vmatprep.subr.bf16.mxu1 %v9542_v39  ;;  %v434_v35 = vrot.slane %v433_v16, 2  ;;  %v1386_v39 = vld [vmem:[#allocation9 + $0x15c0] sm:$0xff] }
 0x1fc   :  { %v9620_v40 = vcombine.high %v1378_v34, %v1386_v39  ;;  %v9619_v47 = vcombine.low %v1378_v34, %v1386_v39  ;;  %v1443_v39 = vld [vmem:[#allocation9 + $0x1788] sm:$0xff] }
 0x1fe   :  { %7013 = vmatpush1.bf16.msra.mxu0 %v9539_v29  ;;  %7177 = vmatpush1.bf16.msra.mxu1 %v9541_v18  ;;  %v9622_v29 = vcombine.high %v1379_v36, %v1387_v37  ;;  %v1394_v18 = vld [vmem:[#allocation9 + $0x1600] sm:$0xff]  ;;  %v1451_v36 = vld [vmem:[#allocation9 + $0x17c8] sm:$0xff] }
 0x1ff   :  { %7014 = vmatprep.subr.bf16.mxu0 %v9556_v22  ;;  %7178 = vmatprep.subr.bf16.mxu1 %v9558_v23  ;;  %v435_v22 = vadd.f32 %v434_v35, %v433_v16  ;;  %v1402_v23 = vld [vmem:[#allocation9 + $0x1640] sm:$0xff]  ;;  %v1427_v16 = vld [vmem:[#allocation9 + $0x1708] sm:$0xff] }
 0x200   :  { %v9636_v56 = vcombine.high %v1394_v18, %v1402_v23  ;;  %v9635_v32 = vcombine.low %v1394_v18, %v1402_v23  ;;  %v1450_v35 = vld [vmem:[#allocation9 + $0x17c0] sm:$0xff]  ;;  %v1459_v23 = vld [vmem:[#allocation9 + $0x1808] sm:$0xff] }
 0x202   :  { %7015 = vmatpush1.bf16.msra.mxu0 %v9555_v17  ;;  %7179 = vmatpush1.bf16.msra.mxu1 %v9557_v49  ;;  %v9638_v17 = vcombine.high %v1395_v24, %v1403_v45  ;;  %v1410_v49 = vld [vmem:[#allocation9 + $0x1680] sm:$0xff]  ;;  %v10098_v57 = vpop.eup %10097  ;;  %v1467_v24 = vld [vmem:[#allocation9 + $0x1848] sm:$0xff] }
 0x203   :  { %7016 = vmatprep.subr.bf16.mxu0 %v9572_v51  ;;  %7180 = vmatprep.subr.bf16.mxu1 %v9574_v52  ;;  %v436_v51 = vrot.slane %v435_v22, 1  ;;  %v1418_v52 = vld [vmem:[#allocation9 + $0x16c0] sm:$0xff]  ;;  %v10100_v59 = vpop.eup %10099 }
 0x204   :  { %v607_v8 = vmul.f32 %v10100_v59, %v583_v25  ;;  %v9651_v9 = vcombine.low %v1410_v49, %v1418_v52 }
 0x206   :  { %7017 = vmatpush1.bf16.msra.mxu0 %v9571_v42  ;;  %7181 = vmatpush1.bf16.msra.mxu1 %v9573_v63  ;;  %v9652_v42 = vcombine.high %v1410_v49, %v1418_v52  ;;  %v9654_v63 = vcombine.high %v1411_v53, %v1419_v55  ;;  %v657_v37 = vadd.f32 %v641_v54, %v607_v8  ;;  %v1483_v52 = vld [vmem:[#allocation9 + $0x18c8] sm:$0xff]  ;;  %v1506_v54 = vld [vmem:[#allocation9 + $0x1980] sm:$0xff] }
 0x207   :  { %7018 = vmatprep.subr.bf16.mxu0 %v9588_v13  ;;  %7182 = vmatprep.subr.bf16.mxu1 %v9590_v3  ;;  %v604_v13 = vmul.f32 %v10098_v57, %v580_v26  ;;  %v437_v3 = vadd.f32 %v436_v51, %v435_v22  ;;  %v1466_v22 = vld [vmem:[#allocation9 + $0x1840] sm:$0xff]  ;;  %v1475_v51 = vld [vmem:[#allocation9 + $0x1888] sm:$0xff]  ;;  %v9701_v57 = vcombine.low %v1459_v23, %v1467_v24 }
 0x208   :  { %v673_v45 = vmul.f32 0.2, %v657_v37  ;;  %vm665_vm9 = vcmp.gt.f32.partialorder %v657_v37, 0.0  ;;  %v1482_v26 = vld [vmem:[#allocation9 + $0x18c0] sm:$0xff] }
 0x209   :  { %v452_v34 = vmul.f32 0.5, %v437_v3 }
 0x20a   :  { %7019 = vmatpush1.bf16.msra.mxu0 %v9587_v10  ;;  %7183 = vmatpush1.bf16.msra.mxu1 %v9589_v14  ;;  %v9668_v10 = vcombine.high %v1426_v2, %v1434_v19  ;;  %v9670_v14 = vcombine.high %v1427_v16, %v1435_v6  ;;  %v681_v53 = vsel %vm665_vm9, %v657_v37, %v673_v45  ;;  %v1523_v37 = vld [vmem:[#allocation9 + $0x1a08] sm:$0xff] }
 0x20b   :  { %7020 = vmatprep.subr.bf16.mxu0 %v9604_v33  ;;  %7184 = vmatprep.subr.bf16.mxu1 %v9606_v21  ;;  %v1442_v33 = vld [vmem:[#allocation9 + $0x1780] sm:$0xff]  ;;  %v654_v21 = vadd.f32 %v629_v50, %v604_v13  ;;  %v10688_v20 = vsub.f32 %v10673_v44, %v452_v34  ;;  %v1491_v13 = vld [vmem:[#allocation9 + $0x1908] sm:$0xff] }
 0x20c   :  { %v9684_v38 = vcombine.high %v1442_v33, %v1450_v35  ;;  %v9683_v46 = vcombine.low %v1442_v33, %v1450_v35  ;;  %v1499_v50 = vld [vmem:[#allocation9 + $0x1948] sm:$0xff] }
 0x20d   :  { %v670_v18 = vmul.f32 0.2, %v654_v21  ;;  %vm662_vm8 = vcmp.gt.f32.partialorder %v654_v21, 0.0  ;;  %v468_v44 = vmul.f32 %v10688_v20, %v10688_v20  ;;  %v9734_v8 = vcombine.high %v1491_v13, %v1499_v50  ;;  %v1547_v45 = vld [vmem:[#allocation9 + $0x1ac8] sm:$0xff] }
 0x20e   :  { %7021 = vmatpush1.bf16.msra.mxu0 %v9603_v41  ;;  %7185 = vmatpush1.bf16.msra.mxu1 %v9605_v43  ;;  %v9667_v41 = vcombine.low %v1426_v2, %v1434_v19  ;;  %v9669_v43 = vcombine.low %v1427_v16, %v1435_v6  ;;  %v1498_v2 = vld [vmem:[#allocation9 + $0x1940] sm:$0xff]  ;;  %v9717_v19 = vcombine.low %v1475_v51, %v1483_v52 }
 0x20f   :  { %7022 = vmatprep.subr.bf16.mxu0 %v9620_v40  ;;  %7186 = vmatprep.subr.bf16.mxu1 %v9622_v29  ;;  %v9686_v40 = vcombine.high %v1443_v39, %v1451_v36  ;;  %v1458_v29 = vld [vmem:[#allocation9 + $0x1800] sm:$0xff]  ;;  %v678_v49 = vsel %vm662_vm8, %v654_v21, %v670_v18  ;;  %v9733_v33 = vcombine.low %v1491_v13, %v1499_v50 }
 0x210   :  { %v9699_v55 = vcombine.low %v1458_v29, %v1466_v22  ;;  %v10692_v25 = vpack.c.bf16 %v678_v49, %v678_v49  ;;  %v1554_v49 = vld [vmem:[#allocation9 + $0x1b00] sm:$0xff] }
 0x212   :  { %7023 = vmatpush1.bf16.msra.mxu0 %v9619_v47  ;;  %7187 = vmatpush1.bf16.msra.mxu1 %v9621_v48  ;;  %v9685_v47 = vcombine.low %v1443_v39, %v1451_v36  ;;  %v9700_v48 = vcombine.high %v1458_v29, %v1466_v22  ;;  %v1522_v39 = vld [vmem:[#allocation9 + $0x1a00] sm:$0xff] }
 0x213   :  { %7024 = vmatprep.subr.bf16.mxu0 %v9636_v56  ;;  %7188 = vmatprep.subr.bf16.mxu1 %v9638_v17  ;;  %v9702_v56 = vcombine.high %v1459_v23, %v1467_v24  ;;  %v1474_v17 = vld [vmem:[#allocation9 + $0x1880] sm:$0xff]  ;;  %v1539_v24 = vld [vmem:[#allocation9 + $0x1a88] sm:$0xff] }
 0x214   :  { %v9716_v59 = vcombine.high %v1474_v17, %v1482_v26  ;;  %v9715_v3 = vcombine.low %v1474_v17, %v1482_v26  ;;  %v1530_v36 = vld [vmem:[#allocation9 + $0x1a40] sm:$0xff]  ;;  %v9782_v17 = vcombine.high %v1539_v24, %v1547_v45  ;;  %v1555_v26 = vld [vmem:[#allocation9 + $0x1b08] sm:$0xff] }
 0x215   :  { %v9764_v29 = vcombine.high %v1522_v39, %v1530_v36  ;;  %v1538_v22 = vld [vmem:[#allocation9 + $0x1a80] sm:$0xff] }
 0x216   :  { %7025 = vmatpush1.bf16.msra.mxu0 %v9635_v32  ;;  %7189 = vmatpush1.bf16.msra.mxu1 %v9637_v60  ;;  %v9718_v32 = vcombine.high %v1475_v51, %v1483_v52  ;;  %v1490_v60 = vld [vmem:[#allocation9 + $0x1900] sm:$0xff]  ;;  %v1563_v51 = vld [vmem:[#allocation9 + $0x1b48] sm:$0xff] }
 0x217   :  { %7026 = vmatprep.subr.bf16.mxu0 %v9652_v42  ;;  %7190 = vmatprep.subr.bf16.mxu1 %v9654_v63  ;;  %v512_v42 = vsel %vm388_vm2, %v468_v44, 0.0  ;;  %v10695_v63 = vpack.c.bf16 %v681_v53, %v681_v53  ;;  %v9732_v6 = vcombine.high %v1490_v60, %v1498_v2  ;;  %v1546_v23 = vld [vmem:[#allocation9 + $0x1ac0] sm:$0xff]  ;;  %v9781_v53 = vcombine.low %v1539_v24, %v1547_v45 }
 0x218   :  { %v513_v16 = vrot.slane %v512_v42, 4  ;;  %v1562_v44 = vld [vmem:[#allocation9 + $0x1b40] sm:$0xff]  ;;  %v9779_v52 = vcombine.low %v1538_v22, %v1546_v23  ;;  %v9797_v50 = vcombine.low %v1555_v26, %v1563_v51 }
 0x219   :  { %v9795_v13 = vcombine.low %v1554_v49, %v1562_v44 }
 0x21a   :  { %7027 = vmatpush1.bf16.msra.mxu0 %v9651_v9  ;;  %7191 = vmatpush1.bf16.msra.mxu1 %v9653_v15  ;;  %v1514_v9 = vld [vmem:[#allocation9 + $0x19c0] sm:$0xff]  ;;  %v1507_v15 = vld [vmem:[#allocation9 + $0x1988] sm:$0xff]  ;;  %v514_v21 = vadd.f32 %v513_v16, %v512_v42 }
 0x21b   :  { %7028 = vmatprep.subr.bf16.mxu0 %v9668_v10  ;;  %7192 = vmatprep.subr.bf16.mxu1 %v9670_v14  ;;  %v1515_v10 = vld [vmem:[#allocation9 + $0x19c8] sm:$0xff]  ;;  %v9731_v14 = vcombine.low %v1490_v60, %v1498_v2  ;;  %v9748_v34 = vcombine.high %v1506_v54, %v1514_v9  ;;  %v1578_v60 = vld [vmem:[#allocation9 + $0x1bc0] sm:$0xff] }
 0x21c   :  { %v9750_v35 = vcombine.high %v1507_v15, %v1515_v10  ;;  %v1571_v42 = vld [vmem:[#allocation9 + $0x1b88] sm:$0xff] }
 0x21d   :  { %v1579_v2 = vld [vmem:[#allocation9 + $0x1bc8] sm:$0xff] }
 0x21e   :  { %7029 = vmatpush1.bf16.msra.mxu0 %v9667_v41  ;;  %7193 = vmatpush1.bf16.msra.mxu1 %v9669_v43  ;;  %v1531_v41 = vld [vmem:[#allocation9 + $0x1a48] sm:$0xff]  ;;  %v9747_v43 = vcombine.low %v1506_v54, %v1514_v9  ;;  %v9814_v16 = vcombine.high %v1571_v42, %v1579_v2 }
 0x21f   :  { %7030 = vmatprep.subr.bf16.mxu0 %v9684_v38  ;;  %7194 = vmatprep.subr.bf16.mxu1 %v9686_v40  ;;  %v9749_v38 = vcombine.low %v1507_v15, %v1515_v10  ;;  %v515_v40 = vrot.slane %v514_v21, 2  ;;  %v9766_v18 = vcombine.high %v1523_v37, %v1531_v41  ;;  %v1587_v54 = vld [vmem:[#allocation9 + $0x1c08] sm:$0xff]  ;;  %v9813_v10 = vcombine.low %v1571_v42, %v1579_v2 }
 0x220   :  { %v1595_v9 = vld [vmem:[#allocation9 + $0x1c48] sm:$0xff] }
 0x222   :  { %7031 = vmatpush1.bf16.msra.mxu0 %v9683_v46  ;;  %7195 = vmatpush1.bf16.msra.mxu1 %v9685_v47  ;;  %v9763_v46 = vcombine.low %v1522_v39, %v1530_v36  ;;  %v9765_v47 = vcombine.low %v1523_v37, %v1531_v41  ;;  %v1603_v39 = vld [vmem:[#allocation9 + $0x1c88] sm:$0xff]  ;;  %v9829_v41 = vcombine.low %v1587_v54, %v1595_v9 }
 0x223   :  { %7041 = vmatprep.subr.bf16.mxu0 %v9700_v48  ;;  %7205 = vmatprep.subr.bf16.mxu1 %v9702_v56  ;;  %v516_v48 = vadd.f32 %v515_v40, %v514_v21  ;;  %v9780_v56 = vcombine.high %v1538_v22, %v1546_v23  ;;  %v9830_v21 = vcombine.high %v1587_v54, %v1595_v9  ;;  %v1611_v36 = vld [vmem:[#allocation9 + $0x1cc8] sm:$0xff] }
 0x224   :  { %v9846_v40 = vcombine.high %v1603_v39, %v1611_v36  ;;  %v1619_v22 = vld [vmem:[#allocation9 + $0x1d08] sm:$0xff]  ;;  %v9845_v45 = vcombine.low %v1603_v39, %v1611_v36  ;;  %v1690_v39 = vld [vmem:[#allocation9 + $0x1f40] sm:$0xff] }
 0x225   :  { %7033 = vmatmul.mubr.bf16.vlgmr.msra.gmra.mrb[8].mxu0 %v10692_v25  ;;  %7197 = vmatmul.mubr.bf16.vlgmr.msra.gmra.mrb[8].mxu1 %v10692_v25  ;;  %v1627_v23 = vld [vmem:[#allocation9 + $0x1d48] sm:$0xff] }
 0x226   :  { %7042 = vmatpush1.bf16.msra.mxu0 %v9699_v55  ;;  %7206 = vmatpush1.bf16.msra.mxu1 %v9701_v57  ;;  %v517_v55 = vrot.slane %v516_v48, 1  ;;  %v9796_v57 = vcombine.high %v1554_v49, %v1562_v44  ;;  %v1643_v49 = vld [vmem:[#allocation9 + $0x1dc8] sm:$0xff] }
 0x227   :  { %7043 = vmatprep.subr.bf16.mxu0 %v9716_v59  ;;  %7207 = vmatprep.subr.bf16.mxu1 %v9718_v32  ;;  %v9798_v59 = vcombine.high %v1555_v26, %v1563_v51  ;;  %v1570_v32 = vld [vmem:[#allocation9 + $0x1b80] sm:$0xff]  ;;  %v9861_v26 = vcombine.low %v1619_v22, %v1627_v23  ;;  %v1683_v36 = vld [vmem:[#allocation9 + $0x1f08] sm:$0xff] }
 0x228   :  { %7073 = vmatprep.mubr.bf16.mxu0 %v10695_v63  ;;  %7237 = vmatprep.mubr.bf16.mxu1 %v10695_v63  ;;  %v9811_v15 = vcombine.low %v1570_v32, %v1578_v60 }
 0x22a   :  { %7044 = vmatpush1.bf16.msra.mxu0 %v9715_v3  ;;  %7208 = vmatpush1.bf16.msra.mxu1 %v9717_v19  ;;  %v518_v3 = vadd.f32 %v517_v55, %v516_v48  ;;  %v9812_v19 = vcombine.high %v1570_v32, %v1578_v60  ;;  %v1634_v48 = vld [vmem:[#allocation9 + $0x1d80] sm:$0xff]  ;;  %v10135_v55 = vld [vmem:[#allocation6] sm:$0xff]  ;;  %v1651_v32 = vld [vmem:[#allocation9 + $0x1e08] sm:$0xff] }
 0x22b   :  { %7045 = vmatprep.subr.bf16.mxu0 %v9732_v6  ;;  %7209 = vmatprep.subr.bf16.mxu1 %v9734_v8  ;;  %v1586_v6 = vld [vmem:[#allocation9 + $0x1c00] sm:$0xff]  ;;  %v1659_v60 = vld [vmem:[#allocation9 + $0x1e48] sm:$0xff] }
 0x22c   :  { %v1594_v8 = vld [vmem:[#allocation9 + $0x1c40] sm:$0xff] }
 0x22d   :  { %v9827_v37 = vcombine.low %v1586_v6, %v1594_v8 }
 0x22e   :  { %7046 = vmatpush1.bf16.msra.mxu0 %v9731_v14  ;;  %7210 = vmatpush1.bf16.msra.mxu1 %v9733_v33  ;;  %v532_v14 = vmul.f32 0.5, %v518_v3  ;;  %v9828_v33 = vcombine.high %v1586_v6, %v1594_v8  ;;  %v1666_v3 = vld [vmem:[#allocation9 + $0x1e80] sm:$0xff]  ;;  %v1667_v6 = vld [vmem:[#allocation9 + $0x1e88] sm:$0xff] }
 0x22f   :  { %7047 = vmatprep.subr.bf16.mxu0 %v9748_v34  ;;  %7211 = vmatprep.subr.bf16.mxu1 %v9750_v35  ;;  %v1602_v34 = vld [vmem:[#allocation9 + $0x1c80] sm:$0xff]  ;;  %v1675_v8 = vld [vmem:[#allocation9 + $0x1ec8] sm:$0xff] }
 0x230   :  { %v1610_v35 = vld [vmem:[#allocation9 + $0x1cc0] sm:$0xff] }
 0x231   :  { %v9843_v24 = vcombine.low %v1602_v34, %v1610_v35 }
 0x232   :  { %7048 = vmatpush1.bf16.msra.mxu0 %v9747_v43  ;;  %7212 = vmatpush1.bf16.msra.mxu1 %v9749_v38  ;;  %v590_v43 = vadd.f32 1e-05, %v532_v14  ;;  %v9844_v38 = vcombine.high %v1602_v34, %v1610_v35  ;;  %v9910_v14 = vcombine.high %v1667_v6, %v1675_v8  ;;  %v10136_v34 = vld [vmem:[#allocation7] sm:$0xff] }
 0x233   :  { %7049 = vmatprep.subr.bf16.mxu0 %v9764_v29  ;;  %7213 = vmatprep.subr.bf16.mxu1 %v9766_v18  ;;  %v1618_v29 = vld [vmem:[#allocation9 + $0x1d00] sm:$0xff]  ;;  %v637_v35 = vrot.slane %v10136_v34, %v10668_v0  ;;  %v749_v34 = vld [vmem:[#allocation9 + $0x1d8] sm:$0xff] }
 0x234   :  { %v1626_v18 = vld [vmem:[#allocation9 + $0x1d40] sm:$0xff]  ;;  %10101 = vrsqrt.f32 %v590_v43 }
 0x235   :  { %v9859_v44 = vcombine.low %v1618_v29, %v1626_v18 }
 0x236   :  { %7050 = vmatpush1.bf16.msra.mxu0 %v9763_v46  ;;  %7214 = vmatpush1.bf16.msra.mxu1 %v9765_v47  ;;  %v9860_v46 = vcombine.high %v1618_v29, %v1626_v18  ;;  %v9862_v47 = vcombine.high %v1619_v22, %v1627_v23  ;;  %v1706_v18 = vld [vmem:[#allocation9 + $0x1fc0] sm:$0xff]  ;;  %v1699_v22 = vld [vmem:[#allocation9 + $0x1f88] sm:$0xff] }
 0x237   :  { %7051 = vmatprep.subr.bf16.mxu0 %v9780_v56  ;;  %7215 = vmatprep.subr.bf16.mxu1 %v9782_v17  ;;  %v1642_v56 = vld [vmem:[#allocation9 + $0x1dc0] sm:$0xff]  ;;  %v1635_v17 = vld [vmem:[#allocation9 + $0x1d88] sm:$0xff] }
 0x238   :  { %v9876_v51 = vcombine.high %v1634_v48, %v1642_v56  ;;  %v9875_v42 = vcombine.low %v1634_v48, %v1642_v56  ;;  %v9877_v2 = vcombine.low %v1635_v17, %v1643_v49  ;;  %v1707_v23 = vld [vmem:[#allocation9 + $0x1fc8] sm:$0xff]  ;;  %v692_v48 = vld [vmem:[#allocation9 + $0x10] sm:$0xff] }
 0x23a   :  { %7052 = vmatpush1.bf16.msra.mxu0 %v9779_v52  ;;  %7216 = vmatpush1.bf16.msra.mxu1 %v9781_v53  ;;  %v9878_v52 = vcombine.high %v1635_v17, %v1643_v49  ;;  %v1650_v53 = vld [vmem:[#allocation9 + $0x1e00] sm:$0xff]  ;;  %v700_v17 = vld [vmem:[#allocation9 + $0x50] sm:$0xff]  ;;  %v693_v49 = vld [vmem:[#allocation9 + $0x18] sm:$0xff] }
 0x23b   :  { %7053 = vmatprep.subr.bf16.mxu0 %v9796_v57  ;;  %7217 = vmatprep.subr.bf16.mxu1 %v9798_v59  ;;  %v563_v57 = vrot.slane %v10135_v55, %v10668_v0  ;;  %v1658_v59 = vld [vmem:[#allocation9 + $0x1e40] sm:$0xff] }
 0x23c   :  { %v9891_v9 = vcombine.low %v1650_v53, %v1658_v59 }
 0x23e   :  { %7054 = vmatpush1.bf16.msra.mxu0 %v9795_v13  ;;  %7218 = vmatpush1.bf16.msra.mxu1 %v9797_v50  ;;  %v9892_v13 = vcombine.high %v1650_v53, %v1658_v59  ;;  %v9894_v50 = vcombine.high %v1651_v32, %v1659_v60  ;;  %v10102_v54 = vpop.eup %10101  ;;  %v716_v59 = vld [vmem:[#allocation9 + $0xd0] sm:$0xff] }
 0x23f   :  { %7055 = vmatprep.subr.bf16.mxu0 %v9812_v19  ;;  %7219 = vmatprep.subr.bf16.mxu1 %v9814_v16  ;;  %v582_v19 = vmul.f32 %v563_v57, %v10688_v20  ;;  %v1674_v16 = vld [vmem:[#allocation9 + $0x1ec0] sm:$0xff]  ;;  %v1691_v20 = vld [vmem:[#allocation9 + $0x1f48] sm:$0xff]  ;;  %v708_v57 = vld [vmem:[#allocation9 + $0x90] sm:$0xff] }
 0x242   :  { %7056 = vmatpush1.bf16.msra.mxu0 %v9811_v15  ;;  %7220 = vmatpush1.bf16.msra.mxu1 %v9813_v10  ;;  %v9893_v15 = vcombine.low %v1651_v32, %v1659_v60  ;;  %v9908_v10 = vcombine.high %v1666_v3, %v1674_v16  ;;  %v709_v32 = vld [vmem:[#allocation9 + $0x98] sm:$0xff] }
 0x243   :  { %7057 = vmatprep.subr.bf16.mxu0 %v9828_v33  ;;  %7221 = vmatprep.subr.bf16.mxu1 %v9830_v21  ;;  %v1682_v33 = vld [vmem:[#allocation9 + $0x1f00] sm:$0xff]  ;;  %v606_v21 = vmul.f32 %v10102_v54, %v582_v19  ;;  %v717_v60 = vld [vmem:[#allocation9 + $0xd8] sm:$0xff]  ;;  %v724_v19 = vld [vmem:[#allocation9 + $0x110] sm:$0xff]  ;;  %v8951_v54 = vcombine.low %v708_v57, %v716_v59 }
 0x244   :  { %v9924_v43 = vcombine.high %v1682_v33, %v1690_v39 }
 0x245   :  { %v656_v29 = vadd.f32 %v637_v35, %v606_v21  ;;  %v741_v21 = vld [vmem:[#allocation9 + $0x198] sm:$0xff] }
 0x246   :  { %7058 = vmatpush1.bf16.msra.mxu0 %v9827_v37  ;;  %7222 = vmatpush1.bf16.msra.mxu1 %v9829_v41  ;;  %v9907_v37 = vcombine.low %v1666_v3, %v1674_v16  ;;  %v9909_v41 = vcombine.low %v1667_v6, %v1675_v8  ;;  %v8954_v3 = vcombine.high %v709_v32, %v717_v60  ;;  %v732_v16 = vld [vmem:[#allocation9 + $0x150] sm:$0xff]  ;;  %v725_v6 = vld [vmem:[#allocation9 + $0x118] sm:$0xff] }
 0x247   :  { %7059 = vmatprep.subr.bf16.mxu0 %v9844_v38  ;;  %7223 = vmatprep.subr.bf16.mxu1 %v9846_v40  ;;  %v9926_v38 = vcombine.high %v1683_v36, %v1691_v20  ;;  %v1698_v40 = vld [vmem:[#allocation9 + $0x1f80] sm:$0xff]  ;;  %v672_v56 = vmul.f32 0.2, %v656_v29  ;;  %vm664_vm10 = vcmp.gt.f32.partialorder %v656_v29, 0.0  ;;  %v733_v8 = vld [vmem:[#allocation9 + $0x158] sm:$0xff]  ;;  %v8967_v35 = vcombine.low %v724_v19, %v732_v16 }
 0x249   :  { %v680_v55 = vsel %vm664_vm10, %v656_v29, %v672_v56  ;;  %v8985_v29 = vcombine.low %v741_v21, %v749_v34 }
 0x24a   :  { %7060 = vmatpush1.bf16.msra.mxu0 %v9843_v24  ;;  %7224 = vmatpush1.bf16.msra.mxu1 %v9845_v45  ;;  %v9923_v24 = vcombine.low %v1682_v33, %v1690_v39  ;;  %v9925_v45 = vcombine.low %v1683_v36, %v1691_v20  ;;  %v748_v33 = vld [vmem:[#allocation9 + $0x1d0] sm:$0xff]  ;;  %v8969_v39 = vcombine.low %v725_v6, %v733_v8 }
 0x24b   :  { %7061 = vmatprep.subr.bf16.mxu0 %v9860_v46  ;;  %7225 = vmatprep.subr.bf16.mxu1 %v9862_v47  ;;  %v9940_v46 = vcombine.high %v1698_v40, %v1706_v18  ;;  %v9942_v47 = vcombine.high %v1699_v22, %v1707_v23  ;;  %v8986_v20 = vcombine.high %v741_v21, %v749_v34  ;;  %v844_v21 = vld [vmem:[#allocation9 + $0x4d0] sm:$0xff]  ;;  %v837_v34 = vld [vmem:[#allocation9 + $0x498] sm:$0xff] }
 0x24e   :  { %7062 = vmatpush1.bf16.msra.mxu0 %v9859_v44  ;;  %7226 = vmatpush1.bf16.msra.mxu1 %v9861_v26  ;;  %v701_v44 = vld [vmem:[#allocation9 + $0x58] sm:$0xff]  ;;  %v9939_v26 = vcombine.low %v1698_v40, %v1706_v18 }
 0x24f   :  { %7063 = vmatprep.subr.bf16.mxu0 %v9876_v51  ;;  %7227 = vmatprep.subr.bf16.mxu1 %v9878_v52  ;;  %v9941_v51 = vcombine.low %v1699_v22, %v1707_v23  ;;  %v8936_v52 = vcombine.high %v692_v48, %v700_v17  ;;  %v8938_v53 = vcombine.high %v693_v49, %v701_v44  ;;  %v772_v23 = vld [vmem:[#allocation9 + $0x290] sm:$0xff] }
 0x252   :  { %7064 = vmatpush1.bf16.msra.mxu0 %v9875_v42  ;;  %7228 = vmatpush1.bf16.msra.mxu1 %v9877_v2  ;;  %v8935_v42 = vcombine.low %v692_v48, %v700_v17  ;;  %v10704_v2 = vpack.c.bf16 %v680_v55, %v680_v55 }
 0x253   :  { %7065 = vmatprep.subr.bf16.mxu0 %v9892_v13  ;;  %7229 = vmatprep.subr.bf16.mxu1 %v9894_v50  ;;  %v8937_v13 = vcombine.low %v693_v49, %v701_v44  ;;  %v8952_v50 = vcombine.high %v708_v57, %v716_v59  ;;  %v788_v49 = vld [vmem:[#allocation9 + $0x310] sm:$0xff] }
 0x254   :  { %v796_v44 = vld [vmem:[#allocation9 + $0x350] sm:$0xff] }
 0x255   :  { %v9032_v55 = vcombine.high %v788_v49, %v796_v44  ;;  %v804_v59 = vld [vmem:[#allocation9 + $0x390] sm:$0xff] }
 0x256   :  { %7066 = vmatpush1.bf16.msra.mxu0 %v9891_v9  ;;  %7230 = vmatpush1.bf16.msra.mxu1 %v9893_v15  ;;  %v8953_v9 = vcombine.low %v709_v32, %v717_v60  ;;  %v8968_v15 = vcombine.high %v724_v19, %v732_v16  ;;  %v812_v32 = vld [vmem:[#allocation9 + $0x3d0] sm:$0xff]  ;;  %v805_v60 = vld [vmem:[#allocation9 + $0x398] sm:$0xff] }
 0x257   :  { %7067 = vmatprep.subr.bf16.mxu0 %v9908_v10  ;;  %7231 = vmatprep.subr.bf16.mxu1 %v9910_v14  ;;  %v8970_v10 = vcombine.high %v725_v6, %v733_v8  ;;  %v740_v14 = vld [vmem:[#allocation9 + $0x190] sm:$0xff]  ;;  %v821_v8 = vld [vmem:[#allocation9 + $0x418] sm:$0xff] }
 0x258   :  { %v8984_v36 = vcombine.high %v740_v14, %v748_v33  ;;  %v8983_v40 = vcombine.low %v740_v14, %v748_v33  ;;  %v820_v16 = vld [vmem:[#allocation9 + $0x410] sm:$0xff] }
 0x259   :  { %v828_v6 = vld [vmem:[#allocation9 + $0x450] sm:$0xff] }
 0x25a   :  { %7068 = vmatpush1.bf16.msra.mxu0 %v9907_v37  ;;  %7232 = vmatpush1.bf16.msra.mxu1 %v9909_v41  ;;  %v756_v37 = vld [vmem:[#allocation9 + $0x210] sm:$0xff] }
 0x25b   :  { %7069 = vmatprep.subr.bf16.mxu0 %v9924_v43  ;;  %7233 = vmatprep.subr.bf16.mxu1 %v9926_v38  ;;  %v764_v41 = vld [vmem:[#allocation9 + $0x250] sm:$0xff]  ;;  %v757_v43 = vld [vmem:[#allocation9 + $0x218] sm:$0xff] }
 0x25c   :  { %v765_v38 = vld [vmem:[#allocation9 + $0x258] sm:$0xff]  ;;  %v9000_v18 = vcombine.high %v756_v37, %v764_v41  ;;  %v836_v33 = vld [vmem:[#allocation9 + $0x490] sm:$0xff] }
 0x25d   :  { %v9002_v22 = vcombine.high %v757_v43, %v765_v38  ;;  %v9001_v48 = vcombine.low %v757_v43, %v765_v38  ;;  %v860_v43 = vld [vmem:[#allocation9 + $0x550] sm:$0xff]  ;;  %v853_v38 = vld [vmem:[#allocation9 + $0x518] sm:$0xff] }
 0x25e   :  { %7070 = vmatpush1.bf16.msra.mxu0 %v9923_v24  ;;  %7234 = vmatpush1.bf16.msra.mxu1 %v9925_v45  ;;  %v780_v24 = vld [vmem:[#allocation9 + $0x2d0] sm:$0xff]  ;;  %v773_v45 = vld [vmem:[#allocation9 + $0x298] sm:$0xff] }
 0x25f   :  { %7071 = vmatprep.subr.bf16.mxu0 %v9940_v46  ;;  %7235 = vmatprep.subr.bf16.mxu1 %v9942_v47  ;;  %v781_v46 = vld [vmem:[#allocation9 + $0x2d8] sm:$0xff]  ;;  %v8999_v47 = vcombine.low %v756_v37, %v764_v41  ;;  %v9016_v56 = vcombine.high %v772_v23, %v780_v24  ;;  %v852_v41 = vld [vmem:[#allocation9 + $0x510] sm:$0xff] }
 0x260   :  { %v9018_v17 = vcombine.high %v773_v45, %v781_v46 }
 0x262   :  { %7072 = vmatpush1.bf16.msra.mxu0 %v9939_v26  ;;  %7236 = vmatpush1.bf16.msra.mxu1 %v9941_v51  ;;  %v789_v26 = vld [vmem:[#allocation9 + $0x318] sm:$0xff] }
 0x263   :  { %7246 = vmatprep.subr.bf16.mxu0 %v8936_v52  ;;  %7410 = vmatprep.subr.bf16.mxu1 %v8938_v53  ;;  %v797_v51 = vld [vmem:[#allocation9 + $0x358] sm:$0xff]  ;;  %v9015_v52 = vcombine.low %v772_v23, %v780_v24  ;;  %v9017_v53 = vcombine.low %v773_v45, %v781_v46  ;;  %v868_v24 = vld [vmem:[#allocation9 + $0x590] sm:$0xff] }
 0x264   :  { %v9034_v57 = vcombine.high %v789_v26, %v797_v51  ;;  %v876_v45 = vld [vmem:[#allocation9 + $0x5d0] sm:$0xff]  ;;  %v869_v46 = vld [vmem:[#allocation9 + $0x598] sm:$0xff] }
 0x265   :  { %7074 = vmatmul.mubr.bf16.vlgmr.msra.gmra.mrb[8].mxu0 %v10704_v2  ;;  %7238 = vmatmul.mubr.bf16.vlgmr.msra.gmra.mrb[8].mxu1 %v10704_v2 }
 0x266   :  { %7247 = vmatpush1.bf16.msra.mxu0 %v8935_v42  ;;  %7278 = vmatprep.mubr.bf16.mxu0 %v10597_v4  ;;  %v813_v42 = vld [vmem:[#allocation9 + $0x3d8] sm:$0xff] }
 0x267   :  { %7411 = vmatpush1.bf16.msra.mxu1 %v8937_v13  ;;  %7442 = vmatprep.mubr.bf16.mxu1 %v10597_v4  ;;  %v9031_v13 = vcombine.low %v788_v49, %v796_v44  ;;  %v9050_v19 = vcombine.high %v805_v60, %v813_v42  ;;  %v884_v44 = vld [vmem:[#allocation9 + $0x610] sm:$0xff] }
 0x268   :  { %7248 = vmatprep.subr.bf16.mxu0 %v8952_v50  ;;  %7412 = vmatprep.subr.bf16.mxu1 %v8954_v3  ;;  %v9033_v50 = vcombine.low %v789_v26, %v797_v51  ;;  %v9048_v3 = vcombine.high %v804_v59, %v812_v32  ;;  %v892_v26 = vld [vmem:[#allocation9 + $0x650] sm:$0xff]  ;;  %v885_v51 = vld [vmem:[#allocation9 + $0x618] sm:$0xff] }
 0x26a   :  { %7249 = vmatpush1.bf16.msra.mxu0 %v8951_v54  ;;  %v829_v54 = vld [vmem:[#allocation9 + $0x458] sm:$0xff] }
 0x26b   :  { %7413 = vmatpush1.bf16.msra.mxu1 %v8953_v9  ;;  %7250 = vmatprep.subr.bf16.mxu0 %v8968_v15  ;;  %v9047_v9 = vcombine.low %v804_v59, %v812_v32  ;;  %v9049_v15 = vcombine.low %v805_v60, %v813_v42  ;;  %v9066_v14 = vcombine.high %v821_v8, %v829_v54  ;;  %v900_v32 = vld [vmem:[#allocation9 + $0x690] sm:$0xff]  ;;  %v901_v42 = vld [vmem:[#allocation9 + $0x698] sm:$0xff] }
 0x26c   :  { %7414 = vmatprep.subr.bf16.mxu1 %v8970_v10  ;;  %v9064_v10 = vcombine.high %v820_v16, %v828_v6  ;;  %v908_v60 = vld [vmem:[#allocation9 + $0x6d0] sm:$0xff] }
 0x26e   :  { %7251 = vmatpush1.bf16.msra.mxu0 %v8967_v35  ;;  %v845_v35 = vld [vmem:[#allocation9 + $0x4d8] sm:$0xff] }
 0x26f   :  { %7415 = vmatpush1.bf16.msra.mxu1 %v8969_v39  ;;  %7252 = vmatprep.subr.bf16.mxu0 %v8984_v36  ;;  %v9063_v39 = vcombine.low %v820_v16, %v828_v6  ;;  %v9065_v36 = vcombine.low %v821_v8, %v829_v54  ;;  %v9082_v37 = vcombine.high %v837_v34, %v845_v35  ;;  %v916_v6 = vld [vmem:[#allocation9 + $0x710] sm:$0xff]  ;;  %v917_v54 = vld [vmem:[#allocation9 + $0x718] sm:$0xff] }
 0x270   :  { %7416 = vmatprep.subr.bf16.mxu1 %v8986_v20  ;;  %v9080_v20 = vcombine.high %v836_v33, %v844_v21  ;;  %v924_v8 = vld [vmem:[#allocation9 + $0x750] sm:$0xff] }
 0x272   :  { %7253 = vmatpush1.bf16.msra.mxu0 %v8983_v40  ;;  %v861_v40 = vld [vmem:[#allocation9 + $0x558] sm:$0xff] }
 0x273   :  { %7417 = vmatpush1.bf16.msra.mxu1 %v8985_v29  ;;  %7254 = vmatprep.subr.bf16.mxu0 %v9000_v18  ;;  %v9079_v29 = vcombine.low %v836_v33, %v844_v21  ;;  %v9081_v18 = vcombine.low %v837_v34, %v845_v35  ;;  %v9098_v23 = vcombine.high %v853_v38, %v861_v40  ;;  %v932_v21 = vld [vmem:[#allocation9 + $0x790] sm:$0xff]  ;;  %v933_v35 = vld [vmem:[#allocation9 + $0x798] sm:$0xff] }
 0x274   :  { %7418 = vmatprep.subr.bf16.mxu1 %v9002_v22  ;;  %v9096_v22 = vcombine.high %v852_v41, %v860_v43  ;;  %v940_v34 = vld [vmem:[#allocation9 + $0x7d0] sm:$0xff] }
 0x276   :  { %7255 = vmatpush1.bf16.msra.mxu0 %v8999_v47  ;;  %v877_v47 = vld [vmem:[#allocation9 + $0x5d8] sm:$0xff] }
 0x277   :  { %7419 = vmatpush1.bf16.msra.mxu1 %v9001_v48  ;;  %7256 = vmatprep.subr.bf16.mxu0 %v9016_v56  ;;  %v9095_v48 = vcombine.low %v852_v41, %v860_v43  ;;  %v9097_v56 = vcombine.low %v853_v38, %v861_v40  ;;  %v9114_v49 = vcombine.high %v869_v46, %v877_v47  ;;  %v948_v43 = vld [vmem:[#allocation9 + $0x810] sm:$0xff]  ;;  %v949_v40 = vld [vmem:[#allocation9 + $0x818] sm:$0xff] }
 0x278   :  { %7420 = vmatprep.subr.bf16.mxu1 %v9018_v17  ;;  %v9112_v17 = vcombine.high %v868_v24, %v876_v45  ;;  %v956_v38 = vld [vmem:[#allocation9 + $0x850] sm:$0xff] }
 0x27a   :  { %7257 = vmatpush1.bf16.msra.mxu0 %v9015_v52  ;;  %v893_v52 = vld [vmem:[#allocation9 + $0x658] sm:$0xff] }
 0x27b   :  { %7421 = vmatpush1.bf16.msra.mxu1 %v9017_v53  ;;  %7258 = vmatprep.subr.bf16.mxu0 %v9032_v55  ;;  %v9111_v53 = vcombine.low %v868_v24, %v876_v45  ;;  %v9113_v55 = vcombine.low %v869_v46, %v877_v47  ;;  %v9130_v59 = vcombine.high %v885_v51, %v893_v52  ;;  %v964_v45 = vld [vmem:[#allocation9 + $0x890] sm:$0xff] }
 0x27c   :  { %7422 = vmatprep.subr.bf16.mxu1 %v9034_v57  ;;  %v9128_v57 = vcombine.high %v884_v44, %v892_v26  ;;  %v972_v46 = vld [vmem:[#allocation9 + $0x8d0] sm:$0xff]  ;;  %v9191_v47 = vcombine.low %v948_v43, %v956_v38 }
 0x27e   :  { %7259 = vmatpush1.bf16.msra.mxu0 %v9031_v13  ;;  %v909_v13 = vld [vmem:[#allocation9 + $0x6d8] sm:$0xff] }
 0x27f   :  { %7423 = vmatpush1.bf16.msra.mxu1 %v9033_v50  ;;  %7260 = vmatprep.subr.bf16.mxu0 %v9048_v3  ;;  %v9127_v50 = vcombine.low %v884_v44, %v892_v26  ;;  %v9129_v3 = vcombine.low %v885_v51, %v893_v52  ;;  %v9146_v16 = vcombine.high %v901_v42, %v909_v13  ;;  %v980_v44 = vld [vmem:[#allocation9 + $0x910] sm:$0xff]  ;;  %v981_v52 = vld [vmem:[#allocation9 + $0x918] sm:$0xff] }
 0x280   :  { %7424 = vmatprep.subr.bf16.mxu1 %v9050_v19  ;;  %v9144_v19 = vcombine.high %v900_v32, %v908_v60  ;;  %v988_v26 = vld [vmem:[#allocation9 + $0x950] sm:$0xff] }
 0x282   :  { %7261 = vmatpush1.bf16.msra.mxu0 %v9047_v9  ;;  %v925_v9 = vld [vmem:[#allocation9 + $0x758] sm:$0xff] }
 0x283   :  { %7425 = vmatpush1.bf16.msra.mxu1 %v9049_v15  ;;  %7262 = vmatprep.subr.bf16.mxu0 %v9064_v10  ;;  %v9143_v15 = vcombine.low %v900_v32, %v908_v60  ;;  %v9145_v10 = vcombine.low %v901_v42, %v909_v13  ;;  %v9162_v33 = vcombine.high %v917_v54, %v925_v9  ;;  %v996_v60 = vld [vmem:[#allocation9 + $0x990] sm:$0xff]  ;;  %v997_v13 = vld [vmem:[#allocation9 + $0x998] sm:$0xff] }
 0x284   :  { %7426 = vmatprep.subr.bf16.mxu1 %v9066_v14  ;;  %v9160_v14 = vcombine.high %v916_v6, %v924_v8  ;;  %v1004_v42 = vld [vmem:[#allocation9 + $0x9d0] sm:$0xff] }
 0x286   :  { %7263 = vmatpush1.bf16.msra.mxu0 %v9063_v39  ;;  %v941_v39 = vld [vmem:[#allocation9 + $0x7d8] sm:$0xff] }
 0x287   :  { %7427 = vmatpush1.bf16.msra.mxu1 %v9065_v36  ;;  %7264 = vmatprep.subr.bf16.mxu0 %v9080_v20  ;;  %v9159_v36 = vcombine.low %v916_v6, %v924_v8  ;;  %v9161_v20 = vcombine.low %v917_v54, %v925_v9  ;;  %v9178_v41 = vcombine.high %v933_v35, %v941_v39  ;;  %v1012_v8 = vld [vmem:[#allocation9 + $0xa10] sm:$0xff]  ;;  %v1013_v9 = vld [vmem:[#allocation9 + $0xa18] sm:$0xff] }
 0x288   :  { %7428 = vmatprep.subr.bf16.mxu1 %v9082_v37  ;;  %v9176_v37 = vcombine.high %v932_v21, %v940_v34  ;;  %v1020_v54 = vld [vmem:[#allocation9 + $0xa50] sm:$0xff] }
 0x28a   :  { %7265 = vmatpush1.bf16.msra.mxu0 %v9079_v29  ;;  %v957_v29 = vld [vmem:[#allocation9 + $0x858] sm:$0xff] }
 0x28b   :  { %7429 = vmatpush1.bf16.msra.mxu1 %v9081_v18  ;;  %7266 = vmatprep.subr.bf16.mxu0 %v9096_v22  ;;  %v9175_v18 = vcombine.low %v932_v21, %v940_v34  ;;  %v9177_v22 = vcombine.low %v933_v35, %v941_v39  ;;  %v9194_v24 = vcombine.high %v949_v40, %v957_v29  ;;  %v1028_v34 = vld [vmem:[#allocation9 + $0xa90] sm:$0xff]  ;;  %v1029_v39 = vld [vmem:[#allocation9 + $0xa98] sm:$0xff] }
 0x28c   :  { %7430 = vmatprep.subr.bf16.mxu1 %v9098_v23  ;;  %v9192_v23 = vcombine.high %v948_v43, %v956_v38  ;;  %v1036_v35 = vld [vmem:[#allocation9 + $0xad0] sm:$0xff] }
 0x28d   :  { %v1044_v38 = vld [vmem:[#allocation9 + $0xb10] sm:$0xff] }
 0x28e   :  { %7267 = vmatpush1.bf16.msra.mxu0 %v9095_v48  ;;  %v965_v48 = vld [vmem:[#allocation9 + $0x898] sm:$0xff] }
 0x28f   :  { %7431 = vmatpush1.bf16.msra.mxu1 %v9097_v56  ;;  %7268 = vmatprep.subr.bf16.mxu0 %v9112_v17  ;;  %v973_v56 = vld [vmem:[#allocation9 + $0x8d8] sm:$0xff]  ;;  %v9193_v17 = vcombine.low %v949_v40, %v957_v29  ;;  %v1052_v40 = vld [vmem:[#allocation9 + $0xb50] sm:$0xff] }
 0x290   :  { %7432 = vmatprep.subr.bf16.mxu1 %v9114_v49  ;;  %v9208_v49 = vcombine.high %v964_v45, %v972_v46  ;;  %v9210_v51 = vcombine.high %v965_v48, %v973_v56  ;;  %v1045_v29 = vld [vmem:[#allocation9 + $0xb18] sm:$0xff] }
 0x292   :  { %7269 = vmatpush1.bf16.msra.mxu0 %v9111_v53  ;;  %v989_v53 = vld [vmem:[#allocation9 + $0x958] sm:$0xff] }
 0x293   :  { %7433 = vmatpush1.bf16.msra.mxu1 %v9113_v55  ;;  %7270 = vmatprep.subr.bf16.mxu0 %v9128_v57  ;;  %v9207_v55 = vcombine.low %v964_v45, %v972_v46  ;;  %v9209_v57 = vcombine.low %v965_v48, %v973_v56  ;;  %v9226_v32 = vcombine.high %v981_v52, %v989_v53  ;;  %v1060_v46 = vld [vmem:[#allocation9 + $0xb90] sm:$0xff]  ;;  %v1061_v48 = vld [vmem:[#allocation9 + $0xb98] sm:$0xff] }
 0x294   :  { %7434 = vmatprep.subr.bf16.mxu1 %v9130_v59  ;;  %v9224_v59 = vcombine.high %v980_v44, %v988_v26  ;;  %v1069_v56 = vld [vmem:[#allocation9 + $0xbd8] sm:$0xff] }
 0x296   :  { %7271 = vmatpush1.bf16.msra.mxu0 %v9127_v50  ;;  %v1005_v50 = vld [vmem:[#allocation9 + $0x9d8] sm:$0xff] }
 0x297   :  { %7435 = vmatpush1.bf16.msra.mxu1 %v9129_v3  ;;  %7272 = vmatprep.subr.bf16.mxu0 %v9144_v19  ;;  %v9223_v3 = vcombine.low %v980_v44, %v988_v26  ;;  %v9225_v19 = vcombine.low %v981_v52, %v989_v53  ;;  %v9242_v6 = vcombine.high %v997_v13, %v1005_v50  ;;  %v1084_v52 = vld [vmem:[#allocation9 + $0xc50] sm:$0xff]  ;;  %v1077_v53 = vld [vmem:[#allocation9 + $0xc18] sm:$0xff] }
 0x298   :  { %7436 = vmatprep.subr.bf16.mxu1 %v9146_v16  ;;  %v9240_v16 = vcombine.high %v996_v60, %v1004_v42  ;;  %v9306_v26 = vcombine.high %v1061_v48, %v1069_v56 }
 0x29a   :  { %7273 = vmatpush1.bf16.msra.mxu0 %v9143_v15  ;;  %v1021_v15 = vld [vmem:[#allocation9 + $0xa58] sm:$0xff] }
 0x29b   :  { %7437 = vmatpush1.bf16.msra.mxu1 %v9145_v10  ;;  %7274 = vmatprep.subr.bf16.mxu0 %v9160_v14  ;;  %v9239_v10 = vcombine.low %v996_v60, %v1004_v42  ;;  %v9241_v14 = vcombine.low %v997_v13, %v1005_v50  ;;  %v9258_v21 = vcombine.high %v1013_v9, %v1021_v15  ;;  %v1092_v42 = vld [vmem:[#allocation9 + $0xc90] sm:$0xff]  ;;  %v1093_v50 = vld [vmem:[#allocation9 + $0xc98] sm:$0xff] }
 0x29c   :  { %7438 = vmatprep.subr.bf16.mxu1 %v9162_v33  ;;  %v9256_v33 = vcombine.high %v1012_v8, %v1020_v54  ;;  %v1100_v13 = vld [vmem:[#allocation9 + $0xcd0] sm:$0xff] }
 0x29e   :  { %7275 = vmatpush1.bf16.msra.mxu0 %v9159_v36  ;;  %v1037_v36 = vld [vmem:[#allocation9 + $0xad8] sm:$0xff] }
 0x29f   :  { %7439 = vmatpush1.bf16.msra.mxu1 %v9161_v20  ;;  %7276 = vmatprep.subr.bf16.mxu0 %v9176_v37  ;;  %v9255_v20 = vcombine.low %v1012_v8, %v1020_v54  ;;  %v9257_v37 = vcombine.low %v1013_v9, %v1021_v15  ;;  %v9274_v43 = vcombine.high %v1029_v39, %v1037_v36  ;;  %v1108_v54 = vld [vmem:[#allocation9 + $0xd10] sm:$0xff]  ;;  %v1109_v15 = vld [vmem:[#allocation9 + $0xd18] sm:$0xff] }
 0x2a0   :  { %7440 = vmatprep.subr.bf16.mxu1 %v9178_v41  ;;  %v9272_v41 = vcombine.high %v1028_v34, %v1036_v35  ;;  %v1116_v9 = vld [vmem:[#allocation9 + $0xd50] sm:$0xff] }
 0x2a2   :  { %7277 = vmatpush1.bf16.msra.mxu0 %v9175_v18  ;;  %v1053_v18 = vld [vmem:[#allocation9 + $0xb58] sm:$0xff] }
 0x2a3   :  { %7441 = vmatpush1.bf16.msra.mxu1 %v9177_v22  ;;  %7287 = vmatprep.subr.bf16.mxu0 %v9192_v23  ;;  %v9271_v22 = vcombine.low %v1028_v34, %v1036_v35  ;;  %v9273_v23 = vcombine.low %v1029_v39, %v1037_v36  ;;  %v9290_v45 = vcombine.high %v1045_v29, %v1053_v18  ;;  %v1124_v35 = vld [vmem:[#allocation9 + $0xd90] sm:$0xff]  ;;  %v1125_v36 = vld [vmem:[#allocation9 + $0xd98] sm:$0xff] }
 0x2a4   :  { %7451 = vmatprep.subr.bf16.mxu1 %v9194_v24  ;;  %v9288_v24 = vcombine.high %v1044_v38, %v1052_v40  ;;  %v1132_v39 = vld [vmem:[#allocation9 + $0xdd0] sm:$0xff] }
 0x2a5   :  { %7279 = vmatmul.mubr.bf16.vlgmr.msra.gmra.mrb[12].mxu0 %v10599_v5 }
 0x2a6   :  { %7443 = vmatmul.mubr.bf16.vlgmr.msra.gmra.mrb[12].mxu1 %v10599_v5  ;;  %7288 = vmatpush1.bf16.msra.mxu0 %v9191_v47  ;;  %v1068_v47 = vld [vmem:[#allocation9 + $0xbd0] sm:$0xff] }
 0x2a7   :  { %7319 = vmatprep.mubr.bf16.mxu0 %v10602_v11  ;;  %7452 = vmatpush1.bf16.msra.mxu1 %v9193_v17  ;;  %v9287_v17 = vcombine.low %v1044_v38, %v1052_v40  ;;  %v9304_v44 = vcombine.high %v1060_v46, %v1068_v47  ;;  %v1140_v40 = vld [vmem:[#allocation9 + $0xe10] sm:$0xff] }
 0x2a8   :  { %7483 = vmatprep.mubr.bf16.mxu1 %v10602_v11  ;;  %7289 = vmatprep.subr.bf16.mxu0 %v9208_v49  ;;  %v9289_v49 = vcombine.low %v1045_v29, %v1053_v18  ;;  %v1148_v29 = vld [vmem:[#allocation9 + $0xe50] sm:$0xff]  ;;  %v1141_v18 = vld [vmem:[#allocation9 + $0xe18] sm:$0xff] }
 0x2a9   :  { %7453 = vmatprep.subr.bf16.mxu1 %v9210_v51  ;;  %v1076_v51 = vld [vmem:[#allocation9 + $0xc10] sm:$0xff] }
 0x2aa   :  { %7290 = vmatpush1.bf16.msra.mxu0 %v9207_v55  ;;  %v1085_v55 = vld [vmem:[#allocation9 + $0xc58] sm:$0xff] }
 0x2ab   :  { %7454 = vmatpush1.bf16.msra.mxu1 %v9209_v57  ;;  %7291 = vmatprep.subr.bf16.mxu0 %v9224_v59  ;;  %v9303_v57 = vcombine.low %v1060_v46, %v1068_v47  ;;  %v9305_v59 = vcombine.low %v1061_v48, %v1069_v56  ;;  %v9322_v60 = vcombine.high %v1077_v53, %v1085_v55  ;;  %v1156_v47 = vld [vmem:[#allocation9 + $0xe90] sm:$0xff]  ;;  %v1157_v56 = vld [vmem:[#allocation9 + $0xe98] sm:$0xff] }
 0x2ac   :  { %7455 = vmatprep.subr.bf16.mxu1 %v9226_v32  ;;  %v9320_v32 = vcombine.high %v1076_v51, %v1084_v52  ;;  %v1164_v48 = vld [vmem:[#allocation9 + $0xed0] sm:$0xff] }
 0x2ae   :  { %7292 = vmatpush1.bf16.msra.mxu0 %v9223_v3  ;;  %v1101_v3 = vld [vmem:[#allocation9 + $0xcd8] sm:$0xff] }
 0x2af   :  { %7456 = vmatpush1.bf16.msra.mxu1 %v9225_v19  ;;  %7293 = vmatprep.subr.bf16.mxu0 %v9240_v16  ;;  %v9319_v19 = vcombine.low %v1076_v51, %v1084_v52  ;;  %v9321_v16 = vcombine.low %v1077_v53, %v1085_v55  ;;  %v9338_v8 = vcombine.high %v1093_v50, %v1101_v3  ;;  %v1172_v52 = vld [vmem:[#allocation9 + $0xf10] sm:$0xff]  ;;  %v1173_v55 = vld [vmem:[#allocation9 + $0xf18] sm:$0xff] }
 0x2b0   :  { %7457 = vmatprep.subr.bf16.mxu1 %v9242_v6  ;;  %v9336_v6 = vcombine.high %v1092_v42, %v1100_v13  ;;  %v1180_v53 = vld [vmem:[#allocation9 + $0xf50] sm:$0xff] }
 0x2b2   :  { %7294 = vmatpush1.bf16.msra.mxu0 %v9239_v10  ;;  %v1117_v10 = vld [vmem:[#allocation9 + $0xd58] sm:$0xff] }
 0x2b3   :  { %7458 = vmatpush1.bf16.msra.mxu1 %v9241_v14  ;;  %7295 = vmatprep.subr.bf16.mxu0 %v9256_v33  ;;  %v9335_v14 = vcombine.low %v1092_v42, %v1100_v13  ;;  %v9337_v33 = vcombine.low %v1093_v50, %v1101_v3  ;;  %v9354_v34 = vcombine.high %v1109_v15, %v1117_v10  ;;  %v1188_v13 = vld [vmem:[#allocation9 + $0xf90] sm:$0xff]  ;;  %v1189_v3 = vld [vmem:[#allocation9 + $0xf98] sm:$0xff] }
 0x2b4   :  { %7459 = vmatprep.subr.bf16.mxu1 %v9258_v21  ;;  %v9352_v21 = vcombine.high %v1108_v54, %v1116_v9  ;;  %v1196_v50 = vld [vmem:[#allocation9 + $0xfd0] sm:$0xff] }
 0x2b6   :  { %7296 = vmatpush1.bf16.msra.mxu0 %v9255_v20  ;;  %v1133_v20 = vld [vmem:[#allocation9 + $0xdd8] sm:$0xff] }
 0x2b7   :  { %7460 = vmatpush1.bf16.msra.mxu1 %v9257_v37  ;;  %7297 = vmatprep.subr.bf16.mxu0 %v9272_v41  ;;  %v9351_v37 = vcombine.low %v1108_v54, %v1116_v9  ;;  %v9353_v41 = vcombine.low %v1109_v15, %v1117_v10  ;;  %v9370_v38 = vcombine.high %v1125_v36, %v1133_v20  ;;  %v1204_v9 = vld [vmem:[#allocation9 + $0x1010] sm:$0xff]  ;;  %v1205_v10 = vld [vmem:[#allocation9 + $0x1018] sm:$0xff] }
 0x2b8   :  { %7461 = vmatprep.subr.bf16.mxu1 %v9274_v43  ;;  %v9368_v43 = vcombine.high %v1124_v35, %v1132_v39  ;;  %v1212_v15 = vld [vmem:[#allocation9 + $0x1050] sm:$0xff] }
 0x2ba   :  { %7298 = vmatpush1.bf16.msra.mxu0 %v9271_v22  ;;  %v1149_v22 = vld [vmem:[#allocation9 + $0xe58] sm:$0xff] }
 0x2bb   :  { %7462 = vmatpush1.bf16.msra.mxu1 %v9273_v23  ;;  %7299 = vmatprep.subr.bf16.mxu0 %v9288_v24  ;;  %v9367_v23 = vcombine.low %v1124_v35, %v1132_v39  ;;  %v9369_v24 = vcombine.low %v1125_v36, %v1133_v20  ;;  %v9386_v46 = vcombine.high %v1141_v18, %v1149_v22  ;;  %v1220_v39 = vld [vmem:[#allocation9 + $0x1090] sm:$0xff] }
 0x2bc   :  { %7463 = vmatprep.subr.bf16.mxu1 %v9290_v45  ;;  %v9384_v45 = vcombine.high %v1140_v40, %v1148_v29  ;;  %v1228_v36 = vld [vmem:[#allocation9 + $0x10d0] sm:$0xff]  ;;  %v9447_v20 = vcombine.low %v1204_v9, %v1212_v15 }
 0x2be   :  { %7300 = vmatpush1.bf16.msra.mxu0 %v9287_v17  ;;  %v1165_v17 = vld [vmem:[#allocation9 + $0xed8] sm:$0xff] }
 0x2bf   :  { %7464 = vmatpush1.bf16.msra.mxu1 %v9289_v49  ;;  %7301 = vmatprep.subr.bf16.mxu0 %v9304_v44  ;;  %v9383_v49 = vcombine.low %v1140_v40, %v1148_v29  ;;  %v9385_v44 = vcombine.low %v1141_v18, %v1149_v22  ;;  %v9402_v51 = vcombine.high %v1157_v56, %v1165_v17  ;;  %v1236_v40 = vld [vmem:[#allocation9 + $0x1110] sm:$0xff]  ;;  %v1237_v22 = vld [vmem:[#allocation9 + $0x1118] sm:$0xff] }
 0x2c0   :  { %7465 = vmatprep.subr.bf16.mxu1 %v9306_v26  ;;  %v9400_v26 = vcombine.high %v1156_v47, %v1164_v48  ;;  %v1244_v29 = vld [vmem:[#allocation9 + $0x1150] sm:$0xff] }
 0x2c2   :  { %7302 = vmatpush1.bf16.msra.mxu0 %v9303_v57  ;;  %v1181_v57 = vld [vmem:[#allocation9 + $0xf58] sm:$0xff] }
 0x2c3   :  { %7466 = vmatpush1.bf16.msra.mxu1 %v9305_v59  ;;  %7303 = vmatprep.subr.bf16.mxu0 %v9320_v32  ;;  %v9399_v59 = vcombine.low %v1156_v47, %v1164_v48  ;;  %v9401_v32 = vcombine.low %v1157_v56, %v1165_v17  ;;  %v9418_v42 = vcombine.high %v1173_v55, %v1181_v57  ;;  %v1252_v48 = vld [vmem:[#allocation9 + $0x1190] sm:$0xff]  ;;  %v1253_v17 = vld [vmem:[#allocation9 + $0x1198] sm:$0xff] }
 0x2c4   :  { %7467 = vmatprep.subr.bf16.mxu1 %v9322_v60  ;;  %v9416_v60 = vcombine.high %v1172_v52, %v1180_v53  ;;  %v1260_v56 = vld [vmem:[#allocation9 + $0x11d0] sm:$0xff] }
 0x2c6   :  { %7304 = vmatpush1.bf16.msra.mxu0 %v9319_v19  ;;  %v1197_v19 = vld [vmem:[#allocation9 + $0xfd8] sm:$0xff] }
 0x2c7   :  { %7468 = vmatpush1.bf16.msra.mxu1 %v9321_v16  ;;  %7305 = vmatprep.subr.bf16.mxu0 %v9336_v6  ;;  %v9415_v16 = vcombine.low %v1172_v52, %v1180_v53  ;;  %v9417_v6 = vcombine.low %v1173_v55, %v1181_v57  ;;  %v9434_v54 = vcombine.high %v1189_v3, %v1197_v19  ;;  %v1268_v53 = vld [vmem:[#allocation9 + $0x1210] sm:$0xff]  ;;  %v1269_v57 = vld [vmem:[#allocation9 + $0x1218] sm:$0xff] }
 0x2c8   :  { %7469 = vmatprep.subr.bf16.mxu1 %v9338_v8  ;;  %v9432_v8 = vcombine.high %v1188_v13, %v1196_v50  ;;  %v1276_v55 = vld [vmem:[#allocation9 + $0x1250] sm:$0xff] }
 0x2ca   :  { %7306 = vmatpush1.bf16.msra.mxu0 %v9335_v14  ;;  %v1213_v14 = vld [vmem:[#allocation9 + $0x1058] sm:$0xff] }
 0x2cb   :  { %7470 = vmatpush1.bf16.msra.mxu1 %v9337_v33  ;;  %7307 = vmatprep.subr.bf16.mxu0 %v9352_v21  ;;  %v9431_v33 = vcombine.low %v1188_v13, %v1196_v50  ;;  %v9433_v21 = vcombine.low %v1189_v3, %v1197_v19  ;;  %v9450_v35 = vcombine.high %v1205_v10, %v1213_v14  ;;  %v1284_v50 = vld [vmem:[#allocation9 + $0x1290] sm:$0xff]  ;;  %v1285_v19 = vld [vmem:[#allocation9 + $0x1298] sm:$0xff] }
 0x2cc   :  { %7471 = vmatprep.subr.bf16.mxu1 %v9354_v34  ;;  %v9448_v34 = vcombine.high %v1204_v9, %v1212_v15  ;;  %v1292_v3 = vld [vmem:[#allocation9 + $0x12d0] sm:$0xff] }
 0x2cd   :  { %v1300_v15 = vld [vmem:[#allocation9 + $0x1310] sm:$0xff] }
 0x2ce   :  { %7308 = vmatpush1.bf16.msra.mxu0 %v9351_v37  ;;  %v1221_v37 = vld [vmem:[#allocation9 + $0x1098] sm:$0xff] }
 0x2cf   :  { %7472 = vmatpush1.bf16.msra.mxu1 %v9353_v41  ;;  %7309 = vmatprep.subr.bf16.mxu0 %v9368_v43  ;;  %v1229_v41 = vld [vmem:[#allocation9 + $0x10d8] sm:$0xff]  ;;  %v9449_v43 = vcombine.low %v1205_v10, %v1213_v14  ;;  %v1308_v10 = vld [vmem:[#allocation9 + $0x1350] sm:$0xff] }
 0x2d0   :  { %7473 = vmatprep.subr.bf16.mxu1 %v9370_v38  ;;  %v9464_v38 = vcombine.high %v1220_v39, %v1228_v36  ;;  %v9466_v18 = vcombine.high %v1221_v37, %v1229_v41  ;;  %v1301_v14 = vld [vmem:[#allocation9 + $0x1318] sm:$0xff] }
 0x2d2   :  { %7310 = vmatpush1.bf16.msra.mxu0 %v9367_v23  ;;  %v1245_v23 = vld [vmem:[#allocation9 + $0x1158] sm:$0xff] }
 0x2d3   :  { %7474 = vmatpush1.bf16.msra.mxu1 %v9369_v24  ;;  %7311 = vmatprep.subr.bf16.mxu0 %v9384_v45  ;;  %v9463_v24 = vcombine.low %v1220_v39, %v1228_v36  ;;  %v9465_v45 = vcombine.low %v1221_v37, %v1229_v41  ;;  %v9482_v47 = vcombine.high %v1237_v22, %v1245_v23  ;;  %v1316_v36 = vld [vmem:[#allocation9 + $0x1390] sm:$0xff]  ;;  %v1317_v37 = vld [vmem:[#allocation9 + $0x1398] sm:$0xff] }
 0x2d4   :  { %7475 = vmatprep.subr.bf16.mxu1 %v9386_v46  ;;  %v9480_v46 = vcombine.high %v1236_v40, %v1244_v29  ;;  %v1325_v41 = vld [vmem:[#allocation9 + $0x13d8] sm:$0xff] }
 0x2d6   :  { %7312 = vmatpush1.bf16.msra.mxu0 %v9383_v49  ;;  %v1261_v49 = vld [vmem:[#allocation9 + $0x11d8] sm:$0xff] }
 0x2d7   :  { %7476 = vmatpush1.bf16.msra.mxu1 %v9385_v44  ;;  %7313 = vmatprep.subr.bf16.mxu0 %v9400_v26  ;;  %v9479_v44 = vcombine.low %v1236_v40, %v1244_v29  ;;  %v9481_v26 = vcombine.low %v1237_v22, %v1245_v23  ;;  %v9498_v52 = vcombine.high %v1253_v17, %v1261_v49  ;;  %v1340_v22 = vld [vmem:[#allocation9 + $0x1450] sm:$0xff]  ;;  %v1333_v23 = vld [vmem:[#allocation9 + $0x1418] sm:$0xff] }
 0x2d8   :  { %7477 = vmatprep.subr.bf16.mxu1 %v9402_v51  ;;  %v9496_v51 = vcombine.high %v1252_v48, %v1260_v56  ;;  %v9562_v29 = vcombine.high %v1317_v37, %v1325_v41 }
 0x2da   :  { %7314 = vmatpush1.bf16.msra.mxu0 %v9399_v59  ;;  %v1277_v59 = vld [vmem:[#allocation9 + $0x1258] sm:$0xff] }
 0x2db   :  { %7478 = vmatpush1.bf16.msra.mxu1 %v9401_v32  ;;  %7315 = vmatprep.subr.bf16.mxu0 %v9416_v60  ;;  %v9495_v32 = vcombine.low %v1252_v48, %v1260_v56  ;;  %v9497_v60 = vcombine.low %v1253_v17, %v1261_v49  ;;  %v9514_v13 = vcombine.high %v1269_v57, %v1277_v59  ;;  %v1348_v56 = vld [vmem:[#allocation9 + $0x1490] sm:$0xff]  ;;  %v1349_v49 = vld [vmem:[#allocation9 + $0x1498] sm:$0xff] }
 0x2dc   :  { %7479 = vmatprep.subr.bf16.mxu1 %v9418_v42  ;;  %v9512_v42 = vcombine.high %v1268_v53, %v1276_v55  ;;  %v1356_v17 = vld [vmem:[#allocation9 + $0x14d0] sm:$0xff] }
 0x2de   :  { %7316 = vmatpush1.bf16.msra.mxu0 %v9415_v16  ;;  %v1293_v16 = vld [vmem:[#allocation9 + $0x12d8] sm:$0xff] }
 0x2df   :  { %7480 = vmatpush1.bf16.msra.mxu1 %v9417_v6  ;;  %7317 = vmatprep.subr.bf16.mxu0 %v9432_v8  ;;  %v9511_v6 = vcombine.low %v1268_v53, %v1276_v55  ;;  %v9513_v8 = vcombine.low %v1269_v57, %v1277_v59  ;;  %v9530_v9 = vcombine.high %v1285_v19, %v1293_v16  ;;  %v1364_v55 = vld [vmem:[#allocation9 + $0x1510] sm:$0xff]  ;;  %v1365_v59 = vld [vmem:[#allocation9 + $0x1518] sm:$0xff] }
 0x2e0   :  { %7481 = vmatprep.subr.bf16.mxu1 %v9434_v54  ;;  %v9528_v54 = vcombine.high %v1284_v50, %v1292_v3  ;;  %v1372_v57 = vld [vmem:[#allocation9 + $0x1550] sm:$0xff] }
 0x2e2   :  { %7318 = vmatpush1.bf16.msra.mxu0 %v9431_v33  ;;  %v1309_v33 = vld [vmem:[#allocation9 + $0x1358] sm:$0xff] }
 0x2e3   :  { %7482 = vmatpush1.bf16.msra.mxu1 %v9433_v21  ;;  %7328 = vmatprep.subr.bf16.mxu0 %v9448_v34  ;;  %v9527_v21 = vcombine.low %v1284_v50, %v1292_v3  ;;  %v9529_v34 = vcombine.low %v1285_v19, %v1293_v16  ;;  %v9546_v39 = vcombine.high %v1301_v14, %v1309_v33  ;;  %v1380_v3 = vld [vmem:[#allocation9 + $0x1590] sm:$0xff]  ;;  %v1381_v16 = vld [vmem:[#allocation9 + $0x1598] sm:$0xff] }
 0x2e4   :  { %7492 = vmatprep.subr.bf16.mxu1 %v9450_v35  ;;  %v9544_v35 = vcombine.high %v1300_v15, %v1308_v10  ;;  %v1388_v19 = vld [vmem:[#allocation9 + $0x15d0] sm:$0xff] }
 0x2e5   :  { %7320 = vmatmul.mubr.bf16.vlgmr.msra.gmra.mrb[12].mxu0 %v10657_v7 }
 0x2e6   :  { %7484 = vmatmul.mubr.bf16.vlgmr.msra.gmra.mrb[12].mxu1 %v10657_v7  ;;  %7329 = vmatpush1.bf16.msra.mxu0 %v9447_v20  ;;  %v1324_v20 = vld [vmem:[#allocation9 + $0x13d0] sm:$0xff] }
 0x2e7   :  { %7360 = vmatprep.mubr.bf16.mxu0 %v10660_v12  ;;  %7493 = vmatpush1.bf16.msra.mxu1 %v9449_v43  ;;  %v9543_v43 = vcombine.low %v1300_v15, %v1308_v10  ;;  %v9560_v40 = vcombine.high %v1316_v36, %v1324_v20  ;;  %v1396_v10 = vld [vmem:[#allocation9 + $0x1610] sm:$0xff] }
 0x2e8   :  { %7524 = vmatprep.mubr.bf16.mxu1 %v10660_v12  ;;  %7330 = vmatprep.subr.bf16.mxu0 %v9464_v38  ;;  %v9545_v38 = vcombine.low %v1301_v14, %v1309_v33  ;;  %v1404_v14 = vld [vmem:[#allocation9 + $0x1650] sm:$0xff]  ;;  %v1397_v33 = vld [vmem:[#allocation9 + $0x1618] sm:$0xff] }
 0x2e9   :  { %7494 = vmatprep.subr.bf16.mxu1 %v9466_v18  ;;  %v1332_v18 = vld [vmem:[#allocation9 + $0x1410] sm:$0xff] }
 0x2ea   :  { %7331 = vmatpush1.bf16.msra.mxu0 %v9463_v24  ;;  %v1341_v24 = vld [vmem:[#allocation9 + $0x1458] sm:$0xff] }
 0x2eb   :  { %7495 = vmatpush1.bf16.msra.mxu1 %v9465_v45  ;;  %7332 = vmatprep.subr.bf16.mxu0 %v9480_v46  ;;  %v9559_v45 = vcombine.low %v1316_v36, %v1324_v20  ;;  %v9561_v46 = vcombine.low %v1317_v37, %v1325_v41  ;;  %v9578_v48 = vcombine.high %v1333_v23, %v1341_v24  ;;  %v1412_v20 = vld [vmem:[#allocation9 + $0x1690] sm:$0xff]  ;;  %v1413_v41 = vld [vmem:[#allocation9 + $0x1698] sm:$0xff] }
 0x2ec   :  { %7496 = vmatprep.subr.bf16.mxu1 %v9482_v47  ;;  %v9576_v47 = vcombine.high %v1332_v18, %v1340_v22  ;;  %v1420_v37 = vld [vmem:[#allocation9 + $0x16d0] sm:$0xff] }
 0x2ee   :  { %7333 = vmatpush1.bf16.msra.mxu0 %v9479_v44  ;;  %v1357_v44 = vld [vmem:[#allocation9 + $0x14d8] sm:$0xff] }
 0x2ef   :  { %7497 = vmatpush1.bf16.msra.mxu1 %v9481_v26  ;;  %7334 = vmatprep.subr.bf16.mxu0 %v9496_v51  ;;  %v9575_v26 = vcombine.low %v1332_v18, %v1340_v22  ;;  %v9577_v51 = vcombine.low %v1333_v23, %v1341_v24  ;;  %v9594_v53 = vcombine.high %v1349_v49, %v1357_v44  ;;  %v1428_v22 = vld [vmem:[#allocation9 + $0x1710] sm:$0xff]  ;;  %v1429_v24 = vld [vmem:[#allocation9 + $0x1718] sm:$0xff] }
 0x2f0   :  { %7498 = vmatprep.subr.bf16.mxu1 %v9498_v52  ;;  %v9592_v52 = vcombine.high %v1348_v56, %v1356_v17  ;;  %v1436_v23 = vld [vmem:[#allocation9 + $0x1750] sm:$0xff] }
 0x2f2   :  { %7335 = vmatpush1.bf16.msra.mxu0 %v9495_v32  ;;  %v1373_v32 = vld [vmem:[#allocation9 + $0x1558] sm:$0xff] }
 0x2f3   :  { %7499 = vmatpush1.bf16.msra.mxu1 %v9497_v60  ;;  %7336 = vmatprep.subr.bf16.mxu0 %v9512_v42  ;;  %v9591_v60 = vcombine.low %v1348_v56, %v1356_v17  ;;  %v9593_v42 = vcombine.low %v1349_v49, %v1357_v44  ;;  %v9610_v50 = vcombine.high %v1365_v59, %v1373_v32  ;;  %v1444_v17 = vld [vmem:[#allocation9 + $0x1790] sm:$0xff]  ;;  %v1445_v44 = vld [vmem:[#allocation9 + $0x1798] sm:$0xff] }
 0x2f4   :  { %7500 = vmatprep.subr.bf16.mxu1 %v9514_v13  ;;  %v9608_v13 = vcombine.high %v1364_v55, %v1372_v57  ;;  %v1452_v49 = vld [vmem:[#allocation9 + $0x17d0] sm:$0xff] }
 0x2f6   :  { %7337 = vmatpush1.bf16.msra.mxu0 %v9511_v6  ;;  %v1389_v6 = vld [vmem:[#allocation9 + $0x15d8] sm:$0xff] }
 0x2f7   :  { %7501 = vmatpush1.bf16.msra.mxu1 %v9513_v8  ;;  %7338 = vmatprep.subr.bf16.mxu0 %v9528_v54  ;;  %v9607_v8 = vcombine.low %v1364_v55, %v1372_v57  ;;  %v9609_v54 = vcombine.low %v1365_v59, %v1373_v32  ;;  %v9626_v15 = vcombine.high %v1381_v16, %v1389_v6  ;;  %v1460_v57 = vld [vmem:[#allocation9 + $0x1810] sm:$0xff]  ;;  %v1461_v32 = vld [vmem:[#allocation9 + $0x1818] sm:$0xff] }
 0x2f8   :  { %7502 = vmatprep.subr.bf16.mxu1 %v9530_v9  ;;  %v9624_v9 = vcombine.high %v1380_v3, %v1388_v19  ;;  %v1468_v59 = vld [vmem:[#allocation9 + $0x1850] sm:$0xff] }
 0x2fa   :  { %7339 = vmatpush1.bf16.msra.mxu0 %v9527_v21  ;;  %v1405_v21 = vld [vmem:[#allocation9 + $0x1658] sm:$0xff] }
 0x2fb   :  { %7503 = vmatpush1.bf16.msra.mxu1 %v9529_v34  ;;  %7340 = vmatprep.subr.bf16.mxu0 %v9544_v35  ;;  %v9623_v34 = vcombine.low %v1380_v3, %v1388_v19  ;;  %v9625_v35 = vcombine.low %v1381_v16, %v1389_v6  ;;  %v9642_v36 = vcombine.high %v1397_v33, %v1405_v21  ;;  %v1476_v19 = vld [vmem:[#allocation9 + $0x1890] sm:$0xff] }
 0x2fc   :  { %7504 = vmatprep.subr.bf16.mxu1 %v9546_v39  ;;  %v9640_v39 = vcombine.high %v1396_v10, %v1404_v14  ;;  %v1484_v16 = vld [vmem:[#allocation9 + $0x18d0] sm:$0xff]  ;;  %v9703_v6 = vcombine.low %v1460_v57, %v1468_v59 }
 0x2fe   :  { %7341 = vmatpush1.bf16.msra.mxu0 %v9543_v43  ;;  %v1421_v43 = vld [vmem:[#allocation9 + $0x16d8] sm:$0xff] }
 0x2ff   :  { %7505 = vmatpush1.bf16.msra.mxu1 %v9545_v38  ;;  %7342 = vmatprep.subr.bf16.mxu0 %v9560_v40  ;;  %v9639_v38 = vcombine.low %v1396_v10, %v1404_v14  ;;  %v9641_v40 = vcombine.low %v1397_v33, %v1405_v21  ;;  %v9658_v18 = vcombine.high %v1413_v41, %v1421_v43  ;;  %v1492_v10 = vld [vmem:[#allocation9 + $0x1910] sm:$0xff]  ;;  %v1493_v21 = vld [vmem:[#allocation9 + $0x1918] sm:$0xff] }
 0x300   :  { %7506 = vmatprep.subr.bf16.mxu1 %v9562_v29  ;;  %v9656_v29 = vcombine.high %v1412_v20, %v1420_v37  ;;  %v1500_v14 = vld [vmem:[#allocation9 + $0x1950] sm:$0xff] }
 0x302   :  { %7343 = vmatpush1.bf16.msra.mxu0 %v9559_v45  ;;  %v1437_v45 = vld [vmem:[#allocation9 + $0x1758] sm:$0xff] }
 0x303   :  { %7507 = vmatpush1.bf16.msra.mxu1 %v9561_v46  ;;  %7344 = vmatprep.subr.bf16.mxu0 %v9576_v47  ;;  %v9655_v46 = vcombine.low %v1412_v20, %v1420_v37  ;;  %v9657_v47 = vcombine.low %v1413_v41, %v1421_v43  ;;  %v9674_v56 = vcombine.high %v1429_v24, %v1437_v45  ;;  %v1508_v37 = vld [vmem:[#allocation9 + $0x1990] sm:$0xff]  ;;  %v1509_v43 = vld [vmem:[#allocation9 + $0x1998] sm:$0xff] }
 0x304   :  { %7508 = vmatprep.subr.bf16.mxu1 %v9578_v48  ;;  %v9672_v48 = vcombine.high %v1428_v22, %v1436_v23  ;;  %v1516_v41 = vld [vmem:[#allocation9 + $0x19d0] sm:$0xff] }
 0x306   :  { %7345 = vmatpush1.bf16.msra.mxu0 %v9575_v26  ;;  %v1453_v26 = vld [vmem:[#allocation9 + $0x17d8] sm:$0xff] }
 0x307   :  { %7509 = vmatpush1.bf16.msra.mxu1 %v9577_v51  ;;  %7346 = vmatprep.subr.bf16.mxu0 %v9592_v52  ;;  %v9671_v51 = vcombine.low %v1428_v22, %v1436_v23  ;;  %v9673_v52 = vcombine.low %v1429_v24, %v1437_v45  ;;  %v9690_v55 = vcombine.high %v1445_v44, %v1453_v26  ;;  %v1524_v23 = vld [vmem:[#allocation9 + $0x1a10] sm:$0xff]  ;;  %v1525_v45 = vld [vmem:[#allocation9 + $0x1a18] sm:$0xff] }
 0x308   :  { %7510 = vmatprep.subr.bf16.mxu1 %v9594_v53  ;;  %v9688_v53 = vcombine.high %v1444_v17, %v1452_v49  ;;  %v1532_v24 = vld [vmem:[#allocation9 + $0x1a50] sm:$0xff] }
 0x30a   :  { %7347 = vmatpush1.bf16.msra.mxu0 %v9591_v60  ;;  %v1469_v60 = vld [vmem:[#allocation9 + $0x1858] sm:$0xff] }
 0x30b   :  { %7511 = vmatpush1.bf16.msra.mxu1 %v9593_v42  ;;  %7348 = vmatprep.subr.bf16.mxu0 %v9608_v13  ;;  %v9687_v42 = vcombine.low %v1444_v17, %v1452_v49  ;;  %v9689_v13 = vcombine.low %v1445_v44, %v1453_v26  ;;  %v9706_v3 = vcombine.high %v1461_v32, %v1469_v60  ;;  %v1540_v49 = vld [vmem:[#allocation9 + $0x1a90] sm:$0xff]  ;;  %v1541_v26 = vld [vmem:[#allocation9 + $0x1a98] sm:$0xff] }
 0x30c   :  { %7512 = vmatprep.subr.bf16.mxu1 %v9610_v50  ;;  %v9704_v50 = vcombine.high %v1460_v57, %v1468_v59  ;;  %v1548_v44 = vld [vmem:[#allocation9 + $0x1ad0] sm:$0xff] }
 0x30d   :  { %v9784_v57 = vcombine.high %v1540_v49, %v1548_v44 }
 0x30e   :  { %7349 = vmatpush1.bf16.msra.mxu0 %v9607_v8  ;;  %v1477_v8 = vld [vmem:[#allocation9 + $0x1898] sm:$0xff] }
 0x30f   :  { %7513 = vmatpush1.bf16.msra.mxu1 %v9609_v54  ;;  %7350 = vmatprep.subr.bf16.mxu0 %v9624_v9  ;;  %v1485_v54 = vld [vmem:[#allocation9 + $0x18d8] sm:$0xff]  ;;  %v9705_v9 = vcombine.low %v1461_v32, %v1469_v60  ;;  %v1556_v32 = vld [vmem:[#allocation9 + $0x1b10] sm:$0xff] }
 0x310   :  { %7514 = vmatprep.subr.bf16.mxu1 %v9626_v15  ;;  %v9720_v15 = vcombine.high %v1476_v19, %v1484_v16  ;;  %v9722_v33 = vcombine.high %v1477_v8, %v1485_v54  ;;  %v1564_v60 = vld [vmem:[#allocation9 + $0x1b50] sm:$0xff] }
 0x312   :  { %7351 = vmatpush1.bf16.msra.mxu0 %v9623_v34  ;;  %v1501_v34 = vld [vmem:[#allocation9 + $0x1958] sm:$0xff] }
 0x313   :  { %7515 = vmatpush1.bf16.msra.mxu1 %v9625_v35  ;;  %7352 = vmatprep.subr.bf16.mxu0 %v9640_v39  ;;  %v9719_v35 = vcombine.low %v1476_v19, %v1484_v16  ;;  %v9721_v39 = vcombine.low %v1477_v8, %v1485_v54  ;;  %v9738_v20 = vcombine.high %v1493_v21, %v1501_v34 }
 0x314   :  { %7516 = vmatprep.subr.bf16.mxu1 %v9642_v36  ;;  %v9736_v36 = vcombine.high %v1492_v10, %v1500_v14  ;;  %v9800_v54 = vcombine.high %v1556_v32, %v1564_v60 }
 0x316   :  { %7353 = vmatpush1.bf16.msra.mxu0 %v9639_v38  ;;  %v1517_v38 = vld [vmem:[#allocation9 + $0x19d8] sm:$0xff] }
 0x317   :  { %7517 = vmatpush1.bf16.msra.mxu1 %v9641_v40  ;;  %7354 = vmatprep.subr.bf16.mxu0 %v9656_v29  ;;  %v9735_v40 = vcombine.low %v1492_v10, %v1500_v14  ;;  %v9737_v29 = vcombine.low %v1493_v21, %v1501_v34  ;;  %v9754_v22 = vcombine.high %v1509_v43, %v1517_v38  ;;  %v1573_v21 = vld [vmem:[#allocation9 + $0x1b98] sm:$0xff] }
 0x318   :  { %7518 = vmatprep.subr.bf16.mxu1 %v9658_v18  ;;  %v9752_v18 = vcombine.high %v1508_v37, %v1516_v41  ;;  %v1581_v34 = vld [vmem:[#allocation9 + $0x1bd8] sm:$0xff] }
 0x31a   :  { %7355 = vmatpush1.bf16.msra.mxu0 %v9655_v46  ;;  %v1533_v46 = vld [vmem:[#allocation9 + $0x1a58] sm:$0xff] }
 0x31b   :  { %7519 = vmatpush1.bf16.msra.mxu1 %v9657_v47  ;;  %7356 = vmatprep.subr.bf16.mxu0 %v9672_v48  ;;  %v9751_v47 = vcombine.low %v1508_v37, %v1516_v41  ;;  %v9753_v48 = vcombine.low %v1509_v43, %v1517_v38  ;;  %v9770_v17 = vcombine.high %v1525_v45, %v1533_v46 }
 0x31c   :  { %7520 = vmatprep.subr.bf16.mxu1 %v9674_v56  ;;  %v9768_v56 = vcombine.high %v1524_v23, %v1532_v24 }
 0x31e   :  { %7357 = vmatpush1.bf16.msra.mxu0 %v9671_v51  ;;  %v1549_v51 = vld [vmem:[#allocation9 + $0x1ad8] sm:$0xff] }
 0x31f   :  { %7521 = vmatpush1.bf16.msra.mxu1 %v9673_v52  ;;  %7358 = vmatprep.subr.bf16.mxu0 %v9688_v53  ;;  %v9767_v52 = vcombine.low %v1524_v23, %v1532_v24  ;;  %v1714_v53 = vld [vmem:[#allocation10] sm:$0xff]  ;;  %v9786_v59 = vcombine.high %v1541_v26, %v1549_v51  ;;  %v9785_v8 = vcombine.low %v1541_v26, %v1549_v51 }
 0x320   :  { %7522 = vmatprep.subr.bf16.mxu1 %v9690_v55  ;;  %v9769_v55 = vcombine.low %v1525_v45, %v1533_v46  ;;  %v1725_v19 = vrot.slane %v1714_v53, %v10530_v30  ;;  %v1733_v16 = vrot.slane %v1714_v53, %v10533_v31  ;;  %v9818_v46 = vcombine.high %v1573_v21, %v1581_v34 }
 0x322   :  { %7359 = vmatpush1.bf16.msra.mxu0 %v9687_v42  ;;  %v1721_v42 = vrot.slane %v1714_v53, %v10525_v28 }
 0x323   :  { %7523 = vmatpush1.bf16.msra.mxu1 %v9689_v13  ;;  %7369 = vmatprep.subr.bf16.mxu0 %v9704_v50  ;;  %v1729_v13 = vrot.slane %v1714_v53, %v10547_v58  ;;  %v1557_v50 = vld [vmem:[#allocation9 + $0x1b18] sm:$0xff] }
 0x324   :  { %7533 = vmatprep.subr.bf16.mxu1 %v9706_v3  ;;  %v1565_v3 = vld [vmem:[#allocation9 + $0x1b58] sm:$0xff] }
 0x325   :  { %7361 = vmatmul.mubr.bf16.vlgmr.msra.gmra.mrb[12].mxu0 %v10692_v25  ;;  %v9802_v14 = vcombine.high %v1557_v50, %v1565_v3  ;;  %v1597_v53 = vld [vmem:[#allocation9 + $0x1c58] sm:$0xff] }
 0x326   :  { %7525 = vmatmul.mubr.bf16.vlgmr.msra.gmra.mrb[12].mxu1 %v10692_v25  ;;  %7370 = vmatpush1.bf16.msra.mxu0 %v9703_v6  ;;  %v9783_v6 = vcombine.low %v1540_v49, %v1548_v44  ;;  %v1588_v49 = vld [vmem:[#allocation9 + $0x1c10] sm:$0xff] }
 0x327   :  { %7401 = vmatprep.mubr.bf16.mxu0 %v10695_v63  ;;  %7534 = vmatpush1.bf16.msra.mxu1 %v9705_v9  ;;  %v1572_v9 = vld [vmem:[#allocation9 + $0x1b90] sm:$0xff] }
 0x328   :  { %7565 = vmatprep.mubr.bf16.mxu1 %v10695_v63  ;;  %7371 = vmatprep.subr.bf16.mxu0 %v9720_v15  ;;  %v1596_v44 = vld [vmem:[#allocation9 + $0x1c50] sm:$0xff] }
 0x329   :  { %7535 = vmatprep.subr.bf16.mxu1 %v9722_v33  ;;  %v1580_v33 = vld [vmem:[#allocation9 + $0x1bd0] sm:$0xff] }
 0x32a   :  { %7372 = vmatpush1.bf16.msra.mxu0 %v9719_v35  ;;  %v9816_v45 = vcombine.high %v1572_v9, %v1580_v33 }
 0x32b   :  { %7536 = vmatpush1.bf16.msra.mxu1 %v9721_v39  ;;  %7373 = vmatprep.subr.bf16.mxu0 %v9736_v36 }
 0x32c   :  { %7537 = vmatprep.subr.bf16.mxu1 %v9738_v20 }
 0x32e   :  { %7374 = vmatpush1.bf16.msra.mxu0 %v9735_v40  ;;  %v9799_v40 = vcombine.low %v1556_v32, %v1564_v60  ;;  %v9817_v32 = vcombine.low %v1573_v21, %v1581_v34 }
 0x32f   :  { %7538 = vmatpush1.bf16.msra.mxu1 %v9737_v29  ;;  %7375 = vmatprep.subr.bf16.mxu0 %v9752_v18  ;;  %v9801_v29 = vcombine.low %v1557_v50, %v1565_v3 }
 0x330   :  { %7539 = vmatprep.subr.bf16.mxu1 %v9754_v22 }
 0x332   :  { %7376 = vmatpush1.bf16.msra.mxu0 %v9751_v47 }
 0x333   :  { %7540 = vmatpush1.bf16.msra.mxu1 %v9753_v48  ;;  %7377 = vmatprep.subr.bf16.mxu0 %v9768_v56 }
 0x334   :  { %7541 = vmatprep.subr.bf16.mxu1 %v9770_v17 }
 0x336   :  { %7378 = vmatpush1.bf16.msra.mxu0 %v9767_v52  ;;  %v1589_v52 = vld [vmem:[#allocation9 + $0x1c18] sm:$0xff] }
 0x337   :  { %7542 = vmatpush1.bf16.msra.mxu1 %v9769_v55  ;;  %7379 = vmatprep.subr.bf16.mxu0 %v9784_v57 }
 0x338   :  { %v7075_v15 = vpop.f32.mrb[8].mxu0  ;;  %v7239_v10 = vpop.f32.mrb[8].mxu1  ;;  %7543 = vmatprep.subr.bf16.mxu1 %v9786_v59  ;;  %v9815_v59 = vcombine.low %v1572_v9, %v1580_v33  ;;  %v9831_v9 = vcombine.low %v1588_v49, %v1596_v44  ;;  %v9833_v33 = vcombine.low %v1589_v52, %v1597_v53 }
 0x339   :  { %v10726_v35 = vadd.f32 %v7075_v15, %v1721_v42  ;;  %v10728_v39 = vadd.f32 %v7239_v10, %v1729_v13  ;;  %v7077_v36 = vpop.f32.mrb[9].mxu0  ;;  %v7241_v20 = vpop.f32.mrb[9].mxu1  ;;  %v9832_v13 = vcombine.high %v1588_v49, %v1596_v44  ;;  %v1605_v15 = vld [vmem:[#allocation9 + $0x1c98] sm:$0xff] }
 0x33a   :  { %v10730_v37 = vadd.f32 %v7077_v36, %v1725_v19  ;;  %v10732_v41 = vadd.f32 %v7241_v20, %v1733_v16  ;;  %v7079_v43 = vpop.f32.mrb[10].mxu0  ;;  %v7243_v38 = vpop.f32.mrb[10].mxu1  ;;  %7380 = vmatpush1.bf16.msra.mxu0 %v9783_v6  ;;  %v9834_v19 = vcombine.high %v1589_v52, %v1597_v53  ;;  %v1604_v16 = vld [vmem:[#allocation9 + $0x1c90] sm:$0xff]  ;;  %v1613_v10 = vld [vmem:[#allocation9 + $0x1cd8] sm:$0xff] }
 0x33b   :  { %v8230_v18 = vsel %vm388_vm2, %v10726_v35, 0.0  ;;  %v8244_v22 = vsel %vm388_vm2, %v10728_v39, 0.0  ;;  %7544 = vmatpush1.bf16.msra.mxu1 %v9785_v8  ;;  %v7080_v23 = vpop.f32.mrb[11].mxu0  ;;  %v7244_v24 = vpop.f32.mrb[11].mxu1  ;;  %7381 = vmatprep.subr.bf16.mxu0 %v9800_v54  ;;  %v1612_v6 = vld [vmem:[#allocation9 + $0x1cd0] sm:$0xff] }
 0x33c   :  { %v8231_v47 = vrot.slane %v8230_v18, 4  ;;  %v8245_v48 = vrot.slane %v8244_v22, 4  ;;  %v8237_v56 = vsel %vm388_vm2, %v10730_v37, 0.0  ;;  %v8251_v17 = vsel %vm388_vm2, %v10732_v41, 0.0  ;;  %7545 = vmatprep.subr.bf16.mxu1 %v9802_v14  ;;  %v1621_v24 = vld [vmem:[#allocation9 + $0x1d18] sm:$0xff]  ;;  %v1636_v53 = vld [vmem:[#allocation9 + $0x1d90] sm:$0xff] }
 0x33d   :  { %v8238_v26 = vrot.slane %v8237_v56, 4  ;;  %v8252_v51 = vrot.slane %v8251_v17, 4  ;;  %v9848_v20 = vcombine.high %v1604_v16, %v1612_v6 }
 0x33e   :  { %v8232_v55 = vadd.f32 %v8231_v47, %v8230_v18  ;;  %v8246_v57 = vadd.f32 %v8245_v48, %v8244_v22  ;;  %7382 = vmatpush1.bf16.msra.mxu0 %v9799_v40  ;;  %v9850_v40 = vcombine.high %v1605_v15, %v1613_v10  ;;  %v1628_v18 = vld [vmem:[#allocation9 + $0x1d50] sm:$0xff]  ;;  %v9847_v48 = vcombine.low %v1604_v16, %v1612_v6 }
 0x33f   :  { %v8239_v60 = vadd.f32 %v8238_v26, %v8237_v56  ;;  %v8253_v42 = vadd.f32 %v8252_v51, %v8251_v17  ;;  %7546 = vmatpush1.bf16.msra.mxu1 %v9801_v29  ;;  %7383 = vmatprep.subr.bf16.mxu0 %v9816_v45  ;;  %v1620_v29 = vld [vmem:[#allocation9 + $0x1d10] sm:$0xff]  ;;  %v1629_v45 = vld [vmem:[#allocation9 + $0x1d58] sm:$0xff]  ;;  %v9849_v56 = vcombine.low %v1605_v15, %v1613_v10 }
 0x340   :  { %v8233_v50 = vrot.slane %v8232_v55, 2  ;;  %v8247_v3 = vrot.slane %v8246_v57, 2  ;;  %7547 = vmatprep.subr.bf16.mxu1 %v9818_v46  ;;  %v9864_v44 = vcombine.high %v1620_v29, %v1628_v18  ;;  %v9866_v52 = vcombine.high %v1621_v24, %v1629_v45 }
 0x341   :  { %v8240_v8 = vrot.slane %v8239_v60, 2  ;;  %v8254_v54 = vrot.slane %v8253_v42, 2 }
 0x342   :  { %v8234_v14 = vadd.f32 %v8233_v50, %v8232_v55  ;;  %v8248_v36 = vadd.f32 %v8247_v3, %v8246_v57  ;;  %7384 = vmatpush1.bf16.msra.mxu0 %v9815_v59  ;;  %v1644_v55 = vld [vmem:[#allocation9 + $0x1dd0] sm:$0xff]  ;;  %v9863_v50 = vcombine.low %v1620_v29, %v1628_v18  ;;  %v9865_v3 = vcombine.low %v1621_v24, %v1629_v45 }
 0x343   :  { %v8241_v21 = vadd.f32 %v8240_v8, %v8239_v60  ;;  %v8255_v34 = vadd.f32 %v8254_v54, %v8253_v42  ;;  %7548 = vmatpush1.bf16.msra.mxu1 %v9817_v32  ;;  %7385 = vmatprep.subr.bf16.mxu0 %v9832_v13  ;;  %v1637_v32 = vld [vmem:[#allocation9 + $0x1d98] sm:$0xff]  ;;  %v9880_v6 = vcombine.high %v1636_v53, %v1644_v55  ;;  %v1652_v8 = vld [vmem:[#allocation9 + $0x1e10] sm:$0xff] }
 0x344   :  { %v8235_v43 = vrot.slane %v8234_v14, 1  ;;  %v8249_v38 = vrot.slane %v8248_v36, 1  ;;  %7549 = vmatprep.subr.bf16.mxu1 %v9834_v19  ;;  %v1645_v60 = vld [vmem:[#allocation9 + $0x1dd8] sm:$0xff]  ;;  %v1660_v54 = vld [vmem:[#allocation9 + $0x1e50] sm:$0xff]  ;;  %v9879_v10 = vcombine.low %v1636_v53, %v1644_v55 }
 0x345   :  { %v8242_v22 = vrot.slane %v8241_v21, 1  ;;  %v8256_v23 = vrot.slane %v8255_v34, 1  ;;  %v9882_v15 = vcombine.high %v1637_v32, %v1645_v60  ;;  %v1676_v24 = vld [vmem:[#allocation9 + $0x1ed0] sm:$0xff] }
 0x346   :  { %v8236_v46 = vadd.f32 %v8235_v43, %v8234_v14  ;;  %v8250_v47 = vadd.f32 %v8249_v38, %v8248_v36  ;;  %7386 = vmatpush1.bf16.msra.mxu0 %v9831_v9  ;;  %v1653_v14 = vld [vmem:[#allocation9 + $0x1e18] sm:$0xff] }
 0x347   :  { %v8243_v17 = vadd.f32 %v8242_v22, %v8241_v21  ;;  %v8257_v49 = vadd.f32 %v8256_v23, %v8255_v34  ;;  %7550 = vmatpush1.bf16.msra.mxu1 %v9833_v33  ;;  %7387 = vmatprep.subr.bf16.mxu0 %v9848_v20  ;;  %v1661_v36 = vld [vmem:[#allocation9 + $0x1e58] sm:$0xff]  ;;  %v9881_v21 = vcombine.low %v1637_v32, %v1645_v60  ;;  %v1668_v23 = vld [vmem:[#allocation9 + $0x1e90] sm:$0xff] }
 0x348   :  { %v8342_v26 = vmul.f32 0.5, %v8236_v46  ;;  %v8344_v51 = vmul.f32 0.5, %v8250_v47  ;;  %7551 = vmatprep.subr.bf16.mxu1 %v9850_v40  ;;  %v9896_v34 = vcombine.high %v1652_v8, %v1660_v54  ;;  %v9898_v22 = vcombine.high %v1653_v14, %v1661_v36  ;;  %v1669_v47 = vld [vmem:[#allocation9 + $0x1e98] sm:$0xff]  ;;  %v1692_v32 = vld [vmem:[#allocation9 + $0x1f50] sm:$0xff] }
 0x349   :  { %v8343_v57 = vmul.f32 0.5, %v8243_v17  ;;  %v8345_v59 = vmul.f32 0.5, %v8257_v49  ;;  %v9895_v49 = vcombine.low %v1652_v8, %v1660_v54  ;;  %v9911_v8 = vcombine.low %v1668_v23, %v1676_v24 }
 0x34a   :  { %v10743_v42 = vsub.f32 %v10726_v35, %v8342_v26  ;;  %v10746_v13 = vsub.f32 %v10728_v39, %v8344_v51  ;;  %7388 = vmatpush1.bf16.msra.mxu0 %v9847_v48  ;;  %v1677_v48 = vld [vmem:[#allocation9 + $0x1ed8] sm:$0xff]  ;;  %v9897_v51 = vcombine.low %v1653_v14, %v1661_v36 }
 0x34b   :  { %v10749_v19 = vsub.f32 %v10730_v37, %v8343_v57  ;;  %v10752_v16 = vsub.f32 %v10732_v41, %v8345_v59  ;;  %7552 = vmatpush1.bf16.msra.mxu1 %v9849_v56  ;;  %7389 = vmatprep.subr.bf16.mxu0 %v9864_v44  ;;  %v9914_v57 = vcombine.high %v1669_v47, %v1677_v48  ;;  %v1684_v59 = vld [vmem:[#allocation9 + $0x1f10] sm:$0xff] }
 0x34c   :  { %v8374_v35 = vmul.f32 %v10743_v42, %v10743_v42  ;;  %v8376_v39 = vmul.f32 %v10746_v13, %v10746_v13  ;;  %7553 = vmatprep.subr.bf16.mxu1 %v9866_v52  ;;  %v9912_v52 = vcombine.high %v1668_v23, %v1676_v24 }
 0x34d   :  { %v8375_v37 = vmul.f32 %v10749_v19, %v10749_v19  ;;  %v8377_v41 = vmul.f32 %v10752_v16, %v10752_v16 }
 0x34e   :  { %v8390_v9 = vsel %vm388_vm2, %v8374_v35, 0.0  ;;  %v8404_v33 = vsel %vm388_vm2, %v8376_v39, 0.0  ;;  %7390 = vmatpush1.bf16.msra.mxu0 %v9863_v50 }
 0x34f   :  { %v8391_v20 = vrot.slane %v8390_v9, 4  ;;  %v8405_v43 = vrot.slane %v8404_v33, 4  ;;  %v8397_v38 = vsel %vm388_vm2, %v8375_v37, 0.0  ;;  %v8411_v40 = vsel %vm388_vm2, %v8377_v41, 0.0  ;;  %7554 = vmatpush1.bf16.msra.mxu1 %v9865_v3  ;;  %7391 = vmatprep.subr.bf16.mxu0 %v9880_v6  ;;  %v1685_v3 = vld [vmem:[#allocation9 + $0x1f18] sm:$0xff] }
 0x350   :  { %v8398_v29 = vrot.slane %v8397_v38, 4  ;;  %v8412_v18 = vrot.slane %v8411_v40, 4  ;;  %7555 = vmatprep.subr.bf16.mxu1 %v9882_v15  ;;  %v1693_v6 = vld [vmem:[#allocation9 + $0x1f58] sm:$0xff]  ;;  %v9913_v37 = vcombine.low %v1669_v47, %v1677_v48  ;;  %v9928_v41 = vcombine.high %v1684_v59, %v1692_v32  ;;  %v694_v48 = vld [vmem:[#allocation9 + $0x20] sm:$0xff] }
 0x351   :  { %v8392_v45 = vadd.f32 %v8391_v20, %v8390_v9  ;;  %v8406_v46 = vadd.f32 %v8405_v43, %v8404_v33  ;;  %v9930_v36 = vcombine.high %v1685_v3, %v1693_v6  ;;  %v1700_v9 = vld [vmem:[#allocation9 + $0x1f90] sm:$0xff]  ;;  %v1701_v20 = vld [vmem:[#allocation9 + $0x1f98] sm:$0xff]  ;;  %v9929_v23 = vcombine.low %v1685_v3, %v1693_v6  ;;  %v711_v6 = vld [vmem:[#allocation9 + $0xa8] sm:$0xff] }
 0x352   :  { %v8399_v56 = vadd.f32 %v8398_v29, %v8397_v38  ;;  %v8413_v17 = vadd.f32 %v8412_v18, %v8411_v40  ;;  %7392 = vmatpush1.bf16.msra.mxu0 %v9879_v10  ;;  %v1708_v33 = vld [vmem:[#allocation9 + $0x1fd0] sm:$0xff]  ;;  %v1709_v43 = vld [vmem:[#allocation9 + $0x1fd8] sm:$0xff]  ;;  %v9927_v29 = vcombine.low %v1684_v59, %v1692_v32 }
 0x353   :  { %v8393_v44 = vrot.slane %v8392_v45, 2  ;;  %v8407_v26 = vrot.slane %v8406_v46, 2  ;;  %7556 = vmatpush1.bf16.msra.mxu1 %v9881_v21  ;;  %7393 = vmatprep.subr.bf16.mxu0 %v9896_v34  ;;  %v9944_v24 = vcombine.high %v1700_v9, %v1708_v33  ;;  %v9946_v47 = vcombine.high %v1701_v20, %v1709_v43  ;;  %v8518_v32 = vld [vmem:[#allocation12] sm:$0xff] }
 0x354   :  { %v8400_v53 = vrot.slane %v8399_v56, 2  ;;  %v8414_v55 = vrot.slane %v8413_v17, 2  ;;  %7557 = vmatprep.subr.bf16.mxu1 %v9898_v22 }
 0x355   :  { %v8394_v60 = vadd.f32 %v8393_v44, %v8392_v45  ;;  %v8408_v50 = vadd.f32 %v8407_v26, %v8406_v46  ;;  %v695_v44 = vld [vmem:[#allocation9 + $0x28] sm:$0xff] }
 0x356   :  { %v8401_v35 = vadd.f32 %v8400_v53, %v8399_v56  ;;  %v8415_v39 = vadd.f32 %v8414_v55, %v8413_v17  ;;  %7394 = vmatpush1.bf16.msra.mxu0 %v9895_v49  ;;  %v702_v56 = vld [vmem:[#allocation9 + $0x60] sm:$0xff]  ;;  %v703_v26 = vld [vmem:[#allocation9 + $0x68] sm:$0xff]  ;;  %v9943_v53 = vcombine.low %v1700_v9, %v1708_v33  ;;  %v9945_v55 = vcombine.low %v1701_v20, %v1709_v43 }
 0x357   :  { %v8395_v54 = vrot.slane %v8394_v60, 1  ;;  %v8409_v15 = vrot.slane %v8408_v50, 1  ;;  %7558 = vmatpush1.bf16.msra.mxu1 %v9897_v51  ;;  %7395 = vmatprep.subr.bf16.mxu0 %v9912_v52  ;;  %v8942_v59 = vcombine.high %v695_v44, %v703_v26  ;;  %v8939_v3 = vcombine.low %v694_v48, %v702_v56  ;;  %v735_v9 = vld [vmem:[#allocation9 + $0x168] sm:$0xff] }
 0x358   :  { %v8402_v10 = vrot.slane %v8401_v35, 1  ;;  %v8416_v14 = vrot.slane %v8415_v39, 1  ;;  %7559 = vmatprep.subr.bf16.mxu1 %v9914_v57  ;;  %v8940_v57 = vcombine.high %v694_v48, %v702_v56  ;;  %v8529_v33 = vrot.slane %v8518_v32, %v10530_v30  ;;  %v743_v56 = vld [vmem:[#allocation9 + $0x1a8] sm:$0xff] }
 0x359   :  { %v8396_v21 = vadd.f32 %v8395_v54, %v8394_v60  ;;  %v8410_v34 = vadd.f32 %v8409_v15, %v8408_v50  ;;  %v710_v60 = vld [vmem:[#allocation9 + $0xa0] sm:$0xff] }
 0x35a   :  { %v8403_v38 = vadd.f32 %v8402_v10, %v8401_v35  ;;  %v8417_v40 = vadd.f32 %v8416_v14, %v8415_v39  ;;  %7396 = vmatpush1.bf16.msra.mxu0 %v9911_v8  ;;  %v718_v50 = vld [vmem:[#allocation9 + $0xe0] sm:$0xff]  ;;  %v719_v35 = vld [vmem:[#allocation9 + $0xe8] sm:$0xff]  ;;  %v8941_v39 = vcombine.low %v695_v44, %v703_v26  ;;  %v8525_v8 = vrot.slane %v8518_v32, %v10525_v28 }
 0x35b   :  { %v8502_v18 = vmul.f32 0.5, %v8396_v21  ;;  %v8504_v22 = vmul.f32 0.5, %v8410_v34  ;;  %7560 = vmatpush1.bf16.msra.mxu1 %v9913_v37  ;;  %7397 = vmatprep.subr.bf16.mxu0 %v9928_v41  ;;  %v10767_v54 = vld [vmem:[#allocation13] sm:$0xff]  ;;  %v8956_v15 = vcombine.high %v710_v60, %v718_v50  ;;  %v8533_v10 = vrot.slane %v8518_v32, %v10547_v58 }
 0x35c   :  { %v8503_v45 = vmul.f32 0.5, %v8403_v38  ;;  %v8505_v46 = vmul.f32 0.5, %v8417_v40  ;;  %7561 = vmatprep.subr.bf16.mxu1 %v9930_v36  ;;  %v726_v37 = vld [vmem:[#allocation9 + $0x120] sm:$0xff]  ;;  %v8958_v14 = vcombine.high %v711_v6, %v719_v35  ;;  %v727_v36 = vld [vmem:[#allocation9 + $0x128] sm:$0xff]  ;;  %v8537_v21 = vrot.slane %v8518_v32, %v10533_v31 }
 0x35d   :  { %v8618_v17 = vadd.f32 1e-05, %v8502_v18  ;;  %v8620_v49 = vadd.f32 1e-05, %v8504_v22  ;;  %v734_v41 = vld [vmem:[#allocation9 + $0x160] sm:$0xff]  ;;  %v8955_v34 = vcombine.low %v710_v60, %v718_v50  ;;  %v8673_v20 = vrot.slane %v10767_v54, %v10525_v28 }
 0x35e   :  { %v8619_v51 = vadd.f32 1e-05, %v8503_v45  ;;  %v8621_v52 = vadd.f32 1e-05, %v8505_v46  ;;  %7398 = vmatpush1.bf16.msra.mxu0 %v9927_v29  ;;  %v8957_v43 = vcombine.low %v711_v6, %v719_v35  ;;  %v8972_v38 = vcombine.high %v726_v37, %v734_v41  ;;  %v742_v22 = vld [vmem:[#allocation9 + $0x1a0] sm:$0xff] }
 0x35f   :  { %10103 = vrsqrt.f32 %v8618_v17  ;;  %7562 = vmatpush1.bf16.msra.mxu1 %v9929_v23  ;;  %7399 = vmatprep.subr.bf16.mxu0 %v9944_v24  ;;  %v8602_v40 = vmul.f32 %v8525_v8, %v10743_v42  ;;  %v8681_v29 = vrot.slane %v10767_v54, %v10547_v58  ;;  %v8974_v18 = vcombine.high %v727_v36, %v735_v9  ;;  %v750_v23 = vld [vmem:[#allocation9 + $0x1e0] sm:$0xff]  ;;  %v751_v17 = vld [vmem:[#allocation9 + $0x1e8] sm:$0xff] }
 0x360   :  { %10105 = vrsqrt.f32 %v8620_v49  ;;  %7563 = vmatprep.subr.bf16.mxu1 %v9946_v47  ;;  %v8604_v45 = vmul.f32 %v8533_v10, %v10746_v13  ;;  %v8677_v46 = vrot.slane %v10767_v54, %v10530_v30  ;;  %v10337_v47 = vmov 1983009808   ;;  %v766_v6 = vld [vmem:[#allocation9 + $0x260] sm:$0xff] }
 0x361   :  { %10107 = vrsqrt.f32 %v8619_v51  ;;  %v8833_v48 = vunpack.c.l.s4 %v10337_v47  ;;  %v8685_v42 = vrot.slane %v10767_v54, %v10533_v31  ;;  %v8603_v26 = vmul.f32 %v8529_v33, %v10749_v19  ;;  %v759_v54 = vld [vmem:[#allocation9 + $0x228] sm:$0xff] }
 0x362   :  { %10109 = vrsqrt.f32 %v8621_v52  ;;  %7400 = vmatpush1.bf16.msra.mxu0 %v9943_v53  ;;  %v8971_v51 = vcombine.low %v726_v37, %v734_v41  ;;  %v8973_v52 = vcombine.low %v727_v36, %v735_v9  ;;  %v8990_v50 = vcombine.high %v743_v56, %v751_v17 }
 0x363   :  { %7564 = vmatpush1.bf16.msra.mxu1 %v9945_v55  ;;  %7574 = vmatprep.subr.bf16.mxu0 %v8940_v57  ;;  %v8605_v55 = vmul.f32 %v8537_v21, %v10752_v16  ;;  %v8988_v57 = vcombine.high %v742_v22, %v750_v23  ;;  %v8987_v8 = vcombine.low %v742_v22, %v750_v23 }
 0x364   :  { %7738 = vmatprep.subr.bf16.mxu1 %v8942_v59  ;;  %v8989_v16 = vcombine.low %v743_v56, %v751_v17  ;;  %v790_v56 = vld [vmem:[#allocation9 + $0x320] sm:$0xff] }
 0x365   :  { %7402 = vmatmul.mubr.bf16.vlgmr.msra.gmra.mrb[12].mxu0 %v10704_v2  ;;  %v798_v17 = vld [vmem:[#allocation9 + $0x360] sm:$0xff] }
 0x366   :  { %7566 = vmatmul.mubr.bf16.vlgmr.msra.gmra.mrb[12].mxu1 %v10704_v2  ;;  %7575 = vmatpush1.bf16.msra.mxu0 %v8939_v3  ;;  %v758_v3 = vld [vmem:[#allocation9 + $0x220] sm:$0xff] }
 0x367   :  { %7606 = vmatprep.mubr.bf16.mxu0 %v10597_v4  ;;  %7739 = vmatpush1.bf16.msra.mxu1 %v8941_v39  ;;  %v8834_v39 = vunpack.c.0.s8 %v8833_v48  ;;  %v9004_v36 = vcombine.high %v758_v3, %v766_v6  ;;  %v9003_v23 = vcombine.low %v758_v3, %v766_v6 }
 0x368   :  { %7770 = vmatprep.mubr.bf16.mxu1 %v10597_v4  ;;  %7576 = vmatprep.subr.bf16.mxu0 %v8956_v15  ;;  %v767_v15 = vld [vmem:[#allocation9 + $0x268] sm:$0xff] }
 0x369   :  { %v10104_v24 = vpop.eup %10103  ;;  %7740 = vmatprep.subr.bf16.mxu1 %v8958_v14  ;;  %v9006_v21 = vcombine.high %v759_v54, %v767_v15 }
 0x36a   :  { %v10106_v49 = vpop.eup %10105  ;;  %v8650_v44 = vmul.f32 %v10104_v24, %v8602_v40  ;;  %7577 = vmatpush1.bf16.msra.mxu0 %v8955_v34  ;;  %v774_v34 = vld [vmem:[#allocation9 + $0x2a0] sm:$0xff]  ;;  %v9005_v24 = vcombine.low %v759_v54, %v767_v15  ;;  %v831_v54 = vld [vmem:[#allocation9 + $0x468] sm:$0xff] }
 0x36b   :  { %v10108_v53 = vpop.eup %10107  ;;  %v8652_v13 = vmul.f32 %v10106_v49, %v8604_v45  ;;  %7741 = vmatpush1.bf16.msra.mxu1 %v8957_v43  ;;  %7578 = vmatprep.subr.bf16.mxu0 %v8972_v38  ;;  %v10789_v38 = vsub.s32 %v8834_v39, %v10522_v27  ;;  %v791_v49 = vld [vmem:[#allocation9 + $0x328] sm:$0xff]  ;;  %v822_v39 = vld [vmem:[#allocation9 + $0x420] sm:$0xff] }
 0x36c   :  { %v10110_v59 = vpop.eup %10109  ;;  %v8750_v32 = vadd.f32 %v8673_v20, %v8650_v44  ;;  %v8651_v60 = vmul.f32 %v10108_v53, %v8603_v26  ;;  %7742 = vmatprep.subr.bf16.mxu1 %v8974_v18  ;;  %v782_v20 = vld [vmem:[#allocation9 + $0x2e0] sm:$0xff]  ;;  %v783_v18 = vld [vmem:[#allocation9 + $0x2e8] sm:$0xff]  ;;  %v9036_v53 = vcombine.high %v790_v56, %v798_v17 }
 0x36d   :  { %v8752_v35 = vadd.f32 %v8681_v29, %v8652_v13  ;;  %v8653_v19 = vmul.f32 %v10110_v59, %v8605_v55  ;;  %v775_v29 = vld [vmem:[#allocation9 + $0x2a8] sm:$0xff]  ;;  %v9020_v47 = vcombine.high %v774_v34, %v782_v20  ;;  %v814_v59 = vld [vmem:[#allocation9 + $0x3e0] sm:$0xff] }
 0x36e   :  { %vm8766_vm11 = vcmp.gt.f32.partialorder %v8750_v32, 0.0  ;;  %v8782_v37 = vmul.f32 0.2, %v8750_v32  ;;  %v8751_v41 = vadd.f32 %v8677_v46, %v8651_v60  ;;  %7579 = vmatpush1.bf16.msra.mxu0 %v8971_v51  ;;  %v799_v44 = vld [vmem:[#allocation9 + $0x368] sm:$0xff]  ;;  %v9019_v51 = vcombine.low %v774_v34, %v782_v20 }
 0x36f   :  { %vm8768_vm12 = vcmp.gt.f32.partialorder %v8752_v35, 0.0  ;;  %v8784_v10 = vmul.f32 0.2, %v8752_v35  ;;  %v8753_v14 = vadd.f32 %v8685_v42, %v8653_v19  ;;  %7743 = vmatpush1.bf16.msra.mxu1 %v8973_v52  ;;  %7580 = vmatprep.subr.bf16.mxu0 %v8988_v57  ;;  %v9022_v42 = vcombine.high %v775_v29, %v783_v18  ;;  %v806_v57 = vld [vmem:[#allocation9 + $0x3a0] sm:$0xff]  ;;  %v815_v60 = vld [vmem:[#allocation9 + $0x3e8] sm:$0xff] }
 0x370   :  { %v8798_v9 = vsel %vm8766_vm11, %v8750_v32, %v8782_v37  ;;  %vm8767_vm13 = vcmp.gt.f32.partialorder %v8751_v41, 0.0  ;;  %v8783_v33 = vmul.f32 0.2, %v8751_v41  ;;  %7744 = vmatprep.subr.bf16.mxu1 %v8990_v50  ;;  %v9021_v52 = vcombine.low %v775_v29, %v783_v18  ;;  %v807_v32 = vld [vmem:[#allocation9 + $0x3a8] sm:$0xff]  ;;  %v830_v19 = vld [vmem:[#allocation9 + $0x460] sm:$0xff] }
 0x371   :  { %v8800_v43 = vsel %vm8768_vm12, %v8752_v35, %v8784_v10  ;;  %vm8769_vm14 = vcmp.gt.f32.partialorder %v8753_v14, 0.0  ;;  %v8785_v40 = vmul.f32 0.2, %v8753_v14  ;;  %v9038_v55 = vcombine.high %v791_v49, %v799_v44  ;;  %v838_v10 = vld [vmem:[#allocation9 + $0x4a0] sm:$0xff]  ;;  %v855_v29 = vld [vmem:[#allocation9 + $0x528] sm:$0xff] }
 0x372   :  { %v8799_v22 = vsel %vm8767_vm13, %v8751_v41, %v8783_v33  ;;  %7581 = vmatpush1.bf16.msra.mxu0 %v8987_v8  ;;  %v9035_v50 = vcombine.low %v790_v56, %v798_v17  ;;  %v9037_v3 = vcombine.low %v791_v49, %v799_v44  ;;  %v9052_v6 = vcombine.high %v806_v57, %v814_v59  ;;  %v823_v8 = vld [vmem:[#allocation9 + $0x428] sm:$0xff]  ;;  %v886_v44 = vld [vmem:[#allocation9 + $0x620] sm:$0xff] }
 0x373   :  { %v8830_v45 = vcombine.low %v8798_v9, %v8799_v22  ;;  %v8801_v46 = vsel %vm8769_vm14, %v8753_v14, %v8785_v40  ;;  %7745 = vmatpush1.bf16.msra.mxu1 %v8989_v16  ;;  %7582 = vmatprep.subr.bf16.mxu0 %v9004_v36  ;;  %v9054_v35 = vcombine.high %v807_v32, %v815_v60  ;;  %v846_v14 = vld [vmem:[#allocation9 + $0x4e0] sm:$0xff]  ;;  %v839_v36 = vld [vmem:[#allocation9 + $0x4a8] sm:$0xff] }
 0x374   :  { %v8831_v48 = vcombine.low %v8800_v43, %v8801_v46  ;;  %7746 = vmatprep.subr.bf16.mxu1 %v9006_v21  ;;  %v9051_v15 = vcombine.low %v806_v57, %v814_v59  ;;  %v9053_v37 = vcombine.low %v807_v32, %v815_v60  ;;  %v9068_v41 = vcombine.high %v822_v39, %v830_v19  ;;  %v847_v9 = vld [vmem:[#allocation9 + $0x4e8] sm:$0xff]  ;;  %v854_v43 = vld [vmem:[#allocation9 + $0x520] sm:$0xff] }
 0x375   :  { %v8838_v27 = vrot.slane %v8830_v45, %v10789_v38  ;;  %v9070_v16 = vcombine.high %v823_v8, %v831_v54  ;;  %v9067_v33 = vcombine.low %v822_v39, %v830_v19  ;;  %v9069_v21 = vcombine.low %v823_v8, %v831_v54  ;;  %v862_v40 = vld [vmem:[#allocation9 + $0x560] sm:$0xff]  ;;  %v863_v18 = vld [vmem:[#allocation9 + $0x568] sm:$0xff] }
 0x376   :  { %v8845_v26 = vrot.slane %v8831_v48, %v10789_v38  ;;  %7583 = vmatpush1.bf16.msra.mxu0 %v9003_v23  ;;  %v9084_v34 = vcombine.high %v838_v10, %v846_v14  ;;  %v9086_v20 = vcombine.high %v839_v36, %v847_v9  ;;  %v9083_v22 = vcombine.low %v838_v10, %v846_v14  ;;  %v870_v46 = vld [vmem:[#allocation9 + $0x5a0] sm:$0xff]  ;;  %v871_v48 = vld [vmem:[#allocation9 + $0x5a8] sm:$0xff] }
 0x377   :  { %7747 = vmatpush1.bf16.msra.mxu1 %v9005_v24  ;;  %7584 = vmatprep.subr.bf16.mxu0 %v9020_v47  ;;  %v9085_v23 = vcombine.low %v839_v36, %v847_v9  ;;  %v9100_v24 = vcombine.high %v854_v43, %v862_v40  ;;  %v9102_v45 = vcombine.high %v855_v29, %v863_v18  ;;  %v878_v47 = vld [vmem:[#allocation9 + $0x5e0] sm:$0xff]  ;;  %v903_v60 = vld [vmem:[#allocation9 + $0x6a8] sm:$0xff] }
 0x378   :  { %v8846_v13 = vcombine.low %v8838_v27, %v8845_v26  ;;  %7748 = vmatprep.subr.bf16.mxu1 %v9022_v42  ;;  %v879_v42 = vld [vmem:[#allocation9 + $0x5e8] sm:$0xff]  ;;  %v9099_v56 = vcombine.low %v854_v43, %v862_v40  ;;  %v9101_v17 = vcombine.low %v855_v29, %v863_v18  ;;  %v9116_v27 = vcombine.high %v870_v46, %v878_v47  ;;  %v894_v26 = vld [vmem:[#allocation9 + $0x660] sm:$0xff] }
 0x379   :  { %v9118_v49 = vcombine.high %v871_v48, %v879_v42  ;;  %v902_v59 = vld [vmem:[#allocation9 + $0x6a0] sm:$0xff]  ;;  %v919_v54 = vld [vmem:[#allocation9 + $0x728] sm:$0xff] }
 0x37a   :  { %8902 = vst [vmem:[%s11012_s9] sm:$0xff] %v8846_v13  ;;  %7585 = vmatpush1.bf16.msra.mxu0 %v9019_v51  ;;  %v887_v51 = vld [vmem:[#allocation9 + $0x628] sm:$0xff]  ;;  %v9117_v13 = vcombine.low %v871_v48, %v879_v42  ;;  %v910_v32 = vld [vmem:[#allocation9 + $0x6e0] sm:$0xff] }
 0x37b   :  { %7749 = vmatpush1.bf16.msra.mxu1 %v9021_v52  ;;  %7586 = vmatprep.subr.bf16.mxu0 %v9036_v53  ;;  %v895_v52 = vld [vmem:[#allocation9 + $0x668] sm:$0xff]  ;;  %v9115_v53 = vcombine.low %v870_v46, %v878_v47  ;;  %v918_v19 = vld [vmem:[#allocation9 + $0x720] sm:$0xff] }
 0x37c   :  { %7750 = vmatprep.subr.bf16.mxu1 %v9038_v55  ;;  %v9132_v55 = vcombine.high %v886_v44, %v894_v26  ;;  %v9134_v57 = vcombine.high %v887_v51, %v895_v52  ;;  %v926_v8 = vld [vmem:[#allocation9 + $0x760] sm:$0xff]  ;;  %v935_v9 = vld [vmem:[#allocation9 + $0x7a8] sm:$0xff] }
 0x37d   :  { %v934_v14 = vld [vmem:[#allocation9 + $0x7a0] sm:$0xff]  ;;  %v951_v18 = vld [vmem:[#allocation9 + $0x828] sm:$0xff] }
 0x37e   :  { %7587 = vmatpush1.bf16.msra.mxu0 %v9035_v50  ;;  %v911_v50 = vld [vmem:[#allocation9 + $0x6e8] sm:$0xff]  ;;  %v942_v36 = vld [vmem:[#allocation9 + $0x7e0] sm:$0xff] }
 0x37f   :  { %7751 = vmatpush1.bf16.msra.mxu1 %v9037_v3  ;;  %7588 = vmatprep.subr.bf16.mxu0 %v9052_v6  ;;  %v9131_v3 = vcombine.low %v886_v44, %v894_v26  ;;  %v9133_v6 = vcombine.low %v887_v51, %v895_v52  ;;  %v9150_v39 = vcombine.high %v903_v60, %v911_v50  ;;  %v950_v40 = vld [vmem:[#allocation9 + $0x820] sm:$0xff]  ;;  %v983_v52 = vld [vmem:[#allocation9 + $0x928] sm:$0xff] }
 0x380   :  { %7752 = vmatprep.subr.bf16.mxu1 %v9054_v35  ;;  %v9148_v35 = vcombine.high %v902_v59, %v910_v32  ;;  %v958_v29 = vld [vmem:[#allocation9 + $0x860] sm:$0xff] }
 0x381   :  { %v966_v47 = vld [vmem:[#allocation9 + $0x8a0] sm:$0xff]  ;;  %v9195_v42 = vcombine.low %v950_v40, %v958_v29 }
 0x382   :  { %7589 = vmatpush1.bf16.msra.mxu0 %v9051_v15  ;;  %v927_v15 = vld [vmem:[#allocation9 + $0x768] sm:$0xff]  ;;  %v974_v48 = vld [vmem:[#allocation9 + $0x8e0] sm:$0xff] }
 0x383   :  { %7753 = vmatpush1.bf16.msra.mxu1 %v9053_v37  ;;  %7590 = vmatprep.subr.bf16.mxu0 %v9068_v41  ;;  %v9147_v37 = vcombine.low %v902_v59, %v910_v32  ;;  %v9149_v41 = vcombine.low %v903_v60, %v911_v50  ;;  %v9166_v10 = vcombine.high %v919_v54, %v927_v15  ;;  %v982_v44 = vld [vmem:[#allocation9 + $0x920] sm:$0xff]  ;;  %v999_v50 = vld [vmem:[#allocation9 + $0x9a8] sm:$0xff] }
 0x384   :  { %7754 = vmatprep.subr.bf16.mxu1 %v9070_v16  ;;  %v9164_v16 = vcombine.high %v918_v19, %v926_v8  ;;  %v990_v26 = vld [vmem:[#allocation9 + $0x960] sm:$0xff] }
 0x385   :  { %v998_v32 = vld [vmem:[#allocation9 + $0x9a0] sm:$0xff] }
 0x386   :  { %7591 = vmatpush1.bf16.msra.mxu0 %v9067_v33  ;;  %v943_v33 = vld [vmem:[#allocation9 + $0x7e8] sm:$0xff]  ;;  %v1006_v60 = vld [vmem:[#allocation9 + $0x9e0] sm:$0xff] }
 0x387   :  { %7755 = vmatpush1.bf16.msra.mxu1 %v9069_v21  ;;  %7592 = vmatprep.subr.bf16.mxu0 %v9084_v34  ;;  %v9163_v21 = vcombine.low %v918_v19, %v926_v8  ;;  %v9165_v34 = vcombine.low %v919_v54, %v927_v15  ;;  %v9182_v43 = vcombine.high %v935_v9, %v943_v33  ;;  %v1014_v8 = vld [vmem:[#allocation9 + $0xa20] sm:$0xff]  ;;  %v1015_v15 = vld [vmem:[#allocation9 + $0xa28] sm:$0xff] }
 0x388   :  { %7756 = vmatprep.subr.bf16.mxu1 %v9086_v20  ;;  %v9180_v20 = vcombine.high %v934_v14, %v942_v36  ;;  %v1022_v54 = vld [vmem:[#allocation9 + $0xa60] sm:$0xff] }
 0x38a   :  { %7593 = vmatpush1.bf16.msra.mxu0 %v9083_v22  ;;  %v959_v22 = vld [vmem:[#allocation9 + $0x868] sm:$0xff] }
 0x38b   :  { %7757 = vmatpush1.bf16.msra.mxu1 %v9085_v23  ;;  %7594 = vmatprep.subr.bf16.mxu0 %v9100_v24  ;;  %v9179_v23 = vcombine.low %v934_v14, %v942_v36  ;;  %v9181_v24 = vcombine.low %v935_v9, %v943_v33  ;;  %v9198_v46 = vcombine.high %v951_v18, %v959_v22  ;;  %v1030_v36 = vld [vmem:[#allocation9 + $0xaa0] sm:$0xff]  ;;  %v1031_v33 = vld [vmem:[#allocation9 + $0xaa8] sm:$0xff] }
 0x38c   :  { %7758 = vmatprep.subr.bf16.mxu1 %v9102_v45  ;;  %v9196_v45 = vcombine.high %v950_v40, %v958_v29  ;;  %v1038_v9 = vld [vmem:[#allocation9 + $0xae0] sm:$0xff] }
 0x38d   :  { %v1046_v29 = vld [vmem:[#allocation9 + $0xb20] sm:$0xff] }
 0x38e   :  { %7595 = vmatpush1.bf16.msra.mxu0 %v9099_v56  ;;  %v967_v56 = vld [vmem:[#allocation9 + $0x8a8] sm:$0xff] }
 0x38f   :  { %7759 = vmatpush1.bf16.msra.mxu1 %v9101_v17  ;;  %7596 = vmatprep.subr.bf16.mxu0 %v9116_v27  ;;  %v975_v17 = vld [vmem:[#allocation9 + $0x8e8] sm:$0xff]  ;;  %v9197_v27 = vcombine.low %v951_v18, %v959_v22  ;;  %v1054_v18 = vld [vmem:[#allocation9 + $0xb60] sm:$0xff] }
 0x390   :  { %7760 = vmatprep.subr.bf16.mxu1 %v9118_v49  ;;  %v9212_v49 = vcombine.high %v966_v47, %v974_v48  ;;  %v9214_v51 = vcombine.high %v967_v56, %v975_v17  ;;  %v1047_v22 = vld [vmem:[#allocation9 + $0xb28] sm:$0xff] }
 0x392   :  { %7597 = vmatpush1.bf16.msra.mxu0 %v9115_v53  ;;  %v991_v53 = vld [vmem:[#allocation9 + $0x968] sm:$0xff] }
 0x393   :  { %7761 = vmatpush1.bf16.msra.mxu1 %v9117_v13  ;;  %7598 = vmatprep.subr.bf16.mxu0 %v9132_v55  ;;  %v9211_v13 = vcombine.low %v966_v47, %v974_v48  ;;  %v9213_v55 = vcombine.low %v967_v56, %v975_v17  ;;  %v9230_v59 = vcombine.high %v983_v52, %v991_v53  ;;  %v1062_v48 = vld [vmem:[#allocation9 + $0xba0] sm:$0xff]  ;;  %v1063_v56 = vld [vmem:[#allocation9 + $0xba8] sm:$0xff] }
 0x394   :  { %7762 = vmatprep.subr.bf16.mxu1 %v9134_v57  ;;  %v9228_v57 = vcombine.high %v982_v44, %v990_v26  ;;  %v1071_v17 = vld [vmem:[#allocation9 + $0xbe8] sm:$0xff] }
 0x396   :  { %7599 = vmatpush1.bf16.msra.mxu0 %v9131_v3  ;;  %v1007_v3 = vld [vmem:[#allocation9 + $0x9e8] sm:$0xff] }
 0x397   :  { %7763 = vmatpush1.bf16.msra.mxu1 %v9133_v6  ;;  %7600 = vmatprep.subr.bf16.mxu0 %v9148_v35  ;;  %v9227_v6 = vcombine.low %v982_v44, %v990_v26  ;;  %v9229_v35 = vcombine.low %v983_v52, %v991_v53  ;;  %v9246_v19 = vcombine.high %v999_v50, %v1007_v3  ;;  %v1086_v52 = vld [vmem:[#allocation9 + $0xc60] sm:$0xff]  ;;  %v1079_v53 = vld [vmem:[#allocation9 + $0xc28] sm:$0xff] }
 0x398   :  { %7764 = vmatprep.subr.bf16.mxu1 %v9150_v39  ;;  %v9244_v39 = vcombine.high %v998_v32, %v1006_v60  ;;  %v9310_v26 = vcombine.high %v1063_v56, %v1071_v17 }
 0x39a   :  { %7601 = vmatpush1.bf16.msra.mxu0 %v9147_v37  ;;  %v1023_v37 = vld [vmem:[#allocation9 + $0xa68] sm:$0xff] }
 0x39b   :  { %7765 = vmatpush1.bf16.msra.mxu1 %v9149_v41  ;;  %7602 = vmatprep.subr.bf16.mxu0 %v9164_v16  ;;  %v9243_v41 = vcombine.low %v998_v32, %v1006_v60  ;;  %v9245_v16 = vcombine.low %v999_v50, %v1007_v3  ;;  %v9262_v14 = vcombine.high %v1015_v15, %v1023_v37  ;;  %v1094_v60 = vld [vmem:[#allocation9 + $0xca0] sm:$0xff]  ;;  %v1095_v3 = vld [vmem:[#allocation9 + $0xca8] sm:$0xff] }
 0x39c   :  { %7766 = vmatprep.subr.bf16.mxu1 %v9166_v10  ;;  %v9260_v10 = vcombine.high %v1014_v8, %v1022_v54  ;;  %v1102_v50 = vld [vmem:[#allocation9 + $0xce0] sm:$0xff] }
 0x39e   :  { %7603 = vmatpush1.bf16.msra.mxu0 %v9163_v21  ;;  %v1039_v21 = vld [vmem:[#allocation9 + $0xae8] sm:$0xff] }
 0x39f   :  { %7767 = vmatpush1.bf16.msra.mxu1 %v9165_v34  ;;  %7604 = vmatprep.subr.bf16.mxu0 %v9180_v20  ;;  %v9259_v34 = vcombine.low %v1014_v8, %v1022_v54  ;;  %v9261_v20 = vcombine.low %v1015_v15, %v1023_v37  ;;  %v9278_v40 = vcombine.high %v1031_v33, %v1039_v21  ;;  %v1110_v54 = vld [vmem:[#allocation9 + $0xd20] sm:$0xff]  ;;  %v1111_v37 = vld [vmem:[#allocation9 + $0xd28] sm:$0xff] }
 0x3a0   :  { %7768 = vmatprep.subr.bf16.mxu1 %v9182_v43  ;;  %v9276_v43 = vcombine.high %v1030_v36, %v1038_v9  ;;  %v1118_v15 = vld [vmem:[#allocation9 + $0xd60] sm:$0xff] }
 0x3a2   :  { %7605 = vmatpush1.bf16.msra.mxu0 %v9179_v23  ;;  %v1055_v23 = vld [vmem:[#allocation9 + $0xb68] sm:$0xff] }
 0x3a3   :  { %7769 = vmatpush1.bf16.msra.mxu1 %v9181_v24  ;;  %7615 = vmatprep.subr.bf16.mxu0 %v9196_v45  ;;  %v9275_v24 = vcombine.low %v1030_v36, %v1038_v9  ;;  %v9277_v45 = vcombine.low %v1031_v33, %v1039_v21  ;;  %v9294_v47 = vcombine.high %v1047_v22, %v1055_v23  ;;  %v1126_v9 = vld [vmem:[#allocation9 + $0xda0] sm:$0xff]  ;;  %v1127_v21 = vld [vmem:[#allocation9 + $0xda8] sm:$0xff] }
 0x3a4   :  { %7779 = vmatprep.subr.bf16.mxu1 %v9198_v46  ;;  %v9292_v46 = vcombine.high %v1046_v29, %v1054_v18  ;;  %v1134_v33 = vld [vmem:[#allocation9 + $0xde0] sm:$0xff] }
 0x3a5   :  { %7607 = vmatmul.mubr.bf16.vlgmr.msra.gmra.mrb[16].mxu0 %v10599_v5 }
 0x3a6   :  { %7771 = vmatmul.mubr.bf16.vlgmr.msra.gmra.mrb[16].mxu1 %v10599_v5  ;;  %7616 = vmatpush1.bf16.msra.mxu0 %v9195_v42  ;;  %v1070_v42 = vld [vmem:[#allocation9 + $0xbe0] sm:$0xff] }
 0x3a7   :  { %7647 = vmatprep.mubr.bf16.mxu0 %v10602_v11  ;;  %7780 = vmatpush1.bf16.msra.mxu1 %v9197_v27  ;;  %v9291_v27 = vcombine.low %v1046_v29, %v1054_v18  ;;  %v9308_v44 = vcombine.high %v1062_v48, %v1070_v42  ;;  %v1142_v18 = vld [vmem:[#allocation9 + $0xe20] sm:$0xff] }
 0x3a8   :  { %7811 = vmatprep.mubr.bf16.mxu1 %v10602_v11  ;;  %7617 = vmatprep.subr.bf16.mxu0 %v9212_v49  ;;  %v9293_v49 = vcombine.low %v1047_v22, %v1055_v23  ;;  %v1150_v22 = vld [vmem:[#allocation9 + $0xe60] sm:$0xff]  ;;  %v1143_v23 = vld [vmem:[#allocation9 + $0xe28] sm:$0xff] }
 0x3a9   :  { %7781 = vmatprep.subr.bf16.mxu1 %v9214_v51  ;;  %v1078_v51 = vld [vmem:[#allocation9 + $0xc20] sm:$0xff] }
 0x3aa   :  { %7618 = vmatpush1.bf16.msra.mxu0 %v9211_v13  ;;  %v1087_v13 = vld [vmem:[#allocation9 + $0xc68] sm:$0xff] }
 0x3ab   :  { %7782 = vmatpush1.bf16.msra.mxu1 %v9213_v55  ;;  %7619 = vmatprep.subr.bf16.mxu0 %v9228_v57  ;;  %v9307_v55 = vcombine.low %v1062_v48, %v1070_v42  ;;  %v9309_v57 = vcombine.low %v1063_v56, %v1071_v17  ;;  %v9326_v32 = vcombine.high %v1079_v53, %v1087_v13  ;;  %v1158_v42 = vld [vmem:[#allocation9 + $0xea0] sm:$0xff]  ;;  %v1159_v17 = vld [vmem:[#allocation9 + $0xea8] sm:$0xff] }
 0x3ac   :  { %7783 = vmatprep.subr.bf16.mxu1 %v9230_v59  ;;  %v9324_v59 = vcombine.high %v1078_v51, %v1086_v52  ;;  %v1166_v56 = vld [vmem:[#allocation9 + $0xee0] sm:$0xff] }
 0x3ae   :  { %7620 = vmatpush1.bf16.msra.mxu0 %v9227_v6  ;;  %v1103_v6 = vld [vmem:[#allocation9 + $0xce8] sm:$0xff] }
 0x3af   :  { %7784 = vmatpush1.bf16.msra.mxu1 %v9229_v35  ;;  %7621 = vmatprep.subr.bf16.mxu0 %v9244_v39  ;;  %v9323_v35 = vcombine.low %v1078_v51, %v1086_v52  ;;  %v9325_v39 = vcombine.low %v1079_v53, %v1087_v13  ;;  %v9342_v8 = vcombine.high %v1095_v3, %v1103_v6  ;;  %v1174_v52 = vld [vmem:[#allocation9 + $0xf20] sm:$0xff]  ;;  %v1175_v13 = vld [vmem:[#allocation9 + $0xf28] sm:$0xff] }
 0x3b0   :  { %7785 = vmatprep.subr.bf16.mxu1 %v9246_v19  ;;  %v9340_v19 = vcombine.high %v1094_v60, %v1102_v50  ;;  %v1182_v53 = vld [vmem:[#allocation9 + $0xf60] sm:$0xff] }
 0x3b2   :  { %7622 = vmatpush1.bf16.msra.mxu0 %v9243_v41  ;;  %v1119_v41 = vld [vmem:[#allocation9 + $0xd68] sm:$0xff] }
 0x3b3   :  { %7786 = vmatpush1.bf16.msra.mxu1 %v9245_v16  ;;  %7623 = vmatprep.subr.bf16.mxu0 %v9260_v10  ;;  %v9339_v16 = vcombine.low %v1094_v60, %v1102_v50  ;;  %v9341_v10 = vcombine.low %v1095_v3, %v1103_v6  ;;  %v9358_v36 = vcombine.high %v1111_v37, %v1119_v41  ;;  %v1190_v50 = vld [vmem:[#allocation9 + $0xfa0] sm:$0xff]  ;;  %v1191_v6 = vld [vmem:[#allocation9 + $0xfa8] sm:$0xff] }
 0x3b4   :  { %7787 = vmatprep.subr.bf16.mxu1 %v9262_v14  ;;  %v9356_v14 = vcombine.high %v1110_v54, %v1118_v15  ;;  %v1198_v3 = vld [vmem:[#allocation9 + $0xfe0] sm:$0xff] }
 0x3b6   :  { %7624 = vmatpush1.bf16.msra.mxu0 %v9259_v34  ;;  %v1135_v34 = vld [vmem:[#allocation9 + $0xde8] sm:$0xff] }
 0x3b7   :  { %7788 = vmatpush1.bf16.msra.mxu1 %v9261_v20  ;;  %7625 = vmatprep.subr.bf16.mxu0 %v9276_v43  ;;  %v9355_v20 = vcombine.low %v1110_v54, %v1118_v15  ;;  %v9357_v43 = vcombine.low %v1111_v37, %v1119_v41  ;;  %v9374_v29 = vcombine.high %v1127_v21, %v1135_v34  ;;  %v1206_v15 = vld [vmem:[#allocation9 + $0x1020] sm:$0xff]  ;;  %v1207_v41 = vld [vmem:[#allocation9 + $0x1028] sm:$0xff] }
 0x3b8   :  { %7789 = vmatprep.subr.bf16.mxu1 %v9278_v40  ;;  %v9372_v40 = vcombine.high %v1126_v9, %v1134_v33  ;;  %v1214_v37 = vld [vmem:[#allocation9 + $0x1060] sm:$0xff] }
 0x3ba   :  { %7626 = vmatpush1.bf16.msra.mxu0 %v9275_v24  ;;  %v1151_v24 = vld [vmem:[#allocation9 + $0xe68] sm:$0xff] }
 0x3bb   :  { %7790 = vmatpush1.bf16.msra.mxu1 %v9277_v45  ;;  %7627 = vmatprep.subr.bf16.mxu0 %v9292_v46  ;;  %v9371_v45 = vcombine.low %v1126_v9, %v1134_v33  ;;  %v9373_v46 = vcombine.low %v1127_v21, %v1135_v34  ;;  %v9390_v48 = vcombine.high %v1143_v23, %v1151_v24  ;;  %v1222_v33 = vld [vmem:[#allocation9 + $0x10a0] sm:$0xff] }
 0x3bc   :  { %7791 = vmatprep.subr.bf16.mxu1 %v9294_v47  ;;  %v9388_v47 = vcombine.high %v1142_v18, %v1150_v22  ;;  %v1230_v21 = vld [vmem:[#allocation9 + $0x10e0] sm:$0xff]  ;;  %v9451_v34 = vcombine.low %v1206_v15, %v1214_v37 }
 0x3be   :  { %7628 = vmatpush1.bf16.msra.mxu0 %v9291_v27  ;;  %v1167_v27 = vld [vmem:[#allocation9 + $0xee8] sm:$0xff] }
 0x3bf   :  { %7792 = vmatpush1.bf16.msra.mxu1 %v9293_v49  ;;  %7629 = vmatprep.subr.bf16.mxu0 %v9308_v44  ;;  %v9387_v49 = vcombine.low %v1142_v18, %v1150_v22  ;;  %v9389_v44 = vcombine.low %v1143_v23, %v1151_v24  ;;  %v9406_v51 = vcombine.high %v1159_v17, %v1167_v27  ;;  %v1238_v18 = vld [vmem:[#allocation9 + $0x1120] sm:$0xff]  ;;  %v1239_v24 = vld [vmem:[#allocation9 + $0x1128] sm:$0xff] }
 0x3c0   :  { %7793 = vmatprep.subr.bf16.mxu1 %v9310_v26  ;;  %v9404_v26 = vcombine.high %v1158_v42, %v1166_v56  ;;  %v1246_v22 = vld [vmem:[#allocation9 + $0x1160] sm:$0xff] }
 0x3c2   :  { %7630 = vmatpush1.bf16.msra.mxu0 %v9307_v55  ;;  %v1183_v55 = vld [vmem:[#allocation9 + $0xf68] sm:$0xff] }
 0x3c3   :  { %7794 = vmatpush1.bf16.msra.mxu1 %v9309_v57  ;;  %7631 = vmatprep.subr.bf16.mxu0 %v9324_v59  ;;  %v9403_v57 = vcombine.low %v1158_v42, %v1166_v56  ;;  %v9405_v59 = vcombine.low %v1159_v17, %v1167_v27  ;;  %v9422_v60 = vcombine.high %v1175_v13, %v1183_v55  ;;  %v1254_v56 = vld [vmem:[#allocation9 + $0x11a0] sm:$0xff]  ;;  %v1255_v27 = vld [vmem:[#allocation9 + $0x11a8] sm:$0xff] }
 0x3c4   :  { %7795 = vmatprep.subr.bf16.mxu1 %v9326_v32  ;;  %v9420_v32 = vcombine.high %v1174_v52, %v1182_v53  ;;  %v1262_v17 = vld [vmem:[#allocation9 + $0x11e0] sm:$0xff] }
 0x3c6   :  { %7632 = vmatpush1.bf16.msra.mxu0 %v9323_v35  ;;  %v1199_v35 = vld [vmem:[#allocation9 + $0xfe8] sm:$0xff] }
 0x3c7   :  { %7796 = vmatpush1.bf16.msra.mxu1 %v9325_v39  ;;  %7633 = vmatprep.subr.bf16.mxu0 %v9340_v19  ;;  %v9419_v39 = vcombine.low %v1174_v52, %v1182_v53  ;;  %v9421_v19 = vcombine.low %v1175_v13, %v1183_v55  ;;  %v9438_v54 = vcombine.high %v1191_v6, %v1199_v35  ;;  %v1270_v53 = vld [vmem:[#allocation9 + $0x1220] sm:$0xff]  ;;  %v1271_v55 = vld [vmem:[#allocation9 + $0x1228] sm:$0xff] }
 0x3c8   :  { %7797 = vmatprep.subr.bf16.mxu1 %v9342_v8  ;;  %v9436_v8 = vcombine.high %v1190_v50, %v1198_v3  ;;  %v1278_v13 = vld [vmem:[#allocation9 + $0x1260] sm:$0xff] }
 0x3ca   :  { %7634 = vmatpush1.bf16.msra.mxu0 %v9339_v16  ;;  %v1215_v16 = vld [vmem:[#allocation9 + $0x1068] sm:$0xff] }
 0x3cb   :  { %7798 = vmatpush1.bf16.msra.mxu1 %v9341_v10  ;;  %7635 = vmatprep.subr.bf16.mxu0 %v9356_v14  ;;  %v9435_v10 = vcombine.low %v1190_v50, %v1198_v3  ;;  %v9437_v14 = vcombine.low %v1191_v6, %v1199_v35  ;;  %v9454_v9 = vcombine.high %v1207_v41, %v1215_v16  ;;  %v1286_v3 = vld [vmem:[#allocation9 + $0x12a0] sm:$0xff]  ;;  %v1287_v35 = vld [vmem:[#allocation9 + $0x12a8] sm:$0xff] }
 0x3cc   :  { %7799 = vmatprep.subr.bf16.mxu1 %v9358_v36  ;;  %v9452_v36 = vcombine.high %v1206_v15, %v1214_v37  ;;  %v1294_v6 = vld [vmem:[#allocation9 + $0x12e0] sm:$0xff] }
 0x3cd   :  { %v1302_v37 = vld [vmem:[#allocation9 + $0x1320] sm:$0xff] }
 0x3ce   :  { %7636 = vmatpush1.bf16.msra.mxu0 %v9355_v20  ;;  %v1223_v20 = vld [vmem:[#allocation9 + $0x10a8] sm:$0xff] }
 0x3cf   :  { %7800 = vmatpush1.bf16.msra.mxu1 %v9357_v43  ;;  %7637 = vmatprep.subr.bf16.mxu0 %v9372_v40  ;;  %v1231_v43 = vld [vmem:[#allocation9 + $0x10e8] sm:$0xff]  ;;  %v9453_v40 = vcombine.low %v1207_v41, %v1215_v16  ;;  %v1310_v41 = vld [vmem:[#allocation9 + $0x1360] sm:$0xff] }
 0x3d0   :  { %7801 = vmatprep.subr.bf16.mxu1 %v9374_v29  ;;  %v9468_v29 = vcombine.high %v1222_v33, %v1230_v21  ;;  %v9470_v23 = vcombine.high %v1223_v20, %v1231_v43  ;;  %v1303_v16 = vld [vmem:[#allocation9 + $0x1328] sm:$0xff] }
 0x3d2   :  { %7638 = vmatpush1.bf16.msra.mxu0 %v9371_v45  ;;  %v1247_v45 = vld [vmem:[#allocation9 + $0x1168] sm:$0xff] }
 0x3d3   :  { %7802 = vmatpush1.bf16.msra.mxu1 %v9373_v46  ;;  %7639 = vmatprep.subr.bf16.mxu0 %v9388_v47  ;;  %v9467_v46 = vcombine.low %v1222_v33, %v1230_v21  ;;  %v9469_v47 = vcombine.low %v1223_v20, %v1231_v43  ;;  %v9486_v42 = vcombine.high %v1239_v24, %v1247_v45  ;;  %v1318_v21 = vld [vmem:[#allocation9 + $0x13a0] sm:$0xff]  ;;  %v1319_v20 = vld [vmem:[#allocation9 + $0x13a8] sm:$0xff] }
 0x3d4   :  { %7803 = vmatprep.subr.bf16.mxu1 %v9390_v48  ;;  %v9484_v48 = vcombine.high %v1238_v18, %v1246_v22  ;;  %v1327_v43 = vld [vmem:[#allocation9 + $0x13e8] sm:$0xff] }
 0x3d6   :  { %7640 = vmatpush1.bf16.msra.mxu0 %v9387_v49  ;;  %v1263_v49 = vld [vmem:[#allocation9 + $0x11e8] sm:$0xff] }
 0x3d7   :  { %7804 = vmatpush1.bf16.msra.mxu1 %v9389_v44  ;;  %7641 = vmatprep.subr.bf16.mxu0 %v9404_v26  ;;  %v9483_v44 = vcombine.low %v1238_v18, %v1246_v22  ;;  %v9485_v26 = vcombine.low %v1239_v24, %v1247_v45  ;;  %v9502_v52 = vcombine.high %v1255_v27, %v1263_v49  ;;  %v1342_v24 = vld [vmem:[#allocation9 + $0x1460] sm:$0xff]  ;;  %v1335_v45 = vld [vmem:[#allocation9 + $0x1428] sm:$0xff] }
 0x3d8   :  { %7805 = vmatprep.subr.bf16.mxu1 %v9406_v51  ;;  %v9500_v51 = vcombine.high %v1254_v56, %v1262_v17  ;;  %v9566_v22 = vcombine.high %v1319_v20, %v1327_v43 }
 0x3da   :  { %7642 = vmatpush1.bf16.msra.mxu0 %v9403_v57  ;;  %v1279_v57 = vld [vmem:[#allocation9 + $0x1268] sm:$0xff] }
 0x3db   :  { %7806 = vmatpush1.bf16.msra.mxu1 %v9405_v59  ;;  %7643 = vmatprep.subr.bf16.mxu0 %v9420_v32  ;;  %v9499_v59 = vcombine.low %v1254_v56, %v1262_v17  ;;  %v9501_v32 = vcombine.low %v1255_v27, %v1263_v49  ;;  %v9518_v50 = vcombine.high %v1271_v55, %v1279_v57  ;;  %v1350_v17 = vld [vmem:[#allocation9 + $0x14a0] sm:$0xff]  ;;  %v1351_v49 = vld [vmem:[#allocation9 + $0x14a8] sm:$0xff] }
 0x3dc   :  { %7807 = vmatprep.subr.bf16.mxu1 %v9422_v60  ;;  %v9516_v60 = vcombine.high %v1270_v53, %v1278_v13  ;;  %v1358_v27 = vld [vmem:[#allocation9 + $0x14e0] sm:$0xff] }
 0x3de   :  { %7644 = vmatpush1.bf16.msra.mxu0 %v9419_v39  ;;  %v1295_v39 = vld [vmem:[#allocation9 + $0x12e8] sm:$0xff] }
 0x3df   :  { %7808 = vmatpush1.bf16.msra.mxu1 %v9421_v19  ;;  %7645 = vmatprep.subr.bf16.mxu0 %v9436_v8  ;;  %v9515_v19 = vcombine.low %v1270_v53, %v1278_v13  ;;  %v9517_v8 = vcombine.low %v1271_v55, %v1279_v57  ;;  %v9534_v15 = vcombine.high %v1287_v35, %v1295_v39  ;;  %v1366_v13 = vld [vmem:[#allocation9 + $0x1520] sm:$0xff]  ;;  %v1367_v57 = vld [vmem:[#allocation9 + $0x1528] sm:$0xff] }
 0x3e0   :  { %7809 = vmatprep.subr.bf16.mxu1 %v9438_v54  ;;  %v9532_v54 = vcombine.high %v1286_v3, %v1294_v6  ;;  %v1374_v55 = vld [vmem:[#allocation9 + $0x1560] sm:$0xff] }
 0x3e2   :  { %7646 = vmatpush1.bf16.msra.mxu0 %v9435_v10  ;;  %v1311_v10 = vld [vmem:[#allocation9 + $0x1368] sm:$0xff] }
 0x3e3   :  { %7810 = vmatpush1.bf16.msra.mxu1 %v9437_v14  ;;  %7656 = vmatprep.subr.bf16.mxu0 %v9452_v36  ;;  %v9531_v14 = vcombine.low %v1286_v3, %v1294_v6  ;;  %v9533_v36 = vcombine.low %v1287_v35, %v1295_v39  ;;  %v9550_v33 = vcombine.high %v1303_v16, %v1311_v10  ;;  %v1382_v6 = vld [vmem:[#allocation9 + $0x15a0] sm:$0xff]  ;;  %v1383_v39 = vld [vmem:[#allocation9 + $0x15a8] sm:$0xff] }
 0x3e4   :  { %7820 = vmatprep.subr.bf16.mxu1 %v9454_v9  ;;  %v9548_v9 = vcombine.high %v1302_v37, %v1310_v41  ;;  %v1390_v35 = vld [vmem:[#allocation9 + $0x15e0] sm:$0xff] }
 0x3e5   :  { %7648 = vmatmul.mubr.bf16.vlgmr.msra.gmra.mrb[16].mxu0 %v10657_v7 }
 0x3e6   :  { %7812 = vmatmul.mubr.bf16.vlgmr.msra.gmra.mrb[16].mxu1 %v10657_v7  ;;  %7657 = vmatpush1.bf16.msra.mxu0 %v9451_v34  ;;  %v1326_v34 = vld [vmem:[#allocation9 + $0x13e0] sm:$0xff] }
 0x3e7   :  { %7688 = vmatprep.mubr.bf16.mxu0 %v10660_v12  ;;  %7821 = vmatpush1.bf16.msra.mxu1 %v9453_v40  ;;  %v9547_v40 = vcombine.low %v1302_v37, %v1310_v41  ;;  %v9564_v18 = vcombine.high %v1318_v21, %v1326_v34  ;;  %v1398_v41 = vld [vmem:[#allocation9 + $0x1620] sm:$0xff] }
 0x3e8   :  { %7852 = vmatprep.mubr.bf16.mxu1 %v10660_v12  ;;  %7658 = vmatprep.subr.bf16.mxu0 %v9468_v29  ;;  %v9549_v29 = vcombine.low %v1303_v16, %v1311_v10  ;;  %v1406_v16 = vld [vmem:[#allocation9 + $0x1660] sm:$0xff]  ;;  %v1399_v10 = vld [vmem:[#allocation9 + $0x1628] sm:$0xff] }
 0x3e9   :  { %7822 = vmatprep.subr.bf16.mxu1 %v9470_v23  ;;  %v1334_v23 = vld [vmem:[#allocation9 + $0x1420] sm:$0xff] }
 0x3ea   :  { %7659 = vmatpush1.bf16.msra.mxu0 %v9467_v46  ;;  %v1343_v46 = vld [vmem:[#allocation9 + $0x1468] sm:$0xff] }
 0x3eb   :  { %7823 = vmatpush1.bf16.msra.mxu1 %v9469_v47  ;;  %7660 = vmatprep.subr.bf16.mxu0 %v9484_v48  ;;  %v9563_v47 = vcombine.low %v1318_v21, %v1326_v34  ;;  %v9565_v48 = vcombine.low %v1319_v20, %v1327_v43  ;;  %v9582_v56 = vcombine.high %v1335_v45, %v1343_v46  ;;  %v1414_v34 = vld [vmem:[#allocation9 + $0x16a0] sm:$0xff]  ;;  %v1415_v43 = vld [vmem:[#allocation9 + $0x16a8] sm:$0xff] }
 0x3ec   :  { %7824 = vmatprep.subr.bf16.mxu1 %v9486_v42  ;;  %v9580_v42 = vcombine.high %v1334_v23, %v1342_v24  ;;  %v1422_v20 = vld [vmem:[#allocation9 + $0x16e0] sm:$0xff] }
 0x3ee   :  { %7661 = vmatpush1.bf16.msra.mxu0 %v9483_v44  ;;  %v1359_v44 = vld [vmem:[#allocation9 + $0x14e8] sm:$0xff] }
 0x3ef   :  { %7825 = vmatpush1.bf16.msra.mxu1 %v9485_v26  ;;  %7662 = vmatprep.subr.bf16.mxu0 %v9500_v51  ;;  %v9579_v26 = vcombine.low %v1334_v23, %v1342_v24  ;;  %v9581_v51 = vcombine.low %v1335_v45, %v1343_v46  ;;  %v9598_v53 = vcombine.high %v1351_v49, %v1359_v44  ;;  %v1430_v24 = vld [vmem:[#allocation9 + $0x1720] sm:$0xff]  ;;  %v1431_v46 = vld [vmem:[#allocation9 + $0x1728] sm:$0xff] }
 0x3f0   :  { %7826 = vmatprep.subr.bf16.mxu1 %v9502_v52  ;;  %v9596_v52 = vcombine.high %v1350_v17, %v1358_v27  ;;  %v1438_v45 = vld [vmem:[#allocation9 + $0x1760] sm:$0xff] }
 0x3f2   :  { %7663 = vmatpush1.bf16.msra.mxu0 %v9499_v59  ;;  %v1375_v59 = vld [vmem:[#allocation9 + $0x1568] sm:$0xff] }
 0x3f3   :  { %7827 = vmatpush1.bf16.msra.mxu1 %v9501_v32  ;;  %7664 = vmatprep.subr.bf16.mxu0 %v9516_v60  ;;  %v9595_v32 = vcombine.low %v1350_v17, %v1358_v27  ;;  %v9597_v60 = vcombine.low %v1351_v49, %v1359_v44  ;;  %v9614_v3 = vcombine.high %v1367_v57, %v1375_v59  ;;  %v1446_v27 = vld [vmem:[#allocation9 + $0x17a0] sm:$0xff]  ;;  %v1447_v44 = vld [vmem:[#allocation9 + $0x17a8] sm:$0xff] }
 0x3f4   :  { %7828 = vmatprep.subr.bf16.mxu1 %v9518_v50  ;;  %v9612_v50 = vcombine.high %v1366_v13, %v1374_v55  ;;  %v1454_v49 = vld [vmem:[#allocation9 + $0x17e0] sm:$0xff] }
 0x3f6   :  { %7665 = vmatpush1.bf16.msra.mxu0 %v9515_v19  ;;  %v1391_v19 = vld [vmem:[#allocation9 + $0x15e8] sm:$0xff] }
 0x3f7   :  { %7829 = vmatpush1.bf16.msra.mxu1 %v9517_v8  ;;  %7666 = vmatprep.subr.bf16.mxu0 %v9532_v54  ;;  %v9611_v8 = vcombine.low %v1366_v13, %v1374_v55  ;;  %v9613_v54 = vcombine.low %v1367_v57, %v1375_v59  ;;  %v9630_v37 = vcombine.high %v1383_v39, %v1391_v19  ;;  %v1462_v55 = vld [vmem:[#allocation9 + $0x1820] sm:$0xff]  ;;  %v1463_v59 = vld [vmem:[#allocation9 + $0x1828] sm:$0xff] }
 0x3f8   :  { %7830 = vmatprep.subr.bf16.mxu1 %v9534_v15  ;;  %v9628_v15 = vcombine.high %v1382_v6, %v1390_v35  ;;  %v1470_v57 = vld [vmem:[#allocation9 + $0x1860] sm:$0xff] }
 0x3fa   :  { %7667 = vmatpush1.bf16.msra.mxu0 %v9531_v14  ;;  %v1407_v14 = vld [vmem:[#allocation9 + $0x1668] sm:$0xff] }
 0x3fb   :  { %7831 = vmatpush1.bf16.msra.mxu1 %v9533_v36  ;;  %7668 = vmatprep.subr.bf16.mxu0 %v9548_v9  ;;  %v9627_v36 = vcombine.low %v1382_v6, %v1390_v35  ;;  %v9629_v9 = vcombine.low %v1383_v39, %v1391_v19  ;;  %v9646_v21 = vcombine.high %v1399_v10, %v1407_v14  ;;  %v1478_v35 = vld [vmem:[#allocation9 + $0x18a0] sm:$0xff] }
 0x3fc   :  { %7832 = vmatprep.subr.bf16.mxu1 %v9550_v33  ;;  %v9644_v33 = vcombine.high %v1398_v41, %v1406_v16  ;;  %v1486_v39 = vld [vmem:[#allocation9 + $0x18e0] sm:$0xff]  ;;  %v9707_v19 = vcombine.low %v1462_v55, %v1470_v57 }
 0x3fe   :  { %7669 = vmatpush1.bf16.msra.mxu0 %v9547_v40  ;;  %v1423_v40 = vld [vmem:[#allocation9 + $0x16e8] sm:$0xff] }
 0x3ff   :  { %7833 = vmatpush1.bf16.msra.mxu1 %v9549_v29  ;;  %7670 = vmatprep.subr.bf16.mxu0 %v9564_v18  ;;  %v9643_v29 = vcombine.low %v1398_v41, %v1406_v16  ;;  %v9645_v18 = vcombine.low %v1399_v10, %v1407_v14  ;;  %v9662_v23 = vcombine.high %v1415_v43, %v1423_v40  ;;  %v1494_v41 = vld [vmem:[#allocation9 + $0x1920] sm:$0xff]  ;;  %v1495_v14 = vld [vmem:[#allocation9 + $0x1928] sm:$0xff] }
 0x400   :  { %7834 = vmatprep.subr.bf16.mxu1 %v9566_v22  ;;  %v9660_v22 = vcombine.high %v1414_v34, %v1422_v20  ;;  %v1502_v16 = vld [vmem:[#allocation9 + $0x1960] sm:$0xff] }
 0x402   :  { %7671 = vmatpush1.bf16.msra.mxu0 %v9563_v47  ;;  %v1439_v47 = vld [vmem:[#allocation9 + $0x1768] sm:$0xff] }
 0x403   :  { %7835 = vmatpush1.bf16.msra.mxu1 %v9565_v48  ;;  %7672 = vmatprep.subr.bf16.mxu0 %v9580_v42  ;;  %v9659_v48 = vcombine.low %v1414_v34, %v1422_v20  ;;  %v9661_v42 = vcombine.low %v1415_v43, %v1423_v40  ;;  %v9678_v17 = vcombine.high %v1431_v46, %v1439_v47  ;;  %v1510_v20 = vld [vmem:[#allocation9 + $0x19a0] sm:$0xff]  ;;  %v1511_v40 = vld [vmem:[#allocation9 + $0x19a8] sm:$0xff] }
 0x404   :  { %7836 = vmatprep.subr.bf16.mxu1 %v9582_v56  ;;  %v9676_v56 = vcombine.high %v1430_v24, %v1438_v45  ;;  %v1518_v43 = vld [vmem:[#allocation9 + $0x19e0] sm:$0xff] }
 0x406   :  { %7673 = vmatpush1.bf16.msra.mxu0 %v9579_v26  ;;  %v1455_v26 = vld [vmem:[#allocation9 + $0x17e8] sm:$0xff] }
 0x407   :  { %7837 = vmatpush1.bf16.msra.mxu1 %v9581_v51  ;;  %7674 = vmatprep.subr.bf16.mxu0 %v9596_v52  ;;  %v9675_v51 = vcombine.low %v1430_v24, %v1438_v45  ;;  %v9677_v52 = vcombine.low %v1431_v46, %v1439_v47  ;;  %v9694_v13 = vcombine.high %v1447_v44, %v1455_v26  ;;  %v1526_v45 = vld [vmem:[#allocation9 + $0x1a20] sm:$0xff]  ;;  %v1527_v47 = vld [vmem:[#allocation9 + $0x1a28] sm:$0xff] }
 0x408   :  { %7838 = vmatprep.subr.bf16.mxu1 %v9598_v53  ;;  %v9692_v53 = vcombine.high %v1446_v27, %v1454_v49  ;;  %v1534_v46 = vld [vmem:[#allocation9 + $0x1a60] sm:$0xff] }
 0x40a   :  { %7675 = vmatpush1.bf16.msra.mxu0 %v9595_v32  ;;  %v1471_v32 = vld [vmem:[#allocation9 + $0x1868] sm:$0xff] }
 0x40b   :  { %7839 = vmatpush1.bf16.msra.mxu1 %v9597_v60  ;;  %7676 = vmatprep.subr.bf16.mxu0 %v9612_v50  ;;  %v9691_v60 = vcombine.low %v1446_v27, %v1454_v49  ;;  %v9693_v50 = vcombine.low %v1447_v44, %v1455_v26  ;;  %v9710_v6 = vcombine.high %v1463_v59, %v1471_v32  ;;  %v1542_v49 = vld [vmem:[#allocation9 + $0x1aa0] sm:$0xff]  ;;  %v1543_v26 = vld [vmem:[#allocation9 + $0x1aa8] sm:$0xff] }
 0x40c   :  { %7840 = vmatprep.subr.bf16.mxu1 %v9614_v3  ;;  %v9708_v3 = vcombine.high %v1462_v55, %v1470_v57  ;;  %v1550_v44 = vld [vmem:[#allocation9 + $0x1ae0] sm:$0xff] }
 0x40d   :  { %v1558_v57 = vld [vmem:[#allocation9 + $0x1b20] sm:$0xff] }
 0x40e   :  { %7677 = vmatpush1.bf16.msra.mxu0 %v9611_v8  ;;  %v1479_v8 = vld [vmem:[#allocation9 + $0x18a8] sm:$0xff] }
 0x40f   :  { %7841 = vmatpush1.bf16.msra.mxu1 %v9613_v54  ;;  %7678 = vmatprep.subr.bf16.mxu0 %v9628_v15  ;;  %v1487_v54 = vld [vmem:[#allocation9 + $0x18e8] sm:$0xff]  ;;  %v9709_v15 = vcombine.low %v1463_v59, %v1471_v32  ;;  %v1566_v59 = vld [vmem:[#allocation9 + $0x1b60] sm:$0xff] }
 0x410   :  { %7842 = vmatprep.subr.bf16.mxu1 %v9630_v37  ;;  %v9724_v37 = vcombine.high %v1478_v35, %v1486_v39  ;;  %v9726_v10 = vcombine.high %v1479_v8, %v1487_v54  ;;  %v10137_v32 = vld [vmem:[#allocation10] sm:$0xff] }
 0x412   :  { %7679 = vmatpush1.bf16.msra.mxu0 %v9627_v36  ;;  %v1503_v36 = vld [vmem:[#allocation9 + $0x1968] sm:$0xff] }
 0x413   :  { %7843 = vmatpush1.bf16.msra.mxu1 %v9629_v9  ;;  %7680 = vmatprep.subr.bf16.mxu0 %v9644_v33  ;;  %v9723_v9 = vcombine.low %v1478_v35, %v1486_v39  ;;  %v9725_v33 = vcombine.low %v1479_v8, %v1487_v54  ;;  %v9742_v34 = vcombine.high %v1495_v14, %v1503_v36 }
 0x414   :  { %7844 = vmatprep.subr.bf16.mxu1 %v9646_v21  ;;  %v9740_v21 = vcombine.high %v1494_v41, %v1502_v16  ;;  %v1741_v35 = vrot.slane %v10137_v32, %v10550_v62  ;;  %v9787_v39 = vcombine.low %v1542_v49, %v1550_v44  ;;  %v9804_v54 = vcombine.high %v1558_v57, %v1566_v59 }
 0x416   :  { %7681 = vmatpush1.bf16.msra.mxu0 %v9643_v29  ;;  %v1519_v29 = vld [vmem:[#allocation9 + $0x19e8] sm:$0xff] }
 0x417   :  { %7845 = vmatpush1.bf16.msra.mxu1 %v9645_v18  ;;  %7682 = vmatprep.subr.bf16.mxu0 %v9660_v22  ;;  %v9739_v18 = vcombine.low %v1494_v41, %v1502_v16  ;;  %v9741_v22 = vcombine.low %v1495_v14, %v1503_v36  ;;  %v9758_v24 = vcombine.high %v1511_v40, %v1519_v29  ;;  %v1574_v41 = vld [vmem:[#allocation9 + $0x1ba0] sm:$0xff] }
 0x418   :  { %7846 = vmatprep.subr.bf16.mxu1 %v9662_v23  ;;  %v9756_v23 = vcombine.high %v1510_v20, %v1518_v43  ;;  %v1582_v16 = vld [vmem:[#allocation9 + $0x1be0] sm:$0xff] }
 0x41a   :  { %7683 = vmatpush1.bf16.msra.mxu0 %v9659_v48  ;;  %v1535_v48 = vld [vmem:[#allocation9 + $0x1a68] sm:$0xff] }
 0x41b   :  { %7847 = vmatpush1.bf16.msra.mxu1 %v9661_v42  ;;  %7684 = vmatprep.subr.bf16.mxu0 %v9676_v56  ;;  %v9755_v42 = vcombine.low %v1510_v20, %v1518_v43  ;;  %v9757_v56 = vcombine.low %v1511_v40, %v1519_v29  ;;  %v9774_v27 = vcombine.high %v1527_v47, %v1535_v48 }
 0x41c   :  { %7848 = vmatprep.subr.bf16.mxu1 %v9678_v17  ;;  %v9772_v17 = vcombine.high %v1526_v45, %v1534_v46  ;;  %v9803_v40 = vcombine.low %v1558_v57, %v1566_v59 }
 0x41e   :  { %7685 = vmatpush1.bf16.msra.mxu0 %v9675_v51  ;;  %v1551_v51 = vld [vmem:[#allocation9 + $0x1ae8] sm:$0xff] }
 0x41f   :  { %7849 = vmatpush1.bf16.msra.mxu1 %v9677_v52  ;;  %7686 = vmatprep.subr.bf16.mxu0 %v9692_v53  ;;  %v9771_v52 = vcombine.low %v1526_v45, %v1534_v46  ;;  %v9773_v53 = vcombine.low %v1527_v47, %v1535_v48  ;;  %v9790_v55 = vcombine.high %v1543_v26, %v1551_v51 }
 0x420   :  { %7850 = vmatprep.subr.bf16.mxu1 %v9694_v13  ;;  %v9788_v13 = vcombine.high %v1542_v49, %v1550_v44  ;;  %v9789_v8 = vcombine.low %v1543_v26, %v1551_v51  ;;  %v9820_v45 = vcombine.high %v1574_v41, %v1582_v16  ;;  %v1591_v51 = vld [vmem:[#allocation9 + $0x1c28] sm:$0xff] }
 0x422   :  { %7687 = vmatpush1.bf16.msra.mxu0 %v9691_v60  ;;  %v1737_v60 = vrot.slane %v10137_v32, %v10618_v61 }
 0x423   :  { %7851 = vmatpush1.bf16.msra.mxu1 %v9693_v50  ;;  %7697 = vmatprep.subr.bf16.mxu0 %v9708_v3  ;;  %v1559_v50 = vld [vmem:[#allocation9 + $0x1b28] sm:$0xff] }
 0x424   :  { %7861 = vmatprep.subr.bf16.mxu1 %v9710_v6  ;;  %v1567_v3 = vld [vmem:[#allocation9 + $0x1b68] sm:$0xff]  ;;  %v1745_v6 = vrot.slane %v10137_v32, %v10668_v0 }
 0x425   :  { %7689 = vmatmul.mubr.bf16.vlgmr.msra.gmra.mrb[16].mxu0 %v10692_v25 }
 0x426   :  { %7853 = vmatmul.mubr.bf16.vlgmr.msra.gmra.mrb[16].mxu1 %v10692_v25  ;;  %7698 = vmatpush1.bf16.msra.mxu0 %v9707_v19  ;;  %v1749_v19 = vrot.slane %v10137_v32, %v10621_v1 }
 0x427   :  { %7729 = vmatprep.mubr.bf16.mxu0 %v10695_v63  ;;  %7862 = vmatpush1.bf16.msra.mxu1 %v9709_v15 }
 0x428   :  { %7893 = vmatprep.mubr.bf16.mxu1 %v10695_v63  ;;  %7699 = vmatprep.subr.bf16.mxu0 %v9724_v37  ;;  %v9806_v37 = vcombine.high %v1559_v50, %v1567_v3 }
 0x429   :  { %7863 = vmatprep.subr.bf16.mxu1 %v9726_v10 }
 0x42a   :  { %7700 = vmatpush1.bf16.msra.mxu0 %v9723_v9  ;;  %v1575_v9 = vld [vmem:[#allocation9 + $0x1ba8] sm:$0xff] }
 0x42b   :  { %7864 = vmatpush1.bf16.msra.mxu1 %v9725_v33  ;;  %7701 = vmatprep.subr.bf16.mxu0 %v9740_v21  ;;  %v1583_v33 = vld [vmem:[#allocation9 + $0x1be8] sm:$0xff] }
 0x42c   :  { %7865 = vmatprep.subr.bf16.mxu1 %v9742_v34  ;;  %v9821_v57 = vcombine.low %v1575_v9, %v1583_v33 }
 0x42e   :  { %7702 = vmatpush1.bf16.msra.mxu0 %v9739_v18 }
 0x42f   :  { %7866 = vmatpush1.bf16.msra.mxu1 %v9741_v22  ;;  %7703 = vmatprep.subr.bf16.mxu0 %v9756_v23 }
 0x430   :  { %7867 = vmatprep.subr.bf16.mxu1 %v9758_v24  ;;  %v9805_v24 = vcombine.low %v1559_v50, %v1567_v3 }
 0x432   :  { %7704 = vmatpush1.bf16.msra.mxu0 %v9755_v42 }
 0x433   :  { %7868 = vmatpush1.bf16.msra.mxu1 %v9757_v56  ;;  %7705 = vmatprep.subr.bf16.mxu0 %v9772_v17  ;;  %v9822_v56 = vcombine.high %v1575_v9, %v1583_v33  ;;  %v1590_v17 = vld [vmem:[#allocation9 + $0x1c20] sm:$0xff] }
 0x434   :  { %7869 = vmatprep.subr.bf16.mxu1 %v9774_v27  ;;  %v1598_v27 = vld [vmem:[#allocation9 + $0x1c60] sm:$0xff] }
 0x436   :  { %7706 = vmatpush1.bf16.msra.mxu0 %v9771_v52  ;;  %v1599_v52 = vld [vmem:[#allocation9 + $0x1c68] sm:$0xff] }
 0x437   :  { %7870 = vmatpush1.bf16.msra.mxu1 %v9773_v53  ;;  %7707 = vmatprep.subr.bf16.mxu0 %v9788_v13 }
 0x438   :  { %v7403_v15 = vpop.f32.mrb[12].mxu0  ;;  %7871 = vmatprep.subr.bf16.mxu1 %v9790_v55  ;;  %v9819_v55 = vcombine.low %v1574_v41, %v1582_v16  ;;  %v9835_v41 = vcombine.low %v1590_v17, %v1598_v27  ;;  %v9837_v16 = vcombine.low %v1591_v51, %v1599_v52 }
 0x439   :  { %v10812_v10 = vadd.f32 %v7403_v15, %v1737_v60  ;;  %v7567_v14 = vpop.f32.mrb[12].mxu1  ;;  %v7405_v36 = vpop.f32.mrb[13].mxu0  ;;  %v9836_v60 = vcombine.high %v1590_v17, %v1598_v27  ;;  %v1615_v15 = vld [vmem:[#allocation9 + $0x1ce8] sm:$0xff] }
 0x43a   :  { %v10814_v21 = vadd.f32 %v7567_v14, %v1745_v6  ;;  %v10816_v34 = vadd.f32 %v7405_v36, %v1741_v35  ;;  %v7569_v20 = vpop.f32.mrb[13].mxu1  ;;  %v7407_v43 = vpop.f32.mrb[14].mxu0  ;;  %7708 = vmatpush1.bf16.msra.mxu0 %v9787_v39  ;;  %v9838_v6 = vcombine.high %v1591_v51, %v1599_v52  ;;  %v1606_v35 = vld [vmem:[#allocation9 + $0x1ca0] sm:$0xff] }
 0x43b   :  { %v8258_v29 = vsel %vm388_vm2, %v10812_v10, 0.0  ;;  %v10820_v18 = vadd.f32 %v7569_v20, %v1749_v19  ;;  %v7571_v22 = vpop.f32.mrb[14].mxu1  ;;  %7872 = vmatpush1.bf16.msra.mxu1 %v9789_v8  ;;  %v7408_v23 = vpop.f32.mrb[15].mxu0  ;;  %7709 = vmatprep.subr.bf16.mxu0 %v9804_v54  ;;  %v1614_v39 = vld [vmem:[#allocation9 + $0x1ce0] sm:$0xff]  ;;  %v1607_v54 = vld [vmem:[#allocation9 + $0x1ca8] sm:$0xff] }
 0x43c   :  { %v8259_v46 = vrot.slane %v8258_v29, 4  ;;  %v8272_v47 = vsel %vm388_vm2, %v10814_v21, 0.0  ;;  %v8265_v48 = vsel %vm388_vm2, %v10816_v34, 0.0  ;;  %v7572_v42 = vpop.f32.mrb[15].mxu1  ;;  %7873 = vmatprep.subr.bf16.mxu1 %v9806_v37  ;;  %v9852_v33 = vcombine.high %v1606_v35, %v1614_v39  ;;  %v1630_v22 = vld [vmem:[#allocation9 + $0x1d60] sm:$0xff] }
 0x43d   :  { %v8273_v49 = vrot.slane %v8272_v47, 4  ;;  %v8266_v44 = vrot.slane %v8265_v48, 4  ;;  %v8279_v26 = vsel %vm388_vm2, %v10820_v18, 0.0  ;;  %v9851_v42 = vcombine.low %v1606_v35, %v1614_v39  ;;  %v1638_v52 = vld [vmem:[#allocation9 + $0x1da0] sm:$0xff] }
 0x43e   :  { %v8260_v53 = vadd.f32 %v8259_v46, %v8258_v29  ;;  %v8280_v13 = vrot.slane %v8279_v26, 4  ;;  %7710 = vmatpush1.bf16.msra.mxu0 %v9803_v40  ;;  %v9854_v40 = vcombine.high %v1607_v54, %v1615_v15  ;;  %v1622_v29 = vld [vmem:[#allocation9 + $0x1d20] sm:$0xff]  ;;  %v1631_v46 = vld [vmem:[#allocation9 + $0x1d68] sm:$0xff] }
 0x43f   :  { %v8274_v59 = vadd.f32 %v8273_v49, %v8272_v47  ;;  %v8267_v32 = vadd.f32 %v8266_v44, %v8265_v48  ;;  %7874 = vmatpush1.bf16.msra.mxu1 %v9805_v24  ;;  %7711 = vmatprep.subr.bf16.mxu0 %v9820_v45  ;;  %v1623_v45 = vld [vmem:[#allocation9 + $0x1d28] sm:$0xff]  ;;  %v9868_v49 = vcombine.high %v1622_v29, %v1630_v22 }
 0x440   :  { %v8261_v50 = vrot.slane %v8260_v53, 2  ;;  %v8281_v3 = vadd.f32 %v8280_v13, %v8279_v26  ;;  %7875 = vmatprep.subr.bf16.mxu1 %v9822_v56  ;;  %v9853_v56 = vcombine.low %v1607_v54, %v1615_v15  ;;  %v9870_v51 = vcombine.high %v1623_v45, %v1631_v46  ;;  %v1654_v54 = vld [vmem:[#allocation9 + $0x1e20] sm:$0xff] }
 0x441   :  { %v8275_v19 = vrot.slane %v8274_v59, 2  ;;  %v8268_v8 = vrot.slane %v8267_v32, 2  ;;  %v1662_v15 = vld [vmem:[#allocation9 + $0x1e60] sm:$0xff] }
 0x442   :  { %v8262_v37 = vadd.f32 %v8261_v50, %v8260_v53  ;;  %v8282_v14 = vrot.slane %v8281_v3, 2  ;;  %7712 = vmatpush1.bf16.msra.mxu0 %v9819_v55  ;;  %v1646_v53 = vld [vmem:[#allocation9 + $0x1de0] sm:$0xff]  ;;  %v9867_v50 = vcombine.low %v1622_v29, %v1630_v22 }
 0x443   :  { %v8276_v36 = vadd.f32 %v8275_v19, %v8274_v59  ;;  %v8269_v9 = vadd.f32 %v8268_v8, %v8267_v32  ;;  %7876 = vmatpush1.bf16.msra.mxu1 %v9821_v57  ;;  %7713 = vmatprep.subr.bf16.mxu0 %v9836_v60  ;;  %v1639_v57 = vld [vmem:[#allocation9 + $0x1da8] sm:$0xff]  ;;  %v9884_v39 = vcombine.high %v1638_v52, %v1646_v53 }
 0x444   :  { %v8263_v20 = vrot.slane %v8262_v37, 1  ;;  %v8283_v43 = vadd.f32 %v8282_v14, %v8281_v3  ;;  %7877 = vmatprep.subr.bf16.mxu1 %v9838_v6  ;;  %v1647_v59 = vld [vmem:[#allocation9 + $0x1de8] sm:$0xff]  ;;  %v9869_v3 = vcombine.low %v1623_v45, %v1631_v46  ;;  %v1678_v45 = vld [vmem:[#allocation9 + $0x1ee0] sm:$0xff] }
 0x445   :  { %v8277_v23 = vrot.slane %v8276_v36, 1  ;;  %v8270_v24 = vrot.slane %v8269_v9, 1  ;;  %v1663_v14 = vld [vmem:[#allocation9 + $0x1e68] sm:$0xff] }
 0x446   :  { %v8264_v47 = vadd.f32 %v8263_v20, %v8262_v37  ;;  %v8284_v48 = vrot.slane %v8283_v43, 1  ;;  %7714 = vmatpush1.bf16.msra.mxu0 %v9835_v41  ;;  %v1655_v37 = vld [vmem:[#allocation9 + $0x1e28] sm:$0xff] }
 0x447   :  { %v8278_v17 = vadd.f32 %v8277_v23, %v8276_v36  ;;  %v8271_v27 = vadd.f32 %v8270_v24, %v8269_v9  ;;  %7878 = vmatpush1.bf16.msra.mxu1 %v9837_v16  ;;  %7715 = vmatprep.subr.bf16.mxu0 %v9852_v33  ;;  %v9885_v36 = vcombine.low %v1639_v57, %v1647_v59  ;;  %v1670_v24 = vld [vmem:[#allocation9 + $0x1ea0] sm:$0xff] }
 0x448   :  { %v8346_v44 = vmul.f32 0.5, %v8264_v47  ;;  %v8285_v26 = vadd.f32 %v8284_v48, %v8283_v43  ;;  %7879 = vmatprep.subr.bf16.mxu1 %v9854_v40  ;;  %v9900_v43 = vcombine.high %v1654_v54, %v1662_v15  ;;  %v9902_v23 = vcombine.high %v1655_v37, %v1663_v14  ;;  %v1671_v48 = vld [vmem:[#allocation9 + $0x1ea8] sm:$0xff] }
 0x449   :  { %v8348_v13 = vmul.f32 0.5, %v8278_v17  ;;  %v8347_v55 = vmul.f32 0.5, %v8271_v27  ;;  %v9899_v27 = vcombine.low %v1654_v54, %v1662_v15 }
 0x44a   :  { %v10829_v32 = vsub.f32 %v10812_v10, %v8346_v44  ;;  %v8349_v60 = vmul.f32 0.5, %v8285_v26  ;;  %7716 = vmatpush1.bf16.msra.mxu0 %v9851_v42  ;;  %v9886_v10 = vcombine.high %v1639_v57, %v1647_v59  ;;  %v1679_v42 = vld [vmem:[#allocation9 + $0x1ee8] sm:$0xff]  ;;  %v9901_v26 = vcombine.low %v1655_v37, %v1663_v14  ;;  %v1694_v57 = vld [vmem:[#allocation9 + $0x1f60] sm:$0xff] }
 0x44b   :  { %v10832_v6 = vsub.f32 %v10814_v21, %v8348_v13  ;;  %v10835_v35 = vsub.f32 %v10816_v34, %v8347_v55  ;;  %7880 = vmatpush1.bf16.msra.mxu1 %v9853_v56  ;;  %7717 = vmatprep.subr.bf16.mxu0 %v9868_v49  ;;  %v9918_v13 = vcombine.high %v1671_v48, %v1679_v42  ;;  %v1686_v55 = vld [vmem:[#allocation9 + $0x1f20] sm:$0xff] }
 0x44c   :  { %v8378_v19 = vmul.f32 %v10829_v32, %v10829_v32  ;;  %v10840_v8 = vsub.f32 %v10820_v18, %v8349_v60  ;;  %7881 = vmatprep.subr.bf16.mxu1 %v9870_v51  ;;  %v9883_v18 = vcombine.low %v1638_v52, %v1646_v53  ;;  %v9916_v51 = vcombine.high %v1670_v24, %v1678_v45 }
 0x44d   :  { %v8380_v21 = vmul.f32 %v10832_v6, %v10832_v6  ;;  %v8379_v34 = vmul.f32 %v10835_v35, %v10835_v35 }
 0x44e   :  { %v8418_v41 = vsel %vm388_vm2, %v8378_v19, 0.0  ;;  %v8381_v16 = vmul.f32 %v10840_v8, %v10840_v8  ;;  %7718 = vmatpush1.bf16.msra.mxu0 %v9867_v50  ;;  %v1687_v50 = vld [vmem:[#allocation9 + $0x1f28] sm:$0xff] }
 0x44f   :  { %v8419_v9 = vrot.slane %v8418_v41, 4  ;;  %v8432_v33 = vsel %vm388_vm2, %v8380_v21, 0.0  ;;  %v8425_v20 = vsel %vm388_vm2, %v8379_v34, 0.0  ;;  %7882 = vmatpush1.bf16.msra.mxu1 %v9869_v3  ;;  %7719 = vmatprep.subr.bf16.mxu0 %v9884_v39  ;;  %v1695_v3 = vld [vmem:[#allocation9 + $0x1f68] sm:$0xff]  ;;  %v9917_v21 = vcombine.low %v1671_v48, %v1679_v42  ;;  %v696_v42 = vld [vmem:[#allocation9 + $0x30] sm:$0xff] }
 0x450   :  { %v8433_v40 = vrot.slane %v8432_v33, 4  ;;  %v8426_v29 = vrot.slane %v8425_v20, 4  ;;  %v8439_v22 = vsel %vm388_vm2, %v8381_v16, 0.0  ;;  %7883 = vmatprep.subr.bf16.mxu1 %v9886_v10  ;;  %v9915_v10 = vcombine.low %v1670_v24, %v1678_v45  ;;  %v1702_v16 = vld [vmem:[#allocation9 + $0x1fa0] sm:$0xff] }
 0x451   :  { %v8420_v46 = vadd.f32 %v8419_v9, %v8418_v41  ;;  %v8440_v47 = vrot.slane %v8439_v22, 4  ;;  %v9932_v34 = vcombine.high %v1686_v55, %v1694_v57  ;;  %v9934_v41 = vcombine.high %v1687_v50, %v1695_v3 }
 0x452   :  { %v8434_v56 = vadd.f32 %v8433_v40, %v8432_v33  ;;  %v8427_v17 = vadd.f32 %v8426_v29, %v8425_v20  ;;  %7720 = vmatpush1.bf16.msra.mxu0 %v9883_v18  ;;  %v1710_v18 = vld [vmem:[#allocation9 + $0x1fe0] sm:$0xff]  ;;  %v1703_v33 = vld [vmem:[#allocation9 + $0x1fa8] sm:$0xff]  ;;  %v9931_v29 = vcombine.low %v1686_v55, %v1694_v57  ;;  %v9933_v24 = vcombine.low %v1687_v50, %v1695_v3  ;;  %v713_v3 = vld [vmem:[#allocation9 + $0xb8] sm:$0xff] }
 0x453   :  { %v8421_v49 = vrot.slane %v8420_v46, 2  ;;  %v8441_v44 = vadd.f32 %v8440_v47, %v8439_v22  ;;  %7884 = vmatpush1.bf16.msra.mxu1 %v9885_v36  ;;  %7721 = vmatprep.subr.bf16.mxu0 %v9900_v43  ;;  %v1711_v20 = vld [vmem:[#allocation9 + $0x1fe8] sm:$0xff]  ;;  %v9948_v45 = vcombine.high %v1702_v16, %v1710_v18 }
 0x454   :  { %v8435_v52 = vrot.slane %v8434_v56, 2  ;;  %v8428_v53 = vrot.slane %v8427_v17, 2  ;;  %7885 = vmatprep.subr.bf16.mxu1 %v9902_v23  ;;  %v9950_v48 = vcombine.high %v1703_v33, %v1711_v20 }
 0x455   :  { %v8422_v59 = vadd.f32 %v8421_v49, %v8420_v46  ;;  %v8442_v60 = vrot.slane %v8441_v44, 2  ;;  %v697_v49 = vld [vmem:[#allocation9 + $0x38] sm:$0xff] }
 0x456   :  { %v8436_v39 = vadd.f32 %v8435_v52, %v8434_v56  ;;  %v8429_v19 = vadd.f32 %v8428_v53, %v8427_v17  ;;  %7722 = vmatpush1.bf16.msra.mxu0 %v9899_v27  ;;  %v704_v56 = vld [vmem:[#allocation9 + $0x70] sm:$0xff]  ;;  %v9947_v52 = vcombine.low %v1702_v16, %v1710_v18  ;;  %v737_v16 = vld [vmem:[#allocation9 + $0x178] sm:$0xff] }
 0x457   :  { %v8423_v54 = vrot.slane %v8422_v59, 1  ;;  %v8443_v15 = vadd.f32 %v8442_v60, %v8441_v44  ;;  %7886 = vmatpush1.bf16.msra.mxu1 %v9901_v26  ;;  %7723 = vmatprep.subr.bf16.mxu0 %v9916_v51  ;;  %v705_v44 = vld [vmem:[#allocation9 + $0x78] sm:$0xff]  ;;  %v8944_v55 = vcombine.high %v696_v42, %v704_v56  ;;  %v720_v60 = vld [vmem:[#allocation9 + $0xf0] sm:$0xff]  ;;  %v8943_v50 = vcombine.low %v696_v42, %v704_v56 }
 0x458   :  { %v8437_v37 = vrot.slane %v8436_v39, 1  ;;  %v8430_v14 = vrot.slane %v8429_v19, 1  ;;  %7887 = vmatprep.subr.bf16.mxu1 %v9918_v13  ;;  %v9949_v13 = vcombine.low %v1703_v33, %v1711_v20  ;;  %v8946_v57 = vcombine.high %v697_v49, %v705_v44  ;;  %v753_v56 = vld [vmem:[#allocation9 + $0x1f8] sm:$0xff] }
 0x459   :  { %v8424_v36 = vadd.f32 %v8423_v54, %v8422_v59  ;;  %v8444_v9 = vrot.slane %v8443_v15, 1  ;;  %v712_v59 = vld [vmem:[#allocation9 + $0xb0] sm:$0xff] }
 0x45a   :  { %v8438_v43 = vadd.f32 %v8437_v37, %v8436_v39  ;;  %v8431_v40 = vadd.f32 %v8430_v14, %v8429_v19  ;;  %7724 = vmatpush1.bf16.msra.mxu0 %v9915_v10  ;;  %v721_v39 = vld [vmem:[#allocation9 + $0xf8] sm:$0xff]  ;;  %v8945_v19 = vcombine.low %v697_v49, %v705_v44  ;;  %v10138_v10 = vld [vmem:[#allocation12] sm:$0xff] }
 0x45b   :  { %v8506_v22 = vmul.f32 0.5, %v8424_v36  ;;  %v8445_v23 = vadd.f32 %v8444_v9, %v8443_v15  ;;  %7888 = vmatpush1.bf16.msra.mxu1 %v9917_v21  ;;  %7725 = vmatprep.subr.bf16.mxu0 %v9932_v34  ;;  %v8541_v54 = vrot.slane %v10138_v10, %v10618_v61  ;;  %v8960_v15 = vcombine.high %v712_v59, %v720_v60  ;;  %v728_v21 = vld [vmem:[#allocation9 + $0x130] sm:$0xff] }
 0x45c   :  { %v8508_v46 = vmul.f32 0.5, %v8438_v43  ;;  %v8507_v47 = vmul.f32 0.5, %v8431_v40  ;;  %7889 = vmatprep.subr.bf16.mxu1 %v9934_v41  ;;  %v736_v34 = vld [vmem:[#allocation9 + $0x170] sm:$0xff]  ;;  %v8549_v37 = vrot.slane %v10138_v10, %v10668_v0  ;;  %v8962_v14 = vcombine.high %v713_v3, %v721_v39  ;;  %v729_v41 = vld [vmem:[#allocation9 + $0x138] sm:$0xff]  ;;  %v10139_v40 = vld [vmem:[#allocation13] sm:$0xff] }
 0x45d   :  { %v8622_v17 = vadd.f32 1e-05, %v8506_v22  ;;  %v8509_v27 = vmul.f32 0.5, %v8445_v23  ;;  %v8545_v18 = vrot.slane %v10138_v10, %v10550_v62  ;;  %v8959_v36 = vcombine.low %v712_v59, %v720_v60  ;;  %v744_v23 = vld [vmem:[#allocation9 + $0x1b0] sm:$0xff] }
 0x45e   :  { %v8624_v26 = vadd.f32 1e-05, %v8508_v46  ;;  %v8623_v51 = vadd.f32 1e-05, %v8507_v47  ;;  %7726 = vmatpush1.bf16.msra.mxu0 %v9931_v29  ;;  %v8553_v9 = vrot.slane %v10138_v10, %v10621_v1  ;;  %v8961_v33 = vcombine.low %v713_v3, %v721_v39  ;;  %v760_v59 = vld [vmem:[#allocation9 + $0x230] sm:$0xff]  ;;  %v761_v39 = vld [vmem:[#allocation9 + $0x238] sm:$0xff] }
 0x45f   :  { %10111 = vrsqrt.f32 %v8622_v17  ;;  %v8625_v53 = vadd.f32 1e-05, %v8509_v27  ;;  %7890 = vmatpush1.bf16.msra.mxu1 %v9933_v24  ;;  %7727 = vmatprep.subr.bf16.mxu0 %v9948_v45  ;;  %v8976_v20 = vcombine.high %v728_v21, %v736_v34  ;;  %v8606_v43 = vmul.f32 %v8541_v54, %v10829_v32  ;;  %v752_v24 = vld [vmem:[#allocation9 + $0x1f0] sm:$0xff]  ;;  %v745_v32 = vld [vmem:[#allocation9 + $0x1b8] sm:$0xff] }
 0x460   :  { %10113 = vrsqrt.f32 %v8624_v26  ;;  %7891 = vmatprep.subr.bf16.mxu1 %v9950_v48  ;;  %v8689_v29 = vrot.slane %v10139_v40, %v10618_v61  ;;  %v8978_v22 = vcombine.high %v729_v41, %v737_v16  ;;  %v8608_v46 = vmul.f32 %v8549_v37, %v10832_v6  ;;  %v768_v60 = vld [vmem:[#allocation9 + $0x270] sm:$0xff] }
 0x461   :  { %10115 = vrsqrt.f32 %v8623_v51  ;;  %v8697_v47 = vrot.slane %v10139_v40, %v10668_v0  ;;  %v8693_v48 = vrot.slane %v10139_v40, %v10550_v62  ;;  %v8701_v42 = vrot.slane %v10139_v40, %v10621_v1 }
 0x462   :  { %10117 = vrsqrt.f32 %v8625_v53  ;;  %7728 = vmatpush1.bf16.msra.mxu0 %v9947_v52  ;;  %v8975_v49 = vcombine.low %v728_v21, %v736_v34  ;;  %v8977_v44 = vcombine.low %v729_v41, %v737_v16  ;;  %v8609_v6 = vmul.f32 %v8553_v9, %v10840_v8  ;;  %v776_v16 = vld [vmem:[#allocation9 + $0x2b0] sm:$0xff] }
 0x463   :  { %7892 = vmatpush1.bf16.msra.mxu1 %v9949_v13  ;;  %7902 = vmatprep.subr.bf16.mxu0 %v8944_v55  ;;  %v8992_v52 = vcombine.high %v744_v23, %v752_v24  ;;  %v8993_v8 = vcombine.low %v745_v32, %v753_v56  ;;  %v9008_v34 = vcombine.high %v760_v59, %v768_v60 }
 0x464   :  { %8066 = vmatprep.subr.bf16.mxu1 %v8946_v57  ;;  %v8994_v57 = vcombine.high %v745_v32, %v753_v56  ;;  %v9007_v40 = vcombine.low %v760_v59, %v768_v60  ;;  %v793_v32 = vld [vmem:[#allocation9 + $0x338] sm:$0xff]  ;;  %v824_v60 = vld [vmem:[#allocation9 + $0x430] sm:$0xff] }
 0x465   :  { %7730 = vmatmul.mubr.bf16.vlgmr.msra.gmra.mrb[16].mxu0 %v10704_v2  ;;  %v801_v56 = vld [vmem:[#allocation9 + $0x378] sm:$0xff] }
 0x466   :  { %7894 = vmatmul.mubr.bf16.vlgmr.msra.gmra.mrb[16].mxu1 %v10704_v2  ;;  %7903 = vmatpush1.bf16.msra.mxu0 %v8943_v50 }
 0x467   :  { %7934 = vmatprep.mubr.bf16.mxu0 %v10597_v4  ;;  %8067 = vmatpush1.bf16.msra.mxu1 %v8945_v19  ;;  %v769_v19 = vld [vmem:[#allocation9 + $0x278] sm:$0xff] }
 0x468   :  { %8098 = vmatprep.mubr.bf16.mxu1 %v10597_v4  ;;  %7904 = vmatprep.subr.bf16.mxu0 %v8960_v15  ;;  %v8607_v4 = vmul.f32 %v8545_v18, %v10835_v35  ;;  %v8991_v35 = vcombine.low %v744_v23, %v752_v24  ;;  %v9010_v41 = vcombine.high %v761_v39, %v769_v19  ;;  %v784_v18 = vld [vmem:[#allocation9 + $0x2f0] sm:$0xff] }
 0x469   :  { %v10112_v45 = vpop.eup %10111  ;;  %8068 = vmatprep.subr.bf16.mxu1 %v8962_v14  ;;  %v9024_v24 = vcombine.high %v776_v16, %v784_v18 }
 0x46a   :  { %v10114_v17 = vpop.eup %10113  ;;  %v8654_v27 = vmul.f32 %v10112_v45, %v8606_v43  ;;  %7905 = vmatpush1.bf16.msra.mxu0 %v8959_v36 }
 0x46b   :  { %v10116_v26 = vpop.eup %10115  ;;  %v8656_v51 = vmul.f32 %v10114_v17, %v8608_v46  ;;  %8069 = vmatpush1.bf16.msra.mxu1 %v8961_v33  ;;  %7906 = vmatprep.subr.bf16.mxu0 %v8976_v20  ;;  %v777_v33 = vld [vmem:[#allocation9 + $0x2b8] sm:$0xff] }
 0x46c   :  { %v10118_v53 = vpop.eup %10117  ;;  %v8754_v13 = vadd.f32 %v8689_v29, %v8654_v27  ;;  %v8655_v55 = vmul.f32 %v10116_v26, %v8607_v4  ;;  %8070 = vmatprep.subr.bf16.mxu1 %v8978_v22  ;;  %v785_v20 = vld [vmem:[#allocation9 + $0x2f8] sm:$0xff]  ;;  %v9009_v29 = vcombine.low %v761_v39, %v769_v19  ;;  %v9023_v27 = vcombine.low %v776_v16, %v784_v18  ;;  %v856_v18 = vld [vmem:[#allocation9 + $0x530] sm:$0xff] }
 0x46d   :  { %v8756_v50 = vadd.f32 %v8697_v47, %v8656_v51  ;;  %v8657_v3 = vmul.f32 %v10118_v53, %v8609_v6  ;;  %v9026_v46 = vcombine.high %v777_v33, %v785_v20  ;;  %v792_v47 = vld [vmem:[#allocation9 + $0x330] sm:$0xff]  ;;  %v9025_v4 = vcombine.low %v777_v33, %v785_v20  ;;  %v817_v53 = vld [vmem:[#allocation9 + $0x3f8] sm:$0xff] }
 0x46e   :  { %vm8770_vm15 = vcmp.gt.f32.partialorder %v8754_v13, 0.0  ;;  %v8786_v10 = vmul.f32 0.2, %v8754_v13  ;;  %v8755_v54 = vadd.f32 %v8693_v48, %v8655_v55  ;;  %7907 = vmatpush1.bf16.msra.mxu0 %v8975_v49  ;;  %v800_v48 = vld [vmem:[#allocation9 + $0x370] sm:$0xff]  ;;  %v9042_v26 = vcombine.high %v793_v32, %v801_v56  ;;  %v865_v33 = vld [vmem:[#allocation9 + $0x578] sm:$0xff] }
 0x46f   :  { %vm8772_vm0 = vcmp.gt.f32.partialorder %v8756_v50, 0.0  ;;  %v8788_v15 = vmul.f32 0.2, %v8756_v50  ;;  %v8757_v21 = vadd.f32 %v8701_v42, %v8657_v3  ;;  %8071 = vmatpush1.bf16.msra.mxu1 %v8977_v44  ;;  %7908 = vmatprep.subr.bf16.mxu0 %v8992_v52  ;;  %v9040_v49 = vcombine.high %v792_v47, %v800_v48  ;;  %v808_v51 = vld [vmem:[#allocation9 + $0x3b0] sm:$0xff]  ;;  %v809_v52 = vld [vmem:[#allocation9 + $0x3b8] sm:$0xff] }
 0x470   :  { %v8802_v37 = vsel %vm8770_vm15, %v8754_v13, %v8786_v10  ;;  %vm8771_vm1 = vcmp.gt.f32.partialorder %v8755_v54, 0.0  ;;  %v8787_v14 = vmul.f32 0.2, %v8755_v54  ;;  %8072 = vmatprep.subr.bf16.mxu1 %v8994_v57  ;;  %v816_v6 = vld [vmem:[#allocation9 + $0x3f0] sm:$0xff]  ;;  %v9039_v13 = vcombine.low %v792_v47, %v800_v48  ;;  %v825_v3 = vld [vmem:[#allocation9 + $0x438] sm:$0xff] }
 0x471   :  { %v8804_v36 = vsel %vm8772_vm0, %v8756_v50, %v8788_v15  ;;  %vm8773_vm3 = vcmp.gt.f32.partialorder %v8757_v21, 0.0  ;;  %v8789_v9 = vmul.f32 0.2, %v8757_v21  ;;  %v9041_v55 = vcombine.low %v793_v32, %v801_v56  ;;  %v832_v50 = vld [vmem:[#allocation9 + $0x470] sm:$0xff] }
 0x472   :  { %v8803_v43 = vsel %vm8771_vm1, %v8755_v54, %v8787_v14  ;;  %7909 = vmatpush1.bf16.msra.mxu0 %v8991_v35  ;;  %v9056_v57 = vcombine.high %v808_v51, %v816_v6  ;;  %v9058_v59 = vcombine.high %v809_v52, %v817_v53  ;;  %v833_v35 = vld [vmem:[#allocation9 + $0x478] sm:$0xff]  ;;  %v9055_v39 = vcombine.low %v808_v51, %v816_v6  ;;  %v848_v15 = vld [vmem:[#allocation9 + $0x4f0] sm:$0xff] }
 0x473   :  { %v8847_v22 = vcombine.low %v8802_v37, %v8803_v43  ;;  %v8805_v23 = vsel %vm8773_vm3, %v8757_v21, %v8789_v9  ;;  %8073 = vmatpush1.bf16.msra.mxu1 %v8993_v8  ;;  %7910 = vmatprep.subr.bf16.mxu0 %v9008_v34  ;;  %v9057_v19 = vcombine.low %v809_v52, %v817_v53  ;;  %v840_v8 = vld [vmem:[#allocation9 + $0x4b0] sm:$0xff]  ;;  %v841_v21 = vld [vmem:[#allocation9 + $0x4b8] sm:$0xff] }
 0x474   :  { %v8848_v45 = vcombine.low %v8804_v36, %v8805_v23  ;;  %8074 = vmatprep.subr.bf16.mxu1 %v9010_v41  ;;  %v9072_v10 = vcombine.high %v824_v60, %v832_v50  ;;  %v9074_v54 = vcombine.high %v825_v3, %v833_v35  ;;  %v849_v34 = vld [vmem:[#allocation9 + $0x4f8] sm:$0xff]  ;;  %v9071_v37 = vcombine.low %v824_v60, %v832_v50  ;;  %v864_v36 = vld [vmem:[#allocation9 + $0x570] sm:$0xff] }
 0x475   :  { %v8855_v42 = vrot.slane %v8847_v22, %v10789_v38  ;;  %v9073_v14 = vcombine.low %v825_v3, %v833_v35  ;;  %v9088_v41 = vcombine.high %v840_v8, %v848_v15  ;;  %v9090_v16 = vcombine.high %v841_v21, %v849_v34  ;;  %v857_v9 = vld [vmem:[#allocation9 + $0x538] sm:$0xff]  ;;  %v872_v22 = vld [vmem:[#allocation9 + $0x5b0] sm:$0xff] }
 0x476   :  { %v8862_v17 = vrot.slane %v8848_v45, %v10789_v38  ;;  %7911 = vmatpush1.bf16.msra.mxu0 %v9007_v40  ;;  %v9087_v20 = vcombine.low %v840_v8, %v848_v15  ;;  %v9089_v43 = vcombine.low %v841_v21, %v849_v34  ;;  %v9104_v40 = vcombine.high %v856_v18, %v864_v36  ;;  %v880_v23 = vld [vmem:[#allocation9 + $0x5f0] sm:$0xff]  ;;  %v881_v45 = vld [vmem:[#allocation9 + $0x5f8] sm:$0xff] }
 0x477   :  { %8075 = vmatpush1.bf16.msra.mxu1 %v9009_v29  ;;  %7912 = vmatprep.subr.bf16.mxu0 %v9024_v24  ;;  %v9106_v29 = vcombine.high %v857_v9, %v865_v33  ;;  %v873_v24 = vld [vmem:[#allocation9 + $0x5b8] sm:$0xff]  ;;  %v9105_v47 = vcombine.low %v857_v9, %v865_v33  ;;  %v9120_v48 = vcombine.high %v872_v22, %v880_v23  ;;  %v888_v32 = vld [vmem:[#allocation9 + $0x630] sm:$0xff] }
 0x478   :  { %v8863_v44 = vcombine.low %v8855_v42, %v8862_v17  ;;  %8076 = vmatprep.subr.bf16.mxu1 %v9026_v46  ;;  %v9103_v46 = vcombine.low %v856_v18, %v864_v36  ;;  %v9122_v42 = vcombine.high %v873_v24, %v881_v45  ;;  %v896_v56 = vld [vmem:[#allocation9 + $0x670] sm:$0xff]  ;;  %v889_v17 = vld [vmem:[#allocation9 + $0x638] sm:$0xff] }
 0x479   :  { %v904_v51 = vld [vmem:[#allocation9 + $0x6b0] sm:$0xff]  ;;  %v905_v52 = vld [vmem:[#allocation9 + $0x6b8] sm:$0xff] }
 0x47a   :  { %8903 = vst [vmem:[%s11012_s9 + $0x8] sm:$0xff] %v8863_v44  ;;  %7913 = vmatpush1.bf16.msra.mxu0 %v9023_v27  ;;  %v897_v27 = vld [vmem:[#allocation9 + $0x678] sm:$0xff]  ;;  %v9136_v44 = vcombine.high %v888_v32, %v896_v56  ;;  %v912_v6 = vld [vmem:[#allocation9 + $0x6f0] sm:$0xff] }
 0x47b   :  { %8077 = vmatpush1.bf16.msra.mxu1 %v9025_v4  ;;  %7914 = vmatprep.subr.bf16.mxu0 %v9040_v49  ;;  %v9119_v4 = vcombine.low %v872_v22, %v880_v23  ;;  %v9121_v49 = vcombine.low %v873_v24, %v881_v45  ;;  %v913_v53 = vld [vmem:[#allocation9 + $0x6f8] sm:$0xff]  ;;  %v920_v60 = vld [vmem:[#allocation9 + $0x730] sm:$0xff] }
 0x47c   :  { %8078 = vmatprep.subr.bf16.mxu1 %v9042_v26  ;;  %v9138_v26 = vcombine.high %v889_v17, %v897_v27  ;;  %v928_v50 = vld [vmem:[#allocation9 + $0x770] sm:$0xff]  ;;  %v921_v3 = vld [vmem:[#allocation9 + $0x738] sm:$0xff] }
 0x47d   :  { %v929_v35 = vld [vmem:[#allocation9 + $0x778] sm:$0xff]  ;;  %v936_v8 = vld [vmem:[#allocation9 + $0x7b0] sm:$0xff] }
 0x47e   :  { %7915 = vmatpush1.bf16.msra.mxu0 %v9039_v13  ;;  %v9135_v13 = vcombine.low %v888_v32, %v896_v56  ;;  %v944_v15 = vld [vmem:[#allocation9 + $0x7f0] sm:$0xff]  ;;  %v937_v21 = vld [vmem:[#allocation9 + $0x7b8] sm:$0xff] }
 0x47f   :  { %8079 = vmatpush1.bf16.msra.mxu1 %v9041_v55  ;;  %7916 = vmatprep.subr.bf16.mxu0 %v9056_v57  ;;  %v9137_v55 = vcombine.low %v889_v17, %v897_v27  ;;  %v9152_v57 = vcombine.high %v904_v51, %v912_v6  ;;  %v945_v34 = vld [vmem:[#allocation9 + $0x7f8] sm:$0xff]  ;;  %v952_v18 = vld [vmem:[#allocation9 + $0x830] sm:$0xff] }
 0x480   :  { %8080 = vmatprep.subr.bf16.mxu1 %v9058_v59  ;;  %v9154_v59 = vcombine.high %v905_v52, %v913_v53  ;;  %v960_v36 = vld [vmem:[#allocation9 + $0x870] sm:$0xff]  ;;  %v953_v9 = vld [vmem:[#allocation9 + $0x838] sm:$0xff] }
 0x481   :  { %v961_v33 = vld [vmem:[#allocation9 + $0x878] sm:$0xff]  ;;  %v968_v22 = vld [vmem:[#allocation9 + $0x8b0] sm:$0xff]  ;;  %v9199_v24 = vcombine.low %v952_v18, %v960_v36 }
 0x482   :  { %7917 = vmatpush1.bf16.msra.mxu0 %v9055_v39  ;;  %v9151_v39 = vcombine.low %v904_v51, %v912_v6  ;;  %v976_v23 = vld [vmem:[#allocation9 + $0x8f0] sm:$0xff]  ;;  %v969_v45 = vld [vmem:[#allocation9 + $0x8b8] sm:$0xff] }
 0x483   :  { %8081 = vmatpush1.bf16.msra.mxu1 %v9057_v19  ;;  %7918 = vmatprep.subr.bf16.mxu0 %v9072_v10  ;;  %v9153_v19 = vcombine.low %v905_v52, %v913_v53  ;;  %v9168_v10 = vcombine.high %v920_v60, %v928_v50  ;;  %v992_v32 = vld [vmem:[#allocation9 + $0x970] sm:$0xff]  ;;  %v985_v17 = vld [vmem:[#allocation9 + $0x938] sm:$0xff] }
 0x484   :  { %8082 = vmatprep.subr.bf16.mxu1 %v9074_v54  ;;  %v9170_v54 = vcombine.high %v921_v3, %v929_v35  ;;  %v993_v27 = vld [vmem:[#allocation9 + $0x978] sm:$0xff]  ;;  %v1000_v51 = vld [vmem:[#allocation9 + $0x9b0] sm:$0xff] }
 0x485   :  { %v1008_v6 = vld [vmem:[#allocation9 + $0x9f0] sm:$0xff]  ;;  %v1001_v52 = vld [vmem:[#allocation9 + $0x9b8] sm:$0xff] }
 0x486   :  { %7919 = vmatpush1.bf16.msra.mxu0 %v9071_v37  ;;  %v9167_v37 = vcombine.low %v920_v60, %v928_v50  ;;  %v1009_v53 = vld [vmem:[#allocation9 + $0x9f8] sm:$0xff]  ;;  %v1024_v60 = vld [vmem:[#allocation9 + $0xa70] sm:$0xff] }
 0x487   :  { %8083 = vmatpush1.bf16.msra.mxu1 %v9073_v14  ;;  %7920 = vmatprep.subr.bf16.mxu0 %v9088_v41  ;;  %v9169_v14 = vcombine.low %v921_v3, %v929_v35  ;;  %v9184_v41 = vcombine.high %v936_v8, %v944_v15  ;;  %v1017_v50 = vld [vmem:[#allocation9 + $0xa38] sm:$0xff]  ;;  %v9249_v35 = vcombine.low %v1001_v52, %v1009_v53 }
 0x488   :  { %8084 = vmatprep.subr.bf16.mxu1 %v9090_v16  ;;  %v9186_v16 = vcombine.high %v937_v21, %v945_v34  ;;  %v1025_v3 = vld [vmem:[#allocation9 + $0xa78] sm:$0xff] }
 0x48a   :  { %7921 = vmatpush1.bf16.msra.mxu0 %v9087_v20  ;;  %v9183_v20 = vcombine.low %v936_v8, %v944_v15  ;;  %v1033_v8 = vld [vmem:[#allocation9 + $0xab8] sm:$0xff] }
 0x48b   :  { %8085 = vmatpush1.bf16.msra.mxu1 %v9089_v43  ;;  %7922 = vmatprep.subr.bf16.mxu0 %v9104_v40  ;;  %v9185_v43 = vcombine.low %v937_v21, %v945_v34  ;;  %v9200_v40 = vcombine.high %v952_v18, %v960_v36  ;;  %v1041_v15 = vld [vmem:[#allocation9 + $0xaf8] sm:$0xff]  ;;  %v9265_v34 = vcombine.low %v1017_v50, %v1025_v3 }
 0x48c   :  { %8086 = vmatprep.subr.bf16.mxu1 %v9106_v29  ;;  %v9202_v29 = vcombine.high %v953_v9, %v961_v33  ;;  %v1049_v18 = vld [vmem:[#allocation9 + $0xb38] sm:$0xff] }
 0x48d   :  { %v1057_v36 = vld [vmem:[#allocation9 + $0xb78] sm:$0xff] }
 0x48e   :  { %7923 = vmatpush1.bf16.msra.mxu0 %v9103_v46  ;;  %v977_v46 = vld [vmem:[#allocation9 + $0x8f8] sm:$0xff] }
 0x48f   :  { %8087 = vmatpush1.bf16.msra.mxu1 %v9105_v47  ;;  %7924 = vmatprep.subr.bf16.mxu0 %v9120_v48  ;;  %v9201_v47 = vcombine.low %v953_v9, %v961_v33  ;;  %v9216_v48 = vcombine.high %v968_v22, %v976_v23  ;;  %v9218_v56 = vcombine.high %v969_v45, %v977_v46 }
 0x490   :  { %8088 = vmatprep.subr.bf16.mxu1 %v9122_v42  ;;  %v984_v42 = vld [vmem:[#allocation9 + $0x930] sm:$0xff]  ;;  %v9281_v33 = vcombine.low %v1033_v8, %v1041_v15 }
 0x492   :  { %7925 = vmatpush1.bf16.msra.mxu0 %v9119_v4  ;;  %v9215_v4 = vcombine.low %v968_v22, %v976_v23  ;;  %v1065_v22 = vld [vmem:[#allocation9 + $0xbb8] sm:$0xff] }
 0x493   :  { %8089 = vmatpush1.bf16.msra.mxu1 %v9121_v49  ;;  %7926 = vmatprep.subr.bf16.mxu0 %v9136_v44  ;;  %v9217_v49 = vcombine.low %v969_v45, %v977_v46  ;;  %v9232_v44 = vcombine.high %v984_v42, %v992_v32  ;;  %v1073_v23 = vld [vmem:[#allocation9 + $0xbf8] sm:$0xff]  ;;  %v9297_v45 = vcombine.low %v1049_v18, %v1057_v36 }
 0x494   :  { %8090 = vmatprep.subr.bf16.mxu1 %v9138_v26  ;;  %v9234_v26 = vcombine.high %v985_v17, %v993_v27 }
 0x496   :  { %7927 = vmatpush1.bf16.msra.mxu0 %v9135_v13  ;;  %v9231_v13 = vcombine.low %v984_v42, %v992_v32  ;;  %v1088_v42 = vld [vmem:[#allocation9 + $0xc70] sm:$0xff]  ;;  %v1081_v32 = vld [vmem:[#allocation9 + $0xc38] sm:$0xff] }
 0x497   :  { %8091 = vmatpush1.bf16.msra.mxu1 %v9137_v55  ;;  %7928 = vmatprep.subr.bf16.mxu0 %v9152_v57  ;;  %v9248_v55 = vcombine.high %v1000_v51, %v1008_v6  ;;  %v9250_v57 = vcombine.high %v1001_v52, %v1009_v53 }
 0x498   :  { %8092 = vmatprep.subr.bf16.mxu1 %v9154_v59  ;;  %v1016_v59 = vld [vmem:[#allocation9 + $0xa30] sm:$0xff] }
 0x499   :  { %v9263_v21 = vcombine.low %v1016_v59, %v1024_v60 }
 0x49a   :  { %7929 = vmatpush1.bf16.msra.mxu0 %v9151_v39  ;;  %v9264_v39 = vcombine.high %v1016_v59, %v1024_v60  ;;  %v1113_v59 = vld [vmem:[#allocation9 + $0xd38] sm:$0xff] }
 0x49b   :  { %8093 = vmatpush1.bf16.msra.mxu1 %v9153_v19  ;;  %7930 = vmatprep.subr.bf16.mxu0 %v9168_v10  ;;  %v9266_v19 = vcombine.high %v1017_v50, %v1025_v3  ;;  %v1032_v10 = vld [vmem:[#allocation9 + $0xab0] sm:$0xff]  ;;  %v1121_v60 = vld [vmem:[#allocation9 + $0xd78] sm:$0xff] }
 0x49c   :  { %8094 = vmatprep.subr.bf16.mxu1 %v9170_v54  ;;  %v1040_v54 = vld [vmem:[#allocation9 + $0xaf0] sm:$0xff] }
 0x49d   :  { %v9279_v9 = vcombine.low %v1032_v10, %v1040_v54 }
 0x49e   :  { %7931 = vmatpush1.bf16.msra.mxu0 %v9167_v37  ;;  %v9280_v37 = vcombine.high %v1032_v10, %v1040_v54  ;;  %v1129_v10 = vld [vmem:[#allocation9 + $0xdb8] sm:$0xff] }
 0x49f   :  { %8095 = vmatpush1.bf16.msra.mxu1 %v9169_v14  ;;  %7932 = vmatprep.subr.bf16.mxu0 %v9184_v41  ;;  %v9282_v14 = vcombine.high %v1033_v8, %v1041_v15  ;;  %v1048_v41 = vld [vmem:[#allocation9 + $0xb30] sm:$0xff]  ;;  %v1137_v54 = vld [vmem:[#allocation9 + $0xdf8] sm:$0xff]  ;;  %v9361_v15 = vcombine.low %v1113_v59, %v1121_v60 }
 0x4a0   :  { %8096 = vmatprep.subr.bf16.mxu1 %v9186_v16  ;;  %v1056_v16 = vld [vmem:[#allocation9 + $0xb70] sm:$0xff] }
 0x4a2   :  { %7933 = vmatpush1.bf16.msra.mxu0 %v9183_v20  ;;  %v9296_v20 = vcombine.high %v1048_v41, %v1056_v16 }
 0x4a3   :  { %8097 = vmatpush1.bf16.msra.mxu1 %v9185_v43  ;;  %7943 = vmatprep.subr.bf16.mxu0 %v9200_v40  ;;  %v9298_v43 = vcombine.high %v1049_v18, %v1057_v36  ;;  %v1064_v40 = vld [vmem:[#allocation9 + $0xbb0] sm:$0xff]  ;;  %v9377_v36 = vcombine.low %v1129_v10, %v1137_v54 }
 0x4a4   :  { %8107 = vmatprep.subr.bf16.mxu1 %v9202_v29  ;;  %v1072_v29 = vld [vmem:[#allocation9 + $0xbf0] sm:$0xff] }
 0x4a5   :  { %7935 = vmatmul.mubr.bf16.vlgmr.msra.gmra.mrb[20].mxu0 %v10599_v5  ;;  %v9312_v46 = vcombine.high %v1064_v40, %v1072_v29 }
 0x4a6   :  { %8099 = vmatmul.mubr.bf16.vlgmr.msra.gmra.mrb[20].mxu1 %v10599_v5  ;;  %7944 = vmatpush1.bf16.msra.mxu0 %v9199_v24  ;;  %v9233_v5 = vcombine.low %v985_v17, %v993_v27  ;;  %v9295_v24 = vcombine.low %v1048_v41, %v1056_v16  ;;  %v9311_v17 = vcombine.low %v1064_v40, %v1072_v29  ;;  %v1145_v41 = vld [vmem:[#allocation9 + $0xe38] sm:$0xff] }
 0x4a7   :  { %7975 = vmatprep.mubr.bf16.mxu0 %v10602_v11  ;;  %8108 = vmatpush1.bf16.msra.mxu1 %v9201_v47  ;;  %v9314_v47 = vcombine.high %v1065_v22, %v1073_v23  ;;  %v9313_v27 = vcombine.low %v1065_v22, %v1073_v23  ;;  %v1153_v16 = vld [vmem:[#allocation9 + $0xe78] sm:$0xff] }
 0x4a8   :  { %8139 = vmatprep.mubr.bf16.mxu1 %v10602_v11  ;;  %7945 = vmatprep.subr.bf16.mxu0 %v9216_v48  ;;  %v9247_v11 = vcombine.low %v1000_v51, %v1008_v6  ;;  %v1080_v48 = vld [vmem:[#allocation9 + $0xc30] sm:$0xff]  ;;  %v1097_v51 = vld [vmem:[#allocation9 + $0xcb8] sm:$0xff]  ;;  %v9393_v23 = vcombine.low %v1145_v41, %v1153_v16 }
 0x4a9   :  { %8109 = vmatprep.subr.bf16.mxu1 %v9218_v56  ;;  %v1089_v56 = vld [vmem:[#allocation9 + $0xc78] sm:$0xff]  ;;  %v9327_v52 = vcombine.low %v1080_v48, %v1088_v42 }
 0x4aa   :  { %7946 = vmatpush1.bf16.msra.mxu0 %v9215_v4  ;;  %v9328_v4 = vcombine.high %v1080_v48, %v1088_v42  ;;  %v1105_v6 = vld [vmem:[#allocation9 + $0xcf8] sm:$0xff]  ;;  %v9329_v53 = vcombine.low %v1081_v32, %v1089_v56 }
 0x4ab   :  { %8110 = vmatpush1.bf16.msra.mxu1 %v9217_v49  ;;  %7947 = vmatprep.subr.bf16.mxu0 %v9232_v44  ;;  %v9330_v49 = vcombine.high %v1081_v32, %v1089_v56  ;;  %v1096_v44 = vld [vmem:[#allocation9 + $0xcb0] sm:$0xff]  ;;  %v9345_v3 = vcombine.low %v1097_v51, %v1105_v6  ;;  %v1161_v40 = vld [vmem:[#allocation9 + $0xeb8] sm:$0xff] }
 0x4ac   :  { %8111 = vmatprep.subr.bf16.mxu1 %v9234_v26  ;;  %v1104_v26 = vld [vmem:[#allocation9 + $0xcf0] sm:$0xff]  ;;  %v1169_v29 = vld [vmem:[#allocation9 + $0xef8] sm:$0xff] }
 0x4ad   :  { %v9343_v50 = vcombine.low %v1096_v44, %v1104_v26  ;;  %v1177_v48 = vld [vmem:[#allocation9 + $0xf38] sm:$0xff]  ;;  %v9409_v56 = vcombine.low %v1161_v40, %v1169_v29 }
 0x4ae   :  { %7948 = vmatpush1.bf16.msra.mxu0 %v9231_v13  ;;  %v9344_v13 = vcombine.high %v1096_v44, %v1104_v26  ;;  %v1185_v42 = vld [vmem:[#allocation9 + $0xf78] sm:$0xff] }
 0x4af   :  { %8112 = vmatpush1.bf16.msra.mxu1 %v9233_v5  ;;  %7949 = vmatprep.subr.bf16.mxu0 %v9248_v55  ;;  %v9346_v5 = vcombine.high %v1097_v51, %v1105_v6  ;;  %v1112_v55 = vld [vmem:[#allocation9 + $0xd30] sm:$0xff]  ;;  %v1193_v44 = vld [vmem:[#allocation9 + $0xfb8] sm:$0xff]  ;;  %v9425_v6 = vcombine.low %v1177_v48, %v1185_v42 }
 0x4b0   :  { %8113 = vmatprep.subr.bf16.mxu1 %v9250_v57  ;;  %v1120_v57 = vld [vmem:[#allocation9 + $0xd70] sm:$0xff]  ;;  %v1201_v26 = vld [vmem:[#allocation9 + $0xff8] sm:$0xff] }
 0x4b1   :  { %v9359_v8 = vcombine.low %v1112_v55, %v1120_v57 }
 0x4b2   :  { %7950 = vmatpush1.bf16.msra.mxu0 %v9247_v11  ;;  %v9360_v11 = vcombine.high %v1112_v55, %v1120_v57  ;;  %v1209_v55 = vld [vmem:[#allocation9 + $0x1038] sm:$0xff] }
 0x4b3   :  { %8114 = vmatpush1.bf16.msra.mxu1 %v9249_v35  ;;  %7951 = vmatprep.subr.bf16.mxu0 %v9264_v39  ;;  %v9362_v35 = vcombine.high %v1113_v59, %v1121_v60  ;;  %v1128_v39 = vld [vmem:[#allocation9 + $0xdb0] sm:$0xff]  ;;  %v1217_v57 = vld [vmem:[#allocation9 + $0x1078] sm:$0xff]  ;;  %v9441_v60 = vcombine.low %v1193_v44, %v1201_v26 }
 0x4b4   :  { %8115 = vmatprep.subr.bf16.mxu1 %v9266_v19  ;;  %v1136_v19 = vld [vmem:[#allocation9 + $0xdf0] sm:$0xff] }
 0x4b5   :  { %v9375_v18 = vcombine.low %v1128_v39, %v1136_v19 }
 0x4b6   :  { %7952 = vmatpush1.bf16.msra.mxu0 %v9263_v21  ;;  %v9376_v21 = vcombine.high %v1128_v39, %v1136_v19  ;;  %v1225_v19 = vld [vmem:[#allocation9 + $0x10b8] sm:$0xff] }
 0x4b7   :  { %8116 = vmatpush1.bf16.msra.mxu1 %v9265_v34  ;;  %7953 = vmatprep.subr.bf16.mxu0 %v9280_v37  ;;  %v9378_v34 = vcombine.high %v1129_v10, %v1137_v54  ;;  %v1144_v37 = vld [vmem:[#allocation9 + $0xe30] sm:$0xff]  ;;  %v1233_v10 = vld [vmem:[#allocation9 + $0x10f8] sm:$0xff]  ;;  %v9457_v54 = vcombine.low %v1209_v55, %v1217_v57 }
 0x4b8   :  { %8117 = vmatprep.subr.bf16.mxu1 %v9282_v14  ;;  %v1152_v14 = vld [vmem:[#allocation9 + $0xe70] sm:$0xff] }
 0x4b9   :  { %v9391_v22 = vcombine.low %v1144_v37, %v1152_v14 }
 0x4ba   :  { %7954 = vmatpush1.bf16.msra.mxu0 %v9279_v9  ;;  %v9392_v9 = vcombine.high %v1144_v37, %v1152_v14  ;;  %v1241_v37 = vld [vmem:[#allocation9 + $0x1138] sm:$0xff] }
 0x4bb   :  { %8118 = vmatpush1.bf16.msra.mxu1 %v9281_v33  ;;  %7955 = vmatprep.subr.bf16.mxu0 %v9296_v20  ;;  %v9394_v33 = vcombine.high %v1145_v41, %v1153_v16  ;;  %v1160_v20 = vld [vmem:[#allocation9 + $0xeb0] sm:$0xff]  ;;  %v1249_v14 = vld [vmem:[#allocation9 + $0x1178] sm:$0xff]  ;;  %v9473_v16 = vcombine.low %v1225_v19, %v1233_v10 }
 0x4bc   :  { %8119 = vmatprep.subr.bf16.mxu1 %v9298_v43  ;;  %v1168_v43 = vld [vmem:[#allocation9 + $0xef0] sm:$0xff] }
 0x4bd   :  { %v9407_v32 = vcombine.low %v1160_v20, %v1168_v43 }
 0x4be   :  { %7956 = vmatpush1.bf16.msra.mxu0 %v9295_v24  ;;  %v9408_v24 = vcombine.high %v1160_v20, %v1168_v43  ;;  %v1257_v20 = vld [vmem:[#allocation9 + $0x11b8] sm:$0xff] }
 0x4bf   :  { %8120 = vmatpush1.bf16.msra.mxu1 %v9297_v45  ;;  %7957 = vmatprep.subr.bf16.mxu0 %v9312_v46  ;;  %v9410_v45 = vcombine.high %v1161_v40, %v1169_v29  ;;  %v1176_v46 = vld [vmem:[#allocation9 + $0xf30] sm:$0xff]  ;;  %v1265_v43 = vld [vmem:[#allocation9 + $0x11f8] sm:$0xff] }
 0x4c0   :  { %8121 = vmatprep.subr.bf16.mxu1 %v9314_v47  ;;  %v1184_v47 = vld [vmem:[#allocation9 + $0xf70] sm:$0xff] }
 0x4c1   :  { %v9423_v51 = vcombine.low %v1176_v46, %v1184_v47 }
 0x4c2   :  { %7958 = vmatpush1.bf16.msra.mxu0 %v9311_v17  ;;  %v9424_v17 = vcombine.high %v1176_v46, %v1184_v47  ;;  %v1281_v46 = vld [vmem:[#allocation9 + $0x1278] sm:$0xff]  ;;  %v9505_v47 = vcombine.low %v1257_v20, %v1265_v43 }
 0x4c3   :  { %8122 = vmatpush1.bf16.msra.mxu1 %v9313_v27  ;;  %7959 = vmatprep.subr.bf16.mxu0 %v9328_v4  ;;  %v9426_v27 = vcombine.high %v1177_v48, %v1185_v42  ;;  %v1192_v4 = vld [vmem:[#allocation9 + $0xfb0] sm:$0xff] }
 0x4c4   :  { %8123 = vmatprep.subr.bf16.mxu1 %v9330_v49  ;;  %v1200_v49 = vld [vmem:[#allocation9 + $0xff0] sm:$0xff] }
 0x4c5   :  { %v9439_v59 = vcombine.low %v1192_v4, %v1200_v49 }
 0x4c6   :  { %7960 = vmatpush1.bf16.msra.mxu0 %v9327_v52  ;;  %v9440_v52 = vcombine.high %v1192_v4, %v1200_v49 }
 0x4c7   :  { %8124 = vmatpush1.bf16.msra.mxu1 %v9329_v53  ;;  %7961 = vmatprep.subr.bf16.mxu0 %v9344_v13  ;;  %v9442_v53 = vcombine.high %v1193_v44, %v1201_v26  ;;  %v1208_v13 = vld [vmem:[#allocation9 + $0x1030] sm:$0xff] }
 0x4c8   :  { %8125 = vmatprep.subr.bf16.mxu1 %v9346_v5  ;;  %v1216_v5 = vld [vmem:[#allocation9 + $0x1070] sm:$0xff] }
 0x4c9   :  { %v9455_v39 = vcombine.low %v1208_v13, %v1216_v5 }
 0x4ca   :  { %7962 = vmatpush1.bf16.msra.mxu0 %v9343_v50  ;;  %v9456_v50 = vcombine.high %v1208_v13, %v1216_v5 }
 0x4cb   :  { %8126 = vmatpush1.bf16.msra.mxu1 %v9345_v3  ;;  %7963 = vmatprep.subr.bf16.mxu0 %v9360_v11  ;;  %v9458_v3 = vcombine.high %v1209_v55, %v1217_v57  ;;  %v1224_v11 = vld [vmem:[#allocation9 + $0x10b0] sm:$0xff] }
 0x4cc   :  { %8127 = vmatprep.subr.bf16.mxu1 %v9362_v35  ;;  %v1232_v35 = vld [vmem:[#allocation9 + $0x10f0] sm:$0xff] }
 0x4cd   :  { %v9471_v41 = vcombine.low %v1224_v11, %v1232_v35 }
 0x4ce   :  { %7964 = vmatpush1.bf16.msra.mxu0 %v9359_v8  ;;  %v9472_v8 = vcombine.high %v1224_v11, %v1232_v35 }
 0x4cf   :  { %8128 = vmatpush1.bf16.msra.mxu1 %v9361_v15  ;;  %7965 = vmatprep.subr.bf16.mxu0 %v9376_v21  ;;  %v1240_v15 = vld [vmem:[#allocation9 + $0x1130] sm:$0xff] }
 0x4d0   :  { %8129 = vmatprep.subr.bf16.mxu1 %v9378_v34  ;;  %v1248_v21 = vld [vmem:[#allocation9 + $0x1170] sm:$0xff]  ;;  %v9474_v34 = vcombine.high %v1225_v19, %v1233_v10 }
 0x4d1   :  { %v9487_v40 = vcombine.low %v1240_v15, %v1248_v21  ;;  %v1336_v10 = vld [vmem:[#allocation9 + $0x1430] sm:$0xff] }
 0x4d2   :  { %7966 = vmatpush1.bf16.msra.mxu0 %v9375_v18  ;;  %v9488_v18 = vcombine.high %v1240_v15, %v1248_v21  ;;  %v1345_v15 = vld [vmem:[#allocation9 + $0x1478] sm:$0xff] }
 0x4d3   :  { %8130 = vmatpush1.bf16.msra.mxu1 %v9377_v36  ;;  %7967 = vmatprep.subr.bf16.mxu0 %v9392_v9  ;;  %v9490_v36 = vcombine.high %v1241_v37, %v1249_v14  ;;  %v1256_v9 = vld [vmem:[#allocation9 + $0x11b0] sm:$0xff] }
 0x4d4   :  { %8131 = vmatprep.subr.bf16.mxu1 %v9394_v33  ;;  %v1264_v33 = vld [vmem:[#allocation9 + $0x11f0] sm:$0xff] }
 0x4d5   :  { %v9504_v29 = vcombine.high %v1256_v9, %v1264_v33 }
 0x4d6   :  { %7968 = vmatpush1.bf16.msra.mxu0 %v9391_v22  ;;  %v9506_v22 = vcombine.high %v1257_v20, %v1265_v43 }
 0x4d7   :  { %8132 = vmatpush1.bf16.msra.mxu1 %v9393_v23  ;;  %7969 = vmatprep.subr.bf16.mxu0 %v9408_v24  ;;  %v1272_v23 = vld [vmem:[#allocation9 + $0x1230] sm:$0xff] }
 0x4d8   :  { %8133 = vmatprep.subr.bf16.mxu1 %v9410_v45  ;;  %v1280_v24 = vld [vmem:[#allocation9 + $0x1270] sm:$0xff]  ;;  %v1273_v45 = vld [vmem:[#allocation9 + $0x1238] sm:$0xff] }
 0x4d9   :  { %v9520_v48 = vcombine.high %v1272_v23, %v1280_v24  ;;  %v9522_v42 = vcombine.high %v1273_v45, %v1281_v46  ;;  %v9519_v4 = vcombine.low %v1272_v23, %v1280_v24  ;;  %v9521_v49 = vcombine.low %v1273_v45, %v1281_v46 }
 0x4da   :  { %7970 = vmatpush1.bf16.msra.mxu0 %v9407_v32  ;;  %v1288_v32 = vld [vmem:[#allocation9 + $0x12b0] sm:$0xff] }
 0x4db   :  { %8134 = vmatpush1.bf16.msra.mxu1 %v9409_v56  ;;  %7971 = vmatprep.subr.bf16.mxu0 %v9424_v17  ;;  %v1296_v56 = vld [vmem:[#allocation9 + $0x12f0] sm:$0xff]  ;;  %v1289_v17 = vld [vmem:[#allocation9 + $0x12b8] sm:$0xff] }
 0x4dc   :  { %8135 = vmatprep.subr.bf16.mxu1 %v9426_v27  ;;  %v1297_v27 = vld [vmem:[#allocation9 + $0x12f8] sm:$0xff]  ;;  %v9536_v44 = vcombine.high %v1288_v32, %v1296_v56  ;;  %v9535_v13 = vcombine.low %v1288_v32, %v1296_v56 }
 0x4dd   :  { %v9538_v26 = vcombine.high %v1289_v17, %v1297_v27  ;;  %v9537_v5 = vcombine.low %v1289_v17, %v1297_v27 }
 0x4de   :  { %7972 = vmatpush1.bf16.msra.mxu0 %v9423_v51  ;;  %v1304_v51 = vld [vmem:[#allocation9 + $0x1330] sm:$0xff] }
 0x4df   :  { %8136 = vmatpush1.bf16.msra.mxu1 %v9425_v6  ;;  %7973 = vmatprep.subr.bf16.mxu0 %v9440_v52  ;;  %v1312_v6 = vld [vmem:[#allocation9 + $0x1370] sm:$0xff]  ;;  %v1305_v52 = vld [vmem:[#allocation9 + $0x1338] sm:$0xff] }
 0x4e0   :  { %8137 = vmatprep.subr.bf16.mxu1 %v9442_v53  ;;  %v1313_v53 = vld [vmem:[#allocation9 + $0x1378] sm:$0xff]  ;;  %v9552_v55 = vcombine.high %v1304_v51, %v1312_v6  ;;  %v9551_v11 = vcombine.low %v1304_v51, %v1312_v6 }
 0x4e1   :  { %v9554_v57 = vcombine.high %v1305_v52, %v1313_v53  ;;  %v9553_v35 = vcombine.low %v1305_v52, %v1313_v53 }
 0x4e2   :  { %7974 = vmatpush1.bf16.msra.mxu0 %v9439_v59  ;;  %v1320_v59 = vld [vmem:[#allocation9 + $0x13b0] sm:$0xff] }
 0x4e3   :  { %8138 = vmatpush1.bf16.msra.mxu1 %v9441_v60  ;;  %7984 = vmatprep.subr.bf16.mxu0 %v9456_v50  ;;  %v1328_v60 = vld [vmem:[#allocation9 + $0x13f0] sm:$0xff]  ;;  %v1321_v50 = vld [vmem:[#allocation9 + $0x13b8] sm:$0xff] }
 0x4e4   :  { %8148 = vmatprep.subr.bf16.mxu1 %v9458_v3  ;;  %v1329_v3 = vld [vmem:[#allocation9 + $0x13f8] sm:$0xff]  ;;  %v9567_v21 = vcombine.low %v1320_v59, %v1328_v60 }
 0x4e5   :  { %7976 = vmatmul.mubr.bf16.vlgmr.msra.gmra.mrb[20].mxu0 %v10657_v7  ;;  %v9570_v19 = vcombine.high %v1321_v50, %v1329_v3 }
 0x4e6   :  { %8140 = vmatmul.mubr.bf16.vlgmr.msra.gmra.mrb[20].mxu1 %v10657_v7  ;;  %7985 = vmatpush1.bf16.msra.mxu0 %v9455_v39  ;;  %v9489_v7 = vcombine.low %v1241_v37, %v1249_v14  ;;  %v9568_v39 = vcombine.high %v1320_v59, %v1328_v60 }
 0x4e7   :  { %8016 = vmatprep.mubr.bf16.mxu0 %v10660_v12  ;;  %8149 = vmatpush1.bf16.msra.mxu1 %v9457_v54  ;;  %v1344_v54 = vld [vmem:[#allocation9 + $0x1470] sm:$0xff] }
 0x4e8   :  { %8180 = vmatprep.mubr.bf16.mxu1 %v10660_v12  ;;  %7986 = vmatprep.subr.bf16.mxu0 %v9472_v8  ;;  %v9503_v12 = vcombine.low %v1256_v9, %v1264_v33  ;;  %v1337_v8 = vld [vmem:[#allocation9 + $0x1438] sm:$0xff]  ;;  %v9584_v37 = vcombine.high %v1336_v10, %v1344_v54  ;;  %v9583_v9 = vcombine.low %v1336_v10, %v1344_v54 }
 0x4e9   :  { %8150 = vmatprep.subr.bf16.mxu1 %v9474_v34  ;;  %v9569_v34 = vcombine.low %v1321_v50, %v1329_v3  ;;  %v9586_v14 = vcombine.high %v1337_v8, %v1345_v15  ;;  %v9585_v33 = vcombine.low %v1337_v8, %v1345_v15 }
 0x4ea   :  { %7987 = vmatpush1.bf16.msra.mxu0 %v9471_v41  ;;  %v1352_v41 = vld [vmem:[#allocation9 + $0x14b0] sm:$0xff] }
 0x4eb   :  { %8151 = vmatpush1.bf16.msra.mxu1 %v9473_v16  ;;  %7988 = vmatprep.subr.bf16.mxu0 %v9488_v18  ;;  %v1360_v16 = vld [vmem:[#allocation9 + $0x14f0] sm:$0xff]  ;;  %v1353_v18 = vld [vmem:[#allocation9 + $0x14b8] sm:$0xff] }
 0x4ec   :  { %8152 = vmatprep.subr.bf16.mxu1 %v9490_v36  ;;  %v1361_v36 = vld [vmem:[#allocation9 + $0x14f8] sm:$0xff]  ;;  %v9600_v20 = vcombine.high %v1352_v41, %v1360_v16  ;;  %v9599_v23 = vcombine.low %v1352_v41, %v1360_v16 }
 0x4ed   :  { %v9602_v43 = vcombine.high %v1353_v18, %v1361_v36  ;;  %v9601_v24 = vcombine.low %v1353_v18, %v1361_v36 }
 0x4ee   :  { %7989 = vmatpush1.bf16.msra.mxu0 %v9487_v40  ;;  %v1368_v40 = vld [vmem:[#allocation9 + $0x1530] sm:$0xff] }
 0x4ef   :  { %8153 = vmatpush1.bf16.msra.mxu1 %v9489_v7  ;;  %7990 = vmatprep.subr.bf16.mxu0 %v9504_v29  ;;  %v1376_v7 = vld [vmem:[#allocation9 + $0x1570] sm:$0xff]  ;;  %v1369_v29 = vld [vmem:[#allocation9 + $0x1538] sm:$0xff] }
 0x4f0   :  { %8154 = vmatprep.subr.bf16.mxu1 %v9506_v22  ;;  %v1377_v22 = vld [vmem:[#allocation9 + $0x1578] sm:$0xff]  ;;  %v9616_v45 = vcombine.high %v1368_v40, %v1376_v7  ;;  %v9615_v32 = vcombine.low %v1368_v40, %v1376_v7 }
 0x4f1   :  { %v9618_v46 = vcombine.high %v1369_v29, %v1377_v22  ;;  %v9617_v56 = vcombine.low %v1369_v29, %v1377_v22 }
 0x4f2   :  { %7991 = vmatpush1.bf16.msra.mxu0 %v9503_v12  ;;  %v1384_v12 = vld [vmem:[#allocation9 + $0x15b0] sm:$0xff] }
 0x4f3   :  { %8155 = vmatpush1.bf16.msra.mxu1 %v9505_v47  ;;  %7992 = vmatprep.subr.bf16.mxu0 %v9520_v48  ;;  %v1392_v47 = vld [vmem:[#allocation9 + $0x15f0] sm:$0xff]  ;;  %v1385_v48 = vld [vmem:[#allocation9 + $0x15b8] sm:$0xff] }
 0x4f4   :  { %8156 = vmatprep.subr.bf16.mxu1 %v9522_v42  ;;  %v1393_v42 = vld [vmem:[#allocation9 + $0x15f8] sm:$0xff]  ;;  %v9632_v17 = vcombine.high %v1384_v12, %v1392_v47  ;;  %v9631_v51 = vcombine.low %v1384_v12, %v1392_v47 }
 0x4f5   :  { %v9634_v27 = vcombine.high %v1385_v48, %v1393_v42  ;;  %v9633_v6 = vcombine.low %v1385_v48, %v1393_v42  ;;  %v1489_v12 = vld [vmem:[#allocation9 + $0x18f8] sm:$0xff]  ;;  %v1496_v42 = vld [vmem:[#allocation9 + $0x1930] sm:$0xff] }
 0x4f6   :  { %7993 = vmatpush1.bf16.msra.mxu0 %v9519_v4  ;;  %v1400_v4 = vld [vmem:[#allocation9 + $0x1630] sm:$0xff] }
 0x4f7   :  { %8157 = vmatpush1.bf16.msra.mxu1 %v9521_v49  ;;  %7994 = vmatprep.subr.bf16.mxu0 %v9536_v44  ;;  %v1408_v49 = vld [vmem:[#allocation9 + $0x1670] sm:$0xff]  ;;  %v1401_v44 = vld [vmem:[#allocation9 + $0x1638] sm:$0xff] }
 0x4f8   :  { %8158 = vmatprep.subr.bf16.mxu1 %v9538_v26  ;;  %v1409_v26 = vld [vmem:[#allocation9 + $0x1678] sm:$0xff]  ;;  %v9648_v52 = vcombine.high %v1400_v4, %v1408_v49  ;;  %v9647_v59 = vcombine.low %v1400_v4, %v1408_v49 }
 0x4f9   :  { %v9650_v53 = vcombine.high %v1401_v44, %v1409_v26  ;;  %v9649_v60 = vcombine.low %v1401_v44, %v1409_v26 }
 0x4fa   :  { %7995 = vmatpush1.bf16.msra.mxu0 %v9535_v13  ;;  %v1416_v13 = vld [vmem:[#allocation9 + $0x16b0] sm:$0xff] }
 0x4fb   :  { %8159 = vmatpush1.bf16.msra.mxu1 %v9537_v5  ;;  %7996 = vmatprep.subr.bf16.mxu0 %v9552_v55  ;;  %v1424_v5 = vld [vmem:[#allocation9 + $0x16f0] sm:$0xff]  ;;  %v1417_v55 = vld [vmem:[#allocation9 + $0x16b8] sm:$0xff] }
 0x4fc   :  { %8160 = vmatprep.subr.bf16.mxu1 %v9554_v57  ;;  %v1425_v57 = vld [vmem:[#allocation9 + $0x16f8] sm:$0xff]  ;;  %v9664_v50 = vcombine.high %v1416_v13, %v1424_v5  ;;  %v9663_v10 = vcombine.low %v1416_v13, %v1424_v5 }
 0x4fd   :  { %v9666_v3 = vcombine.high %v1417_v55, %v1425_v57  ;;  %v9665_v54 = vcombine.low %v1417_v55, %v1425_v57  ;;  %v1528_v57 = vld [vmem:[#allocation9 + $0x1a30] sm:$0xff] }
 0x4fe   :  { %7997 = vmatpush1.bf16.msra.mxu0 %v9551_v11  ;;  %v1432_v11 = vld [vmem:[#allocation9 + $0x1730] sm:$0xff] }
 0x4ff   :  { %8161 = vmatpush1.bf16.msra.mxu1 %v9553_v35  ;;  %7998 = vmatprep.subr.bf16.mxu0 %v9568_v39  ;;  %v1440_v35 = vld [vmem:[#allocation9 + $0x1770] sm:$0xff]  ;;  %v1433_v39 = vld [vmem:[#allocation9 + $0x1738] sm:$0xff] }
 0x500   :  { %8162 = vmatprep.subr.bf16.mxu1 %v9570_v19  ;;  %v1441_v19 = vld [vmem:[#allocation9 + $0x1778] sm:$0xff]  ;;  %v9680_v8 = vcombine.high %v1432_v11, %v1440_v35  ;;  %v9679_v41 = vcombine.low %v1432_v11, %v1440_v35 }
 0x501   :  { %v9682_v15 = vcombine.high %v1433_v39, %v1441_v19  ;;  %v9681_v16 = vcombine.low %v1433_v39, %v1441_v19  ;;  %v1544_v39 = vld [vmem:[#allocation9 + $0x1ab0] sm:$0xff] }
 0x502   :  { %7999 = vmatpush1.bf16.msra.mxu0 %v9567_v21  ;;  %v1448_v21 = vld [vmem:[#allocation9 + $0x17b0] sm:$0xff] }
 0x503   :  { %8163 = vmatpush1.bf16.msra.mxu1 %v9569_v34  ;;  %8000 = vmatprep.subr.bf16.mxu0 %v9584_v37  ;;  %v1456_v34 = vld [vmem:[#allocation9 + $0x17f0] sm:$0xff]  ;;  %v1449_v37 = vld [vmem:[#allocation9 + $0x17b8] sm:$0xff] }
 0x504   :  { %8164 = vmatprep.subr.bf16.mxu1 %v9586_v14  ;;  %v1457_v14 = vld [vmem:[#allocation9 + $0x17f8] sm:$0xff]  ;;  %v9696_v18 = vcombine.high %v1448_v21, %v1456_v34  ;;  %v9695_v40 = vcombine.low %v1448_v21, %v1456_v34  ;;  %v1552_v19 = vld [vmem:[#allocation9 + $0x1af0] sm:$0xff] }
 0x505   :  { %v9698_v36 = vcombine.high %v1449_v37, %v1457_v14  ;;  %v9697_v7 = vcombine.low %v1449_v37, %v1457_v14  ;;  %v9792_v34 = vcombine.high %v1544_v39, %v1552_v19  ;;  %v1560_v14 = vld [vmem:[#allocation9 + $0x1b30] sm:$0xff] }
 0x506   :  { %8001 = vmatpush1.bf16.msra.mxu0 %v9583_v9  ;;  %v1464_v9 = vld [vmem:[#allocation9 + $0x1830] sm:$0xff] }
 0x507   :  { %8165 = vmatpush1.bf16.msra.mxu1 %v9585_v33  ;;  %8002 = vmatprep.subr.bf16.mxu0 %v9600_v20  ;;  %v1472_v33 = vld [vmem:[#allocation9 + $0x1870] sm:$0xff]  ;;  %v1465_v20 = vld [vmem:[#allocation9 + $0x1838] sm:$0xff] }
 0x508   :  { %8166 = vmatprep.subr.bf16.mxu1 %v9602_v43  ;;  %v1473_v43 = vld [vmem:[#allocation9 + $0x1878] sm:$0xff]  ;;  %v9712_v29 = vcombine.high %v1464_v9, %v1472_v33 }
 0x509   :  { %v9714_v22 = vcombine.high %v1465_v20, %v1473_v43  ;;  %v9713_v47 = vcombine.low %v1465_v20, %v1473_v43  ;;  %v9791_v20 = vcombine.low %v1544_v39, %v1552_v19 }
 0x50a   :  { %8003 = vmatpush1.bf16.msra.mxu0 %v9599_v23  ;;  %v1480_v23 = vld [vmem:[#allocation9 + $0x18b0] sm:$0xff] }
 0x50b   :  { %8167 = vmatpush1.bf16.msra.mxu1 %v9601_v24  ;;  %8004 = vmatprep.subr.bf16.mxu0 %v9616_v45  ;;  %v1488_v24 = vld [vmem:[#allocation9 + $0x18f0] sm:$0xff]  ;;  %v9711_v45 = vcombine.low %v1464_v9, %v1472_v33 }
 0x50c   :  { %8168 = vmatprep.subr.bf16.mxu1 %v9618_v46  ;;  %v1481_v46 = vld [vmem:[#allocation9 + $0x18b8] sm:$0xff]  ;;  %v9728_v48 = vcombine.high %v1480_v23, %v1488_v24  ;;  %v9727_v4 = vcombine.low %v1480_v23, %v1488_v24  ;;  %v1576_v23 = vld [vmem:[#allocation9 + $0x1bb0] sm:$0xff] }
 0x50d   :  { %v9729_v49 = vcombine.low %v1481_v46, %v1489_v12  ;;  %v1584_v24 = vld [vmem:[#allocation9 + $0x1bf0] sm:$0xff] }
 0x50e   :  { %8005 = vmatpush1.bf16.msra.mxu0 %v9615_v32  ;;  %v1504_v32 = vld [vmem:[#allocation9 + $0x1970] sm:$0xff]  ;;  %v9823_v39 = vcombine.low %v1576_v23, %v1584_v24 }
 0x50f   :  { %8169 = vmatpush1.bf16.msra.mxu1 %v9617_v56  ;;  %8006 = vmatprep.subr.bf16.mxu0 %v9632_v17  ;;  %v9730_v56 = vcombine.high %v1481_v46, %v1489_v12  ;;  %v1497_v17 = vld [vmem:[#allocation9 + $0x1938] sm:$0xff]  ;;  %v9744_v44 = vcombine.high %v1496_v42, %v1504_v32  ;;  %v9743_v13 = vcombine.low %v1496_v42, %v1504_v32 }
 0x510   :  { %8170 = vmatprep.subr.bf16.mxu1 %v9634_v27  ;;  %v1505_v27 = vld [vmem:[#allocation9 + $0x1978] sm:$0xff] }
 0x511   :  { %v9746_v26 = vcombine.high %v1497_v17, %v1505_v27 }
 0x512   :  { %8007 = vmatpush1.bf16.msra.mxu0 %v9631_v51  ;;  %v1512_v51 = vld [vmem:[#allocation9 + $0x19b0] sm:$0xff] }
 0x513   :  { %8171 = vmatpush1.bf16.msra.mxu1 %v9633_v6  ;;  %8008 = vmatprep.subr.bf16.mxu0 %v9648_v52  ;;  %v1520_v6 = vld [vmem:[#allocation9 + $0x19f0] sm:$0xff]  ;;  %v1513_v52 = vld [vmem:[#allocation9 + $0x19b8] sm:$0xff] }
 0x514   :  { %8172 = vmatprep.subr.bf16.mxu1 %v9650_v53  ;;  %v1521_v53 = vld [vmem:[#allocation9 + $0x19f8] sm:$0xff]  ;;  %v9760_v5 = vcombine.high %v1512_v51, %v1520_v6 }
 0x515   :  { %v9762_v55 = vcombine.high %v1513_v52, %v1521_v53 }
 0x516   :  { %8009 = vmatpush1.bf16.msra.mxu0 %v9647_v59  ;;  %v1536_v59 = vld [vmem:[#allocation9 + $0x1a70] sm:$0xff] }
 0x517   :  { %8173 = vmatpush1.bf16.msra.mxu1 %v9649_v60  ;;  %8010 = vmatprep.subr.bf16.mxu0 %v9664_v50  ;;  %v1529_v60 = vld [vmem:[#allocation9 + $0x1a38] sm:$0xff]  ;;  %v9776_v11 = vcombine.high %v1528_v57, %v1536_v59 }
 0x518   :  { %8174 = vmatprep.subr.bf16.mxu1 %v9666_v3  ;;  %v1537_v50 = vld [vmem:[#allocation9 + $0x1a78] sm:$0xff]  ;;  %v9761_v3 = vcombine.low %v1513_v52, %v1521_v53 }
 0x519   :  { %v9778_v35 = vcombine.high %v1529_v60, %v1537_v50  ;;  %v9777_v21 = vcombine.low %v1529_v60, %v1537_v50 }
 0x51a   :  { %8011 = vmatpush1.bf16.msra.mxu0 %v9663_v10  ;;  %v1545_v10 = vld [vmem:[#allocation9 + $0x1ab8] sm:$0xff] }
 0x51b   :  { %8175 = vmatpush1.bf16.msra.mxu1 %v9665_v54  ;;  %8012 = vmatprep.subr.bf16.mxu0 %v9680_v8  ;;  %v1553_v54 = vld [vmem:[#allocation9 + $0x1af8] sm:$0xff]  ;;  %v9775_v8 = vcombine.low %v1528_v57, %v1536_v59  ;;  %v1600_v57 = vld [vmem:[#allocation9 + $0x1c70] sm:$0xff] }
 0x51c   :  { %8176 = vmatprep.subr.bf16.mxu1 %v9682_v15  ;;  %v10885_v15 = vld [vmem:[#allocation10 + $0x8] sm:$0xff]  ;;  %v9794_v37 = vcombine.high %v1545_v10, %v1553_v54 }
 0x51d   :  { %v1761_v9 = vrot.slane %v10885_v15, %v10547_v58  ;;  %v1757_v33 = vrot.slane %v10885_v15, %v10530_v30  ;;  %v1765_v43 = vrot.slane %v10885_v15, %v10533_v31 }
 0x51e   :  { %8013 = vmatpush1.bf16.msra.mxu0 %v9679_v41  ;;  %v1568_v41 = vld [vmem:[#allocation9 + $0x1b70] sm:$0xff] }
 0x51f   :  { %8177 = vmatpush1.bf16.msra.mxu1 %v9681_v16  ;;  %8014 = vmatprep.subr.bf16.mxu0 %v9696_v18  ;;  %v1753_v16 = vrot.slane %v10885_v15, %v10525_v28  ;;  %v1561_v18 = vld [vmem:[#allocation9 + $0x1b38] sm:$0xff] }
 0x520   :  { %8178 = vmatprep.subr.bf16.mxu1 %v9698_v36  ;;  %v1569_v36 = vld [vmem:[#allocation9 + $0x1b78] sm:$0xff] }
 0x522   :  { %8015 = vmatpush1.bf16.msra.mxu0 %v9695_v40  ;;  %v9793_v40 = vcombine.low %v1545_v10, %v1553_v54 }
 0x523   :  { %8179 = vmatpush1.bf16.msra.mxu1 %v9697_v7  ;;  %8025 = vmatprep.subr.bf16.mxu0 %v9712_v29  ;;  %v9808_v7 = vcombine.high %v1560_v14, %v1568_v41 }
 0x524   :  { %8189 = vmatprep.subr.bf16.mxu1 %v9714_v22  ;;  %v9810_v22 = vcombine.high %v1561_v18, %v1569_v36 }
 0x525   :  { %8017 = vmatmul.mubr.bf16.vlgmr.msra.gmra.mrb[20].mxu0 %v10692_v25 }
 0x526   :  { %8181 = vmatmul.mubr.bf16.vlgmr.msra.gmra.mrb[20].mxu1 %v10692_v25  ;;  %8026 = vmatpush1.bf16.msra.mxu0 %v9711_v45  ;;  %v9745_v25 = vcombine.low %v1497_v17, %v1505_v27  ;;  %v9807_v27 = vcombine.low %v1560_v14, %v1568_v41  ;;  %v1608_v14 = vld [vmem:[#allocation9 + $0x1cb0] sm:$0xff] }
 0x527   :  { %8057 = vmatprep.mubr.bf16.mxu0 %v10695_v63  ;;  %8190 = vmatpush1.bf16.msra.mxu1 %v9713_v47  ;;  %v1577_v47 = vld [vmem:[#allocation9 + $0x1bb8] sm:$0xff]  ;;  %v1616_v41 = vld [vmem:[#allocation9 + $0x1cf0] sm:$0xff] }
 0x528   :  { %8221 = vmatprep.mubr.bf16.mxu1 %v10695_v63  ;;  %8027 = vmatprep.subr.bf16.mxu0 %v9728_v48  ;;  %v9759_v63 = vcombine.low %v1512_v51, %v1520_v6  ;;  %v1585_v48 = vld [vmem:[#allocation9 + $0x1bf8] sm:$0xff]  ;;  %v9809_v51 = vcombine.low %v1561_v18, %v1569_v36  ;;  %v9824_v6 = vcombine.high %v1576_v23, %v1584_v24 }
 0x529   :  { %8191 = vmatprep.subr.bf16.mxu1 %v9730_v56  ;;  %v9825_v19 = vcombine.low %v1577_v47, %v1585_v48  ;;  %v1609_v36 = vld [vmem:[#allocation9 + $0x1cb8] sm:$0xff] }
 0x52a   :  { %8028 = vmatpush1.bf16.msra.mxu0 %v9727_v4 }
 0x52b   :  { %8192 = vmatpush1.bf16.msra.mxu1 %v9729_v49  ;;  %8029 = vmatprep.subr.bf16.mxu0 %v9744_v44 }
 0x52c   :  { %8193 = vmatprep.subr.bf16.mxu1 %v9746_v26 }
 0x52e   :  { %8030 = vmatpush1.bf16.msra.mxu0 %v9743_v13 }
 0x52f   :  { %8194 = vmatpush1.bf16.msra.mxu1 %v9745_v25  ;;  %8031 = vmatprep.subr.bf16.mxu0 %v9760_v5  ;;  %v9826_v5 = vcombine.high %v1577_v47, %v1585_v48  ;;  %v1632_v47 = vld [vmem:[#allocation9 + $0x1d70] sm:$0xff] }
 0x530   :  { %8195 = vmatprep.subr.bf16.mxu1 %v9762_v55  ;;  %v1592_v55 = vld [vmem:[#allocation9 + $0x1c30] sm:$0xff] }
 0x532   :  { %8032 = vmatpush1.bf16.msra.mxu0 %v9759_v63  ;;  %v1593_v63 = vld [vmem:[#allocation9 + $0x1c38] sm:$0xff] }
 0x533   :  { %8196 = vmatpush1.bf16.msra.mxu1 %v9761_v3  ;;  %8033 = vmatprep.subr.bf16.mxu0 %v9776_v11  ;;  %v1601_v3 = vld [vmem:[#allocation9 + $0x1c78] sm:$0xff] }
 0x534   :  { %8197 = vmatprep.subr.bf16.mxu1 %v9778_v35 }
 0x536   :  { %8034 = vmatpush1.bf16.msra.mxu0 %v9775_v8  ;;  %v9840_v8 = vcombine.high %v1592_v55, %v1600_v57 }
 0x537   :  { %8198 = vmatpush1.bf16.msra.mxu1 %v9777_v21  ;;  %8035 = vmatprep.subr.bf16.mxu0 %v9792_v34 }
 0x538   :  { %v7731_v29 = vpop.f32.mrb[16].mxu0  ;;  %8199 = vmatprep.subr.bf16.mxu1 %v9794_v37  ;;  %v9842_v37 = vcombine.high %v1593_v63, %v1601_v3 }
 0x539   :  { %v10895_v45 = vadd.f32 %v7731_v29, %v1753_v16  ;;  %v7895_v46 = vpop.f32.mrb[16].mxu1  ;;  %v7733_v12 = vpop.f32.mrb[17].mxu0 }
 0x53a   :  { %v10897_v42 = vadd.f32 %v7895_v46, %v1761_v9  ;;  %v10899_v32 = vadd.f32 %v7733_v12, %v1757_v33  ;;  %v7897_v56 = vpop.f32.mrb[17].mxu1  ;;  %v7735_v17 = vpop.f32.mrb[18].mxu0  ;;  %8036 = vmatpush1.bf16.msra.mxu0 %v9791_v20  ;;  %v1617_v9 = vld [vmem:[#allocation9 + $0x1cf8] sm:$0xff]  ;;  %v1624_v12 = vld [vmem:[#allocation9 + $0x1d30] sm:$0xff] }
 0x53b   :  { %v8286_v4 = vsel %vm388_vm2, %v10895_v45, 0.0  ;;  %v10903_v49 = vadd.f32 %v7897_v56, %v1765_v43  ;;  %v7899_v44 = vpop.f32.mrb[18].mxu1  ;;  %8200 = vmatpush1.bf16.msra.mxu1 %v9793_v40  ;;  %v7736_v26 = vpop.f32.mrb[19].mxu0  ;;  %8037 = vmatprep.subr.bf16.mxu0 %v9808_v7  ;;  %v9839_v43 = vcombine.low %v1592_v55, %v1600_v57  ;;  %v9841_v40 = vcombine.low %v1593_v63, %v1601_v3  ;;  %v1625_v17 = vld [vmem:[#allocation9 + $0x1d38] sm:$0xff]  ;;  %v1640_v55 = vld [vmem:[#allocation9 + $0x1db0] sm:$0xff] }
 0x53c   :  { %v8287_v52 = vrot.slane %v8286_v4, 4  ;;  %v8300_v53 = vsel %vm388_vm2, %v10897_v42, 0.0  ;;  %v8293_v13 = vsel %vm388_vm2, %v10899_v32, 0.0  ;;  %v7900_v25 = vpop.f32.mrb[19].mxu1  ;;  %8201 = vmatprep.subr.bf16.mxu1 %v9810_v22  ;;  %v9856_v22 = vcombine.high %v1608_v14, %v1616_v41  ;;  %v1648_v57 = vld [vmem:[#allocation9 + $0x1df0] sm:$0xff]  ;;  %v1649_v63 = vld [vmem:[#allocation9 + $0x1df8] sm:$0xff] }
 0x53d   :  { %v8301_v59 = vrot.slane %v8300_v53, 4  ;;  %v8294_v60 = vrot.slane %v8293_v13, 4  ;;  %v8307_v50 = vsel %vm388_vm2, %v10903_v49, 0.0  ;;  %v9858_v46 = vcombine.high %v1609_v36, %v1617_v9 }
 0x53e   :  { %v8288_v11 = vadd.f32 %v8287_v52, %v8286_v4  ;;  %v8308_v35 = vrot.slane %v8307_v50, 4  ;;  %8038 = vmatpush1.bf16.msra.mxu0 %v9807_v27  ;;  %v1633_v27 = vld [vmem:[#allocation9 + $0x1d78] sm:$0xff]  ;;  %v9855_v26 = vcombine.low %v1608_v14, %v1616_v41 }
 0x53f   :  { %v8302_v10 = vadd.f32 %v8301_v59, %v8300_v53  ;;  %v8295_v54 = vadd.f32 %v8294_v60, %v8293_v13  ;;  %8202 = vmatpush1.bf16.msra.mxu1 %v9809_v51  ;;  %8039 = vmatprep.subr.bf16.mxu0 %v9824_v6  ;;  %v9857_v51 = vcombine.low %v1609_v36, %v1617_v9  ;;  %v1657_v14 = vld [vmem:[#allocation9 + $0x1e38] sm:$0xff] }
 0x540   :  { %v8289_v21 = vrot.slane %v8288_v11, 2  ;;  %v8309_v34 = vadd.f32 %v8308_v35, %v8307_v50  ;;  %8203 = vmatprep.subr.bf16.mxu1 %v9826_v5  ;;  %v9872_v53 = vcombine.high %v1624_v12, %v1632_v47  ;;  %v9874_v5 = vcombine.high %v1625_v17, %v1633_v27  ;;  %v1641_v50 = vld [vmem:[#allocation9 + $0x1db8] sm:$0xff] }
 0x541   :  { %v8303_v16 = vrot.slane %v8302_v10, 2  ;;  %v8296_v18 = vrot.slane %v8295_v54, 2  ;;  %v9871_v35 = vcombine.low %v1624_v12, %v1632_v47  ;;  %v1665_v41 = vld [vmem:[#allocation9 + $0x1e78] sm:$0xff]  ;;  %v9889_v36 = vcombine.low %v1641_v50, %v1649_v63 }
 0x542   :  { %v8290_v33 = vadd.f32 %v8289_v21, %v8288_v11  ;;  %v8310_v20 = vrot.slane %v8309_v34, 2  ;;  %8040 = vmatpush1.bf16.msra.mxu0 %v9823_v39  ;;  %v9873_v39 = vcombine.low %v1625_v17, %v1633_v27  ;;  %v1673_v47 = vld [vmem:[#allocation9 + $0x1eb8] sm:$0xff] }
 0x543   :  { %v8304_v7 = vadd.f32 %v8303_v16, %v8302_v10  ;;  %v8297_v29 = vadd.f32 %v8296_v18, %v8295_v54  ;;  %8204 = vmatpush1.bf16.msra.mxu1 %v9825_v19  ;;  %8041 = vmatprep.subr.bf16.mxu0 %v9840_v8  ;;  %v9888_v54 = vcombine.high %v1640_v55, %v1648_v57 }
 0x544   :  { %v8291_v23 = vrot.slane %v8290_v33, 1  ;;  %v8311_v24 = vadd.f32 %v8310_v20, %v8309_v34  ;;  %8205 = vmatprep.subr.bf16.mxu1 %v9842_v37  ;;  %v1656_v34 = vld [vmem:[#allocation9 + $0x1e30] sm:$0xff] }
 0x545   :  { %v8305_v48 = vrot.slane %v8304_v7, 1  ;;  %v8298_v56 = vrot.slane %v8297_v29, 1  ;;  %v1664_v37 = vld [vmem:[#allocation9 + $0x1e70] sm:$0xff] }
 0x546   :  { %v8292_v4 = vadd.f32 %v8291_v23, %v8290_v33  ;;  %v8312_v44 = vrot.slane %v8311_v24, 1  ;;  %8042 = vmatpush1.bf16.msra.mxu0 %v9839_v43  ;;  %v9904_v43 = vcombine.high %v1656_v34, %v1664_v37  ;;  %v1672_v23 = vld [vmem:[#allocation9 + $0x1eb0] sm:$0xff]  ;;  %v9903_v27 = vcombine.low %v1656_v34, %v1664_v37 }
 0x547   :  { %v8306_v6 = vadd.f32 %v8305_v48, %v8304_v7  ;;  %v8299_v52 = vadd.f32 %v8298_v56, %v8297_v29  ;;  %8206 = vmatpush1.bf16.msra.mxu1 %v9841_v40  ;;  %8043 = vmatprep.subr.bf16.mxu0 %v9856_v22  ;;  %v9906_v22 = vcombine.high %v1657_v14, %v1665_v41  ;;  %v1681_v48 = vld [vmem:[#allocation9 + $0x1ef8] sm:$0xff]  ;;  %v1704_v37 = vld [vmem:[#allocation9 + $0x1fb0] sm:$0xff] }
 0x548   :  { %v8350_v13 = vmul.f32 0.5, %v8292_v4  ;;  %v8313_v25 = vadd.f32 %v8312_v44, %v8311_v24  ;;  %8207 = vmatprep.subr.bf16.mxu1 %v9858_v46  ;;  %v1680_v24 = vld [vmem:[#allocation9 + $0x1ef0] sm:$0xff] }
 0x549   :  { %v8352_v59 = vmul.f32 0.5, %v8306_v6  ;;  %v8351_v60 = vmul.f32 0.5, %v8299_v52 }
 0x54a   :  { %v10912_v3 = vsub.f32 %v10895_v45, %v8350_v13  ;;  %v8353_v11 = vmul.f32 0.5, %v8313_v25  ;;  %8044 = vmatpush1.bf16.msra.mxu0 %v9855_v26  ;;  %v9890_v45 = vcombine.high %v1641_v50, %v1649_v63  ;;  %v9905_v26 = vcombine.low %v1657_v14, %v1665_v41  ;;  %v1688_v13 = vld [vmem:[#allocation9 + $0x1f30] sm:$0xff]  ;;  %v1705_v41 = vld [vmem:[#allocation9 + $0x1fb8] sm:$0xff] }
 0x54b   :  { %v10915_v19 = vsub.f32 %v10897_v42, %v8352_v59  ;;  %v10918_v10 = vsub.f32 %v10899_v32, %v8351_v60  ;;  %8208 = vmatpush1.bf16.msra.mxu1 %v9857_v51  ;;  %8045 = vmatprep.subr.bf16.mxu0 %v9872_v53  ;;  %v9920_v51 = vcombine.high %v1672_v23, %v1680_v24  ;;  %v1696_v25 = vld [vmem:[#allocation9 + $0x1f70] sm:$0xff]  ;;  %v1697_v59 = vld [vmem:[#allocation9 + $0x1f78] sm:$0xff] }
 0x54c   :  { %v8382_v8 = vmul.f32 %v10912_v3, %v10912_v3  ;;  %v10923_v21 = vsub.f32 %v10903_v49, %v8353_v11  ;;  %8209 = vmatprep.subr.bf16.mxu1 %v9874_v5  ;;  %v9887_v49 = vcombine.low %v1640_v55, %v1648_v57  ;;  %v9922_v53 = vcombine.high %v1673_v47, %v1681_v48  ;;  %v1689_v57 = vld [vmem:[#allocation9 + $0x1f38] sm:$0xff] }
 0x54d   :  { %v8384_v42 = vmul.f32 %v10915_v19, %v10915_v19  ;;  %v8383_v32 = vmul.f32 %v10918_v10, %v10918_v10  ;;  %v9919_v63 = vcombine.low %v1672_v23, %v1680_v24  ;;  %v9938_v34 = vcombine.high %v1689_v57, %v1697_v59 }
 0x54e   :  { %v8446_v16 = vsel %vm388_vm2, %v8382_v8, 0.0  ;;  %v8385_v18 = vmul.f32 %v10923_v21, %v10923_v21  ;;  %8046 = vmatpush1.bf16.msra.mxu0 %v9871_v35 }
 0x54f   :  { %v8447_v9 = vrot.slane %v8446_v16, 4  ;;  %v8460_v33 = vsel %vm388_vm2, %v8384_v42, 0.0  ;;  %v8453_v20 = vsel %vm388_vm2, %v8383_v32, 0.0  ;;  %8210 = vmatpush1.bf16.msra.mxu1 %v9873_v39  ;;  %8047 = vmatprep.subr.bf16.mxu0 %v9888_v54  ;;  %v9921_v39 = vcombine.low %v1673_v47, %v1681_v48  ;;  %v1712_v42 = vld [vmem:[#allocation9 + $0x1ff0] sm:$0xff] }
 0x550   :  { %v8461_v40 = vrot.slane %v8460_v33, 4  ;;  %v8454_v7 = vrot.slane %v8453_v20, 4  ;;  %v8467_v29 = vsel %vm388_vm2, %v8385_v18, 0.0  ;;  %8211 = vmatprep.subr.bf16.mxu1 %v9890_v45  ;;  %v9936_v54 = vcombine.high %v1688_v13, %v1696_v25 }
 0x551   :  { %v8448_v46 = vadd.f32 %v8447_v9, %v8446_v16  ;;  %v8468_v12 = vrot.slane %v8467_v29, 4  ;;  %v1713_v16 = vld [vmem:[#allocation9 + $0x1ff8] sm:$0xff] }
 0x552   :  { %v8462_v56 = vadd.f32 %v8461_v40, %v8460_v33  ;;  %v8455_v17 = vadd.f32 %v8454_v7, %v8453_v20  ;;  %8048 = vmatpush1.bf16.msra.mxu0 %v9887_v49  ;;  %v9937_v20 = vcombine.low %v1689_v57, %v1697_v59  ;;  %v9953_v48 = vcombine.low %v1705_v41, %v1713_v16 }
 0x553   :  { %v8449_v4 = vrot.slane %v8448_v46, 2  ;;  %v8469_v44 = vadd.f32 %v8468_v12, %v8467_v29  ;;  %8212 = vmatpush1.bf16.msra.mxu1 %v9889_v36  ;;  %8049 = vmatprep.subr.bf16.mxu0 %v9904_v43  ;;  %v9935_v36 = vcombine.low %v1688_v13, %v1696_v25  ;;  %v9952_v43 = vcombine.high %v1704_v37, %v1712_v42 }
 0x554   :  { %v8463_v6 = vrot.slane %v8462_v56, 2  ;;  %v8456_v52 = vrot.slane %v8455_v17, 2  ;;  %8213 = vmatprep.subr.bf16.mxu1 %v9906_v22  ;;  %v9954_v29 = vcombine.high %v1705_v41, %v1713_v16  ;;  %v9951_v12 = vcombine.low %v1704_v37, %v1712_v42 }
 0x555   :  { %v8450_v5 = vadd.f32 %v8449_v4, %v8448_v46  ;;  %v8470_v55 = vrot.slane %v8469_v44, 2  ;;  %v1769_v41 = vrot.slane %v10885_v15, %v10618_v61  ;;  %v1777_v16 = vrot.slane %v10885_v15, %v10668_v0 }
 0x556   :  { %v8464_v60 = vadd.f32 %v8463_v6, %v8462_v56  ;;  %v8457_v50 = vadd.f32 %v8456_v52, %v8455_v17  ;;  %8050 = vmatpush1.bf16.msra.mxu0 %v9903_v27  ;;  %v10935_v56 = vld [vmem:[#allocation12 + $0x8] sm:$0xff]  ;;  %v10939_v27 = vld [vmem:[#allocation13 + $0x8] sm:$0xff] }
 0x557   :  { %v8451_v11 = vrot.slane %v8450_v5, 1  ;;  %v8471_v35 = vadd.f32 %v8470_v55, %v8469_v44  ;;  %8214 = vmatpush1.bf16.msra.mxu1 %v9905_v26  ;;  %8051 = vmatprep.subr.bf16.mxu0 %v9920_v51  ;;  %v8557_v17 = vrot.slane %v10935_v56, %v10525_v28  ;;  %v8565_v4 = vrot.slane %v10935_v56, %v10547_v58 }
 0x558   :  { %v8465_v8 = vrot.slane %v8464_v60, 1  ;;  %v8458_v45 = vrot.slane %v8457_v50, 1  ;;  %8215 = vmatprep.subr.bf16.mxu1 %v9922_v53  ;;  %v8561_v44 = vrot.slane %v10935_v56, %v10530_v30  ;;  %v8569_v26 = vrot.slane %v10935_v56, %v10533_v31 }
 0x559   :  { %v8452_v32 = vadd.f32 %v8451_v11, %v8450_v5  ;;  %v8472_v14 = vrot.slane %v8471_v35, 1  ;;  %v8610_v51 = vmul.f32 %v8557_v17, %v10912_v3  ;;  %v8705_v6 = vrot.slane %v10939_v27, %v10525_v28 }
 0x55a   :  { %v8466_v18 = vadd.f32 %v8465_v8, %v8464_v60  ;;  %v8459_v49 = vadd.f32 %v8458_v45, %v8457_v50  ;;  %8052 = vmatpush1.bf16.msra.mxu0 %v9919_v63  ;;  %v8612_v53 = vmul.f32 %v8565_v4, %v10915_v19  ;;  %v8713_v13 = vrot.slane %v10939_v27, %v10547_v58 }
 0x55b   :  { %v8510_v9 = vmul.f32 0.5, %v8452_v32  ;;  %v8473_v33 = vadd.f32 %v8472_v14, %v8471_v35  ;;  %8216 = vmatpush1.bf16.msra.mxu1 %v9921_v39  ;;  %8053 = vmatprep.subr.bf16.mxu0 %v9936_v54  ;;  %v8611_v55 = vmul.f32 %v8561_v44, %v10918_v10  ;;  %v8613_v3 = vmul.f32 %v8569_v26, %v10923_v21 }
 0x55c   :  { %v8512_v40 = vmul.f32 0.5, %v8466_v18  ;;  %v8511_v7 = vmul.f32 0.5, %v8459_v49  ;;  %8217 = vmatprep.subr.bf16.mxu1 %v9938_v34  ;;  %v8717_v28 = vrot.slane %v10939_v27, %v10533_v31  ;;  %v1773_v18 = vrot.slane %v10885_v15, %v10550_v62 }
 0x55d   :  { %v8626_v22 = vadd.f32 1e-05, %v8510_v9  ;;  %v8513_v23 = vmul.f32 0.5, %v8473_v33  ;;  %v1781_v49 = vrot.slane %v10885_v15, %v10621_v1 }
 0x55e   :  { %v8628_v24 = vadd.f32 1e-05, %v8512_v40  ;;  %v8627_v46 = vadd.f32 1e-05, %v8511_v7  ;;  %8054 = vmatpush1.bf16.msra.mxu0 %v9935_v36 }
 0x55f   :  { %10119 = vrsqrt.f32 %v8626_v22  ;;  %v8629_v47 = vadd.f32 1e-05, %v8513_v23  ;;  %8218 = vmatpush1.bf16.msra.mxu1 %v9937_v20  ;;  %8055 = vmatprep.subr.bf16.mxu0 %v9952_v43 }
 0x560   :  { %10121 = vrsqrt.f32 %v8628_v24  ;;  %8219 = vmatprep.subr.bf16.mxu1 %v9954_v29 }
 0x561   :  { %10123 = vrsqrt.f32 %v8627_v46 }
 0x562   :  { %10125 = vrsqrt.f32 %v8629_v47  ;;  %8056 = vmatpush1.bf16.msra.mxu0 %v9951_v12 }
 0x563   :  { %8220 = vmatpush1.bf16.msra.mxu1 %v9953_v48 }
 0x565   :  { %8058 = vmatmul.mubr.bf16.vlgmr.msra.gmra.mrb[20].mxu0 %v10704_v2 }
 0x566   :  { %8222 = vmatmul.mubr.bf16.vlgmr.msra.gmra.mrb[20].mxu1 %v10704_v2  ;;  %v8709_v2 = vrot.slane %v10939_v27, %v10530_v30 }
 0x569   :  { %v10120_v52 = vpop.eup %10119 }
 0x56a   :  { %v10122_v25 = vpop.eup %10121  ;;  %v8658_v5 = vmul.f32 %v10120_v52, %v8610_v51 }
 0x56b   :  { %v10124_v57 = vpop.eup %10123  ;;  %v8660_v59 = vmul.f32 %v10122_v25, %v8612_v53 }
 0x56c   :  { %v10126_v60 = vpop.eup %10125  ;;  %v8758_v50 = vadd.f32 %v8705_v6, %v8658_v5  ;;  %v8659_v19 = vmul.f32 %v10124_v57, %v8611_v55 }
 0x56d   :  { %v8760_v63 = vadd.f32 %v8713_v13, %v8660_v59  ;;  %v8661_v11 = vmul.f32 %v10126_v60, %v8613_v3 }
 0x56e   :  { %vm8774_vm4 = vcmp.gt.f32.partialorder %v8758_v50, 0.0  ;;  %v8790_v58 = vmul.f32 0.2, %v8758_v50  ;;  %v8759_v35 = vadd.f32 %v8709_v2, %v8659_v19 }
 0x56f   :  { %vm8776_vm5 = vcmp.gt.f32.partialorder %v8760_v63, 0.0  ;;  %v8792_v10 = vmul.f32 0.2, %v8760_v63  ;;  %v8761_v39 = vadd.f32 %v8717_v28, %v8661_v11 }
 0x570   :  { %v8806_v54 = vsel %vm8774_vm4, %v8758_v50, %v8790_v58  ;;  %vm8775_vm6 = vcmp.gt.f32.partialorder %v8759_v35, 0.0  ;;  %v8791_v30 = vmul.f32 0.2, %v8759_v35 }
 0x571   :  { %v8808_v8 = vsel %vm8776_vm5, %v8760_v63, %v8792_v10  ;;  %vm8777_vm7 = vcmp.gt.f32.partialorder %v8761_v39, 0.0  ;;  %v8793_v21 = vmul.f32 0.2, %v8761_v39 }
 0x572   :  { %v8807_v45 = vsel %vm8775_vm6, %v8759_v35, %v8791_v30 }
 0x573   :  { %v8864_v34 = vcombine.low %v8806_v54, %v8807_v45  ;;  %v8809_v31 = vsel %vm8777_vm7, %v8761_v39, %v8793_v21 }
 0x574   :  { %v8865_v37 = vcombine.low %v8808_v8, %v8809_v31 }
 0x575   :  { %v8872_v42 = vrot.slane %v8864_v34, %v10789_v38 }
 0x576   :  { %v8879_v32 = vrot.slane %v8865_v37, %v10789_v38 }
 0x578   :  { %v8880_v14 = vcombine.low %v8872_v42, %v8879_v32 }
 0x57a   :  { %8904 = vst [vmem:[%s11012_s9 + $0x10] sm:$0xff] %v8880_v14 }
 0x638   :  { %v8059_v36 = vpop.f32.mrb[20].mxu0 }
 0x639   :  { %v9967_v9 = vadd.f32 %v8059_v36, %v1769_v41  ;;  %v8223_v33 = vpop.f32.mrb[20].mxu1  ;;  %v8061_v20 = vpop.f32.mrb[21].mxu0 }
 0x63a   :  { %v9969_v43 = vadd.f32 %v8223_v33, %v1777_v16  ;;  %v9968_v40 = vadd.f32 %v8061_v20, %v1773_v18  ;;  %v8225_v7 = vpop.f32.mrb[21].mxu1  ;;  %v8063_v29 = vpop.f32.mrb[22].mxu0 }
 0x63b   :  { %v8314_v22 = vsel %vm388_vm2, %v9967_v9, 0.0  ;;  %v9970_v23 = vadd.f32 %v8225_v7, %v1781_v49  ;;  %v8227_v24 = vpop.f32.mrb[22].mxu1  ;;  %v8064_v46 = vpop.f32.mrb[23].mxu0 }
 0x63c   :  { %v8315_v12 = vrot.slane %v8314_v22, 4  ;;  %v8328_v47 = vsel %vm388_vm2, %v9969_v43, 0.0  ;;  %v8321_v48 = vsel %vm388_vm2, %v9968_v40, 0.0  ;;  %v8228_v17 = vpop.f32.mrb[23].mxu1 }
 0x63d   :  { %v8329_v15 = vrot.slane %v8328_v47, 4  ;;  %v8322_v4 = vrot.slane %v8321_v48, 4  ;;  %v8335_v44 = vsel %vm388_vm2, %v9970_v23, 0.0 }
 0x63e   :  { %v8316_v26 = vadd.f32 %v8315_v12, %v8314_v22  ;;  %v8336_v51 = vrot.slane %v8335_v44, 4 }
 0x63f   :  { %v8330_v6 = vadd.f32 %v8329_v15, %v8328_v47  ;;  %v8323_v52 = vadd.f32 %v8322_v4, %v8321_v48 }
 0x640   :  { %v8317_v53 = vrot.slane %v8316_v26, 2  ;;  %v8337_v13 = vadd.f32 %v8336_v51, %v8335_v44 }
 0x641   :  { %v8331_v25 = vrot.slane %v8330_v6, 2  ;;  %v8324_v5 = vrot.slane %v8323_v52, 2 }
 0x642   :  { %v8318_v55 = vadd.f32 %v8317_v53, %v8316_v26  ;;  %v8338_v2 = vrot.slane %v8337_v13, 2 }
 0x643   :  { %v8332_v57 = vadd.f32 %v8331_v25, %v8330_v6  ;;  %v8325_v59 = vadd.f32 %v8324_v5, %v8323_v52 }
 0x644   :  { %v8319_v3 = vrot.slane %v8318_v55, 1  ;;  %v8339_v28 = vadd.f32 %v8338_v2, %v8337_v13 }
 0x645   :  { %v8333_v60 = vrot.slane %v8332_v57, 1  ;;  %v8326_v50 = vrot.slane %v8325_v59, 1 }
 0x646   :  { %v8320_v19 = vadd.f32 %v8319_v3, %v8318_v55  ;;  %v8340_v63 = vrot.slane %v8339_v28, 1  ;;  %v8573_v3 = vrot.slane %v10935_v56, %v10618_v61 }
 0x647   :  { %v8334_v11 = vadd.f32 %v8333_v60, %v8332_v57  ;;  %v8327_v58 = vadd.f32 %v8326_v50, %v8325_v59  ;;  %v8577_v60 = vrot.slane %v10935_v56, %v10550_v62  ;;  %v8585_v50 = vrot.slane %v10935_v56, %v10621_v1 }
 0x648   :  { %v8354_v35 = vmul.f32 0.5, %v8320_v19  ;;  %v8341_v10 = vadd.f32 %v8340_v63, %v8339_v28  ;;  %v8581_v28 = vrot.slane %v10935_v56, %v10668_v0  ;;  %v8721_v63 = vrot.slane %v10939_v27, %v10618_v61 }
 0x649   :  { %v8356_v39 = vmul.f32 0.5, %v8334_v11  ;;  %v8355_v54 = vmul.f32 0.5, %v8327_v58  ;;  %v8733_v56 = vrot.slane %v10939_v27, %v10621_v1 }
 0x64a   :  { %v8370_v30 = vsub.f32 %v9967_v9, %v8354_v35  ;;  %v8357_v8 = vmul.f32 0.5, %v8341_v10  ;;  %v8729_v35 = vrot.slane %v10939_v27, %v10668_v0 }
 0x64b   :  { %v8372_v21 = vsub.f32 %v9969_v43, %v8356_v39  ;;  %v8371_v45 = vsub.f32 %v9968_v40, %v8355_v54 }
 0x64c   :  { %v8386_v34 = vmul.f32 %v8370_v30, %v8370_v30  ;;  %v8373_v31 = vsub.f32 %v9970_v23, %v8357_v8  ;;  %v8614_v19 = vmul.f32 %v8573_v3, %v8370_v30  ;;  %v8725_v8 = vrot.slane %v10939_v27, %v10550_v62 }
 0x64d   :  { %v8388_v37 = vmul.f32 %v8372_v21, %v8372_v21  ;;  %v8387_v42 = vmul.f32 %v8371_v45, %v8371_v45  ;;  %v8616_v58 = vmul.f32 %v8581_v28, %v8372_v21  ;;  %v8615_v54 = vmul.f32 %v8577_v60, %v8371_v45 }
 0x64e   :  { %v8474_v32 = vsel %vm388_vm2, %v8386_v34, 0.0  ;;  %v8389_v14 = vmul.f32 %v8373_v31, %v8373_v31 }
 0x64f   :  { %v8475_v41 = vrot.slane %v8474_v32, 4  ;;  %v8488_v16 = vsel %vm388_vm2, %v8388_v37, 0.0  ;;  %v8481_v18 = vsel %vm388_vm2, %v8387_v42, 0.0  ;;  %v8617_v42 = vmul.f32 %v8585_v50, %v8373_v31 }
 0x650   :  { %v8489_v49 = vrot.slane %v8488_v16, 4  ;;  %v8482_v36 = vrot.slane %v8481_v18, 4  ;;  %v8495_v33 = vsel %vm388_vm2, %v8389_v14, 0.0 }
 0x651   :  { %v8476_v9 = vadd.f32 %v8475_v41, %v8474_v32  ;;  %v8496_v20 = vrot.slane %v8495_v33, 4 }
 0x652   :  { %v8490_v43 = vadd.f32 %v8489_v49, %v8488_v16  ;;  %v8483_v40 = vadd.f32 %v8482_v36, %v8481_v18 }
 0x653   :  { %v8477_v7 = vrot.slane %v8476_v9, 2  ;;  %v8497_v29 = vadd.f32 %v8496_v20, %v8495_v33 }
 0x654   :  { %v8491_v22 = vrot.slane %v8490_v43, 2  ;;  %v8484_v23 = vrot.slane %v8483_v40, 2 }
 0x655   :  { %v8478_v24 = vadd.f32 %v8477_v7, %v8476_v9  ;;  %v8498_v46 = vrot.slane %v8497_v29, 2 }
 0x656   :  { %v8492_v12 = vadd.f32 %v8491_v22, %v8490_v43  ;;  %v8485_v47 = vadd.f32 %v8484_v23, %v8483_v40 }
 0x657   :  { %v8479_v48 = vrot.slane %v8478_v24, 1  ;;  %v8499_v17 = vadd.f32 %v8498_v46, %v8497_v29 }
 0x658   :  { %v8493_v15 = vrot.slane %v8492_v12, 1  ;;  %v8486_v4 = vrot.slane %v8485_v47, 1 }
 0x659   :  { %v8480_v44 = vadd.f32 %v8479_v48, %v8478_v24  ;;  %v8500_v26 = vrot.slane %v8499_v17, 1 }
 0x65a   :  { %v8494_v51 = vadd.f32 %v8493_v15, %v8492_v12  ;;  %v8487_v6 = vadd.f32 %v8486_v4, %v8485_v47 }
 0x65b   :  { %v8514_v52 = vmul.f32 0.5, %v8480_v44  ;;  %v8501_v53 = vadd.f32 %v8500_v26, %v8499_v17 }
 0x65c   :  { %v8516_v13 = vmul.f32 0.5, %v8494_v51  ;;  %v8515_v25 = vmul.f32 0.5, %v8487_v6 }
 0x65d   :  { %v8630_v5 = vadd.f32 1e-05, %v8514_v52  ;;  %v8517_v55 = vmul.f32 0.5, %v8501_v53 }
 0x65e   :  { %v8632_v2 = vadd.f32 1e-05, %v8516_v13  ;;  %v8631_v57 = vadd.f32 1e-05, %v8515_v25 }
 0x65f   :  { %10127 = vrsqrt.f32 %v8630_v5  ;;  %v8633_v59 = vadd.f32 1e-05, %v8517_v55 }
 0x660   :  { %10129 = vrsqrt.f32 %v8632_v2 }
 0x661   :  { %10131 = vrsqrt.f32 %v8631_v57 }
 0x662   :  { %10133 = vrsqrt.f32 %v8633_v59 }
 0x669   :  { %v10128_v11 = vpop.eup %10127 }
 0x66a   :  { %v10130_v10 = vpop.eup %10129  ;;  %v8662_v39 = vmul.f32 %v10128_v11, %v8614_v19 }
 0x66b   :  { %v10132_v34 = vpop.eup %10131  ;;  %v8664_v37 = vmul.f32 %v10130_v10, %v8616_v58 }
 0x66c   :  { %v10134_v30 = vpop.eup %10133  ;;  %v8762_v32 = vadd.f32 %v8721_v63, %v8662_v39  ;;  %v8663_v61 = vmul.f32 %v10132_v34, %v8615_v54 }
 0x66d   :  { %v8764_v14 = vadd.f32 %v8729_v35, %v8664_v37  ;;  %v8665_v21 = vmul.f32 %v10134_v30, %v8617_v42 }
 0x66e   :  { %vm8778_vm2 = vcmp.gt.f32.partialorder %v8762_v32, 0.0  ;;  %v8794_v41 = vmul.f32 0.2, %v8762_v32  ;;  %v8763_v0 = vadd.f32 %v8725_v8, %v8663_v61 }
 0x66f   :  { %vm8780_vm8 = vcmp.gt.f32.partialorder %v8764_v14, 0.0  ;;  %v8796_v16 = vmul.f32 0.2, %v8764_v14  ;;  %v8765_v45 = vadd.f32 %v8733_v56, %v8665_v21 }
 0x670   :  { %v8810_v18 = vsel %vm8778_vm2, %v8762_v32, %v8794_v41  ;;  %vm8779_vm9 = vcmp.gt.f32.partialorder %v8763_v0, 0.0  ;;  %v8795_v62 = vmul.f32 0.2, %v8763_v0 }
 0x671   :  { %v8812_v49 = vsel %vm8780_vm8, %v8764_v14, %v8796_v16  ;;  %vm8781_vm10 = vcmp.gt.f32.partialorder %v8765_v45, 0.0  ;;  %v8797_v31 = vmul.f32 0.2, %v8765_v45 }
 0x672   :  { %v8811_v36 = vsel %vm8779_vm9, %v8763_v0, %v8795_v62 }
 0x673   :  { %v8881_v33 = vcombine.low %v8810_v18, %v8811_v36  ;;  %v8813_v1 = vsel %vm8781_vm10, %v8765_v45, %v8797_v31 }
 0x674   :  { %v8882_v27 = vcombine.low %v8812_v49, %v8813_v1 }
 0x675   :  { %v8889_v9 = vrot.slane %v8881_v33, %v10789_v38 }
 0x676   :  { %v8896_v20 = vrot.slane %v8882_v27, %v10789_v38 }
 0x678   :  { %v8897_v43 = vcombine.low %v8889_v9, %v8896_v20 }
 0x67a   :  { %8905 = vst [vmem:[%s11012_s9 + $0x18] sm:$0xff] %v8897_v43 }
 0x67b   :  { %8910 = vsyncpa [#allocation3], 1 }
 0x67c   :  { %8911 = vsyncpa [#allocation5], 1 }
 0x67d   :  { %8912 = vsyncpa [#allocation8], 1 }
 0x67e   :  { %8913 = vsyncpa [#allocation11], 1 }
 0x67f   :  { %8914 = vsyncpa [#allocation14], 1 }

</bundles_post_ra>
